<compile_context>
chip_gen: v7x
topology: tpu7x:2x2x1
jax: 0.10.0
libtpu: 0.0.40
codegen_flags: <defaults>
</compile_context>

<pallas_src>
import jax
import jax.numpy as jnp
from jax.experimental import pallas as pl
from jax.experimental.pallas import tpu as pltpu

# ---------------- static config ----------------
NUM_IMAGES      = 2
NUM_OBJ         = 10            # objects per image
NUM_PAIRS       = 64            # relation pairs per image
NUM_OBJ_CLASSES = 16            # cfg.MODEL.ROI_BOX_HEAD.NUM_CLASSES (small)
EMBED_DIM       = 32            # cfg.MODEL.ROI_RELATION_HEAD.EMBED_DIM (small)
GEO_DIM         = 128           # hard-coded geometry_feat_dim
HIDDEN_DIM      = 512           # hard-coded hidden_dim
INPUT_DIM       = 256           # input_dim argument (union visual feature dim)
NUM_REL_CLS     = 51
OUT_DIM         = NUM_REL_CLS - 1
SYMB_DIM        = 2 * EMBED_DIM + 2 * GEO_DIM       # 320
PAD_OUT         = 128           # lane-dense output width
N_OBJ_TOT       = NUM_IMAGES * NUM_OBJ              # 20 real objects
N_OBJ_PAD       = 32            # padded object rows (multiple of 16 for bf16 tiles)
LN_EPS          = 1e-5

# big bf16 weight slab row offsets: [vis_w | geo_w | fus_w]
W_VIS = 0
W_GEO = W_VIS + INPUT_DIM                  # 256
W_FUS = W_GEO + SYMB_DIM                   # 576
W_TOT = W_FUS + 2 * HIDDEN_DIM             # 1600

# small f32 weight slab rows: [pos_w1 (padded to 16) | pos_w2 | obj_emb (padded lanes)]
WS_PW1 = 0
WS_PW2 = 16
WS_EMB = WS_PW2 + GEO_DIM                  # 144
WS_ROWS = WS_EMB + NUM_OBJ_CLASSES         # 160


# ---------------- fused Pallas kernel ----------------
def _fused_kernel(obj_ref, idx_ref, vis_in_ref, pslab_ref, wsmall_ref,
                  wbig_ref, wcls_ref, out_ref, ctr_ref):
    f32, bf16 = jnp.float32, jnp.bfloat16
    H = HIDDEN_DIM
    P = vis_in_ref.shape[0]

    # ---- packed 1-row params (single slab, static 128-aligned slices) ----
    pos_b1 = pslab_ref[0:1, 0:GEO_DIM]
    pos_b2 = pslab_ref[0:1, GEO_DIM:2 * GEO_DIM]
    cls_b  = pslab_ref[0:1, 2 * GEO_DIM:2 * GEO_DIM + PAD_OUT]
    vis_b  = pslab_ref[1:2, 0:H]
    geo_b  = pslab_ref[1:2, H:2 * H]
    ln1_gv = pslab_ref[2:3, 0:H]
    ln1_gg = pslab_ref[2:3, H:2 * H]
    ln1_bv = pslab_ref[3:4, 0:H]
    ln1_bg = pslab_ref[3:4, H:2 * H]
    fus_b  = pslab_ref[4:5, 0:H]
    ln2_g  = pslab_ref[4:5, H:2 * H]
    ln2_b  = pslab_ref[5:6, 0:H]

    # ---- per-object tables (32 padded rows; pad rows are never selected) ----
    # All MXU inputs are explicitly bf16 (single-pass fast path); accumulation is f32.
    pw1 = wsmall_ref[WS_PW1:WS_PW1 + 16, :].astype(bf16)          # (16,128), rows 9..15 zero
    pw2 = wsmall_ref[WS_PW2:WS_PW2 + GEO_DIM, :].astype(bf16)     # (128,128)
    emb = wsmall_ref[WS_EMB:WS_EMB + NUM_OBJ_CLASSES, 0:EMBED_DIM].astype(bf16)  # (16,32)

    # obj_pos_embed: Linear(9,128) -> ReLU -> Linear(128,128)  (box padded 9->16 lanes)
    box = obj_ref[:, 0:16].astype(bf16)                           # (32,16)
    h = jnp.dot(box, pw1, preferred_element_type=f32) + pos_b1
    pos = jnp.dot(jnp.maximum(h, 0.0).astype(bf16), pw2,
                  preferred_element_type=f32) + pos_b2            # (32,128)

    # obj_sem_embed: softmax(pred_logits) @ embedding table
    lg = obj_ref[:, 16:16 + NUM_OBJ_CLASSES]
    lg = lg - jnp.max(lg, axis=-1, keepdims=True)
    e = jnp.exp(lg)
    probs = e / jnp.sum(e, axis=-1, keepdims=True)
    sem = jnp.dot(probs.astype(bf16), emb, preferred_element_type=f32)   # (32,32)

    # proposal_box_feat_extract = ReLU -> Linear(320, 512); ReLU commutes with the gather,
    # so project each object first, then gather per pair with ONE merged one-hot matmul.
    rpos = jnp.maximum(pos, 0.0).astype(bf16)
    rsem = jnp.maximum(sem, 0.0).astype(bf16)
    ctr_ref[0:N_OBJ_PAD, :] = (
        jnp.dot(rpos, wbig_ref[W_GEO:W_GEO + GEO_DIM, :], preferred_element_type=f32)
        + jnp.dot(rsem, wbig_ref[W_GEO + GEO_DIM:W_GEO + GEO_DIM + EMBED_DIM, :],
                  preferred_element_type=f32)).astype(bf16)                      # subject half
    ctr_ref[N_OBJ_PAD:2 * N_OBJ_PAD, :] = (
        jnp.dot(rpos, wbig_ref[W_GEO + GEO_DIM + EMBED_DIM:W_GEO + 2 * GEO_DIM + EMBED_DIM, :],
                preferred_element_type=f32)
        + jnp.dot(rsem, wbig_ref[W_GEO + 2 * GEO_DIM + EMBED_DIM:W_GEO + SYMB_DIM, :],
                  preferred_element_type=f32)).astype(bf16)                      # object half

    # in-kernel one-hot from the int32 pair indices (object index pre-offset by N_OBJ_PAD)
    col = jax.lax.broadcasted_iota(jnp.int32, (P, 2 * N_OBJ_PAD), 1)
    tgt = jnp.where(col < N_OBJ_PAD, idx_ref[:, 0:1], idx_ref[:, 1:2])
    oh = (col == tgt).astype(bf16)                                 # (P, 64), exact 0/1
    geo = jnp.dot(oh, ctr_ref[...], preferred_element_type=f32) + geo_b          # (P, 512)

    # vis_embed: ReLU -> Linear(input_dim, hidden)
    vis = jnp.dot(jnp.maximum(vis_in_ref[...], 0.0).astype(bf16),
                  wbig_ref[W_VIS:W_VIS + INPUT_DIM, :],
                  preferred_element_type=f32) + vis_b                            # (P, 512)

    # proposal_feat_fusion: LayerNorm(1024) over [vis | geo] -> ReLU -> Linear(1024, 512)
    # One-pass moments (no dv/dg temporaries); cancellation is benign at these magnitudes.
    inv_n = jnp.float32(1.0 / (2 * H))
    mean = (jnp.sum(vis, axis=-1, keepdims=True)
            + jnp.sum(geo, axis=-1, keepdims=True)) * inv_n
    ex2 = (jnp.sum(vis * vis, axis=-1, keepdims=True)
           + jnp.sum(geo * geo, axis=-1, keepdims=True)) * inv_n
    var = jnp.maximum(ex2 - mean * mean, 0.0)
    inv = jax.lax.rsqrt(var + LN_EPS)
    xv = jnp.maximum((vis - mean) * inv * ln1_gv + ln1_bv, 0.0)
    xg = jnp.maximum((geo - mean) * inv * ln1_gg + ln1_bg, 0.0)
    fused = (jnp.dot(xv.astype(bf16), wbig_ref[W_FUS:W_FUS + H, :],
                     preferred_element_type=f32)
             + jnp.dot(xg.astype(bf16), wbig_ref[W_FUS + H:W_TOT, :],
                       preferred_element_type=f32)
             + fus_b)                                                            # (P, 512)

    # proposal_relness_cls_fc: LayerNorm(512) -> ReLU -> padded classifier.
    mu2 = jnp.mean(fused, axis=-1, keepdims=True)
    v2 = jnp.maximum(jnp.mean(fused * fused, axis=-1, keepdims=True) - mu2 * mu2, 0.0)
    y = jnp.maximum((fused - mu2) * jax.lax.rsqrt(v2 + LN_EPS) * ln2_g + ln2_b, 0.0)
    logits_pad = jnp.dot(y.astype(bf16), wcls_ref[...],
                         preferred_element_type=f32) + cls_b                     # (P, 128)

    # lanes 0..49 class logits, lane 50 bin logit, lane 51 = sigmoid(bin logit) (the padded
    # classifier carries the folded fusion_layer column in BOTH lanes 50 and 51), rest 0.
    lane = jax.lax.broadcasted_iota(jnp.int32, logits_pad.shape, 1)
    out_ref[...] = jnp.where(lane == OUT_DIM + 1, jax.nn.sigmoid(logits_pad), logits_pad)


def _pick_tile(p_tot):
    # Fill the 256-wide MXU on v6e/v7x when the batch allows; 128 otherwise.
    for t in (512, 256, 128):
        if p_tot % t == 0:
            return t
    return p_tot


def fused_relness_call(obj_data, pair_idx, visual_feat, kp):
    p_tot = visual_feat.shape[0]
    tile = _pick_tile(p_tot)
    grid = (max(p_tot // tile, 1),)
    # Replicated weight blocks only need a single buffer once grid > 1 (constant index_map).
    wkw = {'pipeline_mode': pl.Buffered(1)} if grid[0] > 1 else {}
    rep = lambda shape: pl.BlockSpec(shape, lambda i: (0, 0), **wkw)
    row = lambda feat: pl.BlockSpec((tile, feat), lambda i: (i, 0))

    return pl.pallas_call(
        _fused_kernel,
        grid=grid,
        in_specs=[rep(obj_data.shape),            # (32, 32)  f32 per-object data
                  row(2),                         # (P, 2)    int32 pair indices
                  row(INPUT_DIM),                 # (P, 256)  f32 visual features
                  rep(kp['pslab'].shape),         # (6, 1024) f32 bias / LN slab
                  rep(kp['wsmall'].shape),        # (160,128) f32 small-weight slab
                  rep(kp['wbig'].shape),          # (1600,512) bf16 big-weight slab
                  rep(kp['cls_w_pad'].shape)],    # (512,128) bf16 padded classifier
        out_specs=row(PAD_OUT),
        out_shape=jax.ShapeDtypeStruct((p_tot, PAD_OUT), jnp.float32),
        scratch_shapes=[pltpu.VMEM((2 * N_OBJ_PAD, HIDDEN_DIM), jnp.bfloat16)],
        compiler_params=pltpu.CompilerParams(
            dimension_semantics=("parallel",),
            vmem_limit_bytes=32 * 1024 * 1024),
    )(obj_data, pair_idx, visual_feat,
      kp['pslab'], kp['wsmall'], kp['wbig'], kp['cls_w_pad'])


# ---------------- glue: box encoding, param init / prep ----------------
def encode_box_info(boxes, img_w, img_h):
    # boxes: [N, 4] xyxy  (maskrcnn_benchmark encode_box_info, mode='xyxy')
    x1, y1, x2, y2 = boxes[:, 0:1], boxes[:, 1:2], boxes[:, 2:3], boxes[:, 3:4]
    w = x2 - x1 + 1.0
    h = y2 - y1 + 1.0
    cx = x1 + 0.5 * w
    cy = y1 + 0.5 * h
    return jnp.concatenate([w / img_w, h / img_h, cx / img_w, cy / img_h,
                            x1 / img_w, y1 / img_h, x2 / img_w, y2 / img_h,
                            w * h / (img_w * img_h)], axis=-1)


def init_params(key):
    ks = jax.random.split(key, 10)
    s = 0.05
    p = {}
    # TODO(synk): GloVe-initialized nn.Embedding replaced by deterministic random table.
    p['obj_emb'] = jax.random.normal(ks[0], (NUM_OBJ_CLASSES, EMBED_DIM), jnp.float32) * s
    p['pos_w1'] = jax.random.normal(ks[1], (9, GEO_DIM), jnp.float32) * s
    p['pos_b1'] = jax.random.normal(ks[2], (1, GEO_DIM), jnp.float32) * s
    p['pos_w2'] = jax.random.normal(ks[3], (GEO_DIM, GEO_DIM), jnp.float32) * s
    p['pos_b2'] = jax.random.normal(ks[4], (1, GEO_DIM), jnp.float32) * s
    p['vis_w'] = jax.random.normal(ks[5], (INPUT_DIM, HIDDEN_DIM), jnp.float32) * s
    p['vis_b'] = jnp.zeros((1, HIDDEN_DIM), jnp.float32)
    p['geo_w'] = jax.random.normal(ks[6], (SYMB_DIM, HIDDEN_DIM), jnp.float32) * s
    p['geo_b'] = jnp.zeros((1, HIDDEN_DIM), jnp.float32)
    p['ln1_g'] = jnp.ones((1, 2 * HIDDEN_DIM), jnp.float32)
    p['ln1_b'] = jnp.zeros((1, 2 * HIDDEN_DIM), jnp.float32)
    p['fus_w'] = jax.random.normal(ks[7], (2 * HIDDEN_DIM, HIDDEN_DIM), jnp.float32) * s
    p['fus_b'] = jnp.zeros((1, HIDDEN_DIM), jnp.float32)
    p['ln2_g'] = jnp.ones((1, HIDDEN_DIM), jnp.float32)
    p['ln2_b'] = jnp.zeros((1, HIDDEN_DIM), jnp.float32)
    p['cls_w'] = jax.random.normal(ks[8], (HIDDEN_DIM, OUT_DIM), jnp.float32) * s
    p['cls_b'] = jnp.zeros((1, OUT_DIM), jnp.float32)
    p['fl_w'] = jax.random.normal(ks[9], (OUT_DIM, 1), jnp.float32) * s
    p['fl_b'] = jnp.zeros((1, 1), jnp.float32)
    return p


def prepare_kernel_params(p):
    """Pack parameters into 4 kernel inputs; fold fusion_layer into the padded classifier."""
    bf = jnp.bfloat16
    H = HIDDEN_DIM

    # fold fusion_layer: lane 50 = bin logit, lane 51 = a second copy (sigmoid'd in-kernel)
    bin_w = p['cls_w'] @ p['fl_w']                     # (512, 1)
    bin_b = p['cls_b'] @ p['fl_w'] + p['fl_b']         # (1, 1)
    cls_w_pad = jnp.zeros((H, PAD_OUT), jnp.float32)
    cls_w_pad = cls_w_pad.at[:, :OUT_DIM].set(p['cls_w'])
    cls_w_pad = cls_w_pad.at[:, OUT_DIM:OUT_DIM + 1].set(bin_w)
    cls_w_pad = cls_w_pad.at[:, OUT_DIM + 1:OUT_DIM + 2].set(bin_w)
    cls_b_pad = jnp.zeros((1, PAD_OUT), jnp.float32)
    cls_b_pad = cls_b_pad.at[:, :OUT_DIM].set(p['cls_b'])
    cls_b_pad = cls_b_pad.at[:, OUT_DIM:OUT_DIM + 1].set(bin_b)
    cls_b_pad = cls_b_pad.at[:, OUT_DIM + 1:OUT_DIM + 2].set(bin_b)

    # one packed f32 slab for every 1-row parameter (one DMA instead of ten)
    pslab = jnp.zeros((6, 2 * H), jnp.float32)
    pslab = pslab.at[0, 0:GEO_DIM].set(p['pos_b1'][0])
    pslab = pslab.at[0, GEO_DIM:2 * GEO_DIM].set(p['pos_b2'][0])
    pslab = pslab.at[0, 2 * GEO_DIM:2 * GEO_DIM + PAD_OUT].set(cls_b_pad[0])
    pslab = pslab.at[1, 0:H].set(p['vis_b'][0])
    pslab = pslab.at[1, H:2 * H].set(p['geo_b'][0])
    pslab = pslab.at[2, :].set(p['ln1_g'][0])
    pslab = pslab.at[3, :].set(p['ln1_b'][0])
    pslab = pslab.at[4, 0:H].set(p['fus_b'][0])
    pslab = pslab.at[4, H:2 * H].set(p['ln2_g'][0])
    pslab = pslab.at[5, 0:H].set(p['ln2_b'][0])

    # one packed f32 slab for the small weights (pos MLP + object embedding)
    wsmall = jnp.zeros((WS_ROWS, GEO_DIM), jnp.float32)
    wsmall = wsmall.at[WS_PW1:WS_PW1 + 9, :].set(p['pos_w1'])               # rows 9..15 zero
    wsmall = wsmall.at[WS_PW2:WS_PW2 + GEO_DIM, :].set(p['pos_w2'])
    wsmall = wsmall.at[WS_EMB:WS_EMB + NUM_OBJ_CLASSES, 0:EMBED_DIM].set(p['obj_emb'])

    # one packed bf16 slab for the big matmul weights (halves HBM->VMEM traffic;
    # f32 accumulation in the kernel)
    wbig = jnp.concatenate([p['vis_w'], p['geo_w'], p['fus_w']], axis=0).astype(bf)  # (1600,512)

    return {'pslab': pslab, 'wsmall': wsmall, 'wbig': wbig,
            'cls_w_pad': cls_w_pad.astype(bf)}


def rel_aware_rel_feature_forward(visual_feat, boxes_per_img, img_sizes,
                                  pred_logits_per_img, rel_pair_inds, kparams):
    """Pallas port of RelAwareRelFeature.forward (hybrid predictor)."""
    # glue (pure XLA, microscopic): pack per-object data and pair indices
    box_info = jnp.concatenate([encode_box_info(boxes_per_img[i], *img_sizes[i])
                                for i in range(NUM_IMAGES)], axis=0)        # (20, 9)
    logits_all = jnp.concatenate(pred_logits_per_img, axis=0)               # (20, 16)
    obj_data = jnp.zeros((N_OBJ_PAD, 16 + NUM_OBJ_CLASSES), jnp.float32)
    obj_data = obj_data.at[:N_OBJ_TOT, 0:9].set(box_info)
    obj_data = obj_data.at[:N_OBJ_TOT, 16:16 + NUM_OBJ_CLASSES].set(logits_all)

    sub = jnp.concatenate([rel_pair_inds[i][:, 0] + i * NUM_OBJ
                           for i in range(NUM_IMAGES)], axis=0)
    obj = jnp.concatenate([rel_pair_inds[i][:, 1] + i * NUM_OBJ
                           for i in range(NUM_IMAGES)], axis=0)
    # object index pre-offset into the second half of the stacked per-object table
    pair_idx = jnp.stack([sub, obj + N_OBJ_PAD], axis=1).astype(jnp.int32)  # (P, 2)

    out = fused_relness_call(obj_data, pair_idx, visual_feat, kparams)      # (P, 128)

    relness_logits = out[:, :OUT_DIM + 1]          # cat(class logits, bin logit)
    scores = out[:, OUT_DIM + 1]                   # sigmoid(bin logit)

    relness_matrices = []
    for i in range(NUM_IMAGES):
        sc = scores[i * NUM_PAIRS:(i + 1) * NUM_PAIRS]
        pairs = rel_pair_inds[i]
        m = jnp.zeros((NUM_OBJ, NUM_OBJ), jnp.float32).at[pairs[:, 0], pairs[:, 1]].set(sc)
        relness_matrices.append(m)
    return relness_logits, relness_matrices


# ---------------- pure-JAX f32 reference for correctness check ----------------
def reference_forward(visual_feat, boxes_per_img, img_sizes, pred_logits_per_img,
                      rel_pair_inds, params):
    def ln(x, g, b):
        mu = jnp.mean(x, -1, keepdims=True)
        var = jnp.mean((x - mu) ** 2, -1, keepdims=True)
        return (x - mu) / jnp.sqrt(var + LN_EPS) * g + b

    vis_all = jnp.maximum(visual_feat, 0.0) @ params['vis_w'] + params['vis_b']
    logit_chunks, mats = [], []
    for i in range(NUM_IMAGES):
        boxes, lg_obj, pairs = boxes_per_img[i], pred_logits_per_img[i], rel_pair_inds[i]
        bi = encode_box_info(boxes, *img_sizes[i])
        pos = jnp.maximum(bi @ params['pos_w1'] + params['pos_b1'], 0.0) @ params['pos_w2'] + params['pos_b2']
        sem = jax.nn.softmax(lg_obj, axis=1) @ params['obj_emb']
        symb = jnp.concatenate([pos[pairs[:, 0]], sem[pairs[:, 0]],
                                pos[pairs[:, 1]], sem[pairs[:, 1]]], axis=1)
        geo = jnp.maximum(symb, 0.0) @ params['geo_w'] + params['geo_b']
        vis = vis_all[i * NUM_PAIRS:(i + 1) * NUM_PAIRS]
        x = jnp.maximum(ln(jnp.concatenate([vis, geo], 1), params['ln1_g'], params['ln1_b']), 0.0)
        fused = x @ params['fus_w'] + params['fus_b']
        y = jnp.maximum(ln(fused, params['ln2_g'], params['ln2_b']), 0.0)
        lg = y @ params['cls_w'] + params['cls_b']
        bl = lg @ params['fl_w'] + params['fl_b']
        sc = jax.nn.sigmoid(bl)[:, 0]
        mats.append(jnp.zeros((NUM_OBJ, NUM_OBJ), jnp.float32).at[pairs[:, 0], pairs[:, 1]].set(sc))
        logit_chunks.append(jnp.concatenate([lg, bl], axis=1))
    return jnp.concatenate(logit_chunks, 0), mats


# ---------------- main ----------------
if __name__ == "__main__":
    key = jax.random.PRNGKey(0)
    k_par, k_box, k_log, k_vis, k_pair = jax.random.split(key, 5)
    params = init_params(k_par)
    kparams = prepare_kernel_params(params)

    kb = jax.random.split(k_box, NUM_IMAGES)
    kl = jax.random.split(k_log, NUM_IMAGES)
    kp = jax.random.split(k_pair, NUM_IMAGES)

    boxes_per_img, pred_logits_per_img, rel_pair_inds, img_sizes = [], [], [], []
    all_pairs = jnp.array([(a, b) for a in range(NUM_OBJ) for b in range(NUM_OBJ) if a != b],
                          dtype=jnp.int32)
    for i in range(NUM_IMAGES):
        xy = jax.random.uniform(kb[i], (NUM_OBJ, 2), minval=0.0, maxval=300.0)
        wh = jax.random.uniform(jax.random.fold_in(kb[i], 1), (NUM_OBJ, 2), minval=16.0, maxval=200.0)
        boxes_per_img.append(jnp.concatenate([xy, xy + wh], axis=1).astype(jnp.float32))
        img_sizes.append((640.0, 480.0))
        pred_logits_per_img.append(
            jax.random.normal(kl[i], (NUM_OBJ, NUM_OBJ_CLASSES), jnp.float32))
        perm = jax.random.permutation(kp[i], all_pairs.shape[0])
        rel_pair_inds.append(all_pairs[perm[:NUM_PAIRS]])

    visual_feat = jax.random.normal(k_vis, (NUM_IMAGES * NUM_PAIRS, INPUT_DIM), jnp.float32)

    relness_logits, relness_matrices = rel_aware_rel_feature_forward(
        visual_feat, boxes_per_img, img_sizes, pred_logits_per_img, rel_pair_inds, kparams)
    jax.block_until_ready(relness_logits)
    jax.block_until_ready(relness_matrices)

    ref_logits, ref_mats = reference_forward(
        visual_feat, boxes_per_img, img_sizes, pred_logits_per_img, rel_pair_inds, params)

    assert relness_logits.shape == (NUM_IMAGES * NUM_PAIRS, OUT_DIM + 1)
    # bf16 weights AND bf16 activations at every MXU input (f32 accumulation)
    # => relaxed tolerances; fine for inference.
    max_err = float(jnp.max(jnp.abs(relness_logits - ref_logits)))
    mean_err = float(jnp.mean(jnp.abs(relness_logits - ref_logits)))
    assert max_err < 8e-2, f"max logit err {max_err}"
    assert mean_err < 2e-2, f"mean logit err {mean_err}"
    for m, rm in zip(relness_matrices, ref_mats):
        assert m.shape == (NUM_OBJ, NUM_OBJ)
        assert float(jnp.max(jnp.abs(m - rm))) < 2e-2

    print("KERNEL_OK")
</pallas_src>

<mosaic_0001>
module attributes {stable_mosaic.version = 11 : i64} {
  func.func @_fused_kernel(%arg0: i32, %arg1: memref<32x32xf32, #tpu.memory_space<vmem>>, %arg2: memref<128x2xi32, #tpu.memory_space<vmem>>, %arg3: memref<128x256xf32, #tpu.memory_space<vmem>>, %arg4: memref<6x1024xf32, #tpu.memory_space<vmem>>, %arg5: memref<160x128xf32, #tpu.memory_space<vmem>>, %arg6: memref<1600x512xbf16, #tpu.memory_space<vmem>>, %arg7: memref<512x128xbf16, #tpu.memory_space<vmem>>, %arg8: memref<128x128xf32, #tpu.memory_space<vmem>>, %arg9: memref<64x512xbf16, #tpu.memory_space<vmem>>) attributes {dimension_semantics = [#tpu.dimension_semantics<parallel>], iteration_bounds = array<i64: 1>, scalar_prefetch = 0 : i64, scratch_operands = 1 : i64, tpu.core_type = #tpu.core_type<tc>, window_params = [{pipeline_mode = #tpu.pipeline_mode<synchronous>, transform_indices = @transform_0, window_bounds = array<i64: 32, 32>}, {transform_indices = @transform_1, window_bounds = array<i64: 128, 2>}, {transform_indices = @transform_2, window_bounds = array<i64: 128, 256>}, {pipeline_mode = #tpu.pipeline_mode<synchronous>, transform_indices = @transform_3, window_bounds = array<i64: 6, 1024>}, {pipeline_mode = #tpu.pipeline_mode<synchronous>, transform_indices = @transform_4, window_bounds = array<i64: 160, 128>}, {pipeline_mode = #tpu.pipeline_mode<synchronous>, transform_indices = @transform_5, window_bounds = array<i64: 1600, 512>}, {pipeline_mode = #tpu.pipeline_mode<synchronous>, transform_indices = @transform_6, window_bounds = array<i64: 512, 128>}, {transform_indices = @transform_7, window_bounds = array<i64: 128, 128>}]} {
    %c0 = arith.constant 0 : index
    %c0_0 = arith.constant 0 : index
    %0 = vector.load %arg4[%c0, %c0_0] : memref<6x1024xf32, #tpu.memory_space<vmem>>, vector<1x128xf32>
    %c0_1 = arith.constant 0 : index
    %c128 = arith.constant 128 : index
    %1 = vector.load %arg4[%c0_1, %c128] : memref<6x1024xf32, #tpu.memory_space<vmem>>, vector<1x128xf32>
    %c0_2 = arith.constant 0 : index
    %c256 = arith.constant 256 : index
    %2 = vector.load %arg4[%c0_2, %c256] : memref<6x1024xf32, #tpu.memory_space<vmem>>, vector<1x128xf32>
    %c1 = arith.constant 1 : index
    %c0_3 = arith.constant 0 : index
    %3 = vector.load %arg4[%c1, %c0_3] : memref<6x1024xf32, #tpu.memory_space<vmem>>, vector<1x512xf32>
    %c1_4 = arith.constant 1 : index
    %c512 = arith.constant 512 : index
    %4 = vector.load %arg4[%c1_4, %c512] : memref<6x1024xf32, #tpu.memory_space<vmem>>, vector<1x512xf32>
    %c2 = arith.constant 2 : index
    %c0_5 = arith.constant 0 : index
    %5 = vector.load %arg4[%c2, %c0_5] : memref<6x1024xf32, #tpu.memory_space<vmem>>, vector<1x512xf32>
    %c2_6 = arith.constant 2 : index
    %c512_7 = arith.constant 512 : index
    %6 = vector.load %arg4[%c2_6, %c512_7] : memref<6x1024xf32, #tpu.memory_space<vmem>>, vector<1x512xf32>
    %c3 = arith.constant 3 : index
    %c0_8 = arith.constant 0 : index
    %7 = vector.load %arg4[%c3, %c0_8] : memref<6x1024xf32, #tpu.memory_space<vmem>>, vector<1x512xf32>
    %c3_9 = arith.constant 3 : index
    %c512_10 = arith.constant 512 : index
    %8 = vector.load %arg4[%c3_9, %c512_10] : memref<6x1024xf32, #tpu.memory_space<vmem>>, vector<1x512xf32>
    %c4 = arith.constant 4 : index
    %c0_11 = arith.constant 0 : index
    %9 = vector.load %arg4[%c4, %c0_11] : memref<6x1024xf32, #tpu.memory_space<vmem>>, vector<1x512xf32>
    %c4_12 = arith.constant 4 : index
    %c512_13 = arith.constant 512 : index
    %10 = vector.load %arg4[%c4_12, %c512_13] : memref<6x1024xf32, #tpu.memory_space<vmem>>, vector<1x512xf32>
    %c5 = arith.constant 5 : index
    %c0_14 = arith.constant 0 : index
    %11 = vector.load %arg4[%c5, %c0_14] : memref<6x1024xf32, #tpu.memory_space<vmem>>, vector<1x512xf32>
    %c0_15 = arith.constant 0 : index
    %c0_16 = arith.constant 0 : index
    %12 = vector.load %arg5[%c0_15, %c0_16] : memref<160x128xf32, #tpu.memory_space<vmem>>, vector<16x128xf32>
    %13 = arith.truncf %12 : vector<16x128xf32> to vector<16x128xbf16>
    %c16 = arith.constant 16 : index
    %c0_17 = arith.constant 0 : index
    %14 = vector.load %arg5[%c16, %c0_17] : memref<160x128xf32, #tpu.memory_space<vmem>>, vector<128x128xf32>
    %15 = arith.truncf %14 : vector<128x128xf32> to vector<128x128xbf16>
    %c144 = arith.constant 144 : index
    %c0_18 = arith.constant 0 : index
    %16 = vector.load %arg5[%c144, %c0_18] : memref<160x128xf32, #tpu.memory_space<vmem>>, vector<16x32xf32>
    %17 = arith.truncf %16 : vector<16x32xf32> to vector<16x32xbf16>
    %c0_19 = arith.constant 0 : index
    %c0_20 = arith.constant 0 : index
    %18 = vector.load %arg1[%c0_19, %c0_20] : memref<32x32xf32, #tpu.memory_space<vmem>>, vector<32x16xf32>
    %19 = arith.truncf %18 : vector<32x16xf32> to vector<32x16xbf16>
    %cst = arith.constant dense<0.000000e+00> : vector<32x128xf32>
    %20 = tpu.matmul %19, %13, %cst {dimension_numbers = #tpu.dot_dimension_numbers<[1], [0], [0], [1], [0, 0, 1, 1], [], []>} : vector<32x16xbf16>, vector<16x128xbf16>, vector<32x128xf32> -> vector<32x128xf32>
    %21 = vector.broadcast %0 : vector<1x128xf32> to vector<32x128xf32>
    %22 = arith.addf %20, %21 : vector<32x128xf32>
    %cst_21 = arith.constant 0.000000e+00 : f32
    %23 = vector.broadcast %cst_21 : f32 to vector<32x128xf32>
    %24 = arith.maximumf %22, %23 : vector<32x128xf32>
    %25 = arith.truncf %24 : vector<32x128xf32> to vector<32x128xbf16>
    %cst_22 = arith.constant dense<0.000000e+00> : vector<32x128xf32>
    %26 = tpu.matmul %25, %15, %cst_22 {dimension_numbers = #tpu.dot_dimension_numbers<[1], [0], [0], [1], [0, 0, 1, 1], [], []>} : vector<32x128xbf16>, vector<128x128xbf16>, vector<32x128xf32> -> vector<32x128xf32>
    %27 = vector.broadcast %1 : vector<1x128xf32> to vector<32x128xf32>
    %28 = arith.addf %26, %27 : vector<32x128xf32>
    %c0_23 = arith.constant 0 : index
    %c16_24 = arith.constant 16 : index
    %29 = vector.load %arg1[%c0_23, %c16_24] : memref<32x32xf32, #tpu.memory_space<vmem>>, vector<32x16xf32>
    %cst_25 = arith.constant dense<0xFF800000> : vector<32xf32>
    %30 = vector.multi_reduction <maximumf>, %29, %cst_25 [1] : vector<32x16xf32> to vector<32xf32>
    %31 = vector.shape_cast %30 : vector<32xf32> to vector<32x1xf32>
    %32 = vector.broadcast %31 : vector<32x1xf32> to vector<32x16xf32>
    %33 = arith.subf %29, %32 : vector<32x16xf32>
    %34 = math.exp %33 : vector<32x16xf32>
    %cst_26 = arith.constant dense<0.000000e+00> : vector<32xf32>
    %35 = vector.multi_reduction <add>, %34, %cst_26 [1] : vector<32x16xf32> to vector<32xf32>
    %36 = vector.shape_cast %35 : vector<32xf32> to vector<32x1xf32>
    %37 = vector.broadcast %36 : vector<32x1xf32> to vector<32x16xf32>
    %38 = arith.divf %34, %37 : vector<32x16xf32>
    %39 = arith.truncf %38 : vector<32x16xf32> to vector<32x16xbf16>
    %cst_27 = arith.constant dense<0.000000e+00> : vector<32x32xf32>
    %40 = tpu.matmul %39, %17, %cst_27 {dimension_numbers = #tpu.dot_dimension_numbers<[1], [0], [0], [1], [0, 0, 1, 1], [], []>} : vector<32x16xbf16>, vector<16x32xbf16>, vector<32x32xf32> -> vector<32x32xf32>
    %cst_28 = arith.constant 0.000000e+00 : f32
    %41 = vector.broadcast %cst_28 : f32 to vector<32x128xf32>
    %42 = arith.maximumf %28, %41 : vector<32x128xf32>
    %43 = arith.truncf %42 : vector<32x128xf32> to vector<32x128xbf16>
    %cst_29 = arith.constant 0.000000e+00 : f32
    %44 = vector.broadcast %cst_29 : f32 to vector<32x32xf32>
    %45 = arith.maximumf %40, %44 : vector<32x32xf32>
    %46 = arith.truncf %45 : vector<32x32xf32> to vector<32x32xbf16>
    %c256_30 = arith.constant 256 : index
    %c0_31 = arith.constant 0 : index
    %47 = vector.load %arg6[%c256_30, %c0_31] : memref<1600x512xbf16, #tpu.memory_space<vmem>>, vector<128x512xbf16>
    %cst_32 = arith.constant dense<0.000000e+00> : vector<32x512xf32>
    %48 = tpu.matmul %43, %47, %cst_32 {dimension_numbers = #tpu.dot_dimension_numbers<[1], [0], [0], [1], [0, 0, 1, 1], [], []>} : vector<32x128xbf16>, vector<128x512xbf16>, vector<32x512xf32> -> vector<32x512xf32>
    %c384 = arith.constant 384 : index
    %c0_33 = arith.constant 0 : index
    %49 = vector.load %arg6[%c384, %c0_33] : memref<1600x512xbf16, #tpu.memory_space<vmem>>, vector<32x512xbf16>
    %cst_34 = arith.constant dense<0.000000e+00> : vector<32x512xf32>
    %50 = tpu.matmul %46, %49, %cst_34 {dimension_numbers = #tpu.dot_dimension_numbers<[1], [0], [0], [1], [0, 0, 1, 1], [], []>} : vector<32x32xbf16>, vector<32x512xbf16>, vector<32x512xf32> -> vector<32x512xf32>
    %51 = arith.addf %48, %50 : vector<32x512xf32>
    %52 = arith.truncf %51 : vector<32x512xf32> to vector<32x512xbf16>
    %c0_35 = arith.constant 0 : index
    %c0_36 = arith.constant 0 : index
    %53 = vector.load %arg9[%c0_35, %c0_36] : memref<64x512xbf16, #tpu.memory_space<vmem>>, vector<32x512xbf16>
    tpu.vector_store %arg9[%c0_35, %c0_36], %52 {strides = array<i32>} : memref<64x512xbf16, #tpu.memory_space<vmem>>, vector<32x512xbf16>,
    %c416 = arith.constant 416 : index
    %c0_37 = arith.constant 0 : index
    %54 = vector.load %arg6[%c416, %c0_37] : memref<1600x512xbf16, #tpu.memory_space<vmem>>, vector<128x512xbf16>
    %cst_38 = arith.constant dense<0.000000e+00> : vector<32x512xf32>
    %55 = tpu.matmul %43, %54, %cst_38 {dimension_numbers = #tpu.dot_dimension_numbers<[1], [0], [0], [1], [0, 0, 1, 1], [], []>} : vector<32x128xbf16>, vector<128x512xbf16>, vector<32x512xf32> -> vector<32x512xf32>
    %c544 = arith.constant 544 : index
    %c0_39 = arith.constant 0 : index
    %56 = vector.load %arg6[%c544, %c0_39] : memref<1600x512xbf16, #tpu.memory_space<vmem>>, vector<32x512xbf16>
    %cst_40 = arith.constant dense<0.000000e+00> : vector<32x512xf32>
    %57 = tpu.matmul %46, %56, %cst_40 {dimension_numbers = #tpu.dot_dimension_numbers<[1], [0], [0], [1], [0, 0, 1, 1], [], []>} : vector<32x32xbf16>, vector<32x512xbf16>, vector<32x512xf32> -> vector<32x512xf32>
    %58 = arith.addf %55, %57 : vector<32x512xf32>
    %59 = arith.truncf %58 : vector<32x512xf32> to vector<32x512xbf16>
    %c32 = arith.constant 32 : index
    %c0_41 = arith.constant 0 : index
    %60 = vector.load %arg9[%c32, %c0_41] : memref<64x512xbf16, #tpu.memory_space<vmem>>, vector<32x512xbf16>
    tpu.vector_store %arg9[%c32, %c0_41], %59 {strides = array<i32>} : memref<64x512xbf16, #tpu.memory_space<vmem>>, vector<32x512xbf16>,
    %61 = tpu.iota {dimensions = array<i32: 1>} : vector<128x64xi32>
    %c32_i32 = arith.constant 32 : i32
    %62 = vector.broadcast %c32_i32 : i32 to vector<128x64xi32>
    %63 = arith.cmpi slt, %61, %62 : vector<128x64xi32>
    %c0_42 = arith.constant 0 : index
    %c0_43 = arith.constant 0 : index
    %64 = vector.load %arg2[%c0_42, %c0_43] : memref<128x2xi32, #tpu.memory_space<vmem>>, vector<128x1xi32>
    %c0_44 = arith.constant 0 : index
    %c1_45 = arith.constant 1 : index
    %65 = vector.load %arg2[%c0_44, %c1_45] : memref<128x2xi32, #tpu.memory_space<vmem>>, vector<128x1xi32>
    %66 = vector.shape_cast %64 : vector<128x1xi32> to vector<128x1xi32>
    %67 = vector.broadcast %66 : vector<128x1xi32> to vector<128x64xi32>
    %68 = vector.shape_cast %65 : vector<128x1xi32> to vector<128x1xi32>
    %69 = vector.broadcast %68 : vector<128x1xi32> to vector<128x64xi32>
    %70 = arith.select %63, %67, %69 : vector<128x64xi1>, vector<128x64xi32>
    %71 = arith.cmpi eq, %61, %70 : vector<128x64xi32>
    %72 = arith.extui %71 : vector<128x64xi1> to vector<128x64xi32>
    %73 = arith.sitofp %72 : vector<128x64xi32> to vector<128x64xf32>
    %74 = arith.truncf %73 : vector<128x64xf32> to vector<128x64xbf16>
    %c0_46 = arith.constant 0 : index
    %c0_47 = arith.constant 0 : index
    %75 = vector.load %arg9[%c0_46, %c0_47] : memref<64x512xbf16, #tpu.memory_space<vmem>>, vector<64x512xbf16>
    %cst_48 = arith.constant dense<0.000000e+00> : vector<128x512xf32>
    %76 = tpu.matmul %74, %75, %cst_48 {dimension_numbers = #tpu.dot_dimension_numbers<[1], [0], [0], [1], [0, 0, 1, 1], [], []>} : vector<128x64xbf16>, vector<64x512xbf16>, vector<128x512xf32> -> vector<128x512xf32>
    %77 = vector.broadcast %4 : vector<1x512xf32> to vector<128x512xf32>
    %78 = arith.addf %76, %77 : vector<128x512xf32>
    %c0_49 = arith.constant 0 : index
    %c0_50 = arith.constant 0 : index
    %79 = vector.load %arg3[%c0_49, %c0_50] : memref<128x256xf32, #tpu.memory_space<vmem>>, vector<128x256xf32>
    %cst_51 = arith.constant 0.000000e+00 : f32
    %80 = vector.broadcast %cst_51 : f32 to vector<128x256xf32>
    %81 = arith.maximumf %79, %80 : vector<128x256xf32>
    %82 = arith.truncf %81 : vector<128x256xf32> to vector<128x256xbf16>
    %c0_52 = arith.constant 0 : index
    %c0_53 = arith.constant 0 : index
    %83 = vector.load %arg6[%c0_52, %c0_53] : memref<1600x512xbf16, #tpu.memory_space<vmem>>, vector<256x512xbf16>
    %cst_54 = arith.constant dense<0.000000e+00> : vector<128x512xf32>
    %84 = tpu.matmul %82, %83, %cst_54 {dimension_numbers = #tpu.dot_dimension_numbers<[1], [0], [0], [1], [0, 0, 1, 1], [], []>} : vector<128x256xbf16>, vector<256x512xbf16>, vector<128x512xf32> -> vector<128x512xf32>
    %85 = vector.broadcast %3 : vector<1x512xf32> to vector<128x512xf32>
    %86 = arith.addf %84, %85 : vector<128x512xf32>
    %cst_55 = arith.constant dense<0.000000e+00> : vector<128xf32>
    %87 = vector.multi_reduction <add>, %86, %cst_55 [1] : vector<128x512xf32> to vector<128xf32>
    %88 = vector.shape_cast %87 : vector<128xf32> to vector<128x1xf32>
    %cst_56 = arith.constant dense<0.000000e+00> : vector<128xf32>
    %89 = vector.multi_reduction <add>, %78, %cst_56 [1] : vector<128x512xf32> to vector<128xf32>
    %90 = vector.shape_cast %89 : vector<128xf32> to vector<128x1xf32>
    %91 = arith.addf %88, %90 : vector<128x1xf32>
    %cst_57 = arith.constant 9.765625E-4 : f32
    %92 = vector.broadcast %cst_57 : f32 to vector<128x1xf32>
    %93 = arith.mulf %91, %92 : vector<128x1xf32>
    %94 = arith.mulf %86, %86 : vector<128x512xf32>
    %cst_58 = arith.constant dense<0.000000e+00> : vector<128xf32>
    %95 = vector.multi_reduction <add>, %94, %cst_58 [1] : vector<128x512xf32> to vector<128xf32>
    %96 = vector.shape_cast %95 : vector<128xf32> to vector<128x1xf32>
    %97 = arith.mulf %78, %78 : vector<128x512xf32>
    %cst_59 = arith.constant dense<0.000000e+00> : vector<128xf32>
    %98 = vector.multi_reduction <add>, %97, %cst_59 [1] : vector<128x512xf32> to vector<128xf32>
    %99 = vector.shape_cast %98 : vector<128xf32> to vector<128x1xf32>
    %100 = arith.addf %96, %99 : vector<128x1xf32>
    %cst_60 = arith.constant 9.765625E-4 : f32
    %101 = vector.broadcast %cst_60 : f32 to vector<128x1xf32>
    %102 = arith.mulf %100, %101 : vector<128x1xf32>
    %103 = arith.mulf %93, %93 : vector<128x1xf32>
    %104 = arith.subf %102, %103 : vector<128x1xf32>
    %cst_61 = arith.constant 0.000000e+00 : f32
    %105 = vector.broadcast %cst_61 : f32 to vector<128x1xf32>
    %106 = arith.maximumf %104, %105 : vector<128x1xf32>
    %cst_62 = arith.constant 9.99999974E-6 : f32
    %107 = vector.broadcast %cst_62 : f32 to vector<128x1xf32>
    %108 = arith.addf %106, %107 : vector<128x1xf32>
    %109 = math.rsqrt %108 : vector<128x1xf32>
    %110 = vector.broadcast %93 : vector<128x1xf32> to vector<128x512xf32>
    %111 = arith.subf %86, %110 : vector<128x512xf32>
    %112 = vector.broadcast %109 : vector<128x1xf32> to vector<128x512xf32>
    %113 = arith.mulf %111, %112 : vector<128x512xf32>
    %114 = vector.broadcast %5 : vector<1x512xf32> to vector<128x512xf32>
    %115 = arith.mulf %113, %114 : vector<128x512xf32>
    %116 = vector.broadcast %7 : vector<1x512xf32> to vector<128x512xf32>
    %117 = arith.addf %115, %116 : vector<128x512xf32>
    %cst_63 = arith.constant 0.000000e+00 : f32
    %118 = vector.broadcast %cst_63 : f32 to vector<128x512xf32>
    %119 = arith.maximumf %117, %118 : vector<128x512xf32>
    %120 = vector.broadcast %93 : vector<128x1xf32> to vector<128x512xf32>
    %121 = arith.subf %78, %120 : vector<128x512xf32>
    %122 = vector.broadcast %109 : vector<128x1xf32> to vector<128x512xf32>
    %123 = arith.mulf %121, %122 : vector<128x512xf32>
    %124 = vector.broadcast %6 : vector<1x512xf32> to vector<128x512xf32>
    %125 = arith.mulf %123, %124 : vector<128x512xf32>
    %126 = vector.broadcast %8 : vector<1x512xf32> to vector<128x512xf32>
    %127 = arith.addf %125, %126 : vector<128x512xf32>
    %cst_64 = arith.constant 0.000000e+00 : f32
    %128 = vector.broadcast %cst_64 : f32 to vector<128x512xf32>
    %129 = arith.maximumf %127, %128 : vector<128x512xf32>
    %130 = arith.truncf %119 : vector<128x512xf32> to vector<128x512xbf16>
    %c576 = arith.constant 576 : index
    %c0_65 = arith.constant 0 : index
    %131 = vector.load %arg6[%c576, %c0_65] : memref<1600x512xbf16, #tpu.memory_space<vmem>>, vector<512x512xbf16>
    %cst_66 = arith.constant dense<0.000000e+00> : vector<128x512xf32>
    %132 = tpu.matmul %130, %131, %cst_66 {dimension_numbers = #tpu.dot_dimension_numbers<[1], [0], [0], [1], [0, 0, 1, 1], [], []>} : vector<128x512xbf16>, vector<512x512xbf16>, vector<128x512xf32> -> vector<128x512xf32>
    %133 = arith.truncf %129 : vector<128x512xf32> to vector<128x512xbf16>
    %c1088 = arith.constant 1088 : index
    %c0_67 = arith.constant 0 : index
    %134 = vector.load %arg6[%c1088, %c0_67] : memref<1600x512xbf16, #tpu.memory_space<vmem>>, vector<512x512xbf16>
    %cst_68 = arith.constant dense<0.000000e+00> : vector<128x512xf32>
    %135 = tpu.matmul %133, %134, %cst_68 {dimension_numbers = #tpu.dot_dimension_numbers<[1], [0], [0], [1], [0, 0, 1, 1], [], []>} : vector<128x512xbf16>, vector<512x512xbf16>, vector<128x512xf32> -> vector<128x512xf32>
    %136 = arith.addf %132, %135 : vector<128x512xf32>
    %137 = vector.broadcast %9 : vector<1x512xf32> to vector<128x512xf32>
    %138 = arith.addf %136, %137 : vector<128x512xf32>
    %cst_69 = arith.constant dense<0.000000e+00> : vector<128xf32>
    %139 = vector.multi_reduction <add>, %138, %cst_69 [1] : vector<128x512xf32> to vector<128xf32>
    %140 = vector.shape_cast %139 : vector<128xf32> to vector<128x1xf32>
    %cst_70 = arith.constant 5.120000e+02 : f32
    %141 = vector.broadcast %cst_70 : f32 to vector<128x1xf32>
    %142 = arith.divf %140, %141 : vector<128x1xf32>
    %143 = arith.mulf %138, %138 : vector<128x512xf32>
    %cst_71 = arith.constant dense<0.000000e+00> : vector<128xf32>
    %144 = vector.multi_reduction <add>, %143, %cst_71 [1] : vector<128x512xf32> to vector<128xf32>
    %145 = vector.shape_cast %144 : vector<128xf32> to vector<128x1xf32>
    %cst_72 = arith.constant 5.120000e+02 : f32
    %146 = vector.broadcast %cst_72 : f32 to vector<128x1xf32>
    %147 = arith.divf %145, %146 : vector<128x1xf32>
    %148 = arith.mulf %142, %142 : vector<128x1xf32>
    %149 = arith.subf %147, %148 : vector<128x1xf32>
    %cst_73 = arith.constant 0.000000e+00 : f32
    %150 = vector.broadcast %cst_73 : f32 to vector<128x1xf32>
    %151 = arith.maximumf %149, %150 : vector<128x1xf32>
    %152 = vector.broadcast %142 : vector<128x1xf32> to vector<128x512xf32>
    %153 = arith.subf %138, %152 : vector<128x512xf32>
    %cst_74 = arith.constant 9.99999974E-6 : f32
    %154 = vector.broadcast %cst_74 : f32 to vector<128x1xf32>
    %155 = arith.addf %151, %154 : vector<128x1xf32>
    %156 = math.rsqrt %155 : vector<128x1xf32>
    %157 = vector.broadcast %156 : vector<128x1xf32> to vector<128x512xf32>
    %158 = arith.mulf %153, %157 : vector<128x512xf32>
    %159 = vector.broadcast %10 : vector<1x512xf32> to vector<128x512xf32>
    %160 = arith.mulf %158, %159 : vector<128x512xf32>
    %161 = vector.broadcast %11 : vector<1x512xf32> to vector<128x512xf32>
    %162 = arith.addf %160, %161 : vector<128x512xf32>
    %cst_75 = arith.constant 0.000000e+00 : f32
    %163 = vector.broadcast %cst_75 : f32 to vector<128x512xf32>
    %164 = arith.maximumf %162, %163 : vector<128x512xf32>
    %165 = arith.truncf %164 : vector<128x512xf32> to vector<128x512xbf16>
    %c0_76 = arith.constant 0 : index
    %c0_77 = arith.constant 0 : index
    %166 = vector.load %arg7[%c0_76, %c0_77] : memref<512x128xbf16, #tpu.memory_space<vmem>>, vector<512x128xbf16>
    %cst_78 = arith.constant dense<0.000000e+00> : vector<128x128xf32>
    %167 = tpu.matmul %165, %166, %cst_78 {dimension_numbers = #tpu.dot_dimension_numbers<[1], [0], [0], [1], [0, 0, 1, 1], [], []>} : vector<128x512xbf16>, vector<512x128xbf16>, vector<128x128xf32> -> vector<128x128xf32>
    %168 = vector.broadcast %2 : vector<1x128xf32> to vector<128x128xf32>
    %169 = arith.addf %167, %168 : vector<128x128xf32>
    %170 = tpu.iota {dimensions = array<i32: 1>} : vector<128x128xi32>
    %c51_i32 = arith.constant 51 : i32
    %171 = vector.broadcast %c51_i32 : i32 to vector<128x128xi32>
    %172 = arith.cmpi eq, %170, %171 : vector<128x128xi32>
    %173 = arith.negf %169 : vector<128x128xf32>
    %174 = math.exp %173 : vector<128x128xf32>
    %cst_79 = arith.constant 1.000000e+00 : f32
    %175 = vector.broadcast %cst_79 : f32 to vector<128x128xf32>
    %176 = arith.addf %175, %174 : vector<128x128xf32>
    %177 = arith.divf %175, %176 : vector<128x128xf32>
    %178 = arith.select %172, %177, %169 : vector<128x128xi1>, vector<128x128xf32>
    %c0_80 = arith.constant 0 : index
    %c0_81 = arith.constant 0 : index
    %179 = vector.load %arg8[%c0_80, %c0_81] : memref<128x128xf32, #tpu.memory_space<vmem>>, vector<128x128xf32>
    tpu.vector_store %arg8[%c0_80, %c0_81], %178 {strides = array<i32>} : memref<128x128xf32, #tpu.memory_space<vmem>>, vector<128x128xf32>,
    return
  }
  func.func @transform_0(%arg0: i32) -> (i32, i32) {
    %c0_i32 = arith.constant 0 : i32
    %c0_i32_0 = arith.constant 0 : i32
    %c0_i32_1 = arith.constant 0 : i32
    return %c0_i32, %c0_i32_0 : i32, i32
  }
  func.func @transform_1(%arg0: i32) -> (i32, i32) {
    %c0_i32 = arith.constant 0 : i32
    %c0_i32_0 = arith.constant 0 : i32
    return %arg0, %c0_i32 : i32, i32
  }
  func.func @transform_2(%arg0: i32) -> (i32, i32) {
    %c0_i32 = arith.constant 0 : i32
    %c0_i32_0 = arith.constant 0 : i32
    return %arg0, %c0_i32 : i32, i32
  }
  func.func @transform_3(%arg0: i32) -> (i32, i32) {
    %c0_i32 = arith.constant 0 : i32
    %c0_i32_0 = arith.constant 0 : i32
    %c0_i32_1 = arith.constant 0 : i32
    return %c0_i32, %c0_i32_0 : i32, i32
  }
  func.func @transform_4(%arg0: i32) -> (i32, i32) {
    %c0_i32 = arith.constant 0 : i32
    %c0_i32_0 = arith.constant 0 : i32
    %c0_i32_1 = arith.constant 0 : i32
    return %c0_i32, %c0_i32_0 : i32, i32
  }
  func.func @transform_5(%arg0: i32) -> (i32, i32) {
    %c0_i32 = arith.constant 0 : i32
    %c0_i32_0 = arith.constant 0 : i32
    %c0_i32_1 = arith.constant 0 : i32
    return %c0_i32, %c0_i32_0 : i32, i32
  }
  func.func @transform_6(%arg0: i32) -> (i32, i32) {
    %c0_i32 = arith.constant 0 : i32
    %c0_i32_0 = arith.constant 0 : i32
    %c0_i32_1 = arith.constant 0 : i32
    return %c0_i32, %c0_i32_0 : i32, i32
  }
  func.func @transform_7(%arg0: i32) -> (i32, i32) {
    %c0_i32 = arith.constant 0 : i32
    %c0_i32_0 = arith.constant 0 : i32
    return %arg0, %c0_i32 : i32, i32
  }
}

</mosaic_0001>

<bundles_post_ra>
// kernel: tpu_custom_call.1
= control target key start
LH: loop header
LB: loop body
LE: loop exit
PB: predicated region body
PF: predicated region fallthrough
CT: control target
= control target key end

     0   :  { %12 = vsyncpa [#allocation4], 0  ;;  %s13147_s0 = inlined_call_operand.hbm [shape: f32[32,32], index: 0, kind: input, shape index: {}]   ;;  %s13148_s1 = inlined_call_operand.vmem [shape: s32[128,2], index: 1, kind: input, shape index: {}]   ;;  %s13149_s2 = inlined_call_operand.hbm [shape: f32[128,256], index: 2, kind: input, shape index: {}]   ;;  %s13150_s3 = inlined_call_operand.hbm [shape: f32[6,1024], index: 3, kind: input, shape index: {}]   ;;  %s13151_s4 = inlined_call_operand.hbm [shape: f32[160,128], index: 4, kind: input, shape index: {}]   ;;  %s13152_s5 = inlined_call_operand.hbm [shape: bf16[1600,512], index: 5, kind: input, shape index: {}]   ;;  %s13153_s6 = inlined_call_operand.hbm [shape: bf16[512,128], index: 6, kind: input, shape index: {}]   ;;  %s13154_s7 = inlined_call_operand.hbm [shape: f32[128,128], index: 7, kind: output, shape index: {}]  }
   0x1   :  { %13 = vsyncpa [#allocation7], 0 }
   0x2   :  { %14 = vsyncpa [#allocation10], 0 }
   0x3   :  { %15 = vsyncpa [#allocation13], 0 }
   0x4   :  { %16 = vsyncpa [#allocation5], 0  ;;  %s9667_s24 = smov [#allocation6]   ;;  %s9503_s28 = scalar_lea.hbm %s13149_s2, 4096 }
   0x5   :  { %s36_s25 = sshll.u32 %s9667_s24, 4  ;;  %p9504_p0 = scmp.ne.s32.totalorder %s13149_s2, %s9503_s28  ;;  %s37_s25 = int_to_ptr.vmem [resolvable:$true] %s36_s25 }
   0x6   :  { %p9507_p1 = scmp.lt.u32.totalorder %s9503_s28, %s13149_s2 }
   0x8   :  { %p9509_p2 = pnand %p9507_p1, %p9504_p0 }
   0xa   :  { %9512 = shalt.err (!%p9509_p2)
}
   0xb   :  { %s9513_s10 = scalar_lea.vmem %s37_s25, 4096  ;;  %p9518_p4 = scmp.lt.s32.totalorder %s37_s25, %s37_s25 }
   0xc   :  { %p9514_p3 = scmp.ne.s32.totalorder %s37_s25, %s9513_s10  ;;  %p9519_p5 = scmp.lt.s32.totalorder %s9513_s10, %s9513_s10 }
   0xe   :  { %p9520_p6 = por %p9519_p5, %p9518_p4 }
  0x10   :  { %p9521_p7 = pnand %p9520_p6, %p9514_p3 }
  0x12   :  { %9524 = shalt.err (!%p9521_p7)
}
  0x13   :  { %s9668_s11 = smov 256   ;;  %s9669_s12 = smov 16  }
  0x14   :  { %42 = dma.hbm_to_vmem [thread:$0]  %s13149_s2, 4096, %s37_s25, [#allocation7], %s9668_s11, %s9668_s11, %s9669_s12  }
  0x15   :  { %s9670_s15 = smov [#allocation9]   ;;  %s9671_s17 = smov [#allocation3]  }
  0x16   :  { %s58_s16 = sshll.u32 %s9670_s15, 4  ;;  %s22_s18 = sshll.u32 %s9671_s17, 4  ;;  %s59_s16 = int_to_ptr.vmem [resolvable:$true] %s58_s16  ;;  %s23_s18 = int_to_ptr.vmem [resolvable:$true] %s22_s18 }
  0x17   :  { %s9525_s21 = scalar_lea.hbm %s13151_s4, 2560 }
  0x18   :  { %p9526_p8 = scmp.ne.s32.totalorder %s13151_s4, %s9525_s21  ;;  %p9529_p9 = scmp.lt.u32.totalorder %s9525_s21, %s13151_s4 }
  0x1a   :  { %p9531_p10 = pnand %p9529_p9, %p9526_p8 }
  0x1c   :  { %9534 = shalt.err (!%p9531_p10)
}
  0x1d   :  { %s9535_s2 = scalar_lea.vmem %s59_s16, 2560  ;;  %p9540_p12 = scmp.lt.s32.totalorder %s59_s16, %s59_s16 }
  0x1e   :  { %p9536_p11 = scmp.ne.s32.totalorder %s59_s16, %s9535_s2  ;;  %p9541_p13 = scmp.lt.s32.totalorder %s9535_s2, %s9535_s2 }
  0x20   :  { %p9542_p0 = por %p9541_p13, %p9540_p12 }
  0x22   :  { %p9543_p1 = pnand %p9542_p0, %p9536_p11 }
  0x24   :  { %9546 = shalt.err (!%p9543_p1)
}
  0x25   :  { %s9672_s25 = smov 128   ;;  %s9673_s27 = smov 8  }
  0x26   :  { %64 = dma.hbm_to_vmem [thread:$0]  %s13151_s4, 2560, %s59_s16, [#allocation10], %s9672_s25, %s9672_s25, %s9673_s27  }
  0x27   :  { %s9547_s9 = scalar_lea.hbm %s13147_s0, 512 }
  0x28   :  { %p9548_p2 = scmp.ne.s32.totalorder %s13147_s0, %s9547_s9  ;;  %p9551_p3 = scmp.lt.u32.totalorder %s9547_s9, %s13147_s0 }
  0x2a   :  { %p9553_p4 = pnand %p9551_p3, %p9548_p2 }
  0x2c   :  { %9556 = shalt.err (!%p9553_p4)
}
  0x2d   :  { %s9557_s17 = scalar_lea.vmem %s23_s18, 512  ;;  %p9562_p6 = scmp.lt.s32.totalorder %s23_s18, %s23_s18 }
  0x2e   :  { %p9558_p5 = scmp.ne.s32.totalorder %s23_s18, %s9557_s17  ;;  %p9563_p7 = scmp.lt.s32.totalorder %s9557_s17, %s9557_s17 }
  0x30   :  { %p9564_p8 = por %p9563_p7, %p9562_p6 }
  0x32   :  { %p9565_p9 = pnand %p9564_p8, %p9558_p5 }
  0x34   :  { %9568 = shalt.err (!%p9565_p9)
}
  0x35   :  { %28 = dma.hbm_to_vmem [thread:$0]  %s13147_s0, 512, %s23_s18, [#allocation4], %s9672_s25, %s9672_s25, %s9673_s27  }
  0x36   :  { %s9674_s19 = smov [#allocation8]   ;;  %s9675_s21 = smov [#allocation11]  }
  0x37   :  { %s49_s20 = sshll.u32 %s9674_s19, 4  ;;  %s70_s22 = sshll.u32 %s9675_s21, 4  ;;  %s50_s20 = int_to_ptr.vmem [resolvable:$true] %s49_s20  ;;  %s71_s22 = int_to_ptr.vmem [resolvable:$true] %s70_s22 }
  0x38   :  { %s9569_s26 = scalar_lea.hbm %s13150_s3, 1024 }
  0x39   :  { %p9570_p10 = scmp.ne.s32.totalorder %s13150_s3, %s9569_s26  ;;  %p9573_p11 = scmp.lt.u32.totalorder %s9569_s26, %s13150_s3 }
  0x3b   :  { %p9575_p12 = pnand %p9573_p11, %p9570_p10 }
  0x3d   :  { %9578 = shalt.err (!%p9575_p12)
}
  0x3e   :  { %s9579_s0 = scalar_lea.vmem %s50_s20, 1024  ;;  %p9584_p0 = scmp.lt.s32.totalorder %s50_s20, %s50_s20 }
  0x3f   :  { %p9580_p13 = scmp.ne.s32.totalorder %s50_s20, %s9579_s0  ;;  %p9585_p1 = scmp.lt.s32.totalorder %s9579_s0, %s9579_s0 }
  0x41   :  { %p9586_p2 = por %p9585_p1, %p9584_p0 }
  0x43   :  { %p9587_p3 = pnand %p9586_p2, %p9580_p13 }
  0x45   :  { %9590 = shalt.err (!%p9587_p3)
}
  0x46   :  { %52 = dma.hbm_to_vmem [thread:$0]  %s13150_s3, 1024, %s50_s20, [#allocation7]  }
  0x47   :  { %s9591_s13 = scalar_lea.hbm %s13152_s5, 51200 }
  0x48   :  { %p9592_p4 = scmp.ne.s32.totalorder %s13152_s5, %s9591_s13  ;;  %p9595_p5 = scmp.lt.u32.totalorder %s9591_s13, %s13152_s5 }
  0x4a   :  { %p9597_p6 = pnand %p9595_p5, %p9592_p4 }
  0x4c   :  { %9600 = shalt.err (!%p9597_p6)
}
  0x4d   :  { %s9601_s16 = scalar_lea.vmem %s71_s22, 51200  ;;  %p9606_p8 = scmp.lt.s32.totalorder %s71_s22, %s71_s22 }
  0x4e   :  { %p9602_p7 = scmp.ne.s32.totalorder %s71_s22, %s9601_s16  ;;  %p9607_p9 = scmp.lt.s32.totalorder %s9601_s16, %s9601_s16 }
  0x50   :  { %p9608_p10 = por %p9607_p9, %p9606_p8 }
  0x52   :  { %p9609_p11 = pnand %p9608_p10, %p9602_p7 }
  0x54   :  { %9612 = shalt.err (!%p9609_p11)
}
  0x55   :  { %76 = dma.hbm_to_vmem [thread:$0]  %s13152_s5, 51200, %s71_s22, [#allocation10], %s9668_s11, %s9668_s11, %s9669_s12  }
  0x56   :  { %s9676_s20 = smov [#allocation12]   ;;  %s9613_s26 = scalar_lea.hbm %s13153_s6, 4096 }
  0x57   :  { %s82_s21 = sshll.u32 %s9676_s20, 4  ;;  %p9614_p12 = scmp.ne.s32.totalorder %s13153_s6, %s9613_s26  ;;  %s83_s21 = int_to_ptr.vmem [resolvable:$true] %s82_s21 }
  0x58   :  { %p9617_p13 = scmp.lt.u32.totalorder %s9613_s26, %s13153_s6 }
  0x5a   :  { %p9619_p0 = pnand %p9617_p13, %p9614_p12 }
  0x5c   :  { %9622 = shalt.err (!%p9619_p0)
}
  0x5d   :  { %s9623_s0 = scalar_lea.vmem %s83_s21, 4096  ;;  %p9628_p2 = scmp.lt.s32.totalorder %s83_s21, %s83_s21 }
  0x5e   :  { %p9624_p1 = scmp.ne.s32.totalorder %s83_s21, %s9623_s0  ;;  %p9629_p3 = scmp.lt.s32.totalorder %s9623_s0, %s9623_s0 }
  0x60   :  { %p9630_p4 = por %p9629_p3, %p9628_p2 }
  0x62   :  { %p9631_p5 = pnand %p9630_p4, %p9624_p1 }
  0x64   :  { %9634 = shalt.err (!%p9631_p5)
}
  0x65   :  { %s9677_s5 = smov 64   ;;  %s9678_s11 = smov 4  }
  0x66   :  { %88 = dma.hbm_to_vmem [thread:$0]  %s13153_s6, 4096, %s83_s21, [#allocation13], %s9677_s5, %s9677_s5, %s9678_s11  }
  0x67   :  { %9657 = dma.done.wait [#allocation4], 512  }
  0x68   :  { %9658 = vsyncadd [#allocation4], 4294966784 }
  0x69   :  { %9659 = dma.done.wait [#allocation7], 5120  }
  0x6a   :  { %9660 = vsyncadd [#allocation7], 4294962176 }
  0x6b   :  { %9661 = dma.done.wait [#allocation10], 53760  }
  0x6c   :  { %9662 = vsyncadd [#allocation10], 4294913536 }
  0x6d   :  { %9663 = dma.done.wait [#allocation13], 4096  }
  0x6e   :  { %9664 = vsyncadd [#allocation13], 4294963200  ;;  %vm276_vm0 = vcmask 261248   ;;  %v159_v0 = vld [vmem:[#allocation3] sm:$0xff]  ;;  %v160_v1 = vld [vmem:[#allocation3 + $0x8] sm:$0xff]  ;;  %s9679_s6 = smov 112  }
  0x6f   :  { %v161_v2 = vld [vmem:[#allocation3 + $0x10] sm:$0xff]  ;;  %v277_v3 = vsel %vm276_vm0, %v159_v0, -inf  ;;  %v162_v5 = vld [vmem:[#allocation3 + $0x18] sm:$0xff]  ;;  %v280_v6 = vsel %vm276_vm0, %v160_v1, -inf  ;;  %v129_v21 = vld [vmem:[#allocation9] sm:$0xff]  ;;  %v163_v23 = vpack.c.bf16 %v160_v1, %v159_v0  ;;  %vm165_vm1 = vcmask 130048  }
  0x70   :  { %v283_v4 = vsel %vm276_vm0, %v161_v2, -inf  ;;  %278 = vmax.xlane.f32.xlu0 %v277_v3  ;;  %v286_v7 = vsel %vm276_vm0, %v162_v5, -inf  ;;  %v130_v22 = vld [vmem:[#allocation9 + $0x8] sm:$0xff]  ;;  %v164_v26 = vpack.c.bf16 %v162_v5, %v161_v2  ;;  %v156_v39 = vld [vmem:[#allocation9 + $0x90] sm:$0xff]  ;;  %v157_v40 = vld [vmem:[#allocation9 + $0x98] sm:$0xff]  ;;  %vm492_vm2 = vcmask 261120  }
  0x71   :  { %284 = vmax.xlane.f32.xlu1 %v283_v4  ;;  %v131_v24 = vpack.c.bf16 %v130_v22, %v129_v21  ;;  %8414 = vmatprep.mubr.msk.bf16.mxu0 %vm165_vm1, %v163_v23  ;;  %v158_v41 = vpack.c.bf16 %v157_v40, %v156_v39  ;;  %v132_v46 = vld [vmem:[#allocation9 + $0x10] sm:$0xff]  ;;  %v133_v47 = vld [vmem:[#allocation9 + $0x18] sm:$0xff]  ;;  %v134_v48 = vld [vmem:[#allocation9 + $0x20] sm:$0xff]  ;;  %v9680_v39 = vmov 0   ;;  %vm1579_vm6 = vcmask 523264  }
  0x72   :  { %v148_v52 = vpack.c.bf16 %v133_v47, %v132_v46  ;;  %v135_v53 = vld [vmem:[#allocation9 + $0x28] sm:$0xff]  ;;  %v136_v56 = vld [vmem:[#allocation9 + $0x30] sm:$0xff]  ;;  %v137_v57 = vld [vmem:[#allocation9 + $0x38] sm:$0xff]  ;;  %8701 = vset.pattern.permute.xlu1 %v9680_v39 }
  0x73   :  { %8412 = vmatprep.subr.bf16.mxu0 %v131_v24  ;;  %v149_v55 = vpack.c.bf16 %v135_v53, %v134_v48  ;;  %v108_v61 = vld [vmem:[#allocation8] ss:$0 sm:$0xff]  ;;  %v150_v62 = vpack.c.bf16 %v137_v57, %v136_v56  ;;  %v139_v3 = vld [vmem:[#allocation9 + $0x48] sm:$0xff]  ;;  %v144_v23 = vld [vmem:[#allocation9 + $0x70] sm:$0xff] }
  0x74   :  { %281 = vmax.xlane.f32.xlu0 %v280_v6  ;;  %8413 = vmatpush3.bf16.msra.mxu0 %v131_v24  ;;  %v143_v21 = vld [vmem:[#allocation9 + $0x68] sm:$0xff]  ;;  %v145_v24 = vld [vmem:[#allocation9 + $0x78] sm:$0xff]  ;;  %v1358_v57 = vld [vmem:[%s13148_s1] sm:$0xff] }
  0x75   :  { %287 = vmax.xlane.f32.xlu1 %v286_v7  ;;  %8438 = vmatprep.subr.bf16.mxu0 %v158_v41  ;;  %v8738_v40 = vld [vmem:[#allocation11 + $0x30c] ss:$16 sps:$4 sm:$0xff]  }
  0x76   :  { %8418 = vmatprep.subr.bf16.mxu1 %v148_v52 }
  0x77   :  { %8415 = vmatmul.mubr.msk.bf16.vlgmr.msra.gmra.mrb[0].mxu0 %vm165_vm1, %v164_v26  ;;  %8419 = vmatpush3.bf16.msra.mxu1 %v148_v52  ;;  %v146_v26 = vld [vmem:[#allocation9 + $0x80] sm:$0xff] }
  0x78   :  { %8439 = vmatpush3.bf16.msra.mxu0 %v158_v41  ;;  %8420 = vmatprep.subr.bf16.mxu1 %v149_v55  ;;  %v8741_v41 = vld [vmem:[#allocation11 + $0x44c] ss:$16 sps:$4 sm:$0xff]  }
  0x7b   :  { %8421 = vmatpush3.bf16.msra.mxu1 %v149_v55 }
  0x7c   :  { %8422 = vmatprep.subr.bf16.mxu1 %v150_v62 }
  0x7f   :  { %8423 = vmatpush3.bf16.msra.mxu1 %v150_v62  ;;  %v1360_v62 = vld [vmem:[%s13148_s1 + $0x10] sm:$0xff] }
  0xfd   :  { %v279_v8 = vpop.xlane.xlu0 %278 }
  0xfe   :  { %v285_v9 = vpop.xlane.xlu1 %284  ;;  %v289_v10 = vsub.f32 %v159_v0, %v279_v8 }
  0xff   :  { %v291_v11 = vsub.f32 %v161_v2, %v285_v9  ;;  %v138_v2 = vld [vmem:[#allocation9 + $0x40] sm:$0xff] }
 0x100   :  { %v293_v12 = vmul.f32 1.442695, %v289_v10 }
 0x101   :  { %v297_v13 = vmul.f32 1.442695, %v291_v11  ;;  %v282_v14 = vpop.xlane.xlu0 %281 }
 0x102   :  { %v288_v15 = vpop.xlane.xlu1 %287  ;;  %9356 = vpow2.f32 %v293_v12  ;;  %v290_v16 = vsub.f32 %v160_v1, %v282_v14  ;;  %v140_v14 = vld [vmem:[#allocation9 + $0x50] sm:$0xff] }
 0x103   :  { %v292_v17 = vsub.f32 %v162_v5, %v288_v15  ;;  %v141_v15 = vld [vmem:[#allocation9 + $0x58] sm:$0xff] }
 0x104   :  { %v295_v18 = vmul.f32 1.442695, %v290_v16 }
 0x105   :  { %v299_v19 = vmul.f32 1.442695, %v292_v17 }
 0x106   :  { %9358 = vpow2.f32 %v295_v18 }
 0x107   :  { %9360 = vpow2.f32 %v297_v13  ;;  %v151_v13 = vpack.c.bf16 %v139_v3, %v138_v2  ;;  %v9872_v2 = vld [vmem:[%s13148_s1 + $0x58] sm:$0xff] }
 0x108   :  { %9362 = vpow2.f32 %v299_v19  ;;  %v152_v19 = vpack.c.bf16 %v141_v15, %v140_v14  ;;  %v8736_v14 = vld [vmem:[#allocation11 + $0x308] ss:$16 sps:$4 sm:$0xff]  }
 0x109   :  { %8424 = vmatprep.subr.bf16.mxu1 %v151_v13 }
 0x10a   :  { %8425 = vmatpush3.bf16.msra.mxu1 %v151_v13 }
 0x10b   :  { %8426 = vmatprep.subr.bf16.mxu1 %v152_v19 }
 0x10c   :  { %v9357_v20 = vpop.eup %9356 }
 0x10d   :  { %305 = vrot.lane.b32.xlu0 %v9357_v20, %s9679_s6 }
 0x10e   :  { %8427 = vmatpush3.bf16.msra.mxu1 %v152_v19  ;;  %v8742_v19 = vld [vmem:[#allocation11 + $0x328] ss:$16 sps:$4 sm:$0xff]  }
 0x110   :  { %v9359_v25 = vpop.eup %9358 }
 0x111   :  { %307 = vrot.lane.b32.xlu1 %v9359_v25, %s9679_s6  ;;  %v9811_v27 = vpop.eup %9360 }
 0x112   :  { %v9816_v28 = vpop.eup %9362 }
 0x115   :  { %309 = vrot.lane.b32.xlu1 %v9811_v27, %s9679_s6 }
 0x119   :  { %311 = vrot.lane.b32.xlu1 %v9816_v28, %s9679_s6 }
 0x14a   :  { %v8416_v49 = vpop.f32.mrb[0].mxu0 }
 0x14b   :  { %v206_v54 = vpop.f32.mrb[1].mxu0  ;;  %v215_v63 = vadd.f32 %v8416_v49, %v108_v61 }
 0x14c   :  { %v8417_v58 = vpop.f32.mrb[2].mxu0  ;;  %v207_v0 = vadd.f32 %v206_v54, %v108_v61 }
 0x14d   :  { %v209_v60 = vpop.f32.mrb[3].mxu0  ;;  %v218_v4 = vadd.f32 %v8417_v58, %v108_v61  ;;  %v223_v6 = vmax.f32 %v215_v63, 0.0  ;;  %v9681_v58 = vmov 1   ;;  %v1365_v63 = vld [vmem:[%s13148_s1 + $0x38] sm:$0xff] }
 0x14e   :  { %v210_v5 = vadd.f32 %v209_v60, %v108_v61  ;;  %v221_v7 = vmax.f32 %v207_v0, 0.0  ;;  %8702 = vset.pattern.permute.xlu0 %v9681_v58  ;;  %v1362_v60 = vld [vmem:[%s13148_s1 + $0x20] sm:$0xff]  ;;  %v1361_v61 = vld [vmem:[%s13148_s1 + $0x18] sm:$0xff] }
 0x14f   :  { %v224_v9 = vmax.f32 %v218_v4, 0.0  ;;  %v1366_v0 = vld [vmem:[%s13148_s1 + $0x40] sm:$0xff] }
 0x150   :  { %v222_v10 = vmax.f32 %v210_v5, 0.0 }
 0x151   :  { %v226_v16 = vpack.c.bf16 %v224_v9, %v223_v6  ;;  %v1370_v6 = vld [vmem:[%s13148_s1 + $0x60] sm:$0xff] }
 0x152   :  { %v225_v17 = vpack.c.bf16 %v222_v10, %v221_v7 }
 0x154   :  { %8434 = vmatprep.mubr.bf16.mxu1 %v225_v17  ;;  %v8739_v17 = vld [vmem:[#allocation11 + $0x448] ss:$16 sps:$4 sm:$0xff]  }
 0x17f   :  { %v306_v29 = vpop.permute.xlu0 %305 }
 0x180   :  { %v317_v30 = vsel %vm165_vm1, %v306_v29, 0.0 }
 0x181   :  { %318 = vadd.xlane.f32.xlu0 %v317_v30 }
 0x183   :  { %v308_v31 = vpop.permute.xlu1 %307 }
 0x184   :  { %v320_v32 = vsel %vm165_vm1, %v308_v31, 0.0  ;;  %v8726_v31 = vld [vmem:[#allocation11 + $0x304] ss:$16 sps:$4 sm:$0xff]  }
 0x185   :  { %321 = vadd.xlane.f32.xlu1 %v320_v32  ;;  %v8729_v32 = vld [vmem:[#allocation11 + $0x444] ss:$16 sps:$4 sm:$0xff]   ;;  %499 = vmatprep.subr.bf16.mxu0 %v8726_v31 }
 0x186   :  { %v8762_v31 = vld [vmem:[#allocation11 + $0x244] ss:$16 sps:$4 sm:$0xff]  }
 0x187   :  { %v310_v33 = vpop.permute.xlu1 %309 }
 0x188   :  { %v323_v34 = vsel %vm165_vm1, %v310_v33, 0.0  ;;  %v8724_v33 = vld [vmem:[#allocation11 + $0x300] ss:$16 sps:$4 sm:$0xff]  }
 0x189   :  { %324 = vadd.xlane.f32.xlu0 %v323_v34  ;;  %v8727_v34 = vld [vmem:[#allocation11 + $0x440] ss:$16 sps:$4 sm:$0xff]  }
 0x18b   :  { %v312_v35 = vpop.permute.xlu1 %311 }
 0x18c   :  { %v326_v36 = vsel %vm165_vm1, %v312_v35, 0.0  ;;  %v8732_v35 = vld [vmem:[#allocation11 + $0x324] ss:$16 sps:$4 sm:$0xff]  }
 0x18d   :  { %327 = vadd.xlane.f32.xlu0 %v326_v36  ;;  %v8735_v36 = vld [vmem:[#allocation11 + $0x464] ss:$16 sps:$4 sm:$0xff]  }
 0x20e   :  { %v319_v37 = vpop.xlane.xlu0 %318 }
 0x20f   :  { %9364 = vrcp.f32 %v319_v37  ;;  %v8730_v37 = vld [vmem:[#allocation11 + $0x320] ss:$16 sps:$4 sm:$0xff]  }
 0x212   :  { %v322_v38 = vpop.xlane.xlu1 %321 }
 0x213   :  { %9366 = vrcp.f32 %v322_v38  ;;  %v8733_v38 = vld [vmem:[#allocation11 + $0x460] ss:$16 sps:$4 sm:$0xff]  }
 0x216   :  { %v325_v42 = vpop.xlane.xlu0 %324 }
 0x217   :  { %9368 = vrcp.f32 %v325_v42 }
 0x219   :  { %v9365_v44 = vpop.eup %9364 }
 0x21a   :  { %v328_v43 = vpop.xlane.xlu0 %327  ;;  %v330_v50 = vmul.f32 %v9365_v44, %v9357_v20  ;;  %v142_v20 = vld [vmem:[#allocation9 + $0x60] sm:$0xff] }
 0x21b   :  { %9370 = vrcp.f32 %v328_v43  ;;  %v153_v22 = vpack.c.bf16 %v143_v21, %v142_v20  ;;  %v109_v43 = vld [vmem:[#allocation8 + $0x8] ss:$0 sm:$0xff]  ;;  %v8750_v20 = vld [vmem:[#allocation11 + $0x204] ss:$16 sps:$4 sm:$0xff]  }
 0x21c   :  { %v8745_v21 = vld [vmem:[#allocation11 + $0x468] ss:$16 sps:$4 sm:$0xff]  }
 0x21d   :  { %v9367_v45 = vpop.eup %9366  ;;  %8428 = vmatprep.subr.bf16.mxu1 %v153_v22 }
 0x21e   :  { %v332_v51 = vmul.f32 %v9367_v45, %v9359_v25  ;;  %v154_v25 = vpack.c.bf16 %v145_v24, %v144_v23  ;;  %8429 = vmatpush3.bf16.msra.mxu1 %v153_v22  ;;  %v8753_v22 = vld [vmem:[#allocation11 + $0x344] ss:$16 sps:$4 sm:$0xff]   ;;  %v9900_v23 = vld [vmem:[%s13148_s1 + $0x78] sm:$0xff]  ;;  %v1367_v24 = vld [vmem:[%s13148_s1 + $0x48] sm:$0xff] }
 0x220   :  { %v337_v59 = vpack.c.bf16 %v332_v51, %v330_v50  ;;  %8430 = vmatprep.subr.bf16.mxu1 %v154_v25 }
 0x221   :  { %v9369_v1 = vpop.eup %9368 }
 0x222   :  { %341 = vrot.lane.b32.xlu0 %v337_v59, %s9679_s6  ;;  %v334_v11 = vmul.f32 %v9369_v1, %v9811_v27  ;;  %v147_v27 = vld [vmem:[#allocation9 + $0x88] sm:$0xff]  ;;  %8431 = vmatpush3.bf16.msra.mxu1 %v154_v25  ;;  %v8748_v25 = vld [vmem:[#allocation11 + $0x200] ss:$16 sps:$4 sm:$0xff]  }
 0x223   :  { %v1359_v59 = vld [vmem:[%s13148_s1 + $0x8] sm:$0xff] }
 0x224   :  { %v1363_v1 = vld [vmem:[%s13148_s1 + $0x28] sm:$0xff] }
 0x225   :  { %v9371_v8 = vpop.eup %9370 }
 0x226   :  { %v336_v12 = vmul.f32 %v9371_v8, %v9816_v28  ;;  %v155_v28 = vpack.c.bf16 %v147_v27, %v146_v26  ;;  %1423 = vperm.xlu0 %8702, %v1358_v57   ;;  %v8751_v26 = vld [vmem:[#allocation11 + $0x340] ss:$16 sps:$4 sm:$0xff]   ;;  %v8756_v27 = vld [vmem:[#allocation11 + $0x224] ss:$16 sps:$4 sm:$0xff]  }
 0x228   :  { %v338_v18 = vpack.c.bf16 %v336_v12, %v334_v11  ;;  %8432 = vmatprep.subr.bf16.mxu1 %v155_v28  ;;  %v1364_v12 = vld [vmem:[%s13148_s1 + $0x30] sm:$0xff] }
 0x229   :  { %8433 = vmatpush3.bf16.msra.mxu1 %v155_v28  ;;  %v8759_v28 = vld [vmem:[#allocation11 + $0x364] ss:$16 sps:$4 sm:$0xff]  }
 0x22a   :  { %343 = vrot.lane.b32.xlu1 %v338_v18, %s9679_s6  ;;  %967 = vmatprep.subr.bf16.mxu1 %v8729_v32  ;;  %v8747_v18 = vld [vmem:[#allocation11 + $0x46c] ss:$16 sps:$4 sm:$0xff]   ;;  %v8765_v32 = vld [vmem:[#allocation11 + $0x384] ss:$16 sps:$4 sm:$0xff]  }
 0x22b   :  { %1435 = vperm.xlu0 %8702, %v1362_v60  }
 0x22c   :  { %8435 = vmatmul.mubr.bf16.vlgmr.msra.gmra.mrb[0].mxu1 %v226_v16  ;;  %v8744_v16 = vld [vmem:[#allocation11 + $0x32c] ss:$16 sps:$4 sm:$0xff]  }
 0x22d   :  { %968 = vmatpush1.bf16.msra.mxu1 %v8727_v34  ;;  %999 = vmatprep.mubr.bf16.mxu1 %v9680_v39  ;;  %v8763_v34 = vld [vmem:[#allocation11 + $0x380] ss:$16 sps:$4 sm:$0xff]  }
 0x22e   :  { %969 = vmatprep.subr.bf16.mxu1 %v8735_v36  ;;  %1375 = vperm.xlu1 %8701, %v1358_v57   ;;  %v8771_v36 = vld [vmem:[#allocation11 + $0x3a4] ss:$16 sps:$4 sm:$0xff]   ;;  %v8790_v57 = vld [vmem:[#allocation11 + $0x2e0] ss:$16 sps:$4 sm:$0xff]  }
 0x22f   :  { %8707 = vset.pattern.permute.xlu0 %v9680_v39 }
 0x230   :  { %1384 = vperm.xlu0 %8707, %v1361_v61  }
 0x231   :  { %970 = vmatpush1.bf16.msra.mxu1 %v8733_v38  ;;  %v8769_v38 = vld [vmem:[#allocation11 + $0x3a0] ss:$16 sps:$4 sm:$0xff]  }
 0x232   :  { %1020 = vmatprep.subr.bf16.mxu1 %v8741_v41  ;;  %1378 = vperm.xlu1 %8701, %v1359_v59   ;;  %v8777_v41 = vld [vmem:[#allocation11 + $0x3c4] ss:$16 sps:$4 sm:$0xff]  }
 0x234   :  { %1387 = vperm.xlu0 %8707, %v1362_v60   ;;  %v8798_v60 = vld [vmem:[#allocation11 + $0x20c] ss:$16 sps:$4 sm:$0xff]  }
 0x236   :  { %8703 = vset.pattern.permute.xlu1 %v9681_v58 }
 0x237   :  { %1426 = vperm.xlu1 %8703, %v1359_v59   ;;  %v8793_v59 = vld [vmem:[#allocation11 + $0x420] ss:$16 sps:$4 sm:$0xff]  }
 0x238   :  { %1396 = vperm.xlu0 %8707, %v1365_v63  }
 0x23b   :  { %8704 = vset.pattern.permute.xlu1 %v9680_v39 }
 0x23c   :  { %1381 = vperm.xlu1 %8704, %v1360_v62   ;;  %8712 = vset.pattern.permute.xlu0 %v9681_v58 }
 0x23d   :  { %1447 = vperm.xlu0 %8712, %v1366_v0  }
 0x240   :  { %8705 = vset.pattern.permute.xlu1 %v9681_v58 }
 0x241   :  { %1429 = vperm.xlu1 %8705, %v1360_v62   ;;  %8713 = vset.pattern.permute.xlu0 %v9680_v39  ;;  %v1371_v62 = vld [vmem:[%s13148_s1 + $0x68] sm:$0xff] }
 0x242   :  { %1399 = vperm.xlu0 %8713, %v1366_v0   ;;  %v8799_v0 = vld [vmem:[#allocation11 + $0x348] ss:$16 sps:$4 sm:$0xff]  }
 0x245   :  { %1432 = vperm.xlu1 %8705, %v1361_v61   ;;  %v8801_v61 = vld [vmem:[#allocation11 + $0x34c] ss:$16 sps:$4 sm:$0xff]  }
 0x246   :  { %1408 = vperm.xlu0 %8713, %v9872_v2  }
 0x249   :  { %8706 = vset.pattern.permute.xlu1 %v9680_v39 }
 0x24a   :  { %1390 = vperm.xlu1 %8706, %v1363_v1   ;;  %1411 = vperm.xlu0 %8713, %v1370_v6  }
 0x24e   :  { %8708 = vset.pattern.permute.xlu1 %v9681_v58  ;;  %8718 = vset.pattern.permute.xlu0 %v9681_v58 }
 0x24f   :  { %1438 = vperm.xlu1 %8708, %v1363_v1   ;;  %1459 = vperm.xlu0 %8718, %v1370_v6   ;;  %v8804_v1 = vld [vmem:[#allocation11 + $0x22c] ss:$16 sps:$4 sm:$0xff]  }
 0x250   :  { %v8813_v6 = vld [vmem:[#allocation11 + $0x38c] ss:$16 sps:$4 sm:$0xff]  }
 0x253   :  { %8709 = vset.pattern.permute.xlu1 %v9680_v39  ;;  %8721 = vset.pattern.permute.xlu0 %v9680_v39 }
 0x254   :  { %1393 = vperm.xlu1 %8709, %v1364_v12   ;;  %1420 = vperm.xlu0 %8721, %v9900_v23  }
 0x258   :  { %8710 = vset.pattern.permute.xlu1 %v9681_v58  ;;  %8723 = vset.pattern.permute.xlu0 %v9681_v58 }
 0x259   :  { %1441 = vperm.xlu1 %8710, %v1364_v12   ;;  %v8817_v12 = vld [vmem:[#allocation11 + $0x3a8] ss:$16 sps:$4 sm:$0xff]  }
 0x25d   :  { %1444 = vperm.xlu1 %8710, %v1365_v63   ;;  %v8796_v63 = vld [vmem:[#allocation11 + $0x208] ss:$16 sps:$4 sm:$0xff]  }
 0x261   :  { %8711 = vset.pattern.permute.xlu1 %v9680_v39 }
 0x262   :  { %1402 = vperm.xlu1 %8711, %v1367_v24  }
 0x266   :  { %8714 = vset.pattern.permute.xlu1 %v9681_v58 }
 0x267   :  { %1450 = vperm.xlu1 %8714, %v1367_v24   ;;  %v8837_v24 = vld [vmem:[#allocation11 + $0x40c] ss:$16 sps:$4 sm:$0xff]  }
 0x26b   :  { %8715 = vset.pattern.permute.xlu1 %v9680_v39 }
 0x294   :  { %v342_v29 = vpop.permute.xlu0 %341 }
 0x295   :  { %8440 = vmatprep.mubr.msk.bf16.mxu0 %vm165_vm1, %v342_v29  ;;  %v8754_v29 = vld [vmem:[#allocation11 + $0x220] ss:$16 sps:$4 sm:$0xff]  }
 0x29c   :  { %v344_v30 = vpop.permute.xlu1 %343 }
 0x29d   :  { %8441 = vmatmul.mubr.msk.bf16.vlgmr.msra.gmra.mrb[4].mxu0 %vm165_vm1, %v344_v30  ;;  %v8757_v30 = vld [vmem:[#allocation11 + $0x360] ss:$16 sps:$4 sm:$0xff]  }
 0x29e   :  { %500 = vmatpush1.bf16.msra.mxu0 %v8724_v33  ;;  %531 = vmatprep.mubr.bf16.mxu0 %v9680_v39  ;;  %v8760_v33 = vld [vmem:[#allocation11 + $0x240] ss:$16 sps:$4 sm:$0xff]  }
 0x29f   :  { %501 = vmatprep.subr.bf16.mxu0 %v8732_v35  ;;  %v8768_v35 = vld [vmem:[#allocation11 + $0x264] ss:$16 sps:$4 sm:$0xff]  }
 0x2a2   :  { %502 = vmatpush1.bf16.msra.mxu0 %v8730_v37  ;;  %v8766_v37 = vld [vmem:[#allocation11 + $0x260] ss:$16 sps:$4 sm:$0xff]  }
 0x2a3   :  { %552 = vmatprep.subr.bf16.mxu0 %v8738_v40  ;;  %v8774_v40 = vld [vmem:[#allocation11 + $0x284] ss:$16 sps:$4 sm:$0xff]  }
 0x2ff   :  { %v8436_v42 = vpop.f32.mrb[0].mxu1 }
 0x300   :  { %v270_v44 = vadd.f32 %v8436_v42, %v109_v43  ;;  %v261_v45 = vpop.f32.mrb[1].mxu1  ;;  %v1368_v42 = vld [vmem:[%s13148_s1 + $0x50] sm:$0xff] }
 0x301   :  { %v262_v46 = vadd.f32 %v261_v45, %v109_v43  ;;  %v8437_v47 = vpop.f32.mrb[2].mxu1  ;;  %v8780_v45 = vld [vmem:[#allocation11 + $0x2a4] ss:$16 sps:$4 sm:$0xff]   ;;  %1405 = vperm.xlu1 %8715, %v1368_v42  }
 0x302   :  { %v402_v48 = vmax.f32 %v270_v44, 0.0  ;;  %v273_v49 = vadd.f32 %v8437_v47, %v109_v43  ;;  %v264_v50 = vpop.f32.mrb[3].mxu1  ;;  %v8775_v44 = vld [vmem:[#allocation11 + $0x3c0] ss:$16 sps:$4 sm:$0xff]  }
 0x303   :  { %v400_v51 = vmax.f32 %v262_v46, 0.0  ;;  %v265_v52 = vadd.f32 %v264_v50, %v109_v43  ;;  %v8772_v43 = vld [vmem:[#allocation11 + $0x280] ss:$16 sps:$4 sm:$0xff]   ;;  %v8783_v46 = vld [vmem:[#allocation11 + $0x3e4] ss:$16 sps:$4 sm:$0xff]  }
 0x304   :  { %v403_v53 = vmax.f32 %v273_v49, 0.0  ;;  %v8778_v47 = vld [vmem:[#allocation11 + $0x2a0] ss:$16 sps:$4 sm:$0xff]   ;;  %v8786_v49 = vld [vmem:[#allocation11 + $0x2c4] ss:$16 sps:$4 sm:$0xff]  }
 0x305   :  { %v401_v54 = vmax.f32 %v265_v52, 0.0  ;;  %v8789_v50 = vld [vmem:[#allocation11 + $0x404] ss:$16 sps:$4 sm:$0xff]   ;;  %8716 = vset.pattern.permute.xlu1 %v9681_v58  ;;  %v8787_v52 = vld [vmem:[#allocation11 + $0x400] ss:$16 sps:$4 sm:$0xff]  }
 0x306   :  { %v9833_v55 = vpack.c.bf16 %v403_v53, %v402_v48  ;;  %v8781_v48 = vld [vmem:[#allocation11 + $0x3e0] ss:$16 sps:$4 sm:$0xff]   ;;  %1453 = vperm.xlu1 %8716, %v1368_v42   ;;  %v8792_v53 = vld [vmem:[#allocation11 + $0x2e4] ss:$16 sps:$4 sm:$0xff]  }
 0x307   :  { %v9835_v56 = vpack.c.bf16 %v401_v54, %v400_v51  ;;  %v8784_v51 = vld [vmem:[#allocation11 + $0x2c0] ss:$16 sps:$4 sm:$0xff]   ;;  %v8795_v54 = vld [vmem:[#allocation11 + $0x424] ss:$16 sps:$4 sm:$0xff]  }
 0x30a   :  { %1456 = vperm.xlu1 %8716, %v9872_v2   ;;  %v8807_v2 = vld [vmem:[#allocation11 + $0x36c] ss:$16 sps:$4 sm:$0xff]  }
 0x30e   :  { %8717 = vset.pattern.permute.xlu1 %v9680_v39 }
 0x30f   :  { %1414 = vperm.xlu1 %8717, %v1371_v62  }
 0x313   :  { %8719 = vset.pattern.permute.xlu1 %v9681_v58 }
 0x314   :  { %1462 = vperm.xlu1 %8719, %v1371_v62  }
 0x318   :  { %8720 = vset.pattern.permute.xlu1 %v9680_v39 }
 0x370   :  { %v8442_v3 = vpop.f32.mrb[4].mxu0 }
 0x371   :  { %v385_v4 = vpop.f32.mrb[5].mxu0  ;;  %v408_v7 = vmax.f32 %v8442_v3, 0.0  ;;  %v8802_v3 = vld [vmem:[#allocation11 + $0x228] ss:$16 sps:$4 sm:$0xff]  }
 0x372   :  { %v8443_v5 = vpop.f32.mrb[6].mxu0  ;;  %v406_v10 = vmax.f32 %v385_v4, 0.0  ;;  %v8805_v4 = vld [vmem:[#allocation11 + $0x368] ss:$16 sps:$4 sm:$0xff]  }
 0x373   :  { %v409_v8 = vmax.f32 %v8443_v5, 0.0  ;;  %v388_v9 = vpop.f32.mrb[7].mxu0  ;;  %v8810_v5 = vld [vmem:[#allocation11 + $0x24c] ss:$16 sps:$4 sm:$0xff]  }
 0x374   :  { %v407_v11 = vmax.f32 %v388_v9, 0.0  ;;  %v8816_v9 = vld [vmem:[#allocation11 + $0x26c] ss:$16 sps:$4 sm:$0xff]  }
 0x375   :  { %v9882_v13 = vpack.c.bf16 %v409_v8, %v408_v7  ;;  %v8808_v7 = vld [vmem:[#allocation11 + $0x248] ss:$16 sps:$4 sm:$0xff]  }
 0x376   :  { %v410_v15 = vpack.c.bf16 %v407_v11, %v406_v10  ;;  %v8811_v8 = vld [vmem:[#allocation11 + $0x388] ss:$16 sps:$4 sm:$0xff]   ;;  %v8819_v10 = vld [vmem:[#allocation11 + $0x3ac] ss:$16 sps:$4 sm:$0xff]  }
 0x377   :  { %v8814_v11 = vld [vmem:[#allocation11 + $0x268] ss:$16 sps:$4 sm:$0xff]  }
 0x378   :  { %7788 = vmatmul.mubr.msk.bf16.vlgmr.msra.gmra.mrb[8].mxu0 %vm492_vm2, %v410_v15  ;;  %7832 = vmatmul.mubr.msk.bf16.vlgmr.msra.gmra.mrb[4].mxu1 %vm492_vm2, %v410_v15 }
 0x379   :  { %553 = vmatpush1.bf16.msra.mxu0 %v8736_v14  ;;  %541 = vmatprep.mubr.bf16.mxu0 %v9680_v39  ;;  %v8825_v14 = vld [vmem:[#allocation11 + $0x3cc] ss:$16 sps:$4 sm:$0xff]  }
 0x37a   :  { %1009 = vmatprep.mubr.bf16.mxu1 %v9680_v39  ;;  %554 = vmatprep.subr.bf16.mxu0 %v8744_v16  ;;  %v8820_v16 = vld [vmem:[#allocation11 + $0x288] ss:$16 sps:$4 sm:$0xff]  }
 0x37b   :  { %1021 = vmatpush1.bf16.msra.mxu1 %v8739_v17  ;;  %v8823_v17 = vld [vmem:[#allocation11 + $0x3c8] ss:$16 sps:$4 sm:$0xff]  }
 0x37c   :  { %1022 = vmatprep.subr.bf16.mxu1 %v8747_v18  ;;  %v8828_v18 = vld [vmem:[#allocation11 + $0x2ac] ss:$16 sps:$4 sm:$0xff]  }
 0x37d   :  { %555 = vmatpush1.bf16.msra.mxu0 %v8742_v19  ;;  %v8831_v19 = vld [vmem:[#allocation11 + $0x3ec] ss:$16 sps:$4 sm:$0xff]  }
 0x37e   :  { %765 = vmatprep.subr.bf16.mxu0 %v8750_v20  ;;  %v8826_v20 = vld [vmem:[#allocation11 + $0x2a8] ss:$16 sps:$4 sm:$0xff]  }
 0x37f   :  { %1023 = vmatpush1.bf16.msra.mxu1 %v8745_v21  ;;  %v8829_v21 = vld [vmem:[#allocation11 + $0x3e8] ss:$16 sps:$4 sm:$0xff]  }
 0x380   :  { %7789 = vmatmul.mubr.msk.bf16.gmra.mrb[12].mxu0 %vm492_vm2, %v9882_v13  ;;  %7833 = vmatmul.mubr.msk.bf16.gmra.mrb[8].mxu1 %vm492_vm2, %v9882_v13 }
 0x381   :  { %584 = vmatprep.mubr.bf16.mxu0 %v9680_v39  ;;  %1052 = vmatprep.mubr.bf16.mxu1 %v9680_v39 }
 0x382   :  { %1233 = vmatprep.subr.bf16.mxu1 %v8753_v22  ;;  %v8834_v22 = vld [vmem:[#allocation11 + $0x2cc] ss:$16 sps:$4 sm:$0xff]  }
 0x388   :  { %7790 = vmatmul.mubr.msk.bf16.vlgmr.msra.gmra.mrb[16].mxu0 %vm492_vm2, %v410_v15  ;;  %7834 = vmatmul.mubr.msk.bf16.vlgmr.msra.gmra.mrb[12].mxu1 %vm492_vm2, %v410_v15  ;;  %v1372_v15 = vld [vmem:[%s13148_s1 + $0x70] sm:$0xff]  ;;  %s9683_s1 = smov [#allocation14]  }
 0x389   :  { %766 = vmatpush1.bf16.msra.mxu0 %v8748_v25  ;;  %1234 = vmatpush1.bf16.msra.mxu1 %v8751_v26  ;;  %v8832_v25 = vld [vmem:[#allocation11 + $0x2c8] ss:$16 sps:$4 sm:$0xff]   ;;  %s7761_s14 = sshll.u32 %s9683_s1, 4  ;;  %s7762_s14 = int_to_ptr.vmem [resolvable:$true] %s7761_s14 }
 0x38a   :  { %767 = vmatprep.subr.bf16.mxu0 %v8756_v27  ;;  %1235 = vmatprep.subr.bf16.mxu1 %v8759_v28  ;;  %v8835_v26 = vld [vmem:[#allocation11 + $0x408] ss:$16 sps:$4 sm:$0xff]   ;;  %v8840_v27 = vld [vmem:[#allocation11 + $0x2ec] ss:$16 sps:$4 sm:$0xff]   ;;  %s9635_s15 = scalar_lea.vmem %s7762_s14, 2048  ;;  %p9640_p7 = scmp.lt.s32.totalorder %s7762_s14, %s7762_s14 }
 0x38b   :  { %594 = vmatprep.mubr.bf16.mxu0 %v9680_v39  ;;  %1062 = vmatprep.mubr.bf16.mxu1 %v9680_v39  ;;  %v8843_v28 = vld [vmem:[#allocation11 + $0x42c] ss:$16 sps:$4 sm:$0xff]   ;;  %p9636_p6 = scmp.ne.s32.totalorder %s7762_s14, %s9635_s15  ;;  %p9641_p8 = scmp.lt.s32.totalorder %s9635_s15, %s9635_s15 }
 0x38c   :  { %1417 = vperm.xlu1 %8720, %v1372_v15  }
 0x38d   :  { %768 = vmatpush1.bf16.msra.mxu0 %v8754_v29  ;;  %1236 = vmatpush1.bf16.msra.mxu1 %v8757_v30  ;;  %v8838_v29 = vld [vmem:[#allocation11 + $0x2e8] ss:$16 sps:$4 sm:$0xff]   ;;  %p9642_p9 = por %p9641_p8, %p9640_p7 }
 0x38e   :  { %769 = vmatprep.subr.bf16.mxu0 %v8762_v31  ;;  %1237 = vmatprep.subr.bf16.mxu1 %v8765_v32  ;;  %v8841_v30 = vld [vmem:[#allocation11 + $0x428] ss:$16 sps:$4 sm:$0xff]  }
 0x38f   :  { %p9643_p10 = pnand %p9642_p9, %p9636_p6 }
 0x390   :  { %7791 = vmatmul.mubr.msk.bf16.gmra.mrb[20].mxu0 %vm492_vm2, %v9882_v13  ;;  %7835 = vmatmul.mubr.msk.bf16.gmra.mrb[16].mxu1 %vm492_vm2, %v9882_v13  ;;  %v8822_v13 = vld [vmem:[#allocation11 + $0x28c] ss:$16 sps:$4 sm:$0xff]  }
 0x391   :  { %770 = vmatpush1.bf16.msra.mxu0 %v8760_v33  ;;  %1238 = vmatpush1.bf16.msra.mxu1 %v8763_v34 }
 0x392   :  { %771 = vmatprep.subr.bf16.mxu0 %v8768_v35  ;;  %1239 = vmatprep.subr.bf16.mxu1 %v8771_v36 }
 0x393   :  { %797 = vmatprep.mubr.bf16.mxu0 %v9680_v39  ;;  %1265 = vmatprep.mubr.bf16.mxu1 %v9680_v39 }
 0x394   :  { %8722 = vset.pattern.permute.xlu1 %v9681_v58  ;;  %v1376_v58 = vpop.permute.xlu1 %1375 }
 0x395   :  { %772 = vmatpush1.bf16.msra.mxu0 %v8766_v37  ;;  %1240 = vmatpush1.bf16.msra.mxu1 %v8769_v38 }
 0x396   :  { %773 = vmatprep.subr.bf16.mxu0 %v8774_v40  ;;  %1241 = vmatprep.subr.bf16.mxu1 %v8777_v41 }
 0x397   :  { %1465 = vperm.xlu1 %8722, %v1372_v15  }
 0x399   :  { %774 = vmatpush1.bf16.msra.mxu0 %v8772_v43  ;;  %1242 = vmatpush1.bf16.msra.mxu1 %v8775_v44 }
 0x39a   :  { %775 = vmatprep.subr.bf16.mxu0 %v8780_v45  ;;  %1243 = vmatprep.subr.bf16.mxu1 %v8783_v46 }
 0x39b   :  { %1468 = vperm.xlu1 %8722, %v9900_v23   ;;  %v1379_v23 = vpop.permute.xlu1 %1378 }
 0x39d   :  { %776 = vmatpush1.bf16.msra.mxu0 %v8778_v47  ;;  %1244 = vmatpush1.bf16.msra.mxu1 %v8781_v48 }
 0x39e   :  { %777 = vmatprep.subr.bf16.mxu0 %v8786_v49  ;;  %1245 = vmatprep.subr.bf16.mxu1 %v8789_v50  ;;  %v1355_v50 = vlaneseq }
 0x39f   :  { %v1427_v31 = vpop.permute.xlu1 %1426 }
 0x3a1   :  { %778 = vmatpush1.bf16.msra.mxu0 %v8784_v51  ;;  %1246 = vmatpush1.bf16.msra.mxu1 %v8787_v52  ;;  %v1424_v51 = vpop.permute.xlu0 %1423 }
 0x3a2   :  { %779 = vmatprep.subr.bf16.mxu0 %v8792_v53  ;;  %1247 = vmatprep.subr.bf16.mxu1 %v8795_v54 }
 0x3a3   :  { %v1382_v32 = vpop.permute.xlu1 %1381 }
 0x3a5   :  { %780 = vmatpush1.bf16.msra.mxu0 %v8790_v57  ;;  %1248 = vmatpush1.bf16.msra.mxu1 %v8793_v59  ;;  %v9964_v57 = vand.u32 127, %v1355_v50 }
 0x3a6   :  { %818 = vmatprep.subr.bf16.mxu0 %v8798_v60  ;;  %1286 = vmatprep.subr.bf16.mxu1 %v8801_v61 }
 0x3a7   :  { %v1430_v33 = vpop.permute.xlu1 %1429  ;;  %13358 = vst [vmem:[#allocation20_spill] sm:$0xff] %v9964_v57  ;;  %vm1357_vm3 = vcmp.lt.s32.totalorder %v9964_v57, 32 }
 0x3a8   :  { %798 = vmatmul.mubr.bf16.vlgmr.msra.gmra.mrb[8].mxu0 %v9835_v56  ;;  %1266 = vmatmul.mubr.bf16.vlgmr.msra.gmra.mrb[4].mxu1 %v9835_v56  ;;  %v1472_v15 = vsel %vm1357_vm3, %v1382_v32, %v1430_v33 }
 0x3a9   :  { %819 = vmatpush1.bf16.msra.mxu0 %v8796_v63  ;;  %1287 = vmatpush1.bf16.msra.mxu1 %v8799_v0  ;;  %vm1488_vm7 = vcmp.eq.s32.totalorder %v9964_v57, %v1472_v15  ;;  %v8879_v15 = vld [vmem:[#allocation11 + $0xc4] ss:$16 sps:$4 sm:$0xff]  }
 0x3aa   :  { %820 = vmatprep.subr.bf16.mxu0 %v8804_v1  ;;  %1288 = vmatprep.subr.bf16.mxu1 %v8807_v2 }
 0x3ab   :  { %807 = vmatprep.mubr.bf16.mxu0 %v9680_v39  ;;  %1275 = vmatprep.mubr.bf16.mxu1 %v9680_v39  ;;  %v1433_v34 = vpop.permute.xlu1 %1432 }
 0x3ad   :  { %821 = vmatpush1.bf16.msra.mxu0 %v8802_v3  ;;  %1289 = vmatpush1.bf16.msra.mxu1 %v8805_v4 }
 0x3ae   :  { %822 = vmatprep.subr.bf16.mxu0 %v8810_v5  ;;  %1290 = vmatprep.subr.bf16.mxu1 %v8813_v6  ;;  %v1436_v5 = vpop.permute.xlu0 %1435 }
 0x3af   :  { %v9953_v35 = vpop.permute.xlu1 %1390 }
 0x3b0   :  { %808 = vmatmul.mubr.bf16.gmra.mrb[12].mxu0 %v9833_v55  ;;  %1276 = vmatmul.mubr.bf16.gmra.mrb[8].mxu1 %v9833_v55 }
 0x3b1   :  { %823 = vmatpush1.bf16.msra.mxu0 %v8808_v7  ;;  %1291 = vmatpush1.bf16.msra.mxu1 %v8811_v8  ;;  %v1471_v7 = vsel %vm1357_vm3, %v1379_v23, %v1427_v31  ;;  %v1470_v8 = vsel %vm1357_vm3, %v1376_v58, %v1424_v51  ;;  %v8853_v58 = vld [vmem:[#allocation11 + $0x40] ss:$16 sps:$4 sm:$0xff]  }
 0x3b2   :  { %824 = vmatprep.subr.bf16.mxu0 %v8816_v9  ;;  %1292 = vmatprep.subr.bf16.mxu1 %v8819_v10  ;;  %vm1487_vm4 = vcmp.eq.s32.totalorder %v9964_v57, %v1471_v7  ;;  %vm1486_vm5 = vcmp.eq.s32.totalorder %v9964_v57, %v1470_v8  ;;  %v1385_v9 = vpop.permute.xlu0 %1384 }
 0x3b3   :  { %850 = vmatprep.mubr.bf16.mxu0 %v9680_v39  ;;  %1318 = vmatprep.mubr.bf16.mxu1 %v9680_v39 }
 0x3b5   :  { %825 = vmatpush1.bf16.msra.mxu0 %v8814_v11  ;;  %1293 = vmatpush1.bf16.msra.mxu1 %v8817_v12  ;;  %v8846_v11 = vld [vmem:[#allocation11 + $0x4] ss:$16 sps:$4 sm:$0xff]   ;;  %v9682_v12 = vmov 0.0  }
 0x3b6   :  { %826 = vmatprep.subr.bf16.mxu0 %v8822_v13  ;;  %1294 = vmatprep.subr.bf16.mxu1 %v8825_v14  ;;  %v7869_v13 = vsel %vm1487_vm4, 1.0, %v9682_v12  ;;  %v7868_v14 = vsel %vm1486_vm5, 1.0, %v9682_v12 }
 0x3b9   :  { %827 = vmatpush1.bf16.msra.mxu0 %v8820_v16  ;;  %1295 = vmatpush1.bf16.msra.mxu1 %v8823_v17  ;;  %v1473_v16 = vsel %vm1357_vm3, %v1385_v9, %v1433_v34  ;;  %v1388_v17 = vpop.permute.xlu0 %1387  ;;  %v8861_v34 = vld [vmem:[#allocation11 + $0x64] ss:$16 sps:$4 sm:$0xff]   ;;  %v8871_v9 = vld [vmem:[#allocation11 + $0xa0] ss:$16 sps:$4 sm:$0xff]  }
 0x3ba   :  { %828 = vmatprep.subr.bf16.mxu0 %v8828_v18  ;;  %1296 = vmatprep.subr.bf16.mxu1 %v8831_v19  ;;  %v8844_v18 = vld [vmem:[#allocation11] ss:$16 sps:$4 sm:$0xff]   ;;  %v9983_v19 = vpack.c.bf16 %v7869_v13, %v7868_v14  ;;  %vm1489_vm8 = vcmp.eq.s32.totalorder %v9964_v57, %v1473_v16 }
 0x3bd   :  { %829 = vmatpush1.bf16.msra.mxu0 %v8826_v20  ;;  %1297 = vmatpush1.bf16.msra.mxu1 %v8829_v21  ;;  %v8849_v20 = vld [vmem:[#allocation11 + $0x24] ss:$16 sps:$4 sm:$0xff]  }
 0x3be   :  { %830 = vmatprep.subr.bf16.mxu0 %v8834_v22  ;;  %1298 = vmatprep.subr.bf16.mxu1 %v8837_v24  ;;  %v1397_v22 = vpop.permute.xlu0 %1396  ;;  %v8847_v24 = vld [vmem:[#allocation11 + $0x20] ss:$16 sps:$4 sm:$0xff]  }
 0x3c1   :  { %831 = vmatpush1.bf16.msra.mxu0 %v8832_v25  ;;  %1299 = vmatpush1.bf16.msra.mxu1 %v8835_v26  ;;  %v8855_v25 = vld [vmem:[#allocation11 + $0x44] ss:$16 sps:$4 sm:$0xff]   ;;  %v7870_v26 = vsel %vm1488_vm7, 1.0, %v9682_v12 }
 0x3c2   :  { %832 = vmatprep.subr.bf16.mxu0 %v8840_v27  ;;  %1300 = vmatprep.subr.bf16.mxu1 %v8843_v28  ;;  %v7871_v27 = vsel %vm1489_vm8, 1.0, %v9682_v12 }
 0x3c3   :  { %v10004_v31 = vpack.c.bf16 %v7871_v27, %v7870_v26  ;;  %v8852_v26 = vld [vmem:[#allocation11 + $0xc] ss:$16 sps:$4 sm:$0xff]  }
 0x3c5   :  { %833 = vmatpush1.bf16.msra.mxu0 %v8838_v29  ;;  %1301 = vmatpush1.bf16.msra.mxu1 %v8841_v30  ;;  %v1474_v29 = vsel %vm1357_vm3, %v1388_v17, %v1436_v5  ;;  %v10000_v30 = vpop.permute.xlu0 %1447 }
 0x3c6   :  { %vm1490_vm10 = vcmp.eq.s32.totalorder %v9964_v57, %v1474_v29 }
 0x3c8   :  { %851 = vmatmul.mubr.bf16.vlgmr.msra.gmra.mrb[16].mxu0 %v9835_v56  ;;  %1319 = vmatmul.mubr.bf16.vlgmr.msra.gmra.mrb[12].mxu1 %v9835_v56  ;;  %v9955_v56 = vpop.permute.xlu1 %1438 }
 0x3c9   :  { %860 = vmatprep.mubr.bf16.mxu0 %v9680_v39  ;;  %1328 = vmatprep.mubr.bf16.mxu1 %v9680_v39  ;;  %v1475_v28 = vsel %vm1357_vm3, %v9953_v35, %v9955_v56 }
 0x3ca   :  { %vm1491_vm9 = vcmp.eq.s32.totalorder %v9964_v57, %v1475_v28  ;;  %v8883_v28 = vld [vmem:[#allocation11 + $0xe0] ss:$16 sps:$4 sm:$0xff]  }
 0x3cc   :  { %v9957_v36 = vpop.permute.xlu1 %1393 }
 0x3d0   :  { %861 = vmatmul.mubr.bf16.gmra.mrb[20].mxu0 %v9833_v55  ;;  %1329 = vmatmul.mubr.bf16.gmra.mrb[16].mxu1 %v9833_v55  ;;  %v9959_v37 = vpop.permute.xlu1 %1441 }
 0x3d1   :  { %1636 = vmatprep.mubr.bf16.mxu0 %v9680_v39  ;;  %1749 = vmatprep.mubr.bf16.mxu1 %v9680_v39  ;;  %v1476_v51 = vsel %vm1357_vm3, %v9957_v36, %v9959_v37  ;;  %v8873_v36 = vld [vmem:[#allocation11 + $0xa4] ss:$16 sps:$4 sm:$0xff]  }
 0x3d2   :  { %vm1492_vm11 = vcmp.eq.s32.totalorder %v9964_v57, %v1476_v51 }
 0x3d4   :  { %v9961_v52 = vpop.permute.xlu1 %1444 }
 0x3d8   :  { %v9967_v6 = vpop.permute.xlu1 %1402 }
 0x3dc   :  { %v9975_v10 = vpop.permute.xlu1 %1450 }
 0x3dd   :  { %v1479_v16 = vsel %vm1357_vm3, %v9967_v6, %v9975_v10 }
 0x3de   :  { %vm1495_vm13 = vcmp.eq.s32.totalorder %v9964_v57, %v1479_v16  ;;  %v8886_v16 = vld [vmem:[#allocation11 + $0xc8] ss:$16 sps:$4 sm:$0xff]  }
 0x3df   :  { %v7877_v10 = vsel %vm1495_vm13, 1.0, %v9682_v12 }
 0x3e0   :  { %v9985_v21 = vpop.permute.xlu1 %1405 }
 0x3e4   :  { %v10002_v23 = vpop.permute.xlu1 %1453 }
 0x3e5   :  { %v1480_v29 = vsel %vm1357_vm3, %v9985_v21, %v10002_v23  ;;  %v8897_v23 = vld [vmem:[#allocation11 + $0x124] ss:$16 sps:$4 sm:$0xff]  }
 0x3e6   :  { %vm1496_vm15 = vcmp.eq.s32.totalorder %v9964_v57, %v1480_v29  ;;  %v1837_v29 = vld [vmem:[#allocation6 + $0x38] sm:$0xff] }
 0x47b   :  { %v799_v38 = vpop.f32.mrb[8].mxu0  ;;  %v1267_v55 = vpop.f32.mrb[4].mxu1 }
 0x47c   :  { %v801_v40 = vpop.f32.mrb[9].mxu0  ;;  %v1269_v41 = vpop.f32.mrb[5].mxu1 }
 0x47d   :  { %v803_v42 = vpop.f32.mrb[10].mxu0  ;;  %v1271_v43 = vpop.f32.mrb[6].mxu1 }
 0x47e   :  { %v871_v44 = vpack.c.bf16 %v803_v42, %v799_v38  ;;  %v1339_v45 = vpack.c.bf16 %v1271_v43, %v1267_v55  ;;  %v805_v46 = vpop.f32.mrb[11].mxu0  ;;  %v1273_v47 = vpop.f32.mrb[7].mxu1 }
 0x47f   :  { %v872_v48 = vpack.c.bf16 %v805_v46, %v801_v40  ;;  %v1340_v49 = vpack.c.bf16 %v1273_v47, %v1269_v41  ;;  %v7873_v40 = vsel %vm1491_vm9, 1.0, %v9682_v12  ;;  %v8859_v46 = vld [vmem:[#allocation11 + $0x60] ss:$16 sps:$4 sm:$0xff]  }
 0x481   :  { %1604 = vmatprep.subr.bf16.mxu0 %v872_v48 }
 0x482   :  { %1605 = vmatpush1.bf16.msra.mxu0 %v871_v44 }
 0x483   :  { %v809_v53 = vpop.f32.mrb[12].mxu0  ;;  %v1277_v54 = vpop.f32.mrb[8].mxu1 }
 0x484   :  { %v811_v59 = vpop.f32.mrb[13].mxu0  ;;  %v1279_v60 = vpop.f32.mrb[9].mxu1 }
 0x485   :  { %v813_v61 = vpop.f32.mrb[14].mxu0  ;;  %v1281_v62 = vpop.f32.mrb[10].mxu1 }
 0x486   :  { %v875_v63 = vpack.c.bf16 %v813_v61, %v809_v53  ;;  %v1343_v0 = vpack.c.bf16 %v1281_v62, %v1277_v54  ;;  %v815_v1 = vpop.f32.mrb[15].mxu0  ;;  %v1283_v2 = vpop.f32.mrb[11].mxu1  ;;  %v1477_v53 = vsel %vm1357_vm3, %v1397_v22, %v9961_v52  ;;  %v8865_v61 = vld [vmem:[#allocation11 + $0x80] ss:$16 sps:$4 sm:$0xff]  }
 0x487   :  { %v876_v3 = vpack.c.bf16 %v815_v1, %v811_v59  ;;  %v1344_v4 = vpack.c.bf16 %v1283_v2, %v1279_v60  ;;  %v1457_v59 = vpop.permute.xlu1 %1456  ;;  %v1400_v60 = vpop.permute.xlu0 %1399  ;;  %vm1493_vm12 = vcmp.eq.s32.totalorder %v9964_v57, %v1477_v53  ;;  %v7874_v2 = vsel %vm1492_vm11, 1.0, %v9682_v12  ;;  %v8877_v22 = vld [vmem:[#allocation11 + $0xc0] ss:$16 sps:$4 sm:$0xff]  }
 0x488   :  { %v7875_v8 = vsel %vm1493_vm12, 1.0, %v9682_v12  ;;  %v1478_v17 = vsel %vm1357_vm3, %v1400_v60, %v10000_v30 }
 0x489   :  { %1606 = vmatprep.subr.bf16.mxu0 %v876_v3  ;;  %vm1494_vm14 = vcmp.eq.s32.totalorder %v9964_v57, %v1478_v17  ;;  %v8894_v17 = vld [vmem:[#allocation11 + $0xec] ss:$16 sps:$4 sm:$0xff]  }
 0x48a   :  { %1607 = vmatpush1.bf16.msra.mxu0 %v875_v63 }
 0x48b   :  { %1608 = vmatprep.subr.bf16.mxu0 %v1340_v49  ;;  %v8867_v49 = vld [vmem:[#allocation11 + $0x84] ss:$16 sps:$4 sm:$0xff]   ;;  %v1415_v14 = vpop.permute.xlu1 %1414 }
 0x48e   :  { %1609 = vmatpush1.bf16.msra.mxu0 %v1339_v45  ;;  %v7872_v45 = vsel %vm1490_vm10, 1.0, %v9682_v12 }
 0x48f   :  { %1610 = vmatprep.subr.bf16.mxu0 %v1344_v4  ;;  %v10026_v54 = vpack.c.bf16 %v7873_v40, %v7872_v45  ;;  %v1463_v6 = vpop.permute.xlu1 %1462 }
 0x492   :  { %1611 = vmatpush1.bf16.msra.mxu0 %v1343_v0 }
 0x493   :  { %2315 = vmatprep.subr.bf16.mxu0 %v8846_v11 }
 0x495   :  { %7884 = vmatmul.mubr.msk.bf16.vlgmr.msra.gmra.mrb[24].mxu0 %vm1579_vm6, %v9983_v19 }
 0x496   :  { %1646 = vmatprep.mubr.bf16.mxu0 %v9680_v39  ;;  %2316 = vmatpush1.bf16.msra.mxu0 %v8844_v18  ;;  %v10042_v18 = vpack.c.bf16 %v7875_v8, %v7874_v2  ;;  %v8915_v2 = vld [vmem:[#allocation11 + $0x184] ss:$16 sps:$4 sm:$0xff]  }
 0x497   :  { %2317 = vmatprep.subr.bf16.mxu0 %v8849_v20  ;;  %v1409_v20 = vpop.permute.xlu0 %1408 }
 0x498   :  { %v1481_v30 = vsel %vm1357_vm3, %v1409_v20, %v1457_v59  ;;  %v8868_v59 = vld [vmem:[#allocation11 + $0x68] ss:$16 sps:$4 sm:$0xff]   ;;  %v8919_v20 = vld [vmem:[#allocation11 + $0x1a0] ss:$16 sps:$4 sm:$0xff]  }
 0x499   :  { %vm1497_vm0 = vcmp.eq.s32.totalorder %v9964_v57, %v1481_v30 }
 0x49a   :  { %2318 = vmatpush1.bf16.msra.mxu0 %v8847_v24  ;;  %v8885_v24 = vld [vmem:[#allocation11 + $0xe4] ss:$16 sps:$4 sm:$0xff]   ;;  %v7879_v40 = vsel %vm1497_vm0, 1.0, %v9682_v12 }
 0x49b   :  { %v852_v32 = vpop.f32.mrb[16].mxu0  ;;  %v10006_v33 = vpop.f32.mrb[12].mxu1  ;;  %2319 = vmatprep.subr.bf16.mxu0 %v8855_v25  ;;  %v7876_v25 = vsel %vm1494_vm14, 1.0, %v9682_v12 }
 0x49c   :  { %v854_v35 = vpop.f32.mrb[17].mxu0  ;;  %v1322_v56 = vpop.f32.mrb[13].mxu1 }
 0x49d   :  { %v856_v38 = vpop.f32.mrb[18].mxu0  ;;  %v10010_v55 = vpop.f32.mrb[14].mxu1  ;;  %7885 = vmatmul.mubr.msk.bf16.gmra.mrb[28].mxu0 %vm1579_vm6, %v10004_v31 }
 0x49e   :  { %v873_v41 = vpack.c.bf16 %v856_v38, %v852_v32  ;;  %v1341_v42 = vpack.c.bf16 %v10010_v55, %v10006_v33  ;;  %v858_v43 = vpop.f32.mrb[19].mxu0  ;;  %v1326_v44 = vpop.f32.mrb[15].mxu1  ;;  %1656 = vmatprep.mubr.bf16.mxu0 %v9680_v39  ;;  %2320 = vmatpush1.bf16.msra.mxu0 %v8853_v58  ;;  %v8891_v58 = vld [vmem:[#allocation11 + $0x104] ss:$16 sps:$4 sm:$0xff]   ;;  %v10057_v32 = vpack.c.bf16 %v7877_v10, %v7876_v25  ;;  %v8856_v38 = vld [vmem:[#allocation11 + $0x28] ss:$16 sps:$4 sm:$0xff]  }
 0x49f   :  { %v874_v47 = vpack.c.bf16 %v858_v43, %v854_v35  ;;  %v1342_v48 = vpack.c.bf16 %v1326_v44, %v1322_v56  ;;  %2321 = vmatprep.subr.bf16.mxu0 %v8861_v34  ;;  %v1412_v27 = vpop.permute.xlu0 %1411  ;;  %v1418_v33 = vpop.permute.xlu1 %1417  ;;  %v8850_v34 = vld [vmem:[#allocation11 + $0x8] ss:$16 sps:$4 sm:$0xff]   ;;  %v8858_v35 = vld [vmem:[#allocation11 + $0x2c] ss:$16 sps:$4 sm:$0xff]   ;;  %v8889_v56 = vld [vmem:[#allocation11 + $0x100] ss:$16 sps:$4 sm:$0xff]  }
 0x4a0   :  { %v7878_v55 = vsel %vm1496_vm15, 1.0, %v9682_v12  ;;  %v8895_v44 = vld [vmem:[#allocation11 + $0x120] ss:$16 sps:$4 sm:$0xff]  }
 0x4a1   :  { %1717 = vmatprep.subr.bf16.mxu1 %v874_v47  ;;  %v10073_v45 = vpack.c.bf16 %v7879_v40, %v7878_v55  ;;  %v8870_v47 = vld [vmem:[#allocation11 + $0x6c] ss:$16 sps:$4 sm:$0xff]   ;;  %v8925_v10 = vld [vmem:[#allocation11 + $0x1c0] ss:$16 sps:$4 sm:$0xff]  }
 0x4a2   :  { %1718 = vmatpush1.bf16.msra.mxu1 %v873_v41  ;;  %2322 = vmatpush1.bf16.msra.mxu0 %v8859_v46  ;;  %v8864_v41 = vld [vmem:[#allocation11 + $0x4c] ss:$16 sps:$4 sm:$0xff]   ;;  %v8862_v46 = vld [vmem:[#allocation11 + $0x48] ss:$16 sps:$4 sm:$0xff]   ;;  %v1830_v25 = vld [vmem:[#allocation6] sm:$0xff] }
 0x4a3   :  { %v862_v62 = vpop.f32.mrb[20].mxu0  ;;  %v1330_v63 = vpop.f32.mrb[16].mxu1  ;;  %2323 = vmatprep.subr.bf16.mxu0 %v8867_v49  ;;  %v8901_v49 = vld [vmem:[#allocation11 + $0x140] ss:$16 sps:$4 sm:$0xff]   ;;  %v1862_v30 = vmax.f32 %v1830_v25, 0.0  ;;  %v1853_v25 = vld [vmem:[#allocation6 + $0xb8] sm:$0xff] }
 0x4a4   :  { %v864_v37 = vpop.f32.mrb[21].mxu0  ;;  %v1332_v0 = vpop.f32.mrb[17].mxu1  ;;  %v1834_v40 = vld [vmem:[#allocation6 + $0x20] sm:$0xff] }
 0x4a5   :  { %v866_v1 = vpop.f32.mrb[22].mxu0  ;;  %v1334_v52 = vpop.f32.mrb[18].mxu1  ;;  %7886 = vmatmul.mubr.msk.bf16.gmra.mrb[32].mxu0 %vm1579_vm6, %v10026_v54 }
 0x4a6   :  { %v877_v3 = vpack.c.bf16 %v866_v1, %v862_v62  ;;  %v1345_v4 = vpack.c.bf16 %v1334_v52, %v1330_v63  ;;  %v868_v5 = vpop.f32.mrb[23].mxu0  ;;  %v1336_v7 = vpop.f32.mrb[19].mxu1  ;;  %1666 = vmatprep.mubr.bf16.mxu0 %v9680_v39  ;;  %2324 = vmatpush1.bf16.msra.mxu0 %v8865_v61  ;;  %v8909_v62 = vld [vmem:[#allocation11 + $0x164] ss:$16 sps:$4 sm:$0xff]   ;;  %v8876_v63 = vld [vmem:[#allocation11 + $0x8c] ss:$16 sps:$4 sm:$0xff]  }
 0x4a7   :  { %v878_v11 = vpack.c.bf16 %v868_v5, %v864_v37  ;;  %v1346_v13 = vpack.c.bf16 %v1336_v7, %v1332_v0  ;;  %2325 = vmatprep.subr.bf16.mxu0 %v8873_v36  ;;  %v1460_v21 = vpop.permute.xlu0 %1459  ;;  %v8874_v0 = vld [vmem:[#allocation11 + $0x88] ss:$16 sps:$4 sm:$0xff]   ;;  %v8882_v1 = vld [vmem:[#allocation11 + $0xac] ss:$16 sps:$4 sm:$0xff]   ;;  %v8907_v52 = vld [vmem:[#allocation11 + $0x160] ss:$16 sps:$4 sm:$0xff]  }
 0x4a8   :  { %v1482_v43 = vsel %vm1357_vm3, %v1412_v27, %v1460_v21  ;;  %v8880_v5 = vld [vmem:[#allocation11 + $0xa8] ss:$16 sps:$4 sm:$0xff]   ;;  %v8933_v27 = vld [vmem:[#allocation11 + $0x1e4] ss:$16 sps:$4 sm:$0xff]  }
 0x4a9   :  { %1719 = vmatprep.subr.bf16.mxu1 %v878_v11  ;;  %vm1498_vm2 = vcmp.eq.s32.totalorder %v9964_v57, %v1482_v43  ;;  %v8913_v11 = vld [vmem:[#allocation11 + $0x180] ss:$16 sps:$4 sm:$0xff]   ;;  %v8904_v21 = vld [vmem:[#allocation11 + $0x128] ss:$16 sps:$4 sm:$0xff]  }
 0x4aa   :  { %1720 = vmatpush1.bf16.msra.mxu1 %v877_v3  ;;  %2326 = vmatpush1.bf16.msra.mxu0 %v8871_v9  ;;  %v7880_v61 = vsel %vm1498_vm2, 1.0, %v9682_v12  ;;  %v1831_v3 = vld [vmem:[#allocation6 + $0x8] sm:$0xff] }
 0x4ab   :  { %1721 = vmatprep.subr.bf16.mxu1 %v1342_v48  ;;  %2327 = vmatprep.subr.bf16.mxu0 %v8879_v15  ;;  %v8903_v48 = vld [vmem:[#allocation11 + $0x144] ss:$16 sps:$4 sm:$0xff]   ;;  %v1421_v53 = vpop.permute.xlu0 %1420  ;;  %v8888_v9 = vld [vmem:[#allocation11 + $0xcc] ss:$16 sps:$4 sm:$0xff]   ;;  %v8910_v43 = vld [vmem:[#allocation11 + $0x148] ss:$16 sps:$4 sm:$0xff]  }
 0x4ad   :  { %7887 = vmatmul.mubr.msk.bf16.gmra.mrb[36].mxu0 %vm1579_vm6, %v10042_v18 }
 0x4ae   :  { %1722 = vmatpush1.bf16.msra.mxu1 %v1341_v42  ;;  %1676 = vmatprep.mubr.bf16.mxu0 %v9680_v39  ;;  %v1466_v42 = vpop.permute.xlu1 %1465 }
 0x4af   :  { %1723 = vmatprep.subr.bf16.mxu1 %v1346_v13  ;;  %2328 = vmatpush1.bf16.msra.mxu0 %v8877_v22  ;;  %v1863_v13 = vmax.f32 %v1831_v3, 0.0 }
 0x4b0   :  { %2329 = vmatprep.subr.bf16.mxu0 %v8885_v24  ;;  %v8892_v24 = vld [vmem:[#allocation11 + $0xe8] ss:$16 sps:$4 sm:$0xff]  }
 0x4b2   :  { %1724 = vmatpush1.bf16.msra.mxu1 %v1345_v4  ;;  %v1469_v51 = vpop.permute.xlu1 %1468  ;;  %v1833_v4 = vld [vmem:[#allocation6 + $0x18] sm:$0xff] }
 0x4b3   :  { %2428 = vmatprep.subr.bf16.mxu1 %v8852_v26  ;;  %2330 = vmatpush1.bf16.msra.mxu0 %v8883_v28  ;;  %v1485_v36 = vsel %vm1357_vm3, %v1421_v53, %v1469_v51  ;;  %v1832_v26 = vld [vmem:[#allocation6 + $0x10] sm:$0xff]  ;;  %v1835_v28 = vld [vmem:[#allocation6 + $0x28] sm:$0xff] }
 0x4b4   :  { %2331 = vmatprep.subr.bf16.mxu0 %v8891_v58  ;;  %vm1501_vm5 = vcmp.eq.s32.totalorder %v9964_v57, %v1485_v36  ;;  %v1864_v58 = vmax.f32 %v1832_v26, 0.0  ;;  %v8924_v53 = vld [vmem:[#allocation11 + $0x18c] ss:$16 sps:$4 sm:$0xff]  }
 0x4b5   :  { %7892 = vmatmul.mubr.msk.bf16.vlgmr.msra.gmra.mrb[20].mxu1 %vm1579_vm6, %v9983_v19  ;;  %7888 = vmatmul.mubr.msk.bf16.gmra.mrb[40].mxu0 %vm1579_vm6, %v10057_v32  ;;  %v1483_v19 = vsel %vm1357_vm3, %v1415_v14, %v1463_v6  ;;  %v7883_v8 = vsel %vm1501_vm5, 1.0, %v9682_v12  ;;  %v1865_v14 = vmax.f32 %v1833_v4, 0.0  ;;  %v8900_v6 = vld [vmem:[#allocation11 + $0x10c] ss:$16 sps:$4 sm:$0xff]  }
 0x4b6   :  { %2429 = vmatpush1.bf16.msra.mxu1 %v8850_v34  ;;  %1759 = vmatprep.mubr.bf16.mxu1 %v9680_v39  ;;  %vm1499_vm1 = vcmp.eq.s32.totalorder %v9964_v57, %v1483_v19  ;;  %v8931_v34 = vld [vmem:[#allocation11 + $0x1e0] ss:$16 sps:$4 sm:$0xff]   ;;  %v1841_v19 = vld [vmem:[#allocation6 + $0x58] sm:$0xff] }
 0x4b7   :  { %2430 = vmatprep.subr.bf16.mxu1 %v8858_v35  ;;  %1686 = vmatprep.mubr.bf16.mxu0 %v9680_v39  ;;  %v7881_v60 = vsel %vm1499_vm1, 1.0, %v9682_v12  ;;  %v10103_v22 = vpack.c.bf16 %v1865_v14, %v1863_v13  ;;  %v1867_v35 = vmax.f32 %v1835_v28, 0.0  ;;  %v8936_v4 = vld [vmem:[#allocation11 + $0x1cc] ss:$16 sps:$4 sm:$0xff]  }
 0x4b8   :  { %2332 = vmatpush1.bf16.msra.mxu0 %v8889_v56  ;;  %v10089_v37 = vpack.c.bf16 %v7881_v60, %v7880_v61  ;;  %v1869_v56 = vmax.f32 %v1837_v29, 0.0  ;;  %v1838_v60 = vld [vmem:[#allocation6 + $0x40] sm:$0xff]  ;;  %v1840_v61 = vld [vmem:[#allocation6 + $0x50] sm:$0xff]  ;;  %v1885_v29 = vmax.f32 %v1853_v25, 0.0 }
 0x4b9   :  { %2333 = vmatprep.subr.bf16.mxu0 %v8897_v23  ;;  %v10114_v23 = vpack.c.bf16 %v1864_v58, %v1862_v30  ;;  %v1870_v36 = vmax.f32 %v1838_v60, 0.0  ;;  %v1852_v30 = vld [vmem:[#allocation6 + $0xb0] sm:$0xff]  ;;  %v1855_v58 = vld [vmem:[#allocation6 + $0xc8] sm:$0xff] }
 0x4ba   :  { %2431 = vmatpush1.bf16.msra.mxu1 %v8856_v38  ;;  %v8912_v38 = vld [vmem:[#allocation11 + $0x14c] ss:$16 sps:$4 sm:$0xff]   ;;  %v10116_v55 = vpack.c.bf16 %v1869_v56, %v1867_v35  ;;  %v1884_v35 = vmax.f32 %v1852_v30, 0.0  ;;  %v1887_v56 = vmax.f32 %v1855_v58, 0.0 }
 0x4bb   :  { %2432 = vmatprep.subr.bf16.mxu1 %v8864_v41  ;;  %v1836_v41 = vld [vmem:[#allocation6 + $0x30] sm:$0xff] }
 0x4bc   :  { %2334 = vmatpush1.bf16.msra.mxu0 %v8895_v44  ;;  %v1868_v44 = vmax.f32 %v1836_v41, 0.0  ;;  %v1859_v41 = vld [vmem:[#allocation6 + $0xe8] sm:$0xff] }
 0x4bd   :  { %7893 = vmatmul.mubr.msk.bf16.gmra.mrb[24].mxu1 %vm1579_vm6, %v10004_v31  ;;  %7889 = vmatmul.mubr.msk.bf16.gmra.mrb[44].mxu0 %vm1579_vm6, %v10073_v45  ;;  %v1484_v31 = vsel %vm1357_vm3, %v1418_v33, %v1466_v42  ;;  %v8906_v33 = vld [vmem:[#allocation11 + $0x12c] ss:$16 sps:$4 sm:$0xff]  }
 0x4be   :  { %2433 = vmatpush1.bf16.msra.mxu1 %v8862_v46  ;;  %1769 = vmatprep.mubr.bf16.mxu1 %v9680_v39  ;;  %vm1500_vm4 = vcmp.eq.s32.totalorder %v9964_v57, %v1484_v31  ;;  %v1839_v42 = vld [vmem:[#allocation6 + $0x48] sm:$0xff] }
 0x4bf   :  { %2434 = vmatprep.subr.bf16.mxu1 %v8870_v47  ;;  %1696 = vmatprep.mubr.bf16.mxu0 %v9680_v39  ;;  %v7882_v7 = vsel %vm1500_vm4, 1.0, %v9682_v12  ;;  %v8927_v12 = vld [vmem:[#allocation11 + $0x1c4] ss:$16 sps:$4 sm:$0xff]   ;;  %v8918_v46 = vld [vmem:[#allocation11 + $0x16c] ss:$16 sps:$4 sm:$0xff]   ;;  %v1871_v47 = vmax.f32 %v1839_v42, 0.0 }
 0x4c0   :  { %2335 = vmatprep.subr.bf16.mxu0 %v8903_v48  ;;  %v10101_v15 = vpack.c.bf16 %v7883_v8, %v7882_v7  ;;  %v1873_v48 = vmax.f32 %v1841_v19, 0.0  ;;  %v8922_v31 = vld [vmem:[#allocation11 + $0x188] ss:$16 sps:$4 sm:$0xff]   ;;  %v1842_v7 = vld [vmem:[#allocation6 + $0x60] sm:$0xff]  ;;  %v1844_v8 = vld [vmem:[#allocation6 + $0x70] sm:$0xff] }
 0x4c1   :  { %2336 = vmatpush1.bf16.msra.mxu0 %v8901_v49  ;;  %v8916_v49 = vld [vmem:[#allocation11 + $0x168] ss:$16 sps:$4 sm:$0xff]   ;;  %v1874_v13 = vmax.f32 %v1842_v7, 0.0  ;;  %v1876_v14 = vmax.f32 %v1844_v8, 0.0 }
 0x4c2   :  { %2435 = vmatpush1.bf16.msra.mxu1 %v8868_v59  ;;  %2337 = vmatprep.subr.bf16.mxu0 %v8909_v62  ;;  %v10125_v59 = vpack.c.bf16 %v1873_v48, %v1871_v47  ;;  %v1843_v62 = vld [vmem:[#allocation6 + $0x68] sm:$0xff]  ;;  %v1861_v42 = vld [vmem:[#allocation6 + $0xf8] sm:$0xff]  ;;  %v1858_v48 = vld [vmem:[#allocation6 + $0xe0] sm:$0xff] }
 0x4c3   :  { %2436 = vmatprep.subr.bf16.mxu1 %v8876_v63  ;;  %v1845_v63 = vld [vmem:[#allocation6 + $0x78] sm:$0xff] }
 0x4c4   :  { %v114_v8 = vld [vmem:[#allocation8 + $0x21] ss:$8 sm:$0xf] }
 0x4c5   :  { %7894 = vmatmul.mubr.msk.bf16.gmra.mrb[28].mxu1 %vm1579_vm6, %v10026_v54  ;;  %7890 = vmatmul.mubr.msk.bf16.gmra.mrb[48].mxu0 %vm1579_vm6, %v10089_v37  ;;  %v8921_v54 = vld [vmem:[#allocation11 + $0x1a4] ss:$16 sps:$4 sm:$0xff]  }
 0x4c6   :  { %2437 = vmatpush1.bf16.msra.mxu1 %v8874_v0  ;;  %1779 = vmatprep.mubr.bf16.mxu1 %v9680_v39  ;;  %v8930_v0 = vld [vmem:[#allocation11 + $0x1ac] ss:$16 sps:$4 sm:$0xff]  }
 0x4c7   :  { %2438 = vmatprep.subr.bf16.mxu1 %v8882_v1  ;;  %2338 = vmatpush1.bf16.msra.mxu0 %v8907_v52  ;;  %v1875_v1 = vmax.f32 %v1843_v62, 0.0  ;;  %v1877_v52 = vmax.f32 %v1845_v63, 0.0 }
 0x4c8   :  { %1706 = vmatprep.mubr.bf16.mxu0 %v9680_v39  ;;  %2339 = vmatprep.subr.bf16.mxu0 %v8915_v2  ;;  %v8928_v2 = vld [vmem:[#allocation11 + $0x1a8] ss:$16 sps:$4 sm:$0xff]  }
 0x4ca   :  { %2439 = vmatpush1.bf16.msra.mxu1 %v8880_v5  ;;  %v1901_v5 = vpack.c.bf16 %v1877_v52, %v1875_v1  ;;  %v1560_v52 = vshrl.u32 %v1355_v50, 7 }
 0x4cb   :  { %2440 = vmatprep.subr.bf16.mxu1 %v8888_v9  ;;  %2340 = vmatpush1.bf16.msra.mxu0 %v8913_v11  ;;  %v1847_v9 = vld [vmem:[#allocation6 + $0x88] sm:$0xff]  ;;  %v1849_v11 = vld [vmem:[#allocation6 + $0x98] sm:$0xff] }
 0x4cc   :  { %2341 = vmatprep.subr.bf16.mxu0 %v8921_v54  ;;  %v8934_v54 = vld [vmem:[#allocation11 + $0x1c8] ss:$16 sps:$4 sm:$0xff]   ;;  %v10154_v7 = vsub.s32 1, %v1560_v52 }
 0x4cd   :  { %7895 = vmatmul.mubr.msk.bf16.gmra.mrb[32].mxu1 %vm1579_vm6, %v10042_v18  ;;  %7891 = vmatmul.mubr.msk.bf16.gmra.mrb[52].mxu0 %vm1579_vm6, %v10101_v15  ;;  %v8898_v18 = vld [vmem:[#allocation11 + $0x108] ss:$16 sps:$4 sm:$0xff]  }
 0x4ce   :  { %2441 = vmatpush1.bf16.msra.mxu1 %v8886_v16  ;;  %1789 = vmatprep.mubr.bf16.mxu1 %v9680_v39  ;;  %v1879_v16 = vmax.f32 %v1847_v9, 0.0  ;;  %13360 = vst [vmem:[#allocation22_spill] sm:$0xff] %v10154_v7 }
 0x4cf   :  { %2442 = vmatprep.subr.bf16.mxu1 %v8894_v17  ;;  %2342 = vmatpush1.bf16.msra.mxu0 %v8919_v20  ;;  %v8937_v17 = vld [vmem:[#allocation11 + $0x1e8] ss:$16 sps:$4 sm:$0xff]   ;;  %v1900_v20 = vpack.c.bf16 %v1876_v14, %v1874_v13  ;;  %v10166_v13 = vsub.s32 2, %v1560_v52 }
 0x4d0   :  { %2343 = vmatprep.subr.bf16.mxu0 %v8927_v12  ;;  %2347 = vmatprep.mubr.bf16.mxu0 %v10103_v22 }
 0x4d1   :  { %13361 = vst [vmem:[#allocation23_spill] sm:$0xff] %v10166_v13 }
 0x4d2   :  { %2443 = vmatpush1.bf16.msra.mxu1 %v8892_v24  ;;  %v1846_v24 = vld [vmem:[#allocation6 + $0x80] sm:$0xff] }
 0x4d3   :  { %2444 = vmatprep.subr.bf16.mxu1 %v8900_v6  ;;  %2344 = vmatpush1.bf16.msra.mxu0 %v8925_v10  ;;  %v1848_v6 = vld [vmem:[#allocation6 + $0x90] sm:$0xff]  ;;  %v1851_v10 = vld [vmem:[#allocation6 + $0xa8] sm:$0xff]  ;;  %v1878_v26 = vmax.f32 %v1846_v24, 0.0  ;;  %v10187_v24 = vrot.slane %v114_v8, %v10166_v13 }
 0x4d4   :  { %2345 = vmatprep.subr.bf16.mxu0 %v8933_v27  ;;  %v1880_v27 = vmax.f32 %v1848_v6, 0.0  ;;  %v1883_v28 = vmax.f32 %v1851_v10, 0.0 }
 0x4d5   :  { %7896 = vmatmul.mubr.msk.bf16.gmra.mrb[36].mxu1 %vm1579_vm6, %v10057_v32  ;;  %v1866_v32 = vmax.f32 %v1834_v40, 0.0  ;;  %v1854_v40 = vld [vmem:[#allocation6 + $0xc0] sm:$0xff] }
 0x4d6   :  { %2445 = vmatpush1.bf16.msra.mxu1 %v8898_v18  ;;  %1799 = vmatprep.mubr.bf16.mxu1 %v9680_v39  ;;  %v1850_v18 = vld [vmem:[#allocation6 + $0xa0] sm:$0xff]  ;;  %v1886_v19 = vmax.f32 %v1854_v40, 0.0 }
 0x4d7   :  { %2446 = vmatprep.subr.bf16.mxu1 %v8906_v33  ;;  %2346 = vmatpush1.bf16.msra.mxu0 %v8931_v34  ;;  %v10123_v51 = vpack.c.bf16 %v1868_v44, %v1866_v32  ;;  %v1857_v33 = vld [vmem:[#allocation6 + $0xd8] sm:$0xff]  ;;  %v1882_v34 = vmax.f32 %v1850_v18, 0.0  ;;  %v1891_v32 = vmax.f32 %v1859_v41, 0.0  ;;  %v1893_v44 = vmax.f32 %v1861_v42, 0.0 }
 0x4d9   :  { %v1909_v47 = vpack.c.bf16 %v1893_v44, %v1891_v32 }
 0x4da   :  { %2447 = vmatpush1.bf16.msra.mxu1 %v8904_v21  ;;  %2348 = vmatmul.mubr.bf16.vlgmr.msra.gmra.mrb[56].mxu0 %v10114_v23  ;;  %v1889_v21 = vmax.f32 %v1857_v33, 0.0 }
 0x4db   :  { %2448 = vmatprep.subr.bf16.mxu1 %v8912_v38  ;;  %2357 = vmatprep.mubr.bf16.mxu0 %v10116_v55  ;;  %v1904_v38 = vpack.c.bf16 %v1884_v35, %v1882_v34 }
 0x4dd   :  { %7897 = vmatmul.mubr.msk.bf16.gmra.mrb[40].mxu1 %vm1579_vm6, %v10073_v45  ;;  %v1872_v45 = vmax.f32 %v1840_v61, 0.0 }
 0x4de   :  { %2449 = vmatpush1.bf16.msra.mxu1 %v8910_v43  ;;  %1809 = vmatprep.mubr.bf16.mxu1 %v9680_v39 }
 0x4df   :  { %2450 = vmatprep.subr.bf16.mxu1 %v8918_v46  ;;  %v10132_v3 = vpack.c.bf16 %v1872_v45, %v1870_v36 }
 0x4e2   :  { %2451 = vmatpush1.bf16.msra.mxu1 %v8916_v49  ;;  %2358 = vmatmul.mubr.bf16.gmra.mrb[60].mxu0 %v10123_v51  ;;  %v1860_v49 = vld [vmem:[#allocation6 + $0xf0] sm:$0xff] }
 0x4e3   :  { %2452 = vmatprep.subr.bf16.mxu1 %v8924_v53  ;;  %2367 = vmatprep.mubr.bf16.mxu0 %v10125_v59  ;;  %v1892_v53 = vmax.f32 %v1860_v49, 0.0 }
 0x4e5   :  { %7898 = vmatmul.mubr.msk.bf16.gmra.mrb[44].mxu1 %vm1579_vm6, %v10089_v37  ;;  %v8939_v37 = vld [vmem:[#allocation11 + $0x1ec] ss:$16 sps:$4 sm:$0xff]  }
 0x4e6   :  { %2453 = vmatpush1.bf16.msra.mxu1 %v8922_v31  ;;  %1819 = vmatprep.mubr.bf16.mxu1 %v9680_v39  ;;  %v1881_v39 = vmax.f32 %v1849_v11, 0.0 }
 0x4e7   :  { %2454 = vmatprep.subr.bf16.mxu1 %v8930_v0 }
 0x4e8   :  { %v1903_v12 = vpack.c.bf16 %v1881_v39, %v1879_v16 }
 0x4ea   :  { %2455 = vmatpush1.bf16.msra.mxu1 %v8928_v2  ;;  %2368 = vmatmul.mubr.bf16.gmra.mrb[64].mxu0 %v10132_v3 }
 0x4eb   :  { %2456 = vmatprep.subr.bf16.mxu1 %v8936_v4  ;;  %2377 = vmatprep.mubr.bf16.mxu0 %v1901_v5 }
 0x4ed   :  { %7899 = vmatmul.mubr.msk.bf16.gmra.mrb[48].mxu1 %vm1579_vm6, %v10101_v15  ;;  %v1902_v15 = vpack.c.bf16 %v1880_v27, %v1878_v26 }
 0x4ee   :  { %2457 = vmatpush1.bf16.msra.mxu1 %v8934_v54  ;;  %2460 = vmatprep.mubr.bf16.mxu1 %v10103_v22  ;;  %v1905_v22 = vpack.c.bf16 %v1885_v29, %v1883_v28  ;;  %v10162_v54 = vrot.slane %v114_v8, %v10154_v7 }
 0x4ef   :  { %2458 = vmatprep.subr.bf16.mxu1 %v8939_v37  ;;  %v10170_v37 = vsub.s32 3, %v1560_v52 }
 0x4f1   :  { %13362 = vst [vmem:[#allocation24_spill] sm:$0xff] %v10170_v37  ;;  %v10190_v6 = vrot.slane %v114_v8, %v10170_v37 }
 0x4f2   :  { %2459 = vmatpush1.bf16.msra.mxu1 %v8937_v17  ;;  %2378 = vmatmul.mubr.bf16.gmra.mrb[68].mxu0 %v1900_v20 }
 0x4f3   :  { %2387 = vmatprep.mubr.bf16.mxu0 %v1903_v12 }
 0x4f5   :  { %2461 = vmatmul.mubr.bf16.vlgmr.msra.gmra.mrb[52].mxu1 %v10114_v23  ;;  %v1907_v23 = vpack.c.bf16 %v1889_v21, %v1887_v56 }
 0x4f6   :  { %2470 = vmatprep.mubr.bf16.mxu1 %v10116_v55  ;;  %v1856_v55 = vld [vmem:[#allocation6 + $0xd0] sm:$0xff] }
 0x4f7   :  { %v1888_v43 = vmax.f32 %v1856_v55, 0.0 }
 0x4f9   :  { %v1906_v46 = vpack.c.bf16 %v1888_v43, %v1886_v19 }
 0x4fa   :  { %2388 = vmatmul.mubr.bf16.gmra.mrb[72].mxu0 %v1902_v15 }
 0x4fb   :  { %2397 = vmatprep.mubr.bf16.mxu0 %v1905_v22 }
 0x4fd   :  { %2471 = vmatmul.mubr.bf16.gmra.mrb[56].mxu1 %v10123_v51  ;;  %v1890_v51 = vmax.f32 %v1858_v48, 0.0 }
 0x4fe   :  { %2480 = vmatprep.mubr.bf16.mxu1 %v10125_v59 }
 0x4ff   :  { %v1908_v59 = vpack.c.bf16 %v1892_v53, %v1890_v51 }
 0x502   :  { %2398 = vmatmul.mubr.bf16.gmra.mrb[76].mxu0 %v1904_v38 }
 0x503   :  { %2407 = vmatprep.mubr.bf16.mxu0 %v1907_v23 }
 0x505   :  { %2481 = vmatmul.mubr.bf16.gmra.mrb[60].mxu1 %v10132_v3 }
 0x506   :  { %2490 = vmatprep.mubr.bf16.mxu1 %v1901_v5  ;;  %v10152_v5 = vsub.s32 0, %v1560_v52 }
 0x508   :  { %13359 = vst [vmem:[#allocation21_spill] sm:$0xff] %v10152_v5  ;;  %v10159_v11 = vrot.slane %v114_v8, %v10152_v5 }
 0x50a   :  { %2408 = vmatmul.mubr.bf16.gmra.mrb[80].mxu0 %v1906_v46 }
 0x50b   :  { %2417 = vmatprep.mubr.bf16.mxu0 %v1909_v47 }
 0x50d   :  { %2491 = vmatmul.mubr.bf16.gmra.mrb[64].mxu1 %v1900_v20 }
 0x50e   :  { %2500 = vmatprep.mubr.bf16.mxu1 %v1903_v12 }
 0x512   :  { %2418 = vmatmul.mubr.bf16.gmra.mrb[84].mxu0 %v1908_v59 }
 0x515   :  { %2501 = vmatmul.mubr.bf16.gmra.mrb[68].mxu1 %v1902_v15 }
 0x516   :  { %2510 = vmatprep.mubr.bf16.mxu1 %v1905_v22 }
 0x51d   :  { %2511 = vmatmul.mubr.bf16.gmra.mrb[72].mxu1 %v1904_v38 }
 0x51e   :  { %2520 = vmatprep.mubr.bf16.mxu1 %v1907_v23 }
 0x525   :  { %2521 = vmatmul.mubr.bf16.gmra.mrb[76].mxu1 %v1906_v46 }
 0x526   :  { %2530 = vmatprep.mubr.bf16.mxu1 %v1909_v47 }
 0x52d   :  { %2531 = vmatmul.mubr.bf16.gmra.mrb[80].mxu1 %v1908_v59 }
 0x568   :  { %v1638_v60 = vpop.f32.mrb[24].mxu0 }
 0x569   :  { %v1640_v61 = vpop.f32.mrb[25].mxu0  ;;  %v10181_v20 = vadd.f32 %v1638_v60, %v10159_v11 }
 0x56a   :  { %v1642_v62 = vpop.f32.mrb[26].mxu0  ;;  %v10184_v12 = vadd.f32 %v1640_v61, %v10162_v54 }
 0x56b   :  { %v1644_v63 = vpop.f32.mrb[27].mxu0  ;;  %v10175_v39 = vadd.f32 %v1642_v62, %v10159_v11  ;;  %v2877_v18 = vmul.f32 %v10181_v20, %v10181_v20 }
 0x56c   :  { %v10178_v17 = vadd.f32 %v1644_v63, %v10162_v54  ;;  %v2621_v28 = vadd.f32 %v10184_v12, %v10181_v20  ;;  %v2878_v34 = vmul.f32 %v10184_v12, %v10184_v12 }
 0x56d   :  { %v2881_v10 = vmul.f32 %v10175_v39, %v10175_v39 }
 0x56e   :  { %v2882_v25 = vmul.f32 %v10178_v17, %v10178_v17  ;;  %v2626_v35 = vadd.f32 %v10178_v17, %v10175_v39  ;;  %v2941_v51 = vadd.f32 %v2878_v34, %v2877_v18 }
 0x570   :  { %v1648_v31 = vpop.f32.mrb[28].mxu0  ;;  %v2946_v42 = vadd.f32 %v2882_v25, %v2881_v10 }
 0x571   :  { %v1650_v36 = vpop.f32.mrb[29].mxu0  ;;  %v10223_v40 = vadd.f32 %v1648_v31, %v10159_v11 }
 0x572   :  { %v1652_v45 = vpop.f32.mrb[30].mxu0  ;;  %v10226_v55 = vadd.f32 %v1650_v36, %v10162_v54 }
 0x573   :  { %v1654_v0 = vpop.f32.mrb[31].mxu0  ;;  %13364 = vst [vmem:[#allocation26_spill] sm:$0xff] %v10223_v40  ;;  %v10238_v46 = vadd.f32 %v1652_v45, %v10159_v11  ;;  %v2885_v53 = vmul.f32 %v10223_v40, %v10223_v40 }
 0x574   :  { %13365 = vst [vmem:[#allocation27_spill] sm:$0xff] %v10226_v55  ;;  %v10241_v47 = vadd.f32 %v1654_v0, %v10162_v54  ;;  %v2631_v59 = vadd.f32 %v10226_v55, %v10223_v40  ;;  %v2886_v60 = vmul.f32 %v10226_v55, %v10226_v55  ;;  %v8958_v40 = vld [vmem:[#allocation11 + $0x8e0] ss:$16 sps:$4 sm:$0xff]  }
 0x575   :  { %13367 = vst [vmem:[#allocation29_spill] sm:$0xff] %v10238_v46  ;;  %v2889_v10 = vmul.f32 %v10238_v46, %v10238_v46 }
 0x576   :  { %13368 = vst [vmem:[#allocation30_spill] sm:$0xff] %v10241_v47  ;;  %v2636_v25 = vadd.f32 %v10241_v47, %v10238_v46 }
 0x578   :  { %v10143_v1 = vpop.f32.mrb[32].mxu0 }
 0x579   :  { %v10146_v2 = vpop.f32.mrb[33].mxu0 }
 0x57a   :  { %v10148_v3 = vpop.f32.mrb[34].mxu0 }
 0x57b   :  { %v10150_v4 = vpop.f32.mrb[35].mxu0 }
 0x57c   :  { %v10279_v34 = vadd.f32 %v10150_v4, %v10162_v54 }
 0x57e   :  { %13372 = vst [vmem:[#allocation34_spill] sm:$0xff] %v10279_v34 }
 0x580   :  { %v10156_v9 = vpop.f32.mrb[36].mxu0 }
 0x581   :  { %v10164_v50 = vpop.f32.mrb[37].mxu0 }
 0x582   :  { %v10168_v14 = vpop.f32.mrb[38].mxu0 }
 0x583   :  { %v10172_v16 = vpop.f32.mrb[39].mxu0 }
 0x588   :  { %v1751_v26 = vpop.f32.mrb[20].mxu1  ;;  %v10196_v27 = vpop.f32.mrb[40].mxu0 }
 0x589   :  { %v10201_v29 = vadd.f32 %v1751_v26, %v10187_v24  ;;  %v1753_v15 = vpop.f32.mrb[21].mxu1  ;;  %v10203_v22 = vpop.f32.mrb[41].mxu0  ;;  %v2890_v26 = vmul.f32 %v10241_v47, %v10241_v47 }
 0x58a   :  { %v10208_v30 = vadd.f32 %v1753_v15, %v10190_v6  ;;  %v1755_v58 = vpop.f32.mrb[22].mxu1  ;;  %v10210_v33 = vpop.f32.mrb[42].mxu0 }
 0x58b   :  { %v10217_v56 = vadd.f32 %v1755_v58, %v10187_v24  ;;  %v1757_v21 = vpop.f32.mrb[23].mxu1  ;;  %v2622_v38 = vadd.f32 %v2621_v28, %v10201_v29  ;;  %v10220_v23 = vpop.f32.mrb[43].mxu0  ;;  %v2879_v19 = vmul.f32 %v10201_v29, %v10201_v29  ;;  %v10269_v28 = vadd.f32 %v10143_v1, %v10159_v11 }
 0x58c   :  { %v10229_v41 = vadd.f32 %v1757_v21, %v10190_v6  ;;  %v2880_v62 = vmul.f32 %v10208_v30, %v10208_v30  ;;  %v10275_v58 = vadd.f32 %v10148_v3, %v10159_v11  ;;  %v10288_v1 = vadd.f32 %v10146_v2, %v10162_v54 }
 0x58d   :  { %13363 = vst [vmem:[#allocation25_spill] sm:$0xff] %v10217_v56  ;;  %v2883_v43 = vmul.f32 %v10217_v56, %v10217_v56  ;;  %v2623_v32 = vadd.f32 %v2622_v38, %v10208_v30  ;;  %v2627_v44 = vadd.f32 %v2626_v35, %v10217_v56  ;;  %v2942_v52 = vadd.f32 %v2941_v51, %v2879_v19  ;;  %v8996_v56 = vld [vmem:[#allocation11 + $0x9a4] ss:$16 sps:$4 sm:$0xff]  }
 0x58e   :  { %13366 = vst [vmem:[#allocation28_spill] sm:$0xff] %v10229_v41  ;;  %v2884_v48 = vmul.f32 %v10229_v41, %v10229_v41  ;;  %13370 = vst [vmem:[#allocation32_spill] sm:$0xff] %v10269_v28  ;;  %v2951_v2 = vadd.f32 %v2886_v60, %v2885_v53  ;;  %v2898_v51 = vmul.f32 %v10279_v34, %v10279_v34 }
 0x58f   :  { %2624 = vadd.xlane.f32.xlu0 %v2623_v32  ;;  %v2947_v49 = vadd.f32 %v2946_v42, %v2883_v43  ;;  %v2628_v0 = vadd.f32 %v2627_v44, %v10229_v41  ;;  %13371 = vst [vmem:[#allocation33_spill] sm:$0xff] %v10275_v58  ;;  %13374 = vst [vmem:[#allocation36_spill] sm:$0xff] %v10288_v1  ;;  %v2943_v43 = vadd.f32 %v2942_v52, %v2880_v62 }
 0x590   :  { %v1761_v61 = vpop.f32.mrb[24].mxu1  ;;  %v10253_v63 = vpop.f32.mrb[44].mxu0  ;;  %v2893_v53 = vmul.f32 %v10269_v28, %v10269_v28  ;;  %v2641_v60 = vadd.f32 %v10288_v1, %v10269_v28 }
 0x591   :  { %v10256_v31 = vadd.f32 %v1761_v61, %v10187_v24  ;;  %v1763_v36 = vpop.f32.mrb[25].mxu1  ;;  %v2948_v45 = vadd.f32 %v2947_v49, %v2884_v48  ;;  %v10259_v8 = vpop.f32.mrb[45].mxu0  ;;  %v2956_v48 = vadd.f32 %v2890_v26, %v2889_v10  ;;  %v2897_v49 = vmul.f32 %v10275_v58, %v10275_v58 }
 0x592   :  { %v1765_v15 = vpop.f32.mrb[26].mxu1  ;;  %v10271_v18 = vpop.f32.mrb[46].mxu0  ;;  %v10293_v42 = vadd.f32 %v1763_v36, %v10190_v6 }
 0x593   :  { %13369 = vst [vmem:[#allocation31_spill] sm:$0xff] %v10256_v31  ;;  %v10282_v35 = vadd.f32 %v1765_v15, %v10187_v24  ;;  %v1767_v21 = vpop.f32.mrb[27].mxu1  ;;  %2949 = vadd.xlane.f32.xlu1 %v2948_v45  ;;  %2629 = vadd.xlane.f32.xlu0 %v2628_v0  ;;  %v10284_v38 = vpop.f32.mrb[47].mxu0  ;;  %v2887_v3 = vmul.f32 %v10256_v31, %v10256_v31 }
 0x594   :  { %13375 = vst [vmem:[#allocation37_spill] sm:$0xff] %v10293_v42  ;;  %v10296_v4 = vadd.f32 %v1767_v21, %v10190_v6  ;;  %v2632_v44 = vadd.f32 %v2631_v59, %v10256_v31  ;;  %v2888_v0 = vmul.f32 %v10293_v42, %v10293_v42  ;;  %v2894_v21 = vmul.f32 %v10288_v1, %v10288_v1 }
 0x595   :  { %13373 = vst [vmem:[#allocation35_spill] sm:$0xff] %v10282_v35  ;;  %v2891_v19 = vmul.f32 %v10282_v35, %v10282_v35  ;;  %v2637_v32 = vadd.f32 %v2636_v25, %v10282_v35  ;;  %v2952_v59 = vadd.f32 %v2951_v2, %v2887_v3  ;;  %v2646_v3 = vadd.f32 %v10279_v34, %v10275_v58 }
 0x596   :  { %13376 = vst [vmem:[#allocation38_spill] sm:$0xff] %v10296_v4  ;;  %v2892_v36 = vmul.f32 %v10296_v4, %v10296_v4  ;;  %v2633_v26 = vadd.f32 %v2632_v44, %v10293_v42  ;;  %v10339_v44 = vadd.f32 %v10156_v9, %v10159_v11  ;;  %v2966_v57 = vadd.f32 %v2898_v51, %v2897_v49 }
 0x597   :  { %2944 = vadd.xlane.f32.xlu0 %v2943_v43  ;;  %v2638_v61 = vadd.f32 %v2637_v32, %v10296_v4  ;;  %v2957_v62 = vadd.f32 %v2956_v48, %v2891_v19  ;;  %v10329_v19 = vadd.f32 %v10168_v14, %v10159_v11  ;;  %v10333_v43 = vadd.f32 %v10172_v16, %v10162_v54 }
 0x598   :  { %v1771_v45 = vpop.f32.mrb[28].mxu1  ;;  %v10311_v52 = vpop.f32.mrb[48].mxu0  ;;  %13380 = vst [vmem:[#allocation42_spill] sm:$0xff] %v10339_v44  ;;  %v10348_v16 = vadd.f32 %v10164_v50, %v10162_v54  ;;  %v2953_v9 = vadd.f32 %v2952_v59, %v2888_v0 }
 0x599   :  { %v10318_v10 = vadd.f32 %v1771_v45, %v10187_v24  ;;  %v1773_v25 = vpop.f32.mrb[29].mxu1  ;;  %2639 = vadd.xlane.f32.xlu1 %v2638_v61  ;;  %v10321_v15 = vpop.f32.mrb[49].mxu0  ;;  %13378 = vst [vmem:[#allocation40_spill] sm:$0xff] %v10329_v19  ;;  %13379 = vst [vmem:[#allocation41_spill] sm:$0xff] %v10333_v43  ;;  %v2958_v45 = vadd.f32 %v2957_v62, %v2892_v36  ;;  %v2905_v50 = vmul.f32 %v10329_v19, %v10329_v19 }
 0x59a   :  { %v1775_v32 = vpop.f32.mrb[30].mxu1  ;;  %v10335_v48 = vpop.f32.mrb[50].mxu0  ;;  %13382 = vst [vmem:[#allocation44_spill] sm:$0xff] %v10348_v16  ;;  %v10351_v58 = vadd.f32 %v1773_v25, %v10190_v6  ;;  %v2906_v62 = vmul.f32 %v10333_v43, %v10333_v43 }
 0x59b   :  { %13377 = vst [vmem:[#allocation39_spill] sm:$0xff] %v10318_v10  ;;  %v10342_v2 = vadd.f32 %v1775_v32, %v10187_v24  ;;  %v1777_v61 = vpop.f32.mrb[31].mxu1  ;;  %2634 = vadd.xlane.f32.xlu0 %v2633_v26  ;;  %v10344_v14 = vpop.f32.mrb[51].mxu0  ;;  %v2895_v32 = vmul.f32 %v10318_v10, %v10318_v10  ;;  %v2642_v51 = vadd.f32 %v2641_v60, %v10318_v10 }
 0x59c   :  { %13383 = vst [vmem:[#allocation45_spill] sm:$0xff] %v10351_v58  ;;  %v10354_v34 = vadd.f32 %v1777_v61, %v10190_v6  ;;  %v2961_v26 = vadd.f32 %v2894_v21, %v2893_v53  ;;  %v2901_v61 = vmul.f32 %v10339_v44, %v10339_v44  ;;  %v2651_v60 = vadd.f32 %v10348_v16, %v10339_v44 }
 0x59d   :  { %13381 = vst [vmem:[#allocation43_spill] sm:$0xff] %v10342_v2  ;;  %v2899_v36 = vmul.f32 %v10342_v2, %v10342_v2  ;;  %2959 = vadd.xlane.f32.xlu1 %v2958_v45  ;;  %v2647_v49 = vadd.f32 %v2646_v3, %v10342_v2  ;;  %v2656_v10 = vadd.f32 %v10333_v43, %v10329_v19 }
 0x59e   :  { %13384 = vst [vmem:[#allocation46_spill] sm:$0xff] %v10354_v34  ;;  %v2900_v59 = vmul.f32 %v10354_v34, %v10354_v34  ;;  %v2962_v53 = vadd.f32 %v2961_v26, %v2895_v32  ;;  %v10399_v32 = vadd.f32 %v10220_v23, %v10162_v54 }
 0x59f   :  { %2954 = vadd.xlane.f32.xlu0 %v2953_v9  ;;  %v2648_v0 = vadd.f32 %v2647_v49, %v10354_v34  ;;  %v2967_v25 = vadd.f32 %v2966_v57, %v2899_v36  ;;  %v2643_v49 = vadd.f32 %v2642_v51, %v10351_v58  ;;  %v2896_v57 = vmul.f32 %v10351_v58, %v10351_v58 }
 0x5a0   :  { %v1781_v3 = vpop.f32.mrb[32].mxu1  ;;  %v10373_v45 = vpop.f32.mrb[52].mxu0  ;;  %v2902_v36 = vmul.f32 %v10348_v16, %v10348_v16  ;;  %v10395_v51 = vadd.f32 %v10196_v27, %v10159_v11  ;;  %13388 = vst [vmem:[#allocation50_spill] sm:$0xff] %v10399_v32 }
 0x5a1   :  { %v10376_v2 = vadd.f32 %v1781_v3, %v10187_v24  ;;  %v1783_v9 = vpop.f32.mrb[33].mxu1  ;;  %2649 = vadd.xlane.f32.xlu1 %v2648_v0  ;;  %v10381_v21 = vpop.f32.mrb[53].mxu0  ;;  %v10389_v3 = vadd.f32 %v10210_v33, %v10159_v11  ;;  %v2976_v0 = vadd.f32 %v2906_v62, %v2905_v50  ;;  %v2968_v43 = vadd.f32 %v2967_v25, %v2900_v59 }
 0x5a2   :  { %v1785_v44 = vpop.f32.mrb[34].mxu1  ;;  %v10391_v34 = vpop.f32.mrb[54].mxu0  ;;  %13387 = vst [vmem:[#allocation49_spill] sm:$0xff] %v10395_v51  ;;  %v10408_v50 = vadd.f32 %v10203_v22, %v10162_v54  ;;  %v10413_v62 = vadd.f32 %v1783_v9, %v10190_v6  ;;  %v2963_v59 = vadd.f32 %v2962_v53, %v2896_v57  ;;  %v2971_v16 = vadd.f32 %v2902_v36, %v2901_v61 }
 0x5a3   :  { %13385 = vst [vmem:[#allocation47_spill] sm:$0xff] %v10376_v2  ;;  %13386 = vst [vmem:[#allocation48_spill] sm:$0xff] %v10389_v3  ;;  %v10402_v26 = vadd.f32 %v1785_v44, %v10187_v24  ;;  %v1787_v19 = vpop.f32.mrb[35].mxu1  ;;  %2644 = vadd.xlane.f32.xlu0 %v2643_v49  ;;  %v10404_v33 = vpop.f32.mrb[55].mxu0  ;;  %v2903_v27 = vmul.f32 %v10376_v2, %v10376_v2  ;;  %v2652_v49 = vadd.f32 %v2651_v60, %v10376_v2 }
 0x5a4   :  { %13390 = vst [vmem:[#allocation52_spill] sm:$0xff] %v10408_v50  ;;  %13391 = vst [vmem:[#allocation53_spill] sm:$0xff] %v10413_v62  ;;  %v10416_v23 = vadd.f32 %v1787_v19, %v10190_v6  ;;  %v2913_v22 = vmul.f32 %v10389_v3, %v10389_v3  ;;  %v2914_v9 = vmul.f32 %v10399_v32, %v10399_v32 }
 0x5a5   :  { %13389 = vst [vmem:[#allocation51_spill] sm:$0xff] %v10402_v26  ;;  %v2907_v44 = vmul.f32 %v10402_v26, %v10402_v26  ;;  %2969 = vadd.xlane.f32.xlu1 %v2968_v43  ;;  %v2657_v25 = vadd.f32 %v2656_v10, %v10402_v26  ;;  %v2904_v10 = vmul.f32 %v10413_v62, %v10413_v62 }
 0x5a6   :  { %13392 = vst [vmem:[#allocation54_spill] sm:$0xff] %v10416_v23  ;;  %v2908_v58 = vmul.f32 %v10416_v23, %v10416_v23  ;;  %v2972_v57 = vadd.f32 %v2971_v16, %v2903_v27  ;;  %v2909_v60 = vmul.f32 %v10395_v51, %v10395_v51  ;;  %v2661_v61 = vadd.f32 %v10408_v50, %v10395_v51 }
 0x5a7   :  { %2964 = vadd.xlane.f32.xlu0 %v2963_v59  ;;  %v2658_v19 = vadd.f32 %v2657_v25, %v10416_v23  ;;  %v2977_v28 = vadd.f32 %v2976_v0, %v2907_v44  ;;  %v2653_v59 = vadd.f32 %v2652_v49, %v10413_v62  ;;  %v2910_v0 = vmul.f32 %v10408_v50, %v10408_v50 }
 0x5a8   :  { %v1791_v43 = vpop.f32.mrb[36].mxu1  ;;  %v2666_v44 = vadd.f32 %v10399_v32, %v10389_v3  ;;  %v10445_v16 = vadd.f32 %v10271_v18, %v10159_v11  ;;  %v10449_v27 = vadd.f32 %v10284_v38, %v10162_v54  ;;  %v2986_v2 = vadd.f32 %v2914_v9, %v2913_v22 }
 0x5a9   :  { %v10436_v53 = vadd.f32 %v1791_v43, %v10187_v24  ;;  %v1793_v36 = vpop.f32.mrb[37].mxu1  ;;  %2659 = vadd.xlane.f32.xlu1 %v2658_v19  ;;  %v10453_v19 = vadd.f32 %v10253_v63, %v10159_v11  ;;  %v2978_v26 = vadd.f32 %v2977_v28, %v2908_v58  ;;  %v10460_v18 = vadd.f32 %v10259_v8, %v10162_v54 }
 0x5aa   :  { %13394 = vst [vmem:[#allocation56_spill] sm:$0xff] %v10445_v16  ;;  %13395 = vst [vmem:[#allocation57_spill] sm:$0xff] %v10449_v27  ;;  %v1795_v25 = vpop.f32.mrb[38].mxu1  ;;  %v10463_v23 = vadd.f32 %v1793_v36, %v10190_v6  ;;  %v2973_v62 = vadd.f32 %v2972_v57, %v2904_v10  ;;  %v2921_v22 = vmul.f32 %v10445_v16, %v10445_v16 }
 0x5ab   :  { %13393 = vst [vmem:[#allocation55_spill] sm:$0xff] %v10436_v53  ;;  %13396 = vst [vmem:[#allocation58_spill] sm:$0xff] %v10453_v19  ;;  %v10456_v49 = vadd.f32 %v1795_v25, %v10187_v24  ;;  %v1797_v43 = vpop.f32.mrb[39].mxu1  ;;  %2654 = vadd.xlane.f32.xlu0 %v2653_v59  ;;  %v2911_v63 = vmul.f32 %v10436_v53, %v10436_v53  ;;  %v2662_v58 = vadd.f32 %v2661_v61, %v10436_v53 }
 0x5ac   :  { %13398 = vst [vmem:[#allocation60_spill] sm:$0xff] %v10460_v18  ;;  %13399 = vst [vmem:[#allocation61_spill] sm:$0xff] %v10463_v23  ;;  %v10466_v38 = vadd.f32 %v1797_v43, %v10190_v6  ;;  %v2922_v9 = vmul.f32 %v10449_v27, %v10449_v27  ;;  %v2981_v59 = vadd.f32 %v2910_v0, %v2909_v60 }
 0x5ad   :  { %13397 = vst [vmem:[#allocation59_spill] sm:$0xff] %v10456_v49  ;;  %v2915_v25 = vmul.f32 %v10456_v49, %v10456_v49  ;;  %2979 = vadd.xlane.f32.xlu1 %v2978_v26  ;;  %v2667_v28 = vadd.f32 %v2666_v44, %v10456_v49  ;;  %v10474_v8 = vpop.f32.mrb[56].mxu0  ;;  %v2917_v61 = vmul.f32 %v10453_v19, %v10453_v19 }
 0x5ae   :  { %13400 = vst [vmem:[#allocation62_spill] sm:$0xff] %v10466_v38  ;;  %v10480_v10 = vpop.f32.mrb[57].mxu0  ;;  %v2916_v26 = vmul.f32 %v10466_v38, %v10466_v38  ;;  %v2671_v43 = vadd.f32 %v10460_v18, %v10453_v19  ;;  %v2982_v60 = vadd.f32 %v2981_v59, %v2911_v63  ;;  %v2918_v0 = vmul.f32 %v10460_v18, %v10460_v18 }
 0x5af   :  { %2974 = vadd.xlane.f32.xlu0 %v2973_v62  ;;  %v2668_v57 = vadd.f32 %v2667_v28, %v10466_v38  ;;  %v2987_v36 = vadd.f32 %v2986_v2, %v2915_v25  ;;  %v10485_v44 = vpop.f32.mrb[58].mxu0  ;;  %v2663_v38 = vadd.f32 %v2662_v58, %v10463_v23  ;;  %v2912_v2 = vmul.f32 %v10463_v23, %v10463_v23 }
 0x5b0   :  { %v1801_v49 = vpop.f32.mrb[40].mxu1  ;;  %v10491_v53 = vpop.f32.mrb[59].mxu0  ;;  %v2676_v25 = vadd.f32 %v10449_v27, %v10445_v16  ;;  %v10505_v19 = vadd.f32 %v10311_v52, %v10159_v11  ;;  %v2996_v3 = vadd.f32 %v2922_v9, %v2921_v22  ;;  %v10513_v58 = vadd.f32 %v10335_v48, %v10159_v11 }
 0x5b1   :  { %v10494_v62 = vadd.f32 %v1801_v49, %v10187_v24  ;;  %v1803_v28 = vpop.f32.mrb[41].mxu1  ;;  %2669 = vadd.xlane.f32.xlu1 %v2668_v57  ;;  %v10509_v57 = vadd.f32 %v10321_v15, %v10162_v54  ;;  %v2988_v23 = vadd.f32 %v2987_v36, %v2916_v26  ;;  %v10520_v52 = vadd.f32 %v10344_v14, %v10162_v54 }
 0x5b2   :  { %13402 = vst [vmem:[#allocation64_spill] sm:$0xff] %v10505_v19  ;;  %v1805_v49 = vpop.f32.mrb[42].mxu1  ;;  %13404 = vst [vmem:[#allocation66_spill] sm:$0xff] %v10513_v58  ;;  %v10525_v15 = vadd.f32 %v1803_v28, %v10190_v6  ;;  %v2925_v36 = vmul.f32 %v10505_v19, %v10505_v19  ;;  %v2991_v16 = vadd.f32 %v2918_v0, %v2917_v61 }
 0x5b3   :  { %13401 = vst [vmem:[#allocation63_spill] sm:$0xff] %v10494_v62  ;;  %13403 = vst [vmem:[#allocation65_spill] sm:$0xff] %v10509_v57  ;;  %v10516_v63 = vadd.f32 %v1805_v49, %v10187_v24  ;;  %v1807_v59 = vpop.f32.mrb[43].mxu1  ;;  %2664 = vadd.xlane.f32.xlu0 %v2663_v38  ;;  %v2919_v22 = vmul.f32 %v10494_v62, %v10494_v62  ;;  %v2983_v49 = vadd.f32 %v2982_v60, %v2912_v2  ;;  %v10545_v60 = vld [vmem:[#allocation8 + $0x1] ss:$8 sm:$0xf] }
 0x5b4   :  { %13406 = vst [vmem:[#allocation68_spill] sm:$0xff] %v10520_v52  ;;  %13407 = vst [vmem:[#allocation69_spill] sm:$0xff] %v10525_v15  ;;  %v10528_v9 = vadd.f32 %v1807_v59, %v10190_v6  ;;  %v2672_v26 = vadd.f32 %v2671_v43, %v10494_v62  ;;  %v2926_v59 = vmul.f32 %v10509_v57, %v10509_v57 }
 0x5b5   :  { %13405 = vst [vmem:[#allocation67_spill] sm:$0xff] %v10516_v63  ;;  %v2923_v48 = vmul.f32 %v10516_v63, %v10516_v63  ;;  %2989 = vadd.xlane.f32.xlu1 %v2988_v23  ;;  %v2677_v38 = vadd.f32 %v2676_v25, %v10516_v63  ;;  %v10534_v14 = vpop.f32.mrb[60].mxu0  ;;  %v2929_v25 = vmul.f32 %v10513_v58, %v10513_v58 }
 0x5b6   :  { %13408 = vst [vmem:[#allocation70_spill] sm:$0xff] %v10528_v9  ;;  %v10538_v28 = vpop.f32.mrb[61].mxu0  ;;  %v2924_v23 = vmul.f32 %v10528_v9, %v10528_v9  ;;  %v2930_v61 = vmul.f32 %v10520_v52, %v10520_v52  ;;  %v2992_v63 = vadd.f32 %v2991_v16, %v2919_v22  ;;  %v2686_v18 = vadd.f32 %v10520_v52, %v10513_v58 }
 0x5b7   :  { %2984 = vadd.xlane.f32.xlu0 %v2983_v49  ;;  %v2678_v27 = vadd.f32 %v2677_v38, %v10528_v9  ;;  %v2997_v2 = vadd.f32 %v2996_v3, %v2923_v48  ;;  %v10547_v43 = vpop.f32.mrb[62].mxu0  ;;  %v2920_v49 = vmul.f32 %v10525_v15, %v10525_v15  ;;  %v2673_v48 = vadd.f32 %v2672_v26, %v10525_v15 }
 0x5b8   :  { %v1811_v0 = vpop.f32.mrb[44].mxu1  ;;  %v10555_v38 = vpop.f32.mrb[63].mxu0  ;;  %v2681_v9 = vadd.f32 %v10509_v57, %v10505_v19  ;;  %v10567_v32 = vrot.slane %v10545_v60, %v10152_v5  ;;  %v10571_v16 = vrot.slane %v10545_v60, %v10154_v7  ;;  %v3001_v15 = vadd.f32 %v2926_v59, %v2925_v36 }
 0x5b9   :  { %v10558_v62 = vadd.f32 %v1811_v0, %v10187_v24  ;;  %v1813_v3 = vpop.f32.mrb[45].mxu1  ;;  %2679 = vadd.xlane.f32.xlu1 %v2678_v27  ;;  %v10575_v27 = vadd.f32 %v10373_v45, %v10159_v11  ;;  %v2998_v0 = vadd.f32 %v2997_v2, %v2924_v23  ;;  %v2993_v52 = vadd.f32 %v2992_v63, %v2920_v49 }
 0x5ba   :  { %v1815_v51 = vpop.f32.mrb[46].mxu1  ;;  %v10581_v58 = vadd.f32 %v1813_v3, %v10190_v6  ;;  %v3006_v57 = vadd.f32 %v2930_v61, %v2929_v25  ;;  %v10596_v59 = vadd.f32 %v10381_v21, %v10162_v54  ;;  %v10600_v63 = vadd.f32 %v10391_v34, %v10159_v11 }
 0x5bb   :  { %13409 = vst [vmem:[#allocation71_spill] sm:$0xff] %v10558_v62  ;;  %v10578_v22 = vadd.f32 %v1815_v51, %v10187_v24  ;;  %v1817_v26 = vpop.f32.mrb[47].mxu1  ;;  %2674 = vadd.xlane.f32.xlu0 %v2673_v48  ;;  %v2927_v50 = vmul.f32 %v10558_v62, %v10558_v62  ;;  %v2682_v23 = vadd.f32 %v2681_v9, %v10558_v62 }
 0x5bc   :  { %13411 = vst [vmem:[#allocation73_spill] sm:$0xff] %v10581_v58  ;;  %v10584_v19 = vadd.f32 %v1817_v26, %v10190_v6  ;;  %v10604_v2 = vadd.f32 %v10404_v33, %v10162_v54  ;;  %v10608_v25 = vadd.f32 %v10474_v8, %v10567_v32  ;;  %v10615_v21 = vadd.f32 %v10480_v10, %v10571_v16 }
 0x5bd   :  { %13410 = vst [vmem:[#allocation72_spill] sm:$0xff] %v10578_v22  ;;  %v2931_v45 = vmul.f32 %v10578_v22, %v10578_v22  ;;  %2999 = vadd.xlane.f32.xlu1 %v2998_v0  ;;  %v2687_v51 = vadd.f32 %v2686_v18, %v10578_v22  ;;  %v10592_v36 = vpop.f32.mrb[64].mxu0  ;;  %v10623_v33 = vadd.f32 %v10485_v44, %v10567_v32  ;;  %v8945_v22 = vld [vmem:[#allocation11 + $0x88c] ss:$16 sps:$4 sm:$0xff]  }
 0x5be   :  { %13412 = vst [vmem:[#allocation74_spill] sm:$0xff] %v10584_v19  ;;  %13413 = vst [vmem:[#allocation75_spill] sm:$0xff] %v10608_v25  ;;  %v10610_v18 = vpop.f32.mrb[65].mxu0  ;;  %v2932_v11 = vmul.f32 %v10584_v19, %v10584_v19  ;;  %v10627_v8 = vadd.f32 %v10491_v53, %v10571_v16  ;;  %v2928_v3 = vmul.f32 %v10581_v58, %v10581_v58  ;;  %5043 = vmatprep.subr.bf16.mxu1 %v8945_v22 }
 0x5bf   :  { %2994 = vadd.xlane.f32.xlu0 %v2993_v52  ;;  %v2688_v9 = vadd.f32 %v2687_v51, %v10584_v19  ;;  %13414 = vst [vmem:[#allocation76_spill] sm:$0xff] %v10615_v21  ;;  %v3007_v34 = vadd.f32 %v3006_v57, %v2931_v45  ;;  %v10619_v61 = vpop.f32.mrb[66].mxu0  ;;  %13415 = vst [vmem:[#allocation77_spill] sm:$0xff] %v10623_v33  ;;  %v2683_v57 = vadd.f32 %v2682_v23, %v10581_v58  ;;  %v8940_v45 = vld [vmem:[#allocation11 + $0x880] ss:$16 sps:$4 sm:$0xff]  }
 0x5c0   :  { %v1821_v54 = vpop.f32.mrb[48].mxu1  ;;  %13416 = vst [vmem:[#allocation78_spill] sm:$0xff] %v10627_v8  ;;  %v10629_v52 = vpop.f32.mrb[67].mxu0  ;;  %v3002_v48 = vadd.f32 %v3001_v15, %v2927_v50  ;;  %v2691_v44 = vadd.f32 %v10596_v59, %v10575_v27  ;;  %v2696_v53 = vadd.f32 %v10604_v2, %v10600_v63  ;;  %v10643_v0 = vrot.slane %v10545_v60, %v10166_v13  ;;  %v8942_v51 = vld [vmem:[#allocation11 + $0x884] ss:$16 sps:$4 sm:$0xff]  }
 0x5c1   :  { %v10632_v10 = vadd.f32 %v1821_v54, %v10187_v24  ;;  %v1823_v49 = vpop.f32.mrb[49].mxu1  ;;  %2689 = vadd.xlane.f32.xlu1 %v2688_v9  ;;  %v2733_v50 = vmul.f32 %v10608_v25, %v10608_v25  ;;  %v2734_v15 = vmul.f32 %v10615_v21, %v10615_v21  ;;  %v3008_v54 = vadd.f32 %v3007_v34, %v2932_v11 }
 0x5c2   :  { %v1825_v26 = vpop.f32.mrb[50].mxu1  ;;  %v2737_v19 = vmul.f32 %v10623_v33, %v10623_v33  ;;  %4817 = vmatprep.subr.bf16.mxu0 %v8942_v51  ;;  %v10664_v58 = vadd.f32 %v1823_v49, %v10190_v6  ;;  %v3003_v11 = vadd.f32 %v3002_v48, %v2928_v3  ;;  %v10672_v35 = vrot.slane %v10545_v60, %v10170_v37  ;;  %v8946_v3 = vld [vmem:[#allocation11 + $0x8a0] ss:$16 sps:$4 sm:$0xff]   ;;  %v8948_v48 = vld [vmem:[#allocation11 + $0x8a4] ss:$16 sps:$4 sm:$0xff]  }
 0x5c3   :  { %13417 = vst [vmem:[#allocation79_spill] sm:$0xff] %v10632_v10  ;;  %v10646_v9 = vadd.f32 %v1825_v26, %v10187_v24  ;;  %v1827_v23 = vpop.f32.mrb[51].mxu1  ;;  %2684 = vadd.xlane.f32.xlu0 %v2683_v57  ;;  %v2738_v24 = vmul.f32 %v10627_v8, %v10627_v8  ;;  %v10661_v26 = vadd.f32 %v10534_v14, %v10567_v32  ;;  %v8943_v57 = vld [vmem:[#allocation11 + $0x888] ss:$16 sps:$4 sm:$0xff]  }
 0x5c4   :  { %v10653_v62 = vadd.f32 %v1827_v23, %v10190_v6  ;;  %13421 = vst [vmem:[#allocation83_spill] sm:$0xff] %v10664_v58  ;;  %v2692_v23 = vadd.f32 %v2691_v44, %v10632_v10  ;;  %v10676_v14 = vadd.f32 %v10538_v28, %v10571_v16  ;;  %v10680_v6 = vadd.f32 %v10547_v43, %v10567_v32  ;;  %v8951_v43 = vld [vmem:[#allocation11 + $0x8ac] ss:$16 sps:$4 sm:$0xff]  }
 0x5c5   :  { %13418 = vst [vmem:[#allocation80_spill] sm:$0xff] %v10646_v9  ;;  %13420 = vst [vmem:[#allocation82_spill] sm:$0xff] %v10661_v26  ;;  %3009 = vadd.xlane.f32.xlu1 %v3008_v54  ;;  %v2697_v34 = vadd.f32 %v2696_v53, %v10646_v9  ;;  %v10668_v1 = vpop.f32.mrb[68].mxu0  ;;  %4818 = vmatpush1.bf16.msra.mxu0 %v8940_v45  ;;  %v2541_v44 = vadd.f32 %v10615_v21, %v10608_v25  ;;  %v8949_v25 = vld [vmem:[#allocation11 + $0x8a8] ss:$16 sps:$4 sm:$0xff]  }
 0x5c6   :  { %13419 = vst [vmem:[#allocation81_spill] sm:$0xff] %v10653_v62  ;;  %13422 = vst [vmem:[#allocation84_spill] sm:$0xff] %v10676_v14  ;;  %v10682_v49 = vpop.f32.mrb[69].mxu0  ;;  %v10689_v28 = vadd.f32 %v10555_v38, %v10571_v16  ;;  %v2546_v51 = vadd.f32 %v10627_v8, %v10623_v33  ;;  %v2797_v45 = vadd.f32 %v2734_v15, %v2733_v50  ;;  %5044 = vmatpush1.bf16.msra.mxu1 %v8943_v57  ;;  %v8957_v8 = vld [vmem:[#allocation11 + $0x8cc] ss:$16 sps:$4 sm:$0xff]  }
 0x5c7   :  { %13423 = vst [vmem:[#allocation85_spill] sm:$0xff] %v10680_v6  ;;  %3004 = vadd.xlane.f32.xlu0 %v3003_v11  ;;  %v2698_v60 = vadd.f32 %v2697_v34, %v10653_v62  ;;  %v10691_v53 = vpop.f32.mrb[70].mxu0  ;;  %4819 = vmatprep.subr.bf16.mxu0 %v8948_v48  ;;  %v2741_v38 = vmul.f32 %v10661_v26, %v10661_v26  ;;  %v8952_v48 = vld [vmem:[#allocation11 + $0x8c0] ss:$16 sps:$4 sm:$0xff]  }
 0x5c8   :  { %13424 = vst [vmem:[#allocation86_spill] sm:$0xff] %v10689_v28  ;;  %v2462_v22 = vpop.f32.mrb[52].mxu1  ;;  %v10695_v54 = vpop.f32.mrb[71].mxu0  ;;  %v2693_v21 = vadd.f32 %v2692_v23, %v10664_v58  ;;  %v2802_v31 = vadd.f32 %v2738_v24, %v2737_v19  ;;  %v2742_v15 = vmul.f32 %v10676_v14, %v10676_v14  ;;  %v2745_v57 = vmul.f32 %v10680_v6, %v10680_v6 }
 0x5c9   :  { %v10698_v11 = vadd.f32 %v2462_v22, %v10643_v0  ;;  %v2464_v34 = vpop.f32.mrb[53].mxu1  ;;  %2699 = vadd.xlane.f32.xlu1 %v2698_v60  ;;  %5045 = vmatprep.subr.bf16.mxu1 %v8951_v43  ;;  %v8954_v60 = vld [vmem:[#allocation11 + $0x8c4] ss:$16 sps:$4 sm:$0xff]   ;;  %v2746_v24 = vmul.f32 %v10689_v28, %v10689_v28 }
 0x5ca   :  { %v10704_v33 = vadd.f32 %v2464_v34, %v10672_v35  ;;  %v2466_v50 = vpop.f32.mrb[54].mxu1  ;;  %4820 = vmatpush1.bf16.msra.mxu0 %v8946_v3  ;;  %v10723_v3 = vadd.f32 %v10592_v36, %v10567_v32  ;;  %5046 = vmatpush1.bf16.msra.mxu1 %v8949_v25  ;;  %v10739_v36 = vadd.f32 %v10619_v61, %v10567_v32 }
 0x5cb   :  { %13425 = vst [vmem:[#allocation87_spill] sm:$0xff] %v10698_v11  ;;  %v2735_v22 = vmul.f32 %v10698_v11, %v10698_v11  ;;  %v10713_v23 = vadd.f32 %v2466_v50, %v10643_v0  ;;  %v2468_v19 = vpop.f32.mrb[55].mxu1  ;;  %2694 = vadd.xlane.f32.xlu0 %v2693_v21  ;;  %v2542_v34 = vadd.f32 %v2541_v44, %v10698_v11  ;;  %v8955_v21 = vld [vmem:[#allocation11 + $0x8c8] ss:$16 sps:$4 sm:$0xff]  }
 0x5cc   :  { %13426 = vst [vmem:[#allocation88_spill] sm:$0xff] %v10704_v33  ;;  %v10719_v4 = vadd.f32 %v2468_v19, %v10672_v35  ;;  %13429 = vst [vmem:[#allocation91_spill] sm:$0xff] %v10723_v3  ;;  %v2736_v43 = vmul.f32 %v10704_v33, %v10704_v33  ;;  %v10729_v50 = vadd.f32 %v10610_v18, %v10571_v16  ;;  %4821 = vmatprep.subr.bf16.mxu0 %v8954_v60 }
 0x5cd   :  { %13427 = vst [vmem:[#allocation89_spill] sm:$0xff] %v10713_v23  ;;  %v2739_v44 = vmul.f32 %v10713_v23, %v10713_v23  ;;  %v2543_v11 = vadd.f32 %v2542_v34, %v10704_v33  ;;  %v2547_v19 = vadd.f32 %v2546_v51, %v10713_v23  ;;  %v2798_v46 = vadd.f32 %v2797_v45, %v2735_v22  ;;  %v10735_v42 = vpop.f32.mrb[72].mxu0  ;;  %v8960_v34 = vld [vmem:[#allocation11 + $0x8e4] ss:$16 sps:$4 sm:$0xff]  }
 0x5ce   :  { %13428 = vst [vmem:[#allocation90_spill] sm:$0xff] %v10719_v4  ;;  %13430 = vst [vmem:[#allocation92_spill] sm:$0xff] %v10729_v50  ;;  %v10743_v18 = vadd.f32 %v10629_v52, %v10571_v16  ;;  %v10745_v25 = vpop.f32.mrb[73].mxu0  ;;  %5047 = vmatprep.subr.bf16.mxu1 %v8957_v8  ;;  %4822 = vmatpush1.bf16.msra.mxu0 %v8952_v48  ;;  %v2551_v51 = vadd.f32 %v10676_v14, %v10661_v26  ;;  %v8963_v52 = vld [vmem:[#allocation11 + $0x8ec] ss:$16 sps:$4 sm:$0xff]  }
 0x5cf   :  { %13431 = vst [vmem:[#allocation93_spill] sm:$0xff] %v10739_v36  ;;  %2544 = vadd.xlane.f32.xlu0 %v2543_v11  ;;  %v2548_v45 = vadd.f32 %v2547_v19, %v10719_v4  ;;  %v2740_v61 = vmul.f32 %v10719_v4, %v10719_v4  ;;  %v2803_v60 = vadd.f32 %v2802_v31, %v2739_v44  ;;  %v10752_v22 = vpop.f32.mrb[74].mxu0  ;;  %v8961_v11 = vld [vmem:[#allocation11 + $0x8e8] ss:$16 sps:$4 sm:$0xff]  }
 0x5d0   :  { %13432 = vst [vmem:[#allocation94_spill] sm:$0xff] %v10743_v18  ;;  %v2556_v23 = vadd.f32 %v10689_v28, %v10680_v6  ;;  %v2472_v8 = vpop.f32.mrb[56].mxu1  ;;  %v2807_v48 = vadd.f32 %v2742_v15, %v2741_v38  ;;  %v2812_v33 = vadd.f32 %v2746_v24, %v2745_v57  ;;  %v10756_v47 = vpop.f32.mrb[75].mxu0  ;;  %5048 = vmatpush1.bf16.msra.mxu1 %v8955_v21  ;;  %v8966_v21 = vld [vmem:[#allocation11 + $0x904] ss:$16 sps:$4 sm:$0xff]  }
 0x5d1   :  { %4823 = vmatprep.subr.bf16.mxu0 %v8960_v34  ;;  %v10759_v19 = vadd.f32 %v2472_v8, %v10643_v0  ;;  %v2474_v26 = vpop.f32.mrb[57].mxu1  ;;  %2549 = vadd.xlane.f32.xlu1 %v2548_v45  ;;  %v2749_v31 = vmul.f32 %v10723_v3, %v10723_v3  ;;  %v2799_v44 = vadd.f32 %v2798_v46, %v2736_v43  ;;  %v8969_v8 = vld [vmem:[#allocation11 + $0x90c] ss:$16 sps:$4 sm:$0xff]  }
 0x5d2   :  { %v2750_v4 = vmul.f32 %v10729_v50, %v10729_v50  ;;  %v10766_v38 = vadd.f32 %v2474_v26, %v10672_v35  ;;  %v2476_v15 = vpop.f32.mrb[58].mxu1  ;;  %v2753_v57 = vmul.f32 %v10739_v36, %v10739_v36  ;;  %v2754_v24 = vmul.f32 %v10743_v18, %v10743_v18  ;;  %5049 = vmatprep.subr.bf16.mxu1 %v8963_v52 }
 0x5d3   :  { %13433 = vst [vmem:[#allocation95_spill] sm:$0xff] %v10759_v19  ;;  %4824 = vmatpush1.bf16.msra.mxu0 %v8958_v40  ;;  %v2743_v34 = vmul.f32 %v10759_v19, %v10759_v19  ;;  %v10775_v46 = vadd.f32 %v2476_v15, %v10643_v0  ;;  %v2478_v43 = vpop.f32.mrb[59].mxu1  ;;  %2800 = vadd.xlane.f32.xlu0 %v2799_v44  ;;  %v8964_v44 = vld [vmem:[#allocation11 + $0x900] ss:$16 sps:$4 sm:$0xff]  }
 0x5d4   :  { %13434 = vst [vmem:[#allocation96_spill] sm:$0xff] %v10766_v38  ;;  %v2804_v26 = vadd.f32 %v2803_v60, %v2740_v61  ;;  %v2552_v45 = vadd.f32 %v2551_v51, %v10759_v19  ;;  %v10779_v6 = vadd.f32 %v2478_v43, %v10672_v35  ;;  %v10783_v52 = vadd.f32 %v10668_v1, %v10567_v32  ;;  %v8967_v61 = vld [vmem:[#allocation11 + $0x908] ss:$16 sps:$4 sm:$0xff]  }
 0x5d5   :  { %13435 = vst [vmem:[#allocation97_spill] sm:$0xff] %v10775_v46  ;;  %v2744_v40 = vmul.f32 %v10766_v38, %v10766_v38  ;;  %v10789_v15 = vadd.f32 %v10682_v49, %v10571_v16  ;;  %5050 = vmatpush1.bf16.msra.mxu1 %v8961_v11  ;;  %v2747_v51 = vmul.f32 %v10775_v46, %v10775_v46  ;;  %v10795_v19 = vpop.f32.mrb[76].mxu0 }
 0x5d6   :  { %13436 = vst [vmem:[#allocation98_spill] sm:$0xff] %v10779_v6  ;;  %13437 = vst [vmem:[#allocation99_spill] sm:$0xff] %v10783_v52  ;;  %2805 = vadd.xlane.f32.xlu1 %v2804_v26  ;;  %v2553_v60 = vadd.f32 %v2552_v45, %v10766_v38  ;;  %v2557_v43 = vadd.f32 %v2556_v23, %v10775_v46  ;;  %v2808_v1 = vadd.f32 %v2807_v48, %v2743_v34  ;;  %v10805_v11 = vpop.f32.mrb[77].mxu0  ;;  %v8972_v26 = vld [vmem:[#allocation11 + $0x924] ss:$16 sps:$4 sm:$0xff]  }
 0x5d7   :  { %13438 = vst [vmem:[#allocation100_spill] sm:$0xff] %v10789_v15  ;;  %v10799_v14 = vadd.f32 %v10691_v53, %v10567_v32  ;;  %v10803_v49 = vadd.f32 %v10695_v54, %v10571_v16  ;;  %4825 = vmatprep.subr.bf16.mxu0 %v8966_v21  ;;  %5051 = vmatprep.subr.bf16.mxu1 %v8969_v8  ;;  %v10812_v34 = vpop.f32.mrb[78].mxu0  ;;  %v8975_v46 = vld [vmem:[#allocation11 + $0x92c] ss:$16 sps:$4 sm:$0xff]  }
 0x5d8   :  { %v2561_v45 = vadd.f32 %v10729_v50, %v10723_v3  ;;  %2554 = vadd.xlane.f32.xlu0 %v2553_v60  ;;  %v2558_v23 = vadd.f32 %v2557_v43, %v10779_v6  ;;  %v2748_v48 = vmul.f32 %v10779_v6, %v10779_v6  ;;  %v2813_v53 = vadd.f32 %v2812_v33, %v2747_v51  ;;  %v2482_v38 = vpop.f32.mrb[60].mxu1  ;;  %v10816_v28 = vpop.f32.mrb[79].mxu0  ;;  %v8970_v60 = vld [vmem:[#allocation11 + $0x920] ss:$16 sps:$4 sm:$0xff]  }
 0x5d9   :  { %13439 = vst [vmem:[#allocation101_spill] sm:$0xff] %v10799_v14  ;;  %13440 = vst [vmem:[#allocation102_spill] sm:$0xff] %v10803_v49  ;;  %v2566_v54 = vadd.f32 %v10743_v18, %v10739_v36  ;;  %v2817_v21 = vadd.f32 %v2750_v4, %v2749_v31  ;;  %v2822_v8 = vadd.f32 %v2754_v24, %v2753_v57  ;;  %4826 = vmatpush1.bf16.msra.mxu0 %v8964_v44  ;;  %v2484_v3 = vpop.f32.mrb[61].mxu1  ;;  %v8973_v24 = vld [vmem:[#allocation11 + $0x928] ss:$16 sps:$4 sm:$0xff]  }
 0x5da   :  { %5052 = vmatpush1.bf16.msra.mxu1 %v8967_v61  ;;  %v10819_v43 = vadd.f32 %v2482_v38, %v10643_v0  ;;  %2559 = vadd.xlane.f32.xlu1 %v2558_v23  ;;  %v2757_v33 = vmul.f32 %v10783_v52, %v10783_v52  ;;  %v2809_v51 = vadd.f32 %v2808_v1, %v2744_v40  ;;  %v2486_v31 = vpop.f32.mrb[62].mxu1  ;;  %v8978_v44 = vld [vmem:[#allocation11 + $0x944] ss:$16 sps:$4 sm:$0xff]  }
 0x5db   :  { %v2758_v6 = vmul.f32 %v10789_v15, %v10789_v15  ;;  %v10826_v4 = vadd.f32 %v2484_v3, %v10672_v35  ;;  %v2761_v57 = vmul.f32 %v10799_v14, %v10799_v14  ;;  %v2762_v38 = vmul.f32 %v10803_v49, %v10803_v49  ;;  %4827 = vmatprep.subr.bf16.mxu0 %v8972_v26  ;;  %v2488_v1 = vpop.f32.mrb[63].mxu1 }
 0x5dc   :  { %13441 = vst [vmem:[#allocation103_spill] sm:$0xff] %v10819_v43  ;;  %5053 = vmatprep.subr.bf16.mxu1 %v8975_v46  ;;  %v2751_v40 = vmul.f32 %v10819_v43, %v10819_v43  ;;  %v10835_v61 = vadd.f32 %v2486_v31, %v10643_v0  ;;  %2810 = vadd.xlane.f32.xlu0 %v2809_v51  ;;  %v8976_v31 = vld [vmem:[#allocation11 + $0x940] ss:$16 sps:$4 sm:$0xff]   ;;  %v8981_v51 = vld [vmem:[#allocation11 + $0x94c] ss:$16 sps:$4 sm:$0xff]  }
 0x5dd   :  { %13442 = vst [vmem:[#allocation104_spill] sm:$0xff] %v10826_v4  ;;  %v2814_v3 = vadd.f32 %v2813_v53, %v2748_v48  ;;  %v2562_v23 = vadd.f32 %v2561_v45, %v10819_v43  ;;  %v10839_v36 = vadd.f32 %v2488_v1, %v10672_v35  ;;  %v10843_v26 = vadd.f32 %v10735_v42, %v10567_v32  ;;  %v10855_v1 = vpop.f32.mrb[80].mxu0 }
 0x5de   :  { %13443 = vst [vmem:[#allocation105_spill] sm:$0xff] %v10835_v61  ;;  %v2752_v46 = vmul.f32 %v10826_v4, %v10826_v4  ;;  %v10849_v50 = vadd.f32 %v10745_v25, %v10571_v16  ;;  %4828 = vmatpush1.bf16.msra.mxu0 %v8970_v60  ;;  %v2755_v45 = vmul.f32 %v10835_v61, %v10835_v61  ;;  %v10865_v60 = vpop.f32.mrb[81].mxu0 }
 0x5df   :  { %13444 = vst [vmem:[#allocation106_spill] sm:$0xff] %v10839_v36  ;;  %13445 = vst [vmem:[#allocation107_spill] sm:$0xff] %v10843_v26  ;;  %2815 = vadd.xlane.f32.xlu1 %v2814_v3  ;;  %v2563_v48 = vadd.f32 %v2562_v23, %v10826_v4  ;;  %v2567_v53 = vadd.f32 %v2566_v54, %v10835_v61  ;;  %v2818_v42 = vadd.f32 %v2817_v21, %v2751_v40  ;;  %v8979_v3 = vld [vmem:[#allocation11 + $0x948] ss:$16 sps:$4 sm:$0xff]   ;;  %v10872_v40 = vpop.f32.mrb[82].mxu0 }
 0x5e0   :  { %13446 = vst [vmem:[#allocation108_spill] sm:$0xff] %v10849_v50  ;;  %v10859_v43 = vadd.f32 %v10752_v22, %v10567_v32  ;;  %v10863_v25 = vadd.f32 %v10756_v47, %v10571_v16  ;;  %5054 = vmatpush1.bf16.msra.mxu1 %v8973_v24  ;;  %4829 = vmatprep.subr.bf16.mxu0 %v8978_v44  ;;  %v8984_v61 = vld [vmem:[#allocation11 + $0x964] ss:$16 sps:$4 sm:$0xff]   ;;  %v2492_v24 = vpop.f32.mrb[64].mxu1  ;;  %v10876_v18 = vpop.f32.mrb[83].mxu0 }
 0x5e1   :  { %v2571_v23 = vadd.f32 %v10789_v15, %v10783_v52  ;;  %2564 = vadd.xlane.f32.xlu0 %v2563_v48  ;;  %v2568_v54 = vadd.f32 %v2567_v53, %v10839_v36  ;;  %v2756_v21 = vmul.f32 %v10839_v36, %v10839_v36  ;;  %v2823_v22 = vadd.f32 %v2822_v8, %v2755_v45  ;;  %v8987_v48 = vld [vmem:[#allocation11 + $0x96c] ss:$16 sps:$4 sm:$0xff]   ;;  %v2494_v52 = vpop.f32.mrb[65].mxu1 }
 0x5e2   :  { %13447 = vst [vmem:[#allocation109_spill] sm:$0xff] %v10859_v43  ;;  %13448 = vst [vmem:[#allocation110_spill] sm:$0xff] %v10863_v25  ;;  %v2576_v47 = vadd.f32 %v10803_v49, %v10799_v14  ;;  %v2832_v4 = vadd.f32 %v2762_v38, %v2761_v57  ;;  %v2827_v44 = vadd.f32 %v2758_v6, %v2757_v33  ;;  %5055 = vmatprep.subr.bf16.mxu1 %v8981_v51  ;;  %v2496_v6 = vpop.f32.mrb[66].mxu1  ;;  %v8985_v51 = vld [vmem:[#allocation11 + $0x968] ss:$16 sps:$4 sm:$0xff]  }
 0x5e3   :  { %4830 = vmatpush1.bf16.msra.mxu0 %v8976_v31  ;;  %v10879_v53 = vadd.f32 %v2492_v24, %v10643_v0  ;;  %2569 = vadd.xlane.f32.xlu1 %v2568_v54  ;;  %v2765_v8 = vmul.f32 %v10843_v26, %v10843_v26  ;;  %v2819_v45 = vadd.f32 %v2818_v42, %v2752_v46  ;;  %v8982_v31 = vld [vmem:[#allocation11 + $0x960] ss:$16 sps:$4 sm:$0xff]   ;;  %v2498_v54 = vpop.f32.mrb[67].mxu1  ;;  %v8991_v49 = vld [vmem:[#allocation11 + $0x988] ss:$16 sps:$4 sm:$0xff]  }
 0x5e4   :  { %v2766_v36 = vmul.f32 %v10849_v50, %v10849_v50  ;;  %v10886_v57 = vadd.f32 %v2494_v52, %v10672_v35  ;;  %v2769_v33 = vmul.f32 %v10859_v43, %v10859_v43  ;;  %v2770_v38 = vmul.f32 %v10863_v25, %v10863_v25  ;;  %5056 = vmatpush1.bf16.msra.mxu1 %v8979_v3 }
 0x5e5   :  { %13449 = vst [vmem:[#allocation111_spill] sm:$0xff] %v10879_v53  ;;  %4831 = vmatprep.subr.bf16.mxu0 %v8984_v61  ;;  %v2759_v46 = vmul.f32 %v10879_v53, %v10879_v53  ;;  %v10895_v42 = vadd.f32 %v2496_v6, %v10643_v0  ;;  %2820 = vadd.xlane.f32.xlu0 %v2819_v45  ;;  %v8990_v6 = vld [vmem:[#allocation11 + $0x984] ss:$16 sps:$4 sm:$0xff]   ;;  %v8993_v45 = vld [vmem:[#allocation11 + $0x98c] ss:$16 sps:$4 sm:$0xff]  }
 0x5e6   :  { %13450 = vst [vmem:[#allocation112_spill] sm:$0xff] %v10886_v57  ;;  %v2824_v52 = vadd.f32 %v2823_v22, %v2756_v21  ;;  %v2572_v24 = vadd.f32 %v2571_v23, %v10879_v53  ;;  %v10899_v14 = vadd.f32 %v2498_v54, %v10672_v35  ;;  %v10903_v3 = vadd.f32 %v10795_v19, %v10567_v32  ;;  %v10915_v54 = vpop.f32.mrb[84].mxu0 }
 0x5e7   :  { %13451 = vst [vmem:[#allocation113_spill] sm:$0xff] %v10895_v42  ;;  %v2760_v61 = vmul.f32 %v10886_v57, %v10886_v57  ;;  %v10909_v15 = vadd.f32 %v10805_v11, %v10571_v16  ;;  %5057 = vmatprep.subr.bf16.mxu1 %v8987_v48  ;;  %v2763_v23 = vmul.f32 %v10895_v42, %v10895_v42  ;;  %v10925_v48 = vpop.f32.mrb[85].mxu0 }
 0x5e8   :  { %13452 = vst [vmem:[#allocation114_spill] sm:$0xff] %v10899_v14  ;;  %13453 = vst [vmem:[#allocation115_spill] sm:$0xff] %v10903_v3  ;;  %2825 = vadd.xlane.f32.xlu1 %v2824_v52  ;;  %v2573_v21 = vadd.f32 %v2572_v24, %v10886_v57  ;;  %v2577_v22 = vadd.f32 %v2576_v47, %v10895_v42  ;;  %v2828_v19 = vadd.f32 %v2827_v44, %v2759_v46  ;;  %v8988_v52 = vld [vmem:[#allocation11 + $0x980] ss:$16 sps:$4 sm:$0xff]   ;;  %v10932_v24 = vpop.f32.mrb[86].mxu0 }
 0x5e9   :  { %13454 = vst [vmem:[#allocation116_spill] sm:$0xff] %v10909_v15  ;;  %v10919_v53 = vadd.f32 %v10812_v34, %v10567_v32  ;;  %v10923_v11 = vadd.f32 %v10816_v28, %v10571_v16  ;;  %4832 = vmatpush1.bf16.msra.mxu0 %v8982_v31  ;;  %5058 = vmatpush1.bf16.msra.mxu1 %v8985_v51  ;;  %v2502_v31 = vpop.f32.mrb[68].mxu1  ;;  %v10936_v57 = vpop.f32.mrb[87].mxu0 }
 0x5ea   :  { %v2764_v47 = vmul.f32 %v10899_v14, %v10899_v14  ;;  %v2581_v44 = vadd.f32 %v10849_v50, %v10843_v26  ;;  %2574 = vadd.xlane.f32.xlu0 %v2573_v21  ;;  %v2578_v34 = vadd.f32 %v2577_v22, %v10899_v14  ;;  %v2833_v46 = vadd.f32 %v2832_v4, %v2763_v23  ;;  %v2504_v21 = vpop.f32.mrb[69].mxu1  ;;  %v8997_v14 = vld [vmem:[#allocation11 + $0x9a8] ss:$16 sps:$4 sm:$0xff]  }
 0x5eb   :  { %13455 = vst [vmem:[#allocation117_spill] sm:$0xff] %v10919_v53  ;;  %13456 = vst [vmem:[#allocation118_spill] sm:$0xff] %v10923_v11  ;;  %v2586_v28 = vadd.f32 %v10863_v25, %v10859_v43  ;;  %v2842_v42 = vadd.f32 %v2770_v38, %v2769_v33  ;;  %v2837_v51 = vadd.f32 %v2766_v36, %v2765_v8  ;;  %4833 = vmatprep.subr.bf16.mxu0 %v8990_v6  ;;  %v2506_v36 = vpop.f32.mrb[70].mxu1  ;;  %v8994_v6 = vld [vmem:[#allocation11 + $0x9a0] ss:$16 sps:$4 sm:$0xff]  }
 0x5ec   :  { %5059 = vmatprep.subr.bf16.mxu1 %v8993_v45  ;;  %v10939_v55 = vadd.f32 %v2502_v31, %v10643_v0  ;;  %2579 = vadd.xlane.f32.xlu1 %v2578_v34  ;;  %v2773_v4 = vmul.f32 %v10903_v3, %v10903_v3  ;;  %v2829_v23 = vadd.f32 %v2828_v19, %v2760_v61  ;;  %v8999_v45 = vld [vmem:[#allocation11 + $0x9ac] ss:$16 sps:$4 sm:$0xff]   ;;  %v2508_v34 = vpop.f32.mrb[71].mxu1  ;;  %v122_v50 = vld [vmem:[#allocation8 + $0x23] ss:$8 sm:$0xf] }
 0x5ed   :  { %v2774_v22 = vmul.f32 %v10909_v15, %v10909_v15  ;;  %v10946_v33 = vadd.f32 %v2504_v21, %v10672_v35  ;;  %v2777_v8 = vmul.f32 %v10919_v53, %v10919_v53  ;;  %v2778_v38 = vmul.f32 %v10923_v11, %v10923_v11  ;;  %4834 = vmatpush1.bf16.msra.mxu0 %v8988_v52 }
 0x5ee   :  { %13457 = vst [vmem:[#allocation119_spill] sm:$0xff] %v10939_v55  ;;  %5060 = vmatpush1.bf16.msra.mxu1 %v8991_v49  ;;  %v2767_v61 = vmul.f32 %v10939_v55, %v10939_v55  ;;  %v10955_v19 = vadd.f32 %v2506_v36, %v10643_v0  ;;  %2830 = vadd.xlane.f32.xlu0 %v2829_v23  ;;  %v9002_v23 = vld [vmem:[#allocation11 + $0x9c4] ss:$16 sps:$4 sm:$0xff]  }
 0x5ef   :  { %13458 = vst [vmem:[#allocation120_spill] sm:$0xff] %v10946_v33  ;;  %v2834_v31 = vadd.f32 %v2833_v46, %v2764_v47  ;;  %v2582_v21 = vadd.f32 %v2581_v44, %v10939_v55  ;;  %v10959_v26 = vadd.f32 %v2508_v34, %v10672_v35  ;;  %v10963_v49 = vadd.f32 %v10855_v1, %v10567_v32  ;;  %v9005_v47 = vld [vmem:[#allocation11 + $0x9cc] ss:$16 sps:$4 sm:$0xff]  }
 0x5f0   :  { %13459 = vst [vmem:[#allocation121_spill] sm:$0xff] %v10955_v19  ;;  %v2768_v52 = vmul.f32 %v10946_v33, %v10946_v33  ;;  %v10969_v36 = vadd.f32 %v10865_v60, %v10571_v16  ;;  %4835 = vmatprep.subr.bf16.mxu0 %v8996_v56  ;;  %v2587_v44 = vadd.f32 %v2586_v28, %v10955_v19  ;;  %v9000_v60 = vld [vmem:[#allocation11 + $0x9c0] ss:$16 sps:$4 sm:$0xff]  }
 0x5f1   :  { %13460 = vst [vmem:[#allocation122_spill] sm:$0xff] %v10959_v26  ;;  %13461 = vst [vmem:[#allocation123_spill] sm:$0xff] %v10963_v49  ;;  %v2771_v46 = vmul.f32 %v10955_v19, %v10955_v19  ;;  %2835 = vadd.xlane.f32.xlu1 %v2834_v31  ;;  %v2583_v34 = vadd.f32 %v2582_v21, %v10946_v33  ;;  %v2838_v1 = vadd.f32 %v2837_v51, %v2767_v61  ;;  %v9003_v31 = vld [vmem:[#allocation11 + $0x9c8] ss:$16 sps:$4 sm:$0xff]   ;;  %v2512_v19 = vpop.f32.mrb[72].mxu1 }
 0x5f2   :  { %13462 = vst [vmem:[#allocation124_spill] sm:$0xff] %v10969_v36  ;;  %v2772_v55 = vmul.f32 %v10959_v26, %v10959_v26  ;;  %v10979_v43 = vadd.f32 %v10872_v40, %v10567_v32  ;;  %v10983_v56 = vadd.f32 %v10876_v18, %v10571_v16  ;;  %5061 = vmatprep.subr.bf16.mxu1 %v8999_v45  ;;  %v9008_v18 = vld [vmem:[#allocation11 + $0x9e4] ss:$16 sps:$4 sm:$0xff]  }
 0x5f3   :  { %4836 = vmatpush1.bf16.msra.mxu0 %v8994_v6  ;;  %v2591_v28 = vadd.f32 %v10909_v15, %v10903_v3  ;;  %2584 = vadd.xlane.f32.xlu0 %v2583_v34  ;;  %v2588_v51 = vadd.f32 %v2587_v44, %v10959_v26  ;;  %v2843_v61 = vadd.f32 %v2842_v42, %v2771_v46  ;;  %v9011_v6 = vld [vmem:[#allocation11 + $0x9ec] ss:$16 sps:$4 sm:$0xff]   ;;  %v2514_v3 = vpop.f32.mrb[73].mxu1  ;;  %v9009_v34 = vld [vmem:[#allocation11 + $0x9e8] ss:$16 sps:$4 sm:$0xff]  }
 0x5f4   :  { %13463 = vst [vmem:[#allocation125_spill] sm:$0xff] %v10979_v43  ;;  %13464 = vst [vmem:[#allocation126_spill] sm:$0xff] %v10983_v56  ;;  %5062 = vmatpush1.bf16.msra.mxu1 %v8997_v14  ;;  %v2596_v40 = vadd.f32 %v10923_v11, %v10919_v53  ;;  %v2852_v21 = vadd.f32 %v2778_v38, %v2777_v8  ;;  %v2847_v33 = vadd.f32 %v2774_v22, %v2773_v4  ;;  %v2516_v4 = vpop.f32.mrb[74].mxu1 }
 0x5f5   :  { %4837 = vmatprep.subr.bf16.mxu0 %v9002_v23  ;;  %5063 = vmatprep.subr.bf16.mxu1 %v9005_v47  ;;  %v10991_v45 = vadd.f32 %v2512_v19, %v10643_v0  ;;  %v2781_v42 = vmul.f32 %v10963_v49, %v10963_v49  ;;  %v2839_v14 = vadd.f32 %v2838_v1, %v2768_v52  ;;  %v9006_v23 = vld [vmem:[#allocation11 + $0x9e0] ss:$16 sps:$4 sm:$0xff]   ;;  %v2518_v46 = vpop.f32.mrb[75].mxu1 }
 0x5f6   :  { %2589 = vadd.xlane.f32.xlu1 %v2588_v51  ;;  %v2782_v44 = vmul.f32 %v10969_v36, %v10969_v36  ;;  %v10998_v8 = vadd.f32 %v2514_v3, %v10672_v35  ;;  %v2785_v22 = vmul.f32 %v10979_v43, %v10979_v43  ;;  %v2844_v38 = vadd.f32 %v2843_v61, %v2772_v55  ;;  %v9014_v51 = vld [vmem:[#allocation11 + $0xa04] ss:$16 sps:$4 sm:$0xff]   ;;  %v9017_v61 = vld [vmem:[#allocation11 + $0xa0c] ss:$16 sps:$4 sm:$0xff]  }
 0x5f7   :  { %13465 = vst [vmem:[#allocation127_spill] sm:$0xff] %v10991_v45  ;;  %v2786_v19 = vmul.f32 %v10983_v56, %v10983_v56  ;;  %4838 = vmatpush1.bf16.msra.mxu0 %v9000_v60  ;;  %v2775_v47 = vmul.f32 %v10991_v45, %v10991_v45  ;;  %v11007_v52 = vadd.f32 %v2516_v4, %v10643_v0 }
 0x5f8   :  { %13466 = vst [vmem:[#allocation128_spill] sm:$0xff] %v10998_v8  ;;  %2840 = vadd.xlane.f32.xlu0 %v2839_v14  ;;  %v2592_v3 = vadd.f32 %v2591_v28, %v10991_v45  ;;  %5064 = vmatpush1.bf16.msra.mxu1 %v9003_v31  ;;  %v11011_v1 = vadd.f32 %v2518_v46, %v10672_v35 }
 0x5f9   :  { %13467 = vst [vmem:[#allocation129_spill] sm:$0xff] %v11007_v52  ;;  %v11015_v55 = vadd.f32 %v10915_v54, %v10567_v32  ;;  %v2776_v60 = vmul.f32 %v10998_v8, %v10998_v8  ;;  %4839 = vmatprep.subr.bf16.mxu0 %v9008_v18  ;;  %5065 = vmatprep.subr.bf16.mxu1 %v9011_v6  ;;  %v9012_v18 = vld [vmem:[#allocation11 + $0xa00] ss:$16 sps:$4 sm:$0xff]  }
 0x5fa   :  { %13468 = vst [vmem:[#allocation130_spill] sm:$0xff] %v11011_v1  ;;  %v2597_v14 = vadd.f32 %v2596_v40, %v11007_v52  ;;  %v2779_v28 = vmul.f32 %v11007_v52, %v11007_v52  ;;  %2845 = vadd.xlane.f32.xlu1 %v2844_v38  ;;  %v2593_v31 = vadd.f32 %v2592_v3, %v10998_v8  ;;  %v9015_v38 = vld [vmem:[#allocation11 + $0xa08] ss:$16 sps:$4 sm:$0xff]   ;;  %v9023_v52 = vld [vmem:[#allocation11 + $0xa2c] ss:$16 sps:$4 sm:$0xff]  }
 0x5fb   :  { %13469 = vst [vmem:[#allocation131_spill] sm:$0xff] %v11015_v55  ;;  %v2848_v4 = vadd.f32 %v2847_v33, %v2775_v47  ;;  %v2780_v54 = vmul.f32 %v11011_v1, %v11011_v1  ;;  %v11027_v46 = vadd.f32 %v10925_v48, %v10571_v16  ;;  %4840 = vmatpush1.bf16.msra.mxu0 %v9006_v23  ;;  %v2522_v47 = vpop.f32.mrb[76].mxu1  ;;  %v9020_v48 = vld [vmem:[#allocation11 + $0xa24] ss:$16 sps:$4 sm:$0xff]  }
 0x5fc   :  { %v2601_v6 = vadd.f32 %v10969_v36, %v10963_v49  ;;  %2594 = vadd.xlane.f32.xlu0 %v2593_v31  ;;  %v2598_v40 = vadd.f32 %v2597_v14, %v11011_v1  ;;  %v2853_v45 = vadd.f32 %v2852_v21, %v2779_v28  ;;  %5066 = vmatpush1.bf16.msra.mxu1 %v9009_v34  ;;  %v2524_v26 = vpop.f32.mrb[77].mxu1  ;;  %v9021_v31 = vld [vmem:[#allocation11 + $0xa28] ss:$16 sps:$4 sm:$0xff]  }
 0x5fd   :  { %13470 = vst [vmem:[#allocation132_spill] sm:$0xff] %v11027_v46  ;;  %v2606_v33 = vadd.f32 %v10983_v56, %v10979_v43  ;;  %v2857_v3 = vadd.f32 %v2782_v44, %v2781_v42  ;;  %4841 = vmatprep.subr.bf16.mxu0 %v9014_v51  ;;  %5067 = vmatprep.subr.bf16.mxu1 %v9017_v61  ;;  %v2526_v28 = vpop.f32.mrb[78].mxu1  ;;  %v118_v36 = vld [vmem:[#allocation8 + $0x22] ss:$8 sm:$0xf] }
 0x5fe   :  { %v2862_v23 = vadd.f32 %v2786_v19, %v2785_v22  ;;  %v11035_v8 = vadd.f32 %v2522_v47, %v10643_v0  ;;  %2599 = vadd.xlane.f32.xlu1 %v2598_v40  ;;  %v2789_v21 = vmul.f32 %v11015_v55, %v11015_v55  ;;  %v2849_v34 = vadd.f32 %v2848_v4, %v2776_v60  ;;  %v9018_v19 = vld [vmem:[#allocation11 + $0xa20] ss:$16 sps:$4 sm:$0xff]   ;;  %v2528_v60 = vpop.f32.mrb[79].mxu1 }
 0x5ff   :  { %v11040_v14 = vadd.f32 %v2524_v26, %v10672_v35  ;;  %v2790_v42 = vmul.f32 %v11027_v46, %v11027_v46  ;;  %v11046_v44 = vadd.f32 %v10932_v24, %v10567_v32  ;;  %v2854_v22 = vadd.f32 %v2853_v45, %v2780_v54  ;;  %4842 = vmatpush1.bf16.msra.mxu0 %v9012_v18  ;;  %v9026_v45 = vld [vmem:[#allocation11 + $0xa44] ss:$16 sps:$4 sm:$0xff]   ;;  %v9029_v54 = vld [vmem:[#allocation11 + $0xa4c] ss:$16 sps:$4 sm:$0xff]   ;;  %v9024_v47 = vld [vmem:[#allocation11 + $0xa40] ss:$16 sps:$4 sm:$0xff]  }
 0x600   :  { %13471 = vst [vmem:[#allocation133_spill] sm:$0xff] %v11035_v8  ;;  %v2783_v51 = vmul.f32 %v11035_v8, %v11035_v8  ;;  %v11051_v61 = vadd.f32 %v2526_v28, %v10643_v0  ;;  %2850 = vadd.xlane.f32.xlu0 %v2849_v34  ;;  %v2602_v26 = vadd.f32 %v2601_v6, %v11035_v8 }
 0x601   :  { %13472 = vst [vmem:[#allocation134_spill] sm:$0xff] %v11040_v14  ;;  %13473 = vst [vmem:[#allocation135_spill] sm:$0xff] %v11046_v44  ;;  %5068 = vmatpush1.bf16.msra.mxu1 %v9015_v38  ;;  %v11055_v4 = vadd.f32 %v2528_v60, %v10672_v35  ;;  %v11059_v32 = vadd.f32 %v10936_v57, %v10571_v16  ;;  %v2784_v24 = vmul.f32 %v11040_v14, %v11040_v14  ;;  %v9032_v60 = vld [vmem:[#allocation11 + $0xa64] ss:$16 sps:$4 sm:$0xff]  }
 0x602   :  { %13474 = vst [vmem:[#allocation136_spill] sm:$0xff] %v11051_v61  ;;  %4843 = vmatprep.subr.bf16.mxu0 %v9020_v48  ;;  %5069 = vmatprep.subr.bf16.mxu1 %v9023_v52  ;;  %v2607_v18 = vadd.f32 %v2606_v33, %v11051_v61  ;;  %v2787_v6 = vmul.f32 %v11051_v61, %v11051_v61 }
 0x603   :  { %13475 = vst [vmem:[#allocation137_spill] sm:$0xff] %v11055_v4  ;;  %13476 = vst [vmem:[#allocation138_spill] sm:$0xff] %v11059_v32  ;;  %2855 = vadd.xlane.f32.xlu1 %v2854_v22  ;;  %v2603_v40 = vadd.f32 %v2602_v26, %v11040_v14  ;;  %v2858_v38 = vadd.f32 %v2857_v3, %v2783_v51  ;;  %v2933_v16 = vmul.f32 %v10575_v27, %v10575_v27  ;;  %v9027_v3 = vld [vmem:[#allocation11 + $0xa48] ss:$16 sps:$4 sm:$0xff]   ;;  %v9035_v26 = vld [vmem:[#allocation11 + $0xa6c] ss:$16 sps:$4 sm:$0xff]  }
 0x604   :  { %v2934_v57 = vmul.f32 %v10596_v59, %v10596_v59  ;;  %v2788_v52 = vmul.f32 %v11055_v4, %v11055_v4  ;;  %4844 = vmatpush1.bf16.msra.mxu0 %v9018_v19  ;;  %v2611_v33 = vadd.f32 %v11027_v46, %v11015_v55  ;;  %v2608_v48 = vadd.f32 %v2607_v18, %v11055_v4  ;;  %v2532_v19 = vpop.f32.mrb[80].mxu1  ;;  %v9030_v4 = vld [vmem:[#allocation11 + $0xa60] ss:$16 sps:$4 sm:$0xff]  }
 0x605   :  { %2604 = vadd.xlane.f32.xlu0 %v2603_v40  ;;  %v2863_v34 = vadd.f32 %v2862_v23, %v2787_v6  ;;  %5070 = vmatpush1.bf16.msra.mxu1 %v9021_v31  ;;  %v2937_v28 = vmul.f32 %v10600_v63, %v10600_v63  ;;  %v2793_v22 = vmul.f32 %v11046_v44, %v11046_v44  ;;  %v2534_v6 = vpop.f32.mrb[81].mxu1 }
 0x606   :  { %v2794_v51 = vmul.f32 %v11059_v32, %v11059_v32  ;;  %4845 = vmatprep.subr.bf16.mxu0 %v9026_v45  ;;  %5071 = vmatprep.subr.bf16.mxu1 %v9029_v54  ;;  %v2938_v18 = vmul.f32 %v10604_v2, %v10604_v2  ;;  %v2867_v23 = vadd.f32 %v2790_v42, %v2789_v21  ;;  %v2536_v54 = vpop.f32.mrb[82].mxu1 }
 0x607   :  { %v11085_v31 = vadd.f32 %v2532_v19, %v10643_v0  ;;  %2609 = vadd.xlane.f32.xlu1 %v2608_v48  ;;  %v2859_v40 = vadd.f32 %v2858_v38, %v2784_v24  ;;  %v2935_v8 = vmul.f32 %v10632_v10, %v10632_v10  ;;  %v2616_v61 = vadd.f32 %v11059_v32, %v11046_v44  ;;  %v2538_v24 = vpop.f32.mrb[83].mxu1  ;;  %v9033_v48 = vld [vmem:[#allocation11 + $0xa68] ss:$16 sps:$4 sm:$0xff]  }
 0x608   :  { %v11092_v45 = vadd.f32 %v2534_v6, %v10672_v35  ;;  %v2864_v14 = vadd.f32 %v2863_v34, %v2788_v52  ;;  %4846 = vmatpush1.bf16.msra.mxu0 %v9024_v47  ;;  %v11097_v42 = vadd.f32 %v2536_v54, %v10643_v0  ;;  %v2872_v19 = vadd.f32 %v2794_v51, %v2793_v22 }
 0x609   :  { %13477 = vst [vmem:[#allocation139_spill] sm:$0xff] %v11085_v31  ;;  %v2791_v21 = vmul.f32 %v11085_v31, %v11085_v31  ;;  %2860 = vadd.xlane.f32.xlu0 %v2859_v40  ;;  %v2612_v38 = vadd.f32 %v2611_v33, %v11085_v31  ;;  %5072 = vmatpush1.bf16.msra.mxu1 %v9027_v3 }
 0x60a   :  { %13478 = vst [vmem:[#allocation140_spill] sm:$0xff] %v11092_v45  ;;  %13479 = vst [vmem:[#allocation141_spill] sm:$0xff] %v11097_v42  ;;  %v2792_v6 = vmul.f32 %v11092_v45, %v11092_v45  ;;  %v11103_v52 = vadd.f32 %v2538_v24, %v10672_v35  ;;  %4847 = vmatprep.subr.bf16.mxu0 %v9032_v60  ;;  %5073 = vmatprep.subr.bf16.mxu1 %v9035_v26  ;;  %v9041_v26 = vld [vmem:[#allocation11 + $0xa8c] ss:$16 sps:$4 sm:$0xff]  }
 0x60b   :  { %v2617_v47 = vadd.f32 %v2616_v61, %v11097_v42  ;;  %v2795_v0 = vmul.f32 %v11097_v42, %v11097_v42  ;;  %2865 = vadd.xlane.f32.xlu1 %v2864_v14  ;;  %v2613_v34 = vadd.f32 %v2612_v38, %v11092_v45  ;;  %v2868_v33 = vadd.f32 %v2867_v23, %v2791_v21  ;;  %v9038_v61 = vld [vmem:[#allocation11 + $0xa84] ss:$16 sps:$4 sm:$0xff]  }
 0x60c   :  { %13480 = vst [vmem:[#allocation142_spill] sm:$0xff] %v11103_v52  ;;  %v3011_v3 = vadd.f32 %v2934_v57, %v2933_v16  ;;  %v2939_v22 = vmul.f32 %v10646_v9, %v10646_v9  ;;  %4848 = vmatpush1.bf16.msra.mxu0 %v9030_v4  ;;  %v2796_v35 = vmul.f32 %v11103_v52, %v11103_v52 }
 0x60d   :  { %2614 = vadd.xlane.f32.xlu0 %v2613_v34  ;;  %v2618_v51 = vadd.f32 %v2617_v47, %v11103_v52  ;;  %v2873_v60 = vadd.f32 %v2872_v19, %v2795_v0  ;;  %5074 = vmatpush1.bf16.msra.mxu1 %v9033_v48  ;;  %v3016_v40 = vadd.f32 %v2938_v18, %v2937_v28 }
 0x60e   :  { %v2936_v14 = vmul.f32 %v10664_v58, %v10664_v58  ;;  %v2869_v16 = vadd.f32 %v2868_v33, %v2792_v6  ;;  %v3012_v57 = vadd.f32 %v3011_v3, %v2935_v8  ;;  %4930 = vmatprep.subr.bf16.mxu0 %v9038_v61  ;;  %5156 = vmatprep.subr.bf16.mxu1 %v9041_v26 }
 0x60f   :  { %2619 = vadd.xlane.f32.xlu1 %v2618_v51  ;;  %v2940_v4 = vmul.f32 %v10653_v62, %v10653_v62  ;;  %v2874_v23 = vadd.f32 %v2873_v60, %v2796_v35  ;;  %v3017_v54 = vadd.f32 %v3016_v40, %v2939_v22  ;;  %v11171_v9 = vrot.slane %v118_v36, %v10154_v7 }
 0x610   :  { %v3013_v21 = vadd.f32 %v3012_v57, %v2936_v14  ;;  %v11191_v10 = vrot.slane %v122_v50, %v10170_v37 }
 0x611   :  { %2870 = vadd.xlane.f32.xlu0 %v2869_v16  ;;  %v3018_v24 = vadd.f32 %v3017_v54, %v2940_v4 }
 0x612   :  { %13484 = vst [vmem:[#allocation146_spill] sm:$0xff] %v11191_v10 }
 0x613   :  { %2875 = vadd.xlane.f32.xlu1 %v2874_v23 }
 0x615   :  { %3014 = vadd.xlane.f32.xlu0 %v3013_v21 }
 0x617   :  { %3019 = vadd.xlane.f32.xlu1 %v3018_v24 }
 0x61c   :  { %v2625_v28 = vpop.xlane.xlu0 %2624 }
 0x620   :  { %v2630_v18 = vpop.xlane.xlu0 %2629  ;;  %v2950_v38 = vpop.xlane.xlu1 %2949 }
 0x624   :  { %v2945_v48 = vpop.xlane.xlu0 %2944 }
 0x626   :  { %v2640_v19 = vpop.xlane.xlu1 %2639 }
 0x628   :  { %v2635_v6 = vpop.xlane.xlu0 %2634 }
 0x62a   :  { %v11118_v8 = vpop.xlane.xlu1 %2959 }
 0x62c   :  { %v2955_v47 = vpop.xlane.xlu0 %2954 }
 0x62e   :  { %v11120_v0 = vpop.xlane.xlu1 %2649 }
 0x630   :  { %v11122_v34 = vpop.xlane.xlu0 %2644 }
 0x632   :  { %v11124_v33 = vpop.xlane.xlu1 %2969 }
 0x634   :  { %v11126_v3 = vpop.xlane.xlu0 %2964 }
 0x636   :  { %v11128_v22 = vpop.xlane.xlu1 %2659 }
 0x638   :  { %v11130_v35 = vpop.xlane.xlu0 %2654 }
 0x63a   :  { %v11132_v51 = vpop.xlane.xlu1 %2979 }
 0x63c   :  { %v11134_v60 = vpop.xlane.xlu0 %2974 }
 0x63e   :  { %v11136_v61 = vpop.xlane.xlu1 %2669 }
 0x640   :  { %v11138_v26 = vpop.xlane.xlu0 %2664 }
 0x642   :  { %v11140_v40 = vpop.xlane.xlu1 %2989 }
 0x644   :  { %v11142_v14 = vpop.xlane.xlu0 %2984 }
 0x646   :  { %v11144_v16 = vpop.xlane.xlu1 %2679 }
 0x648   :  { %v11146_v57 = vpop.xlane.xlu0 %2674 }
 0x64a   :  { %v11148_v4 = vpop.xlane.xlu1 %2999 }
 0x64c   :  { %v11150_v23 = vpop.xlane.xlu0 %2994 }
 0x64e   :  { %v11152_v54 = vpop.xlane.xlu1 %2689 }
 0x650   :  { %v11154_v21 = vpop.xlane.xlu0 %2684 }
 0x652   :  { %v11156_v24 = vpop.xlane.xlu1 %3009 }
 0x654   :  { %v11158_v31 = vpop.xlane.xlu0 %3004 }
 0x656   :  { %v11162_v45 = vpop.xlane.xlu1 %2699 }
 0x658   :  { %v11160_v42 = vpop.xlane.xlu0 %2694 }
 0x65c   :  { %v2545_v52 = vpop.xlane.xlu0 %2544 }
 0x65d   :  { %v2701_v1 = vadd.f32 %v2625_v28, %v2545_v52 }
 0x65e   :  { %v2550_v55 = vpop.xlane.xlu1 %2549 }
 0x65f   :  { %v11164_v44 = vmul.f32 0.0009765625, %v2701_v1  ;;  %v2702_v46 = vadd.f32 %v2630_v18, %v2550_v55  ;;  %v11174_v1 = vrot.slane %v118_v36, %v10152_v5  ;;  %v11179_v18 = vrot.slane %v122_v50, %v10154_v7 }
 0x660   :  { %v2801_v32 = vpop.xlane.xlu0 %2800  ;;  %v11200_v7 = vrot.slane %v122_v50, %v10166_v13 }
 0x661   :  { %13481 = vst [vmem:[#allocation143_spill] sm:$0xff] %v11164_v44  ;;  %v11166_v49 = vmul.f32 0.0009765625, %v2702_v46  ;;  %v3021_v43 = vadd.f32 %v2945_v48, %v2801_v32  ;;  %v3053_v53 = vmul.f32 %v11164_v44, %v11164_v44 }
 0x662   :  { %13485 = vst [vmem:[#allocation147_spill] sm:$0xff] %v11200_v7 }
 0x663   :  { %v2806_v56 = vpop.xlane.xlu1 %2805  ;;  %v3037_v15 = vmul.f32 0.0009765625, %v3021_v43  ;;  %v3054_v46 = vmul.f32 %v11166_v49, %v11166_v49  ;;  %v11182_v43 = vrot.slane %v122_v50, %v10152_v5  ;;  %v3497_v5 = vsub.f32 %v10201_v29, %v11164_v44 }
 0x664   :  { %v3022_v11 = vadd.f32 %v2950_v38, %v2806_v56  ;;  %v11185_v56 = vrot.slane %v118_v36, %v10170_v37  ;;  %v11188_v38 = vrot.slane %v118_v36, %v10166_v13 }
 0x665   :  { %v2555_v25 = vpop.xlane.xlu0 %2554  ;;  %v3069_v55 = vsub.f32 %v3037_v15, %v3053_v53 }
 0x666   :  { %v3038_v32 = vmul.f32 0.0009765625, %v3022_v11  ;;  %v2703_v52 = vadd.f32 %v2635_v6, %v2555_v25  ;;  %13482 = vst [vmem:[#allocation144_spill] sm:$0xff] %v11185_v56  ;;  %13483 = vst [vmem:[#allocation145_spill] sm:$0xff] %v11188_v38  ;;  %v13499_v38 = vld [vmem:[#allocation33_spill] sm:$0xff] }
 0x667   :  { %v2560_v28 = vpop.xlane.xlu1 %2559  ;;  %v3085_v48 = vmax.f32 %v3069_v55, 0.0 }
 0x668   :  { %v3070_v15 = vsub.f32 %v3038_v32, %v3054_v46  ;;  %v2704_v53 = vadd.f32 %v2640_v19, %v2560_v28  ;;  %v11193_v25 = vmul.f32 0.0009765625, %v2703_v52  ;;  %v3498_v19 = vsub.f32 %v10208_v30, %v11164_v44 }
 0x669   :  { %v2811_v11 = vpop.xlane.xlu0 %2810  ;;  %v3101_v36 = vadd.f32 1e-05, %v3085_v48 }
 0x66a   :  { %v3086_v62 = vmax.f32 %v3070_v15, 0.0  ;;  %v11202_v55 = vmul.f32 0.0009765625, %v2704_v53  ;;  %v3023_v46 = vadd.f32 %v2955_v47, %v2811_v11  ;;  %v3055_v30 = vmul.f32 %v11193_v25, %v11193_v25  ;;  %v13486_v11 = vld [vmem:[#allocation27_spill] sm:$0xff]  ;;  %v13488_v15 = vld [vmem:[#allocation30_spill] sm:$0xff] }
 0x66b   :  { %9372 = vrsqrt.f32 %v3101_v36 }
 0x66c   :  { %v2816_v32 = vpop.xlane.xlu1 %2815  ;;  %v3102_v50 = vadd.f32 1e-05, %v3086_v62  ;;  %v3039_v47 = vmul.f32 0.0009765625, %v3023_v46  ;;  %v3056_v29 = vmul.f32 %v11202_v55, %v11202_v55  ;;  %v13489_v46 = vld [vmem:[#allocation26_spill] sm:$0xff] }
 0x66d   :  { %v3024_v48 = vadd.f32 %v11118_v8, %v2816_v32 }
 0x66e   :  { %v2565_v53 = vpop.xlane.xlu0 %2564  ;;  %9374 = vrsqrt.f32 %v3102_v50  ;;  %v3071_v36 = vsub.f32 %v3039_v47, %v3055_v30 }
 0x66f   :  { %v3040_v62 = vmul.f32 0.0009765625, %v3024_v48  ;;  %v2705_v8 = vadd.f32 %v11122_v34, %v2565_v53  ;;  %v13491_v48 = vld [vmem:[#allocation29_spill] sm:$0xff]  ;;  %v13496_v53 = vld [vmem:[#allocation32_spill] sm:$0xff] }
 0x670   :  { %v2570_v32 = vpop.xlane.xlu1 %2569  ;;  %v3087_v34 = vmax.f32 %v3071_v36, 0.0 }
 0x671   :  { %v3072_v7 = vsub.f32 %v3040_v62, %v3056_v29  ;;  %v11230_v6 = vmul.f32 0.0009765625, %v2705_v8  ;;  %v2706_v50 = vadd.f32 %v11120_v0, %v2570_v32  ;;  %v13495_v32 = vld [vmem:[#allocation36_spill] sm:$0xff] }
 0x672   :  { %v2821_v30 = vpop.xlane.xlu0 %2820  ;;  %v3103_v8 = vadd.f32 1e-05, %v3087_v34  ;;  %v13498_v34 = vld [vmem:[#allocation34_spill] sm:$0xff] }
 0x673   :  { %v3088_v58 = vmax.f32 %v3072_v7, 0.0  ;;  %v11241_v29 = vmul.f32 0.0009765625, %v2706_v50  ;;  %v3057_v0 = vmul.f32 %v11230_v6, %v11230_v6  ;;  %v3025_v62 = vadd.f32 %v11126_v3, %v2821_v30 }
 0x674   :  { %9376 = vrsqrt.f32 %v3103_v8 }
 0x675   :  { %v2826_v36 = vpop.xlane.xlu1 %2825  ;;  %v3104_v28 = vadd.f32 1e-05, %v3088_v58  ;;  %v3041_v7 = vmul.f32 0.0009765625, %v3025_v62  ;;  %v3058_v50 = vmul.f32 %v11241_v29, %v11241_v29  ;;  %v11261_v41 = vpop.eup %9372 }
 0x676   :  { %v3026_v37 = vadd.f32 %v11124_v33, %v2826_v36  ;;  %13501 = vst [vmem:[#allocation27_spill] sm:$0xff] %v11261_v41  ;;  %v13502_v33 = vsub.f32 %v10184_v12, %v11164_v44  ;;  %v13503_v36 = vsub.f32 %v10181_v20, %v11164_v44  ;;  %v11273_v56 = vmul.f32 %v11261_v41, %v3498_v19 }
 0x677   :  { %v2575_v3 = vpop.xlane.xlu0 %2574  ;;  %9378 = vrsqrt.f32 %v3104_v28  ;;  %v3073_v58 = vsub.f32 %v3041_v7, %v3057_v0  ;;  %v11276_v28 = vmul.f32 %v11261_v41, %v3497_v5  ;;  %v13504_v20 = vsub.f32 %v10178_v17, %v11166_v49 }
 0x678   :  { %v3042_v62 = vmul.f32 0.0009765625, %v3026_v37  ;;  %v2707_v13 = vadd.f32 %v11130_v35, %v2575_v3  ;;  %v3560_v8 = vmul.f32 %v11261_v41, %v13502_v33  ;;  %v3559_v52 = vmul.f32 %v11261_v41, %v13503_v36  ;;  %v11278_v37 = vpop.eup %9374 }
 0x679   :  { %v2580_v10 = vpop.xlane.xlu1 %2579  ;;  %v3089_v35 = vmax.f32 %v3073_v58, 0.0  ;;  %v3564_v33 = vmul.f32 %v11278_v37, %v13504_v20  ;;  %v13505_v5 = vsub.f32 %v10175_v39, %v11166_v49 }
 0x67a   :  { %v3074_v0 = vsub.f32 %v3042_v62, %v3058_v50  ;;  %v11280_v7 = vmul.f32 0.0009765625, %v2707_v13  ;;  %v2708_v12 = vadd.f32 %v11128_v22, %v2580_v10  ;;  %v3645_v19 = vmul.f32 %v11171_v9, %v3560_v8 }
 0x67b   :  { %v2831_v3 = vpop.xlane.xlu0 %2830  ;;  %v3563_v36 = vmul.f32 %v11278_v37, %v13505_v5  ;;  %v3644_v58 = vmul.f32 %v11174_v1, %v3559_v52  ;;  %v3105_v50 = vadd.f32 1e-05, %v3089_v35  ;;  %v3649_v20 = vmul.f32 %v11171_v9, %v3564_v33 }
 0x67c   :  { %v3090_v13 = vmax.f32 %v3074_v0, 0.0  ;;  %v11293_v62 = vmul.f32 0.0009765625, %v2708_v12  ;;  %v3059_v10 = vmul.f32 %v11280_v7, %v11280_v7  ;;  %v3027_v17 = vadd.f32 %v11134_v60, %v2831_v3 }
 0x67d   :  { %v3730_v8 = vadd.f32 %v11179_v18, %v3645_v19  ;;  %v3648_v39 = vmul.f32 %v11174_v1, %v3563_v36  ;;  %9380 = vrsqrt.f32 %v3105_v50  ;;  %v3734_v30 = vadd.f32 %v11179_v18, %v3649_v20 }
 0x67e   :  { %v2836_v22 = vpop.xlane.xlu1 %2835  ;;  %v3106_v5 = vadd.f32 1e-05, %v3090_v13  ;;  %v3060_v52 = vmul.f32 %v11293_v62, %v11293_v62  ;;  %v3043_v0 = vmul.f32 0.0009765625, %v3027_v17  ;;  %v3729_v60 = vadd.f32 %v11182_v43, %v3644_v58  ;;  %v11308_v36 = vpop.eup %9376 }
 0x67f   :  { %v3028_v35 = vadd.f32 %v11132_v51, %v2836_v22  ;;  %v3794_v41 = vmax.f32 %v3730_v8, 0.0  ;;  %v3733_v19 = vadd.f32 %v11182_v43, %v3648_v39  ;;  %v3798_v44 = vmax.f32 %v3734_v30, 0.0  ;;  %v13506_v51 = vld [vmem:[#allocation44_spill] sm:$0xff] }
 0x680   :  { %v2585_v12 = vpop.xlane.xlu0 %2584  ;;  %9382 = vrsqrt.f32 %v3106_v5  ;;  %v3075_v50 = vsub.f32 %v3043_v0, %v3059_v10  ;;  %v3793_v47 = vmax.f32 %v3729_v60, 0.0  ;;  %v3520_v17 = vsub.f32 %v13506_v51, %v11280_v7 }
 0x681   :  { %v3044_v3 = vmul.f32 0.0009765625, %v3028_v35  ;;  %v2709_v33 = vadd.f32 %v11138_v26, %v2585_v12  ;;  %v11312_v22 = vpop.eup %9378  ;;  %v3797_v5 = vmax.f32 %v3733_v19, 0.0  ;;  %v4018_v39 = vpack.c.bf16 %v3798_v44, %v3794_v41  ;;  %v9039_v41 = vld [vmem:[#allocation11 + $0xa88] ss:$16 sps:$4 sm:$0xff]  }
 0x682   :  { %v3091_v26 = vmax.f32 %v3075_v50, 0.0  ;;  %v13507_v10 = vsub.f32 %v13486_v11, %v11193_v25  ;;  %v13508_v0 = vsub.f32 %v13488_v15, %v11202_v55 }
 0x683   :  { %v2590_v13 = vpop.xlane.xlu1 %2589  ;;  %v3076_v20 = vsub.f32 %v3044_v3, %v3060_v52  ;;  %v11314_v8 = vmul.f32 0.0009765625, %v2709_v33  ;;  %v9036_v33 = vld [vmem:[#allocation11 + $0xa80] ss:$16 sps:$4 sm:$0xff]   ;;  %4849 = vmatprep.mubr.bf16.mxu0 %v4018_v39  ;;  %5075 = vmatprep.mubr.bf16.mxu1 %v4018_v39  ;;  %v4017_v11 = vpack.c.bf16 %v3797_v5, %v3793_v47  ;;  %v13509_v5 = vsub.f32 %v13489_v46, %v11193_v25 }
 0x684   :  { %v2710_v58 = vadd.f32 %v11136_v61, %v2590_v13  ;;  %v3568_v30 = vmul.f32 %v11308_v36, %v13507_v10  ;;  %v3572_v12 = vmul.f32 %v11312_v22, %v13508_v0  ;;  %v3107_v44 = vadd.f32 1e-05, %v3091_v26  ;;  %v9044_v13 = vld [vmem:[#allocation11 + $0xaa4] ss:$16 sps:$4 sm:$0xff]  }
 0x685   :  { %v2841_v35 = vpop.xlane.xlu0 %2840  ;;  %v3092_v60 = vmax.f32 %v3076_v20, 0.0  ;;  %v3061_v61 = vmul.f32 %v11314_v8, %v11314_v8  ;;  %v9047_v20 = vld [vmem:[#allocation11 + $0xaac] ss:$16 sps:$4 sm:$0xff]   ;;  %4850 = vmatmul.mubr.bf16.vlgmr.msra.gmra.mrb[88].mxu0 %v4017_v11  ;;  %5076 = vmatmul.mubr.bf16.vlgmr.msra.gmra.mrb[84].mxu1 %v4017_v11  ;;  %v3567_v39 = vmul.f32 %v11308_v36, %v13509_v5 }
 0x686   :  { %v11325_v52 = vmul.f32 0.0009765625, %v2710_v58  ;;  %v3029_v3 = vadd.f32 %v11142_v14, %v2841_v35  ;;  %v3653_v50 = vmul.f32 %v11171_v9, %v3568_v30  ;;  %v3657_v15 = vmul.f32 %v11171_v9, %v3572_v12  ;;  %4931 = vmatpush1.bf16.msra.mxu0 %v9036_v33  ;;  %5157 = vmatpush1.bf16.msra.mxu1 %v9039_v41 }
 0x687   :  { %v2846_v19 = vpop.xlane.xlu1 %2845  ;;  %v3108_v58 = vadd.f32 1e-05, %v3092_v60  ;;  %9384 = vrsqrt.f32 %v3107_v44  ;;  %v11341_v30 = vpop.eup %9380  ;;  %v9045_v44 = vld [vmem:[#allocation11 + $0xaa8] ss:$16 sps:$4 sm:$0xff]   ;;  %v3652_v5 = vmul.f32 %v11174_v1, %v3567_v39  ;;  %4932 = vmatprep.subr.bf16.mxu0 %v9044_v13  ;;  %5158 = vmatprep.subr.bf16.mxu1 %v9047_v20  ;;  %v13511_v13 = vsub.f32 %v13495_v32, %v11230_v6 }
 0x688   :  { %v3045_v10 = vmul.f32 0.0009765625, %v3029_v3  ;;  %v3062_v0 = vmul.f32 %v11325_v52, %v11325_v52  ;;  %v3030_v14 = vadd.f32 %v11140_v40, %v2846_v19  ;;  %v3738_v35 = vadd.f32 %v11179_v18, %v3653_v50  ;;  %v9042_v3 = vld [vmem:[#allocation11 + $0xaa0] ss:$16 sps:$4 sm:$0xff]  }
 0x689   :  { %v2595_v26 = vpop.xlane.xlu0 %2594  ;;  %v3742_v47 = vadd.f32 %v11179_v18, %v3657_v15  ;;  %9386 = vrsqrt.f32 %v3108_v58  ;;  %v13510_v15 = vsub.f32 %v13491_v48, %v11202_v55  ;;  %v3576_v20 = vmul.f32 %v11341_v30, %v13511_v13 }
 0x68a   :  { %v3077_v12 = vsub.f32 %v3045_v10, %v3061_v61  ;;  %v3046_v60 = vmul.f32 0.0009765625, %v3030_v14  ;;  %v2711_v40 = vadd.f32 %v11146_v57, %v2595_v26  ;;  %v3802_v11 = vmax.f32 %v3738_v35, 0.0  ;;  %v11349_v61 = vpop.eup %9382  ;;  %v9050_v10 = vld [vmem:[#allocation11 + $0xac4] ss:$16 sps:$4 sm:$0xff]   ;;  %v9053_v14 = vld [vmem:[#allocation11 + $0xacc] ss:$16 sps:$4 sm:$0xff]   ;;  %4933 = vmatpush1.bf16.msra.mxu0 %v9042_v3  ;;  %5159 = vmatpush1.bf16.msra.mxu1 %v9045_v44 }
 0x68b   :  { %v2600_v19 = vpop.xlane.xlu1 %2599  ;;  %v3806_v50 = vmax.f32 %v3742_v47, 0.0  ;;  %v3571_v46 = vmul.f32 %v11312_v22, %v13510_v15  ;;  %v3737_v47 = vadd.f32 %v11182_v43, %v3652_v5  ;;  %v9048_v15 = vld [vmem:[#allocation11 + $0xac0] ss:$16 sps:$4 sm:$0xff]   ;;  %v9056_v5 = vld [vmem:[#allocation11 + $0xae4] ss:$16 sps:$4 sm:$0xff]   ;;  %4934 = vmatprep.subr.bf16.mxu0 %v9050_v10  ;;  %5160 = vmatprep.subr.bf16.mxu1 %v9053_v14  ;;  %v13513_v13 = vsub.f32 %v13496_v53, %v11230_v6 }
 0x68c   :  { %v3093_v58 = vmax.f32 %v3077_v12, 0.0  ;;  %v3078_v57 = vsub.f32 %v3046_v60, %v3062_v0  ;;  %v11351_v33 = vmul.f32 0.0009765625, %v2711_v40  ;;  %v2712_v41 = vadd.f32 %v11144_v16, %v2600_v19  ;;  %v9051_v60 = vld [vmem:[#allocation11 + $0xac8] ss:$16 sps:$4 sm:$0xff]   ;;  %v9054_v10 = vld [vmem:[#allocation11 + $0xae0] ss:$16 sps:$4 sm:$0xff]  }
 0x68d   :  { %v2851_v26 = vpop.xlane.xlu0 %2850  ;;  %v4022_v35 = vpack.c.bf16 %v3806_v50, %v3802_v11  ;;  %v3656_v48 = vmul.f32 %v11174_v1, %v3571_v46  ;;  %v3801_v32 = vmax.f32 %v3737_v47, 0.0  ;;  %v13512_v50 = vsub.f32 %v13498_v34, %v11241_v29  ;;  %v9057_v14 = vld [vmem:[#allocation11 + $0xae8] ss:$16 sps:$4 sm:$0xff]  }
 0x68e   :  { %v3109_v39 = vadd.f32 1e-05, %v3093_v58  ;;  %v3094_v0 = vmax.f32 %v3078_v57, 0.0  ;;  %v11360_v12 = vmul.f32 0.0009765625, %v2712_v41  ;;  %v3063_v16 = vmul.f32 %v11351_v33, %v11351_v33  ;;  %4935 = vmatpush1.bf16.msra.mxu0 %v9048_v15  ;;  %5161 = vmatpush1.bf16.msra.mxu1 %v9051_v60  ;;  %v9065_v15 = vld [vmem:[#allocation11 + $0xb0c] ss:$16 sps:$4 sm:$0xff]  }
 0x68f   :  { %v3031_v40 = vadd.f32 %v11150_v23, %v2851_v26  ;;  %4859 = vmatprep.mubr.bf16.mxu0 %v4022_v35  ;;  %5085 = vmatprep.mubr.bf16.mxu1 %v4022_v35  ;;  %v3741_v11 = vadd.f32 %v11182_v43, %v3656_v48  ;;  %v3580_v46 = vmul.f32 %v11349_v61, %v13512_v50  ;;  %v9059_v23 = vld [vmem:[#allocation11 + $0xaec] ss:$16 sps:$4 sm:$0xff]  }
 0x690   :  { %v2856_v19 = vpop.xlane.xlu1 %2855  ;;  %9388 = vrsqrt.f32 %v3109_v39  ;;  %v3110_v58 = vadd.f32 1e-05, %v3094_v0  ;;  %v3064_v3 = vmul.f32 %v11360_v12, %v11360_v12  ;;  %v3661_v35 = vmul.f32 %v11171_v9, %v3576_v20  ;;  %4936 = vmatprep.subr.bf16.mxu0 %v9056_v5  ;;  %5162 = vmatprep.subr.bf16.mxu1 %v9059_v23  ;;  %v9063_v23 = vld [vmem:[#allocation11 + $0xb08] ss:$16 sps:$4 sm:$0xff]  }
 0x691   :  { %v3032_v44 = vadd.f32 %v11148_v4, %v2856_v19  ;;  %v3047_v57 = vmul.f32 0.0009765625, %v3031_v40  ;;  %v3805_v41 = vmax.f32 %v3741_v11, 0.0  ;;  %v3665_v34 = vmul.f32 %v11171_v9, %v3580_v46  ;;  %v11380_v39 = vpop.eup %9384 }
 0x692   :  { %v2605_v26 = vpop.xlane.xlu0 %2604  ;;  %9390 = vrsqrt.f32 %v3110_v58  ;;  %v3575_v4 = vmul.f32 %v11341_v30, %v13513_v13  ;;  %v3746_v19 = vadd.f32 %v11179_v18, %v3661_v35  ;;  %v13515_v58 = vsub.f32 %v13499_v38, %v11241_v29  ;;  %4937 = vmatpush1.bf16.msra.mxu0 %v9054_v10  ;;  %5163 = vmatpush1.bf16.msra.mxu1 %v9057_v14  ;;  %v9060_v38 = vld [vmem:[#allocation11 + $0xb00] ss:$16 sps:$4 sm:$0xff]  }
 0x693   :  { %v3048_v48 = vmul.f32 0.0009765625, %v3032_v44  ;;  %v2713_v47 = vadd.f32 %v11154_v21, %v2605_v26  ;;  %v3079_v0 = vsub.f32 %v3047_v57, %v3063_v16  ;;  %v4021_v40 = vpack.c.bf16 %v3805_v41, %v3801_v32  ;;  %v9062_v21 = vld [vmem:[#allocation11 + $0xb04] ss:$16 sps:$4 sm:$0xff]   ;;  %v11384_v60 = vpop.eup %9386  ;;  %5164 = vmatprep.subr.bf16.mxu1 %v9065_v15 }
 0x694   :  { %v2610_v20 = vpop.xlane.xlu1 %2609  ;;  %v3750_v11 = vadd.f32 %v11179_v18, %v3665_v34  ;;  %13514 = vst [vmem:[#allocation30_spill] sm:$0xff] %v11384_v60  ;;  %v3579_v16 = vmul.f32 %v11349_v61, %v13515_v58  ;;  %v3810_v5 = vmax.f32 %v3746_v19, 0.0  ;;  %v3660_v41 = vmul.f32 %v11174_v1, %v3575_v4  ;;  %4938 = vmatprep.subr.bf16.mxu0 %v9062_v21  ;;  %v9068_v4 = vld [vmem:[#allocation11 + $0xb24] ss:$16 sps:$4 sm:$0xff]  }
 0x695   :  { %v3080_v50 = vsub.f32 %v3048_v48, %v3064_v3  ;;  %v11386_v53 = vmul.f32 0.0009765625, %v2713_v47  ;;  %v2714_v46 = vadd.f32 %v11152_v54, %v2610_v20  ;;  %v3095_v32 = vmax.f32 %v3079_v0, 0.0  ;;  %4860 = vmatmul.mubr.bf16.gmra.mrb[92].mxu0 %v4021_v40  ;;  %5086 = vmatmul.mubr.bf16.gmra.mrb[88].mxu1 %v4021_v40  ;;  %v9071_v40 = vld [vmem:[#allocation11 + $0xb2c] ss:$16 sps:$4 sm:$0xff]  }
 0x696   :  { %v2861_v44 = vpop.xlane.xlu0 %2860  ;;  %v3814_v57 = vmax.f32 %v3750_v11, 0.0  ;;  %v3664_v13 = vmul.f32 %v11174_v1, %v3579_v16  ;;  %v3745_v0 = vadd.f32 %v11182_v43, %v3660_v41  ;;  %4939 = vmatpush1.bf16.msra.mxu0 %v9060_v38  ;;  %5165 = vmatpush1.bf16.msra.mxu1 %v9063_v23  ;;  %v3584_v41 = vmul.f32 %v11380_v39, %v3520_v17 }
 0x697   :  { %v3096_v26 = vmax.f32 %v3080_v50, 0.0  ;;  %v11394_v3 = vmul.f32 0.0009765625, %v2714_v46  ;;  %v3065_v54 = vmul.f32 %v11386_v53, %v11386_v53  ;;  %v3033_v35 = vadd.f32 %v11158_v31, %v2861_v44  ;;  %v13516_v46 = vld [vmem:[#allocation41_spill] sm:$0xff]  ;;  %4940 = vmatprep.subr.bf16.mxu0 %v9068_v4  ;;  %5166 = vmatprep.subr.bf16.mxu1 %v9071_v40  ;;  %v9072_v40 = vld [vmem:[#allocation11 + $0xb40] ss:$16 sps:$4 sm:$0xff]  }
 0x698   :  { %v3111_v34 = vadd.f32 1e-05, %v3095_v32  ;;  %v2866_v48 = vpop.xlane.xlu1 %2865  ;;  %v4026_v47 = vpack.c.bf16 %v3814_v57, %v3810_v5  ;;  %v3749_v14 = vadd.f32 %v11182_v43, %v3664_v13  ;;  %v3809_v11 = vmax.f32 %v3745_v0, 0.0  ;;  %v9069_v44 = vld [vmem:[#allocation11 + $0xb28] ss:$16 sps:$4 sm:$0xff]  }
 0x699   :  { %v3112_v20 = vadd.f32 1e-05, %v3096_v26  ;;  %v3049_v19 = vmul.f32 0.0009765625, %v3033_v35  ;;  %v3066_v31 = vmul.f32 %v11394_v3, %v11394_v3  ;;  %v3034_v10 = vadd.f32 %v11156_v24, %v2866_v48  ;;  %v9066_v24 = vld [vmem:[#allocation11 + $0xb20] ss:$16 sps:$4 sm:$0xff]  }
 0x69a   :  { %9392 = vrsqrt.f32 %v3111_v34  ;;  %4869 = vmatprep.mubr.bf16.mxu0 %v4026_v47  ;;  %5095 = vmatprep.mubr.bf16.mxu1 %v4026_v47  ;;  %v2615_v50 = vpop.xlane.xlu0 %2614  ;;  %v3524_v21 = vsub.f32 %v13516_v46, %v11293_v62  ;;  %v11407_v15 = vpop.eup %9388  ;;  %v3813_v5 = vmax.f32 %v3749_v14, 0.0  ;;  %v13517_v35 = vld [vmem:[#allocation42_spill] sm:$0xff]  ;;  %v9077_v13 = vld [vmem:[#allocation11 + $0xb4c] ss:$16 sps:$4 sm:$0xff]   ;;  %v3669_v17 = vmul.f32 %v11171_v9, %v3584_v41 }
 0x69b   :  { %9394 = vrsqrt.f32 %v3112_v20  ;;  %v3081_v58 = vsub.f32 %v3049_v19, %v3065_v54  ;;  %v3050_v16 = vmul.f32 0.0009765625, %v3034_v10  ;;  %v2715_v32 = vadd.f32 %v11160_v42, %v2615_v50  ;;  %v9074_v47 = vld [vmem:[#allocation11 + $0xb44] ss:$16 sps:$4 sm:$0xff]   ;;  %4941 = vmatpush1.bf16.msra.mxu0 %v9066_v24  ;;  %5167 = vmatpush1.bf16.msra.mxu1 %v9069_v44  ;;  %v9083_v24 = vld [vmem:[#allocation11 + $0xb6c] ss:$16 sps:$4 sm:$0xff]  }
 0x69c   :  { %v2620_v57 = vpop.xlane.xlu1 %2619  ;;  %v3588_v26 = vmul.f32 %v11384_v60, %v3524_v21  ;;  %v3519_v34 = vsub.f32 %v13517_v35, %v11280_v7  ;;  %v11417_v54 = vpop.eup %9390  ;;  %v4025_v51 = vpack.c.bf16 %v3813_v5, %v3809_v11  ;;  %v13518_v19 = vld [vmem:[#allocation40_spill] sm:$0xff]  ;;  %v3754_v46 = vadd.f32 %v11179_v18, %v3669_v17  ;;  %4942 = vmatprep.subr.bf16.mxu0 %v9074_v47 }
 0x69d   :  { %v3097_v42 = vmax.f32 %v3081_v58, 0.0  ;;  %v3082_v38 = vsub.f32 %v3050_v16, %v3066_v31  ;;  %v11419_v23 = vmul.f32 0.0009765625, %v2715_v32  ;;  %v2716_v48 = vadd.f32 %v11162_v45, %v2620_v57  ;;  %v9075_v45 = vld [vmem:[#allocation11 + $0xb48] ss:$16 sps:$4 sm:$0xff]   ;;  %v9080_v16 = vld [vmem:[#allocation11 + $0xb64] ss:$16 sps:$4 sm:$0xff]   ;;  %5168 = vmatprep.subr.bf16.mxu1 %v9077_v13 }
 0x69e   :  { %v2871_v0 = vpop.xlane.xlu0 %2870  ;;  %v3673_v20 = vmul.f32 %v11171_v9, %v3588_v26  ;;  %v3523_v4 = vsub.f32 %v13518_v19, %v11293_v62  ;;  %v3583_v31 = vmul.f32 %v11380_v39, %v3519_v34  ;;  %4870 = vmatmul.mubr.bf16.gmra.mrb[96].mxu0 %v4025_v51  ;;  %5096 = vmatmul.mubr.bf16.gmra.mrb[92].mxu1 %v4025_v51  ;;  %v3818_v44 = vmax.f32 %v3754_v46, 0.0  ;;  %v9078_v47 = vld [vmem:[#allocation11 + $0xb60] ss:$16 sps:$4 sm:$0xff]   ;;  %v9081_v13 = vld [vmem:[#allocation11 + $0xb68] ss:$16 sps:$4 sm:$0xff]  }
 0x69f   :  { %v3113_v10 = vadd.f32 1e-05, %v3097_v42  ;;  %v3098_v14 = vmax.f32 %v3082_v38, 0.0  ;;  %v11426_v50 = vmul.f32 0.0009765625, %v2716_v48  ;;  %v3067_v57 = vmul.f32 %v11419_v23, %v11419_v23  ;;  %4943 = vmatpush1.bf16.msra.mxu0 %v9072_v40  ;;  %5169 = vmatpush1.bf16.msra.mxu1 %v9075_v45  ;;  %v13519_v48 = vld [vmem:[#allocation52_spill] sm:$0xff] }
 0x6a0   :  { %v2876_v11 = vpop.xlane.xlu1 %2875  ;;  %v3758_v21 = vadd.f32 %v11179_v18, %v3673_v20  ;;  %v3587_v58 = vmul.f32 %v11384_v60, %v3523_v4  ;;  %v3668_v5 = vmul.f32 %v11174_v1, %v3583_v31  ;;  %v3528_v51 = vsub.f32 %v13519_v48, %v11314_v8  ;;  %v13521_v31 = vld [vmem:[#allocation49_spill] sm:$0xff]  ;;  %4944 = vmatprep.subr.bf16.mxu0 %v9080_v16 }
 0x6a1   :  { %9396 = vrsqrt.f32 %v3113_v10  ;;  %v3114_v32 = vadd.f32 1e-05, %v3098_v14  ;;  %v3068_v34 = vmul.f32 %v11426_v50, %v11426_v50  ;;  %v13520_v10 = vld [vmem:[#allocation50_spill] sm:$0xff]  ;;  %v3527_v46 = vsub.f32 %v13521_v31, %v11314_v8  ;;  %5170 = vmatprep.subr.bf16.mxu1 %v9083_v24  ;;  %v13523_v24 = vld [vmem:[#allocation60_spill] sm:$0xff] }
 0x6a2   :  { %v3822_v41 = vmax.f32 %v3758_v21, 0.0  ;;  %v3672_v26 = vmul.f32 %v11174_v1, %v3587_v58  ;;  %v3015_v35 = vpop.xlane.xlu0 %3014  ;;  %v3753_v42 = vadd.f32 %v11182_v43, %v3668_v5  ;;  %v3532_v14 = vsub.f32 %v13520_v10, %v11325_v52  ;;  %v9089_v5 = vld [vmem:[#allocation11 + $0xb8c] ss:$16 sps:$4 sm:$0xff]   ;;  %v9092_v31 = vld [vmem:[#allocation11 + $0xba4] ss:$16 sps:$4 sm:$0xff]  }
 0x6a3   :  { %9398 = vrsqrt.f32 %v3114_v32  ;;  %v3035_v38 = vadd.f32 %v3015_v35, %v2871_v0  ;;  %v9086_v0 = vld [vmem:[#allocation11 + $0xb84] ss:$16 sps:$4 sm:$0xff]   ;;  %v3592_v32 = vmul.f32 %v11407_v15, %v3528_v51  ;;  %v3591_v16 = vmul.f32 %v11407_v15, %v3527_v46  ;;  %4945 = vmatpush1.bf16.msra.mxu0 %v9078_v47  ;;  %5171 = vmatpush1.bf16.msra.mxu1 %v9081_v13  ;;  %v13524_v13 = vld [vmem:[#allocation57_spill] sm:$0xff] }
 0x6a4   :  { %v11441_v17 = vpop.eup %9392  ;;  %v4030_v20 = vpack.c.bf16 %v3822_v41, %v3818_v44  ;;  %v3757_v19 = vadd.f32 %v11182_v43, %v3672_v26  ;;  %v3020_v4 = vpop.xlane.xlu1 %3019  ;;  %v3817_v45 = vmax.f32 %v3753_v42, 0.0  ;;  %v3596_v41 = vmul.f32 %v11417_v54, %v3532_v14  ;;  %v13522_v26 = vld [vmem:[#allocation48_spill] sm:$0xff]  ;;  %4946 = vmatprep.subr.bf16.mxu0 %v9086_v0  ;;  %5172 = vmatprep.subr.bf16.mxu1 %v9089_v5 }
 0x6a5   :  { %v11448_v40 = vpop.eup %9394  ;;  %v3051_v21 = vmul.f32 0.0009765625, %v3035_v38  ;;  %v3036_v58 = vadd.f32 %v3020_v4, %v2876_v11  ;;  %v3531_v35 = vsub.f32 %v13522_v26, %v11325_v52  ;;  %v3677_v42 = vmul.f32 %v11171_v9, %v3592_v32  ;;  %v9084_v11 = vld [vmem:[#allocation11 + $0xb80] ss:$16 sps:$4 sm:$0xff]   ;;  %v9087_v38 = vld [vmem:[#allocation11 + $0xb88] ss:$16 sps:$4 sm:$0xff]  }
 0x6a6   :  { %4879 = vmatprep.mubr.bf16.mxu0 %v4030_v20  ;;  %5105 = vmatprep.mubr.bf16.mxu1 %v4030_v20  ;;  %v3821_v44 = vmax.f32 %v3757_v19, 0.0  ;;  %v3536_v51 = vsub.f32 %v13523_v24, %v11351_v33  ;;  %v3681_v19 = vmul.f32 %v11171_v9, %v3596_v41  ;;  %v3676_v14 = vmul.f32 %v11174_v1, %v3591_v16  ;;  %v9090_v41 = vld [vmem:[#allocation11 + $0xba0] ss:$16 sps:$4 sm:$0xff]   ;;  %v9093_v16 = vld [vmem:[#allocation11 + $0xba8] ss:$16 sps:$4 sm:$0xff]  }
 0x6a7   :  { %v3083_v48 = vsub.f32 %v3051_v21, %v3067_v57  ;;  %v3052_v10 = vmul.f32 0.0009765625, %v3036_v58  ;;  %v3595_v4 = vmul.f32 %v11417_v54, %v3531_v35  ;;  %v9095_v57 = vld [vmem:[#allocation11 + $0xbac] ss:$16 sps:$4 sm:$0xff]   ;;  %v3762_v47 = vadd.f32 %v11179_v18, %v3677_v42  ;;  %4947 = vmatpush1.bf16.msra.mxu0 %v9084_v11  ;;  %5173 = vmatpush1.bf16.msra.mxu1 %v9087_v38  ;;  %v13525_v11 = vld [vmem:[#allocation58_spill] sm:$0xff] }
 0x6a8   :  { %v4029_v20 = vpack.c.bf16 %v3821_v44, %v3817_v45  ;;  %v3540_v58 = vsub.f32 %v13524_v13, %v11360_v12  ;;  %v3766_v45 = vadd.f32 %v11179_v18, %v3681_v19  ;;  %v3761_v44 = vadd.f32 %v11182_v43, %v3676_v14  ;;  %4948 = vmatprep.subr.bf16.mxu0 %v9092_v31  ;;  %v9098_v14 = vld [vmem:[#allocation11 + $0xbc4] ss:$16 sps:$4 sm:$0xff]  }
 0x6a9   :  { %v3099_v46 = vmax.f32 %v3083_v48, 0.0  ;;  %v3084_v21 = vsub.f32 %v3052_v10, %v3068_v34  ;;  %v3680_v32 = vmul.f32 %v11174_v1, %v3595_v4  ;;  %v3826_v34 = vmax.f32 %v3762_v47, 0.0  ;;  %5174 = vmatprep.subr.bf16.mxu1 %v9095_v57  ;;  %v13526_v13 = vld [vmem:[#allocation56_spill] sm:$0xff] }
 0x6aa   :  { %4880 = vmatmul.mubr.bf16.gmra.mrb[100].mxu0 %v4029_v20  ;;  %5106 = vmatmul.mubr.bf16.gmra.mrb[96].mxu1 %v4029_v20  ;;  %v3600_v5 = vmul.f32 %v11441_v17, %v3536_v51  ;;  %v3830_v48 = vmax.f32 %v3766_v45, 0.0  ;;  %v3825_v42 = vmax.f32 %v3761_v44, 0.0  ;;  %v3604_v24 = vmul.f32 %v11448_v40, %v3540_v58  ;;  %v9101_v51 = vld [vmem:[#allocation11 + $0xbcc] ss:$16 sps:$4 sm:$0xff]   ;;  %v9096_v45 = vld [vmem:[#allocation11 + $0xbc0] ss:$16 sps:$4 sm:$0xff]  }
 0x6ab   :  { %v11467_v0 = vpop.eup %9396  ;;  %v3115_v26 = vadd.f32 1e-05, %v3099_v46  ;;  %v3100_v35 = vmax.f32 %v3084_v21, 0.0  ;;  %v3765_v10 = vadd.f32 %v11182_v43, %v3680_v32  ;;  %v3535_v38 = vsub.f32 %v13525_v11, %v11351_v33  ;;  %4949 = vmatpush1.bf16.msra.mxu0 %v9090_v41  ;;  %5175 = vmatpush1.bf16.msra.mxu1 %v9093_v16  ;;  %v9099_v32 = vld [vmem:[#allocation11 + $0xbc8] ss:$16 sps:$4 sm:$0xff]   ;;  %v13528_v41 = vld [vmem:[#allocation68_spill] sm:$0xff] }
 0x6ac   :  { %v3685_v4 = vmul.f32 %v11171_v9, %v3600_v5  ;;  %v4034_v46 = vpack.c.bf16 %v3830_v48, %v3826_v34  ;;  %v3689_v47 = vmul.f32 %v11171_v9, %v3604_v24  ;;  %v3539_v58 = vsub.f32 %v13526_v13, %v11360_v12  ;;  %v13527_v44 = vld [vmem:[#allocation65_spill] sm:$0xff]  ;;  %v9104_v48 = vld [vmem:[#allocation11 + $0xbe4] ss:$16 sps:$4 sm:$0xff]   ;;  %4950 = vmatprep.subr.bf16.mxu0 %v9098_v14 }
 0x6ad   :  { %v11472_v20 = vpop.eup %9398  ;;  %9400 = vrsqrt.f32 %v3115_v26  ;;  %v3116_v19 = vadd.f32 1e-05, %v3100_v35  ;;  %v3829_v21 = vmax.f32 %v3765_v10, 0.0  ;;  %v3599_v57 = vmul.f32 %v11441_v17, %v3535_v38  ;;  %5176 = vmatprep.subr.bf16.mxu1 %v9101_v51  ;;  %v13529_v38 = vld [vmem:[#allocation64_spill] sm:$0xff] }
 0x6ae   :  { %v3770_v31 = vadd.f32 %v11179_v18, %v3685_v4  ;;  %v3544_v26 = vsub.f32 %v13527_v44, %v11386_v53  ;;  %4889 = vmatprep.mubr.bf16.mxu0 %v4034_v46  ;;  %5115 = vmatprep.mubr.bf16.mxu1 %v4034_v46  ;;  %v3774_v34 = vadd.f32 %v11179_v18, %v3689_v47  ;;  %v9107_v4 = vld [vmem:[#allocation11 + $0xbec] ss:$16 sps:$4 sm:$0xff]  }
 0x6af   :  { %9402 = vrsqrt.f32 %v3116_v19  ;;  %v4033_v35 = vpack.c.bf16 %v3829_v21, %v3825_v42  ;;  %v3603_v5 = vmul.f32 %v11448_v40, %v3539_v58  ;;  %v3684_v24 = vmul.f32 %v11174_v1, %v3599_v57  ;;  %v13530_v21 = vld [vmem:[#allocation66_spill] sm:$0xff]  ;;  %4951 = vmatpush1.bf16.msra.mxu0 %v9096_v45  ;;  %5177 = vmatpush1.bf16.msra.mxu1 %v9099_v32 }
 0x6b0   :  { %v3834_v10 = vmax.f32 %v3770_v31, 0.0  ;;  %v3548_v16 = vsub.f32 %v13528_v41, %v11394_v3  ;;  %v3608_v19 = vmul.f32 %v11467_v0, %v3544_v26  ;;  %v3838_v11 = vmax.f32 %v3774_v34, 0.0  ;;  %v9102_v58 = vld [vmem:[#allocation11 + $0xbe0] ss:$16 sps:$4 sm:$0xff]   ;;  %v9105_v31 = vld [vmem:[#allocation11 + $0xbe8] ss:$16 sps:$4 sm:$0xff]   ;;  %4952 = vmatprep.subr.bf16.mxu0 %v9104_v48  ;;  %5178 = vmatprep.subr.bf16.mxu1 %v9107_v4 }
 0x6b1   :  { %v3688_v42 = vmul.f32 %v11174_v1, %v3603_v5  ;;  %v3543_v46 = vsub.f32 %v13529_v38, %v11386_v53  ;;  %v3547_v47 = vsub.f32 %v13530_v21, %v11394_v3  ;;  %v3769_v14 = vadd.f32 %v11182_v43, %v3684_v24  ;;  %v9110_v34 = vld [vmem:[#allocation11 + $0xc04] ss:$16 sps:$4 sm:$0xff]   ;;  %v9113_v5 = vld [vmem:[#allocation11 + $0xc0c] ss:$16 sps:$4 sm:$0xff]   ;;  %v9108_v4 = vld [vmem:[#allocation11 + $0xc00] ss:$16 sps:$4 sm:$0xff]  }
 0x6b2   :  { %4890 = vmatmul.mubr.bf16.gmra.mrb[104].mxu0 %v4033_v35  ;;  %5116 = vmatmul.mubr.bf16.gmra.mrb[100].mxu1 %v4033_v35  ;;  %v3612_v51 = vmul.f32 %v11472_v20, %v3548_v16  ;;  %v3693_v13 = vmul.f32 %v11171_v9, %v3608_v19  ;;  %v4038_v57 = vpack.c.bf16 %v3838_v11, %v3834_v10  ;;  %v9111_v38 = vld [vmem:[#allocation11 + $0xc08] ss:$16 sps:$4 sm:$0xff]  }
 0x6b3   :  { %v3773_v44 = vadd.f32 %v11182_v43, %v3688_v42  ;;  %v3607_v26 = vmul.f32 %v11467_v0, %v3543_v46  ;;  %v3611_v35 = vmul.f32 %v11472_v20, %v3547_v47  ;;  %v3833_v41 = vmax.f32 %v3769_v14, 0.0  ;;  %4953 = vmatpush1.bf16.msra.mxu0 %v9102_v58  ;;  %5179 = vmatpush1.bf16.msra.mxu1 %v9105_v31 }
 0x6b4   :  { %v3697_v45 = vmul.f32 %v11171_v9, %v3612_v51  ;;  %v3778_v32 = vadd.f32 %v11179_v18, %v3693_v13  ;;  %v3552_v24 = vsub.f32 %v10596_v59, %v11419_v23  ;;  %4899 = vmatprep.mubr.bf16.mxu0 %v4038_v57  ;;  %5125 = vmatprep.mubr.bf16.mxu1 %v4038_v57  ;;  %v9116_v51 = vld [vmem:[#allocation11 + $0xc24] ss:$16 sps:$4 sm:$0xff]   ;;  %v9119_v13 = vld [vmem:[#allocation11 + $0xc2c] ss:$16 sps:$4 sm:$0xff]  }
 0x6b5   :  { %v3837_v10 = vmax.f32 %v3773_v44, 0.0  ;;  %v3692_v16 = vmul.f32 %v11174_v1, %v3607_v26  ;;  %v3696_v19 = vmul.f32 %v11174_v1, %v3611_v35  ;;  %v3556_v48 = vsub.f32 %v10604_v2, %v11426_v50  ;;  %4954 = vmatprep.subr.bf16.mxu0 %v9110_v34  ;;  %5180 = vmatprep.subr.bf16.mxu1 %v9113_v5  ;;  %v13531_v44 = vld [vmem:[#allocation28_spill] sm:$0xff] }
 0x6b6   :  { %v3782_v42 = vadd.f32 %v11179_v18, %v3697_v45  ;;  %v3551_v59 = vsub.f32 %v10575_v27, %v11419_v23  ;;  %v3555_v46 = vsub.f32 %v10600_v63, %v11426_v50  ;;  %v3842_v47 = vmax.f32 %v3778_v32, 0.0  ;;  %v9114_v32 = vld [vmem:[#allocation11 + $0xc20] ss:$16 sps:$4 sm:$0xff]  }
 0x6b7   :  { %v11509_v11 = vpop.eup %9400  ;;  %v4037_v21 = vpack.c.bf16 %v3837_v10, %v3833_v41  ;;  %v3777_v14 = vadd.f32 %v11182_v43, %v3692_v16  ;;  %v3781_v2 = vadd.f32 %v11182_v43, %v3696_v19  ;;  %v13532_v63 = vsub.f32 %v13531_v44, %v11166_v49  ;;  %4955 = vmatpush1.bf16.msra.mxu0 %v9108_v4  ;;  %v9123_v44 = vld [vmem:[#allocation11 + $0xc48] ss:$16 sps:$4 sm:$0xff]  }
 0x6b8   :  { %v3846_v31 = vmax.f32 %v3782_v42, 0.0  ;;  %v3616_v57 = vmul.f32 %v11509_v11, %v3552_v24  ;;  %v3615_v27 = vmul.f32 %v11509_v11, %v3551_v59  ;;  %5181 = vmatpush1.bf16.msra.mxu1 %v9111_v38  ;;  %v9117_v24 = vld [vmem:[#allocation11 + $0xc28] ss:$16 sps:$4 sm:$0xff]   ;;  %4956 = vmatprep.subr.bf16.mxu0 %v9116_v51 }
 0x6b9   :  { %v11518_v58 = vpop.eup %9402  ;;  %v3566_v26 = vmul.f32 %v11278_v37, %v13532_v63  ;;  %v3841_v35 = vmax.f32 %v3777_v14, 0.0  ;;  %v3845_v41 = vmax.f32 %v3781_v2, 0.0  ;;  %5182 = vmatprep.subr.bf16.mxu1 %v9119_v13  ;;  %v13536_v63 = vld [vmem:[#allocation146_spill] sm:$0xff] }
 0x6ba   :  { %4900 = vmatmul.mubr.bf16.gmra.mrb[108].mxu0 %v4037_v21  ;;  %5126 = vmatmul.mubr.bf16.gmra.mrb[104].mxu1 %v4037_v21  ;;  %v3620_v34 = vmul.f32 %v11518_v58, %v3556_v48  ;;  %v3619_v5 = vmul.f32 %v11518_v58, %v3555_v46  ;;  %v4042_v45 = vpack.c.bf16 %v3846_v31, %v3842_v47  ;;  %v9122_v21 = vld [vmem:[#allocation11 + $0xc44] ss:$16 sps:$4 sm:$0xff]   ;;  %v9125_v48 = vld [vmem:[#allocation11 + $0xc4c] ss:$16 sps:$4 sm:$0xff]  }
 0x6bb   :  { %v3701_v10 = vmul.f32 %v11171_v9, %v3616_v57  ;;  %v3700_v16 = vmul.f32 %v11174_v1, %v3615_v27  ;;  %v4041_v19 = vpack.c.bf16 %v3845_v41, %v3841_v35  ;;  %v13533_v46 = vld [vmem:[#allocation144_spill] sm:$0xff]  ;;  %4957 = vmatpush1.bf16.msra.mxu0 %v9114_v32  ;;  %v9131_v32 = vld [vmem:[#allocation11 + $0xc6c] ss:$16 sps:$4 sm:$0xff]  }
 0x6bc   :  { %v3705_v42 = vmul.f32 %v11171_v9, %v3620_v34  ;;  %v3704_v59 = vmul.f32 %v11174_v1, %v3619_v5  ;;  %4909 = vmatprep.mubr.bf16.mxu0 %v4042_v45  ;;  %5135 = vmatprep.mubr.bf16.mxu1 %v4042_v45  ;;  %v3647_v47 = vmul.f32 %v13533_v46, %v11273_v56  ;;  %v13534_v9 = vld [vmem:[#allocation25_spill] sm:$0xff]  ;;  %v9120_v27 = vld [vmem:[#allocation11 + $0xc40] ss:$16 sps:$4 sm:$0xff]   ;;  %v9128_v45 = vld [vmem:[#allocation11 + $0xc64] ss:$16 sps:$4 sm:$0xff]  }
 0x6bd   :  { %v3786_v4 = vadd.f32 %v11179_v18, %v3701_v10  ;;  %v3785_v38 = vadd.f32 %v11182_v43, %v3700_v16  ;;  %v3651_v51 = vmul.f32 %v13533_v46, %v3566_v26  ;;  %v13535_v1 = vsub.f32 %v13534_v9, %v11166_v49  ;;  %5183 = vmatpush1.bf16.msra.mxu1 %v9117_v24  ;;  %v13537_v56 = vld [vmem:[#allocation145_spill] sm:$0xff]  ;;  %v13538_v24 = vld [vmem:[#allocation147_spill] sm:$0xff] }
 0x6be   :  { %v3790_v14 = vadd.f32 %v11179_v18, %v3705_v42  ;;  %v3789_v2 = vadd.f32 %v11182_v43, %v3704_v59  ;;  %v3732_v35 = vadd.f32 %v13536_v63, %v3647_v47  ;;  %v3646_v18 = vmul.f32 %v13537_v56, %v11276_v28  ;;  %4958 = vmatprep.subr.bf16.mxu0 %v9122_v21  ;;  %v13539_v16 = vld [vmem:[#allocation37_spill] sm:$0xff] }
 0x6bf   :  { %v3565_v13 = vmul.f32 %v11278_v37, %v13535_v1  ;;  %v3850_v31 = vmax.f32 %v3786_v4, 0.0  ;;  %v3849_v57 = vmax.f32 %v3785_v38, 0.0  ;;  %5184 = vmatprep.subr.bf16.mxu1 %v9125_v48  ;;  %v3736_v26 = vadd.f32 %v13536_v63, %v3651_v51  ;;  %v13541_v4 = vld [vmem:[#allocation38_spill] sm:$0xff]  ;;  %4959 = vmatpush1.bf16.msra.mxu0 %v9120_v27  ;;  %v9129_v51 = vld [vmem:[#allocation11 + $0xc68] ss:$16 sps:$4 sm:$0xff]  }
 0x6c0   :  { %v3854_v41 = vmax.f32 %v3790_v14, 0.0  ;;  %v3853_v43 = vmax.f32 %v3789_v2, 0.0  ;;  %v3796_v5 = vmax.f32 %v3732_v35, 0.0  ;;  %v3731_v10 = vadd.f32 %v13538_v24, %v3646_v18  ;;  %v9126_v2 = vld [vmem:[#allocation11 + $0xc60] ss:$16 sps:$4 sm:$0xff]   ;;  %v13543_v35 = vld [vmem:[#allocation31_spill] sm:$0xff]  ;;  %4960 = vmatprep.subr.bf16.mxu0 %v9128_v45 }
 0x6c1   :  { %v3650_v34 = vmul.f32 %v13537_v56, %v3565_v13  ;;  %v13540_v42 = vsub.f32 %v13539_v16, %v11193_v25  ;;  %v13542_v28 = vsub.f32 %v13541_v4, %v11202_v55  ;;  %v3800_v47 = vmax.f32 %v3736_v26, 0.0  ;;  %5185 = vmatpush1.bf16.msra.mxu1 %v9123_v44  ;;  %v13545_v27 = vld [vmem:[#allocation35_spill] sm:$0xff]  ;;  %v13547_v26 = vld [vmem:[#allocation45_spill] sm:$0xff] }
 0x6c2   :  { %4910 = vmatmul.mubr.bf16.gmra.mrb[112].mxu0 %v4041_v19  ;;  %5136 = vmatmul.mubr.bf16.gmra.mrb[108].mxu1 %v4041_v19  ;;  %v4046_v48 = vpack.c.bf16 %v3854_v41, %v3850_v31  ;;  %v4045_v38 = vpack.c.bf16 %v3853_v43, %v3849_v57  ;;  %v3795_v9 = vmax.f32 %v3731_v10, 0.0  ;;  %v13544_v18 = vsub.f32 %v13543_v35, %v11193_v25  ;;  %v9134_v57 = vld [vmem:[#allocation11 + $0x484] ss:$16 sps:$4 sm:$0xff]   ;;  %v9137_v41 = vld [vmem:[#allocation11 + $0x48c] ss:$16 sps:$4 sm:$0xff]  }
 0x6c3   :  { %v3570_v59 = vmul.f32 %v11308_v36, %v13540_v42  ;;  %v3574_v21 = vmul.f32 %v11312_v22, %v13542_v28  ;;  %v3735_v14 = vadd.f32 %v13538_v24, %v3650_v34  ;;  %v4020_v19 = vpack.c.bf16 %v3800_v47, %v3796_v5  ;;  %5186 = vmatprep.subr.bf16.mxu1 %v9131_v32 }
 0x6c4   :  { %v3569_v16 = vmul.f32 %v11308_v36, %v13544_v18  ;;  %4919 = vmatprep.mubr.bf16.mxu0 %v4046_v48  ;;  %5145 = vmatprep.mubr.bf16.mxu1 %v4046_v48  ;;  %v13546_v44 = vsub.f32 %v13545_v27, %v11202_v55  ;;  %v13548_v34 = vsub.f32 %v13547_v26, %v11230_v6  ;;  %v13552_v27 = vld [vmem:[#allocation43_spill] sm:$0xff] }
 0x6c5   :  { %v3655_v1 = vmul.f32 %v13533_v46, %v3570_v59  ;;  %v3659_v13 = vmul.f32 %v13533_v46, %v3574_v21  ;;  %v3799_v31 = vmax.f32 %v3735_v14, 0.0  ;;  %v13549_v21 = vld [vmem:[#allocation46_spill] sm:$0xff]  ;;  %4961 = vmatpush1.bf16.msra.mxu0 %v9126_v2  ;;  %5187 = vmatpush1.bf16.msra.mxu1 %v9129_v51  ;;  %v3517_v2 = vsub.f32 %v13552_v27, %v11241_v29 }
 0x6c6   :  { %v3573_v43 = vmul.f32 %v11312_v22, %v13546_v44  ;;  %v3578_v10 = vmul.f32 %v11341_v30, %v13548_v34  ;;  %v3654_v5 = vmul.f32 %v13537_v56, %v3569_v16  ;;  %v13550_v48 = vsub.f32 %v13549_v21, %v11241_v29  ;;  %5909 = vmatprep.subr.bf16.mxu0 %v9134_v57  ;;  %v13553_v57 = vld [vmem:[#allocation53_spill] sm:$0xff] }
 0x6c7   :  { %v3740_v42 = vadd.f32 %v13536_v63, %v3655_v1  ;;  %v3744_v59 = vadd.f32 %v13536_v63, %v3659_v13  ;;  %v4019_v4 = vpack.c.bf16 %v3799_v31, %v3795_v9  ;;  %v13551_v13 = vld [vmem:[#allocation39_spill] sm:$0xff]  ;;  %6135 = vmatprep.subr.bf16.mxu1 %v9137_v41  ;;  %v3522_v41 = vsub.f32 %v13553_v57, %v11280_v7 }
 0x6c8   :  { %v3658_v28 = vmul.f32 %v13537_v56, %v3573_v43  ;;  %v3582_v47 = vmul.f32 %v11349_v61, %v13550_v48  ;;  %v3663_v14 = vmul.f32 %v13533_v46, %v3578_v10  ;;  %v3739_v1 = vadd.f32 %v13538_v24, %v3654_v5  ;;  %v13555_v48 = vld [vmem:[#allocation47_spill] sm:$0xff] }
 0x6c9   :  { %v3804_v45 = vmax.f32 %v3740_v42, 0.0  ;;  %v3808_v32 = vmax.f32 %v3744_v59, 0.0  ;;  %v3513_v35 = vsub.f32 %v13551_v13, %v11230_v6  ;;  %v3581_v10 = vmul.f32 %v11349_v61, %v3517_v2  ;;  %v13554_v59 = vld [vmem:[#allocation54_spill] sm:$0xff] }
 0x6ca   :  { %v3743_v9 = vadd.f32 %v13538_v24, %v3658_v28  ;;  %v3667_v18 = vmul.f32 %v13533_v46, %v3582_v47  ;;  %v3748_v16 = vadd.f32 %v13536_v63, %v3663_v14  ;;  %4920 = vmatmul.mubr.bf16.gmra.mrb[116].mxu0 %v4045_v38  ;;  %5146 = vmatmul.mubr.bf16.gmra.mrb[112].mxu1 %v4045_v38  ;;  %v3803_v44 = vmax.f32 %v3739_v1, 0.0 }
 0x6cb   :  { %v4024_v31 = vpack.c.bf16 %v3808_v32, %v3804_v45  ;;  %v3577_v51 = vmul.f32 %v11341_v30, %v3513_v35  ;;  %4962 = vmatprep.mubr.bf16.mxu0 %v4020_v19  ;;  %5188 = vmatprep.mubr.bf16.mxu1 %v4020_v19  ;;  %v3526_v5 = vsub.f32 %v13554_v59, %v11293_v62  ;;  %v13556_v32 = vld [vmem:[#allocation51_spill] sm:$0xff]  ;;  %v9140_v59 = vld [vmem:[#allocation11 + $0x4a4] ss:$16 sps:$4 sm:$0xff]  }
 0x6cc   :  { %v3807_v43 = vmax.f32 %v3743_v9, 0.0  ;;  %v3752_v26 = vadd.f32 %v13536_v63, %v3667_v18  ;;  %v3812_v34 = vmax.f32 %v3748_v16, 0.0  ;;  %v3586_v21 = vmul.f32 %v11380_v39, %v3522_v41  ;;  %v13557_v18 = vld [vmem:[#allocation61_spill] sm:$0xff] }
 0x6cd   :  { %v3662_v42 = vmul.f32 %v13537_v56, %v3577_v51  ;;  %v3521_v47 = vsub.f32 %v13555_v48, %v11280_v7  ;;  %v3666_v14 = vmul.f32 %v13537_v56, %v3581_v10  ;;  %v3590_v45 = vmul.f32 %v11384_v60, %v3526_v5  ;;  %v9143_v5 = vld [vmem:[#allocation11 + $0x4ac] ss:$16 sps:$4 sm:$0xff]  }
 0x6ce   :  { %v11597_v28 = vpack.c.bf16 %v3807_v43, %v3803_v44  ;;  %v3816_v38 = vmax.f32 %v3752_v26, 0.0  ;;  %v3525_v1 = vsub.f32 %v13556_v32, %v11293_v62  ;;  %v3671_v35 = vmul.f32 %v13533_v46, %v3586_v21  ;;  %v9132_v43 = vld [vmem:[#allocation11 + $0x480] ss:$16 sps:$4 sm:$0xff]   ;;  %v9135_v26 = vld [vmem:[#allocation11 + $0x488] ss:$16 sps:$4 sm:$0xff]  }
 0x6cf   :  { %v3747_v19 = vadd.f32 %v13538_v24, %v3662_v42  ;;  %v3585_v9 = vmul.f32 %v11380_v39, %v3521_v47  ;;  %v3530_v16 = vsub.f32 %v13557_v18, %v11314_v8  ;;  %v3751_v27 = vadd.f32 %v13538_v24, %v3666_v14  ;;  %v13559_v47 = vld [vmem:[#allocation55_spill] sm:$0xff] }
 0x6d0   :  { %v11607_v13 = vpack.c.bf16 %v3816_v38, %v3812_v34  ;;  %v3675_v51 = vmul.f32 %v13533_v46, %v3590_v45  ;;  %v3589_v44 = vmul.f32 %v11384_v60, %v3525_v1  ;;  %v3756_v57 = vadd.f32 %v13536_v63, %v3671_v35  ;;  %v13558_v34 = vld [vmem:[#allocation62_spill] sm:$0xff] }
 0x6d1   :  { %v3811_v2 = vmax.f32 %v3747_v19, 0.0  ;;  %v3670_v41 = vmul.f32 %v13537_v56, %v3585_v9  ;;  %v3534_v10 = vsub.f32 %v13558_v34, %v11325_v52  ;;  %v3594_v42 = vmul.f32 %v11407_v15, %v3530_v16  ;;  %v13560_v16 = vld [vmem:[#allocation59_spill] sm:$0xff] }
 0x6d2   :  { %v3815_v38 = vmax.f32 %v3751_v27, 0.0  ;;  %v3760_v21 = vadd.f32 %v13536_v63, %v3675_v51  ;;  %v3674_v48 = vmul.f32 %v13537_v56, %v3589_v44  ;;  %v3529_v14 = vsub.f32 %v13559_v47, %v11314_v8  ;;  %4963 = vmatmul.mubr.bf16.vlgmr.msra.gmra.mrb[88].mxu0 %v4019_v4  ;;  %5189 = vmatmul.mubr.bf16.vlgmr.msra.gmra.mrb[84].mxu1 %v4019_v4  ;;  %v9138_v4 = vld [vmem:[#allocation11 + $0x4a0] ss:$16 sps:$4 sm:$0xff]   ;;  %v9141_v51 = vld [vmem:[#allocation11 + $0x4a8] ss:$16 sps:$4 sm:$0xff]  }
 0x6d3   :  { %v3820_v19 = vmax.f32 %v3756_v57, 0.0  ;;  %v3755_v45 = vadd.f32 %v13538_v24, %v3670_v41  ;;  %v3598_v32 = vmul.f32 %v11417_v54, %v3534_v10  ;;  %v3679_v1 = vmul.f32 %v13533_v46, %v3594_v42  ;;  %4972 = vmatprep.mubr.bf16.mxu0 %v4024_v31  ;;  %5198 = vmatprep.mubr.bf16.mxu1 %v4024_v31  ;;  %v9146_v31 = vld [vmem:[#allocation11 + $0x4c4] ss:$16 sps:$4 sm:$0xff]  }
 0x6d4   :  { %v11628_v35 = vpack.c.bf16 %v3815_v38, %v3811_v2  ;;  %v3824_v9 = vmax.f32 %v3760_v21, 0.0  ;;  %v3759_v18 = vadd.f32 %v13538_v24, %v3674_v48  ;;  %v3533_v27 = vsub.f32 %v13560_v16, %v11325_v52  ;;  %5910 = vmatpush1.bf16.msra.mxu0 %v9132_v43  ;;  %6136 = vmatpush1.bf16.msra.mxu1 %v9135_v26  ;;  %v9149_v2 = vld [vmem:[#allocation11 + $0x4cc] ss:$16 sps:$4 sm:$0xff]  }
 0x6d5   :  { %v3819_v44 = vmax.f32 %v3755_v45, 0.0  ;;  %v3683_v57 = vmul.f32 %v13533_v46, %v3598_v32  ;;  %v3764_v41 = vadd.f32 %v13536_v63, %v3679_v1  ;;  %v3593_v34 = vmul.f32 %v11407_v15, %v3529_v14  ;;  %5911 = vmatprep.subr.bf16.mxu0 %v9140_v59  ;;  %6137 = vmatprep.subr.bf16.mxu1 %v9143_v5  ;;  %v13561_v43 = vld [vmem:[#allocation69_spill] sm:$0xff]  ;;  %v13562_v45 = vld [vmem:[#allocation70_spill] sm:$0xff]  ;;  %v13563_v32 = vld [vmem:[#allocation63_spill] sm:$0xff] }
 0x6d6   :  { %v11636_v10 = vpack.c.bf16 %v3824_v9, %v3820_v19  ;;  %v3823_v42 = vmax.f32 %v3759_v18, 0.0  ;;  %v3597_v38 = vmul.f32 %v11417_v54, %v3533_v27  ;;  %v3538_v26 = vsub.f32 %v13561_v43, %v11351_v33  ;;  %v9144_v9 = vld [vmem:[#allocation11 + $0x4c0] ss:$16 sps:$4 sm:$0xff]   ;;  %v9147_v18 = vld [vmem:[#allocation11 + $0x4c8] ss:$16 sps:$4 sm:$0xff]  }
 0x6d7   :  { %v3768_v21 = vadd.f32 %v13536_v63, %v3683_v57  ;;  %v3828_v48 = vmax.f32 %v3764_v41, 0.0  ;;  %v3678_v47 = vmul.f32 %v13537_v56, %v3593_v34  ;;  %v3542_v14 = vsub.f32 %v13562_v45, %v11360_v12  ;;  %v13564_v41 = vld [vmem:[#allocation67_spill] sm:$0xff]  ;;  %v9152_v34 = vld [vmem:[#allocation11 + $0x4e4] ss:$16 sps:$4 sm:$0xff]  }
 0x6d8   :  { %v11645_v59 = vpack.c.bf16 %v3823_v42, %v3819_v44  ;;  %v3682_v5 = vmul.f32 %v13537_v56, %v3597_v38  ;;  %v3602_v19 = vmul.f32 %v11441_v17, %v3538_v26  ;;  %v3537_v1 = vsub.f32 %v13563_v32, %v11351_v33  ;;  %5912 = vmatpush1.bf16.msra.mxu0 %v9138_v4  ;;  %v9155_v42 = vld [vmem:[#allocation11 + $0x4ec] ss:$16 sps:$4 sm:$0xff]  }
 0x6d9   :  { %6138 = vmatpush1.bf16.msra.mxu1 %v9141_v51  ;;  %v3832_v16 = vmax.f32 %v3768_v21, 0.0  ;;  %v3763_v27 = vadd.f32 %v13538_v24, %v3678_v47  ;;  %v3606_v57 = vmul.f32 %v11448_v40, %v3542_v14  ;;  %v3541_v44 = vsub.f32 %v13564_v41, %v11360_v12  ;;  %5913 = vmatprep.subr.bf16.mxu0 %v9146_v31  ;;  %v13565_v14 = vld [vmem:[#allocation73_spill] sm:$0xff] }
 0x6da   :  { %6139 = vmatprep.subr.bf16.mxu1 %v9149_v2  ;;  %v3767_v38 = vadd.f32 %v13538_v24, %v3682_v5  ;;  %v3687_v43 = vmul.f32 %v13533_v46, %v3602_v19  ;;  %v3601_v4 = vmul.f32 %v11441_v17, %v3537_v1  ;;  %4973 = vmatmul.mubr.bf16.gmra.mrb[92].mxu0 %v11597_v28  ;;  %v13566_v1 = vld [vmem:[#allocation74_spill] sm:$0xff] }
 0x6db   :  { %5199 = vmatmul.mubr.bf16.gmra.mrb[88].mxu1 %v11597_v28  ;;  %v11660_v51 = vpack.c.bf16 %v3832_v16, %v3828_v48  ;;  %v3827_v26 = vmax.f32 %v3763_v27, 0.0  ;;  %v3691_v21 = vmul.f32 %v13533_v46, %v3606_v57  ;;  %v3605_v31 = vmul.f32 %v11448_v40, %v3541_v44  ;;  %4982 = vmatprep.mubr.bf16.mxu0 %v11607_v13  ;;  %v9150_v28 = vld [vmem:[#allocation11 + $0x4e0] ss:$16 sps:$4 sm:$0xff]   ;;  %v9153_v48 = vld [vmem:[#allocation11 + $0x4e8] ss:$16 sps:$4 sm:$0xff]  }
 0x6dc   :  { %5208 = vmatprep.mubr.bf16.mxu1 %v11607_v13  ;;  %v3831_v2 = vmax.f32 %v3767_v38, 0.0  ;;  %v3772_v47 = vadd.f32 %v13536_v63, %v3687_v43  ;;  %v3686_v45 = vmul.f32 %v13537_v56, %v3601_v4  ;;  %v3546_v5 = vsub.f32 %v13565_v14, %v11386_v53  ;;  %5914 = vmatpush1.bf16.msra.mxu0 %v9144_v9  ;;  %v9158_v13 = vld [vmem:[#allocation11 + $0x504] ss:$16 sps:$4 sm:$0xff]   ;;  %v9161_v27 = vld [vmem:[#allocation11 + $0x50c] ss:$16 sps:$4 sm:$0xff]  }
 0x6dd   :  { %6140 = vmatpush1.bf16.msra.mxu1 %v9147_v18  ;;  %v3776_v19 = vadd.f32 %v13536_v63, %v3691_v21  ;;  %v3690_v32 = vmul.f32 %v13537_v56, %v3605_v31  ;;  %v3550_v16 = vsub.f32 %v13566_v1, %v11394_v3  ;;  %5915 = vmatprep.subr.bf16.mxu0 %v9152_v34  ;;  %v13567_v4 = vld [vmem:[#allocation71_spill] sm:$0xff] }
 0x6de   :  { %6141 = vmatprep.subr.bf16.mxu1 %v9155_v42  ;;  %v11674_v57 = vpack.c.bf16 %v3831_v2, %v3827_v26  ;;  %v3836_v41 = vmax.f32 %v3772_v47, 0.0  ;;  %v3771_v44 = vadd.f32 %v13538_v24, %v3686_v45  ;;  %v3610_v9 = vmul.f32 %v11467_v0, %v3546_v5  ;;  %v13568_v42 = vld [vmem:[#allocation72_spill] sm:$0xff]  ;;  %v13569_v2 = vld [vmem:[#allocation83_spill] sm:$0xff] }
 0x6df   :  { %v3840_v18 = vmax.f32 %v3776_v19, 0.0  ;;  %v3775_v38 = vadd.f32 %v13538_v24, %v3690_v32  ;;  %v3614_v43 = vmul.f32 %v11472_v20, %v3550_v16  ;;  %v3545_v21 = vsub.f32 %v13567_v4, %v11386_v53  ;;  %v9156_v45 = vld [vmem:[#allocation11 + $0x500] ss:$16 sps:$4 sm:$0xff]   ;;  %v9159_v14 = vld [vmem:[#allocation11 + $0x508] ss:$16 sps:$4 sm:$0xff]  }
 0x6e0   :  { %v3835_v31 = vmax.f32 %v3771_v44, 0.0  ;;  %v3695_v34 = vmul.f32 %v13533_v46, %v3610_v9  ;;  %v3549_v26 = vsub.f32 %v13568_v42, %v11394_v3  ;;  %v3554_v47 = vsub.f32 %v13569_v2, %v11419_v23  ;;  %5916 = vmatpush1.bf16.msra.mxu0 %v9150_v28  ;;  %v9164_v16 = vld [vmem:[#allocation11 + $0x524] ss:$16 sps:$4 sm:$0xff]   ;;  %v9167_v44 = vld [vmem:[#allocation11 + $0x52c] ss:$16 sps:$4 sm:$0xff]  }
 0x6e1   :  { %6142 = vmatpush1.bf16.msra.mxu1 %v9153_v48  ;;  %v11687_v5 = vpack.c.bf16 %v3840_v18, %v3836_v41  ;;  %v3839_v19 = vmax.f32 %v3775_v38, 0.0  ;;  %v3699_v32 = vmul.f32 %v13533_v46, %v3614_v43  ;;  %v3609_v1 = vmul.f32 %v11467_v0, %v3545_v21  ;;  %5917 = vmatprep.subr.bf16.mxu0 %v9158_v13  ;;  %v13570_v28 = vld [vmem:[#allocation81_spill] sm:$0xff] }
 0x6e2   :  { %6143 = vmatprep.subr.bf16.mxu1 %v9161_v27  ;;  %v3780_v9 = vadd.f32 %v13536_v63, %v3695_v34  ;;  %v3613_v4 = vmul.f32 %v11472_v20, %v3549_v26  ;;  %v3558_v48 = vsub.f32 %v13570_v28, %v11426_v50  ;;  %4983 = vmatmul.mubr.bf16.gmra.mrb[96].mxu0 %v11628_v35  ;;  %v13571_v26 = vld [vmem:[#allocation79_spill] sm:$0xff] }
 0x6e3   :  { %5209 = vmatmul.mubr.bf16.gmra.mrb[92].mxu1 %v11628_v35  ;;  %v11697_v41 = vpack.c.bf16 %v3839_v19, %v3835_v31  ;;  %v3784_v18 = vadd.f32 %v13536_v63, %v3699_v32  ;;  %v3694_v13 = vmul.f32 %v13537_v56, %v3609_v1  ;;  %4992 = vmatprep.mubr.bf16.mxu0 %v11636_v10  ;;  %v9162_v35 = vld [vmem:[#allocation11 + $0x520] ss:$16 sps:$4 sm:$0xff]   ;;  %v9165_v31 = vld [vmem:[#allocation11 + $0x528] ss:$16 sps:$4 sm:$0xff]   ;;  %v9170_v32 = vld [vmem:[#allocation11 + $0x544] ss:$16 sps:$4 sm:$0xff]  }
 0x6e4   :  { %5218 = vmatprep.mubr.bf16.mxu1 %v11636_v10  ;;  %v3844_v27 = vmax.f32 %v3780_v9, 0.0  ;;  %v3698_v38 = vmul.f32 %v13537_v56, %v3613_v4  ;;  %v3618_v43 = vmul.f32 %v11509_v11, %v3554_v47  ;;  %v3622_v21 = vmul.f32 %v11518_v58, %v3558_v48  ;;  %5918 = vmatpush1.bf16.msra.mxu0 %v9156_v45  ;;  %v13572_v19 = vld [vmem:[#allocation80_spill] sm:$0xff]  ;;  %v9173_v1 = vld [vmem:[#allocation11 + $0x54c] ss:$16 sps:$4 sm:$0xff]  }
 0x6e5   :  { %6144 = vmatpush1.bf16.msra.mxu1 %v9159_v14  ;;  %v3848_v34 = vmax.f32 %v3784_v18, 0.0  ;;  %v3779_v42 = vadd.f32 %v13538_v24, %v3694_v13  ;;  %v3553_v2 = vsub.f32 %v13571_v26, %v11419_v23  ;;  %v3557_v10 = vsub.f32 %v13572_v19, %v11426_v50  ;;  %5919 = vmatprep.subr.bf16.mxu0 %v9164_v16 }
 0x6e6   :  { %6145 = vmatprep.subr.bf16.mxu1 %v9167_v44  ;;  %v3783_v47 = vadd.f32 %v13538_v24, %v3698_v38  ;;  %v3703_v45 = vmul.f32 %v13533_v46, %v3618_v43  ;;  %v3707_v14 = vmul.f32 %v13533_v46, %v3622_v21  ;;  %v9168_v44 = vld [vmem:[#allocation11 + $0x540] ss:$16 sps:$4 sm:$0xff]   ;;  %v9171_v38 = vld [vmem:[#allocation11 + $0x548] ss:$16 sps:$4 sm:$0xff]   ;;  %v9179_v21 = vld [vmem:[#allocation11 + $0x56c] ss:$16 sps:$4 sm:$0xff]  }
 0x6e7   :  { %v11714_v9 = vpack.c.bf16 %v3848_v34, %v3844_v27  ;;  %v3617_v4 = vmul.f32 %v11509_v11, %v3553_v2  ;;  %v3621_v28 = vmul.f32 %v11518_v58, %v3557_v10  ;;  %v3843_v48 = vmax.f32 %v3779_v42, 0.0  ;;  %v9176_v27 = vld [vmem:[#allocation11 + $0x564] ss:$16 sps:$4 sm:$0xff]   ;;  %v9177_v2 = vld [vmem:[#allocation11 + $0x568] ss:$16 sps:$4 sm:$0xff]  }
 0x6e8   :  { %v3847_v18 = vmax.f32 %v3783_v47, 0.0  ;;  %v3788_v13 = vadd.f32 %v13536_v63, %v3703_v45  ;;  %v3792_v16 = vadd.f32 %v13536_v63, %v3707_v14  ;;  %5920 = vmatpush1.bf16.msra.mxu0 %v9162_v35  ;;  %v9183_v47 = vld [vmem:[#allocation11 + $0x588] ss:$16 sps:$4 sm:$0xff]   ;;  %v9191_v45 = vld [vmem:[#allocation11 + $0x5ac] ss:$16 sps:$4 sm:$0xff]  }
 0x6e9   :  { %6146 = vmatpush1.bf16.msra.mxu1 %v9165_v31  ;;  %v3702_v43 = vmul.f32 %v13537_v56, %v3617_v4  ;;  %v3706_v46 = vmul.f32 %v13537_v56, %v3621_v28  ;;  %5921 = vmatprep.subr.bf16.mxu0 %v9170_v32  ;;  %v9174_v31 = vld [vmem:[#allocation11 + $0x560] ss:$16 sps:$4 sm:$0xff]   ;;  %v9182_v32 = vld [vmem:[#allocation11 + $0x584] ss:$16 sps:$4 sm:$0xff]   ;;  %v9189_v4 = vld [vmem:[#allocation11 + $0x5a8] ss:$16 sps:$4 sm:$0xff]  }
 0x6ea   :  { %6147 = vmatprep.subr.bf16.mxu1 %v9173_v1  ;;  %v11722_v34 = vpack.c.bf16 %v3847_v18, %v3843_v48  ;;  %v3852_v42 = vmax.f32 %v3788_v13, 0.0  ;;  %v3856_v26 = vmax.f32 %v3792_v16, 0.0  ;;  %4993 = vmatmul.mubr.bf16.gmra.mrb[100].mxu0 %v11645_v59  ;;  %v9186_v14 = vld [vmem:[#allocation11 + $0x5a0] ss:$16 sps:$4 sm:$0xff]   ;;  %v9194_v28 = vld [vmem:[#allocation11 + $0x5c4] ss:$16 sps:$4 sm:$0xff]  }
 0x6eb   :  { %5219 = vmatmul.mubr.bf16.gmra.mrb[96].mxu1 %v11645_v59  ;;  %v3787_v63 = vadd.f32 %v13538_v24, %v3702_v43  ;;  %v3791_v35 = vadd.f32 %v13538_v24, %v3706_v46  ;;  %5002 = vmatprep.mubr.bf16.mxu0 %v11660_v51  ;;  %v9185_v59 = vld [vmem:[#allocation11 + $0x58c] ss:$16 sps:$4 sm:$0xff]   ;;  %v9180_v24 = vld [vmem:[#allocation11 + $0x580] ss:$16 sps:$4 sm:$0xff]  }
 0x6ec   :  { %5228 = vmatprep.mubr.bf16.mxu1 %v11660_v51  ;;  %v11730_v56 = vpack.c.bf16 %v3856_v26, %v3852_v42  ;;  %5922 = vmatpush1.bf16.msra.mxu0 %v9168_v44  ;;  %v9188_v51 = vld [vmem:[#allocation11 + $0x5a4] ss:$16 sps:$4 sm:$0xff]   ;;  %v9197_v48 = vld [vmem:[#allocation11 + $0x5cc] ss:$16 sps:$4 sm:$0xff]   ;;  %v9195_v44 = vld [vmem:[#allocation11 + $0x5c8] ss:$16 sps:$4 sm:$0xff]  }
 0x6ed   :  { %6148 = vmatpush1.bf16.msra.mxu1 %v9171_v38  ;;  %v3851_v19 = vmax.f32 %v3787_v63, 0.0  ;;  %v3855_v10 = vmax.f32 %v3791_v35, 0.0  ;;  %5923 = vmatprep.subr.bf16.mxu0 %v9176_v27  ;;  %v11738_v18 = vld [vmem:[#allocation8 + $0x2] ss:$8 sm:$0xf] }
 0x6ee   :  { %6149 = vmatprep.subr.bf16.mxu1 %v9179_v21  ;;  %v13573_v13 = vld [vmem:[#allocation78_spill] sm:$0xff]  ;;  %v9203_v38 = vld [vmem:[#allocation11 + $0x5ec] ss:$16 sps:$4 sm:$0xff]   ;;  %v13575_v46 = vld [vmem:[#allocation76_spill] sm:$0xff] }
 0x6ef   :  { %v11732_v1 = vpack.c.bf16 %v3855_v10, %v3851_v19  ;;  %v3138_v16 = vsub.f32 %v13573_v13, %v11166_v49  ;;  %v13574_v43 = vld [vmem:[#allocation143_spill] sm:$0xff]  ;;  %v13577_v35 = vld [vmem:[#allocation22_spill] sm:$0xff] }
 0x6f0   :  { %5924 = vmatpush1.bf16.msra.mxu0 %v9174_v31  ;;  %v3134_v27 = vsub.f32 %v13575_v46, %v13574_v43  ;;  %v11749_v42 = vld [vmem:[#allocation8 + $0x3] ss:$8 sm:$0xf]  ;;  %v11754_v31 = vrot.slane %v11738_v18, %v13577_v35  ;;  %v9206_v10 = vld [vmem:[#allocation11 + $0x604] ss:$16 sps:$4 sm:$0xff]  }
 0x6f1   :  { %6150 = vmatpush1.bf16.msra.mxu1 %v9177_v2  ;;  %5925 = vmatprep.subr.bf16.mxu0 %v9182_v32  ;;  %v3202_v21 = vmul.f32 %v11278_v37, %v3138_v16  ;;  %v13576_v26 = vld [vmem:[#allocation27_spill] sm:$0xff]  ;;  %v9198_v2 = vld [vmem:[#allocation11 + $0x5e0] ss:$16 sps:$4 sm:$0xff]  }
 0x6f2   :  { %6151 = vmatprep.subr.bf16.mxu1 %v9185_v59  ;;  %5003 = vmatmul.mubr.bf16.gmra.mrb[104].mxu0 %v11674_v57  ;;  %v3198_v63 = vmul.f32 %v13576_v26, %v3134_v27  ;;  %v9201_v19 = vld [vmem:[#allocation11 + $0x5e8] ss:$16 sps:$4 sm:$0xff]   ;;  %v11760_v59 = vrot.slane %v11749_v42, %v13577_v35  ;;  %v9236_v35 = vld [vmem:[#allocation11 + $0x6a4] ss:$16 sps:$4 sm:$0xff]  }
 0x6f3   :  { %5229 = vmatmul.mubr.bf16.gmra.mrb[100].mxu1 %v11674_v57  ;;  %5012 = vmatprep.mubr.bf16.mxu0 %v11687_v5  ;;  %v9192_v57 = vld [vmem:[#allocation11 + $0x5c0] ss:$16 sps:$4 sm:$0xff]   ;;  %v3287_v32 = vmul.f32 %v11754_v31, %v3202_v21  ;;  %v13580_v16 = vld [vmem:[#allocation75_spill] sm:$0xff] }
 0x6f4   :  { %5238 = vmatprep.mubr.bf16.mxu1 %v11687_v5  ;;  %5926 = vmatpush1.bf16.msra.mxu0 %v9180_v24  ;;  %v9200_v5 = vld [vmem:[#allocation11 + $0x5e4] ss:$16 sps:$4 sm:$0xff]   ;;  %v13578_v24 = vld [vmem:[#allocation77_spill] sm:$0xff] }
 0x6f5   :  { %6152 = vmatpush1.bf16.msra.mxu1 %v9183_v47  ;;  %5927 = vmatprep.subr.bf16.mxu0 %v9188_v51  ;;  %v3137_v47 = vsub.f32 %v13578_v24, %v11166_v49  ;;  %v9204_v51 = vld [vmem:[#allocation11 + $0x600] ss:$16 sps:$4 sm:$0xff]   ;;  %v3372_v13 = vadd.f32 %v11760_v59, %v3287_v32  ;;  %v9221_v32 = vld [vmem:[#allocation11 + $0x64c] ss:$16 sps:$4 sm:$0xff]  }
 0x6f6   :  { %6153 = vmatprep.subr.bf16.mxu1 %v9191_v45  ;;  %v9207_v45 = vld [vmem:[#allocation11 + $0x608] ss:$16 sps:$4 sm:$0xff]  }
 0x6f7   :  { %v3436_v24 = vmax.f32 %v3372_v13, 0.0  ;;  %v9219_v13 = vld [vmem:[#allocation11 + $0x648] ss:$16 sps:$4 sm:$0xff]  }
 0x6f8   :  { %5928 = vmatpush1.bf16.msra.mxu0 %v9186_v14  ;;  %v13579_v14 = vld [vmem:[#allocation86_spill] sm:$0xff] }
 0x6f9   :  { %6154 = vmatpush1.bf16.msra.mxu1 %v9189_v4  ;;  %5929 = vmatprep.subr.bf16.mxu0 %v9194_v28  ;;  %v3146_v4 = vsub.f32 %v13579_v14, %v11202_v55  ;;  %v9212_v28 = vld [vmem:[#allocation11 + $0x624] ss:$16 sps:$4 sm:$0xff]  }
 0x6fa   :  { %6155 = vmatprep.subr.bf16.mxu1 %v9197_v48  ;;  %5013 = vmatmul.mubr.bf16.gmra.mrb[108].mxu0 %v11697_v41  ;;  %v9215_v48 = vld [vmem:[#allocation11 + $0x62c] ss:$16 sps:$4 sm:$0xff]  }
 0x6fb   :  { %5239 = vmatmul.mubr.bf16.gmra.mrb[104].mxu1 %v11697_v41  ;;  %5022 = vmatprep.mubr.bf16.mxu0 %v11714_v9  ;;  %v9209_v41 = vld [vmem:[#allocation11 + $0x60c] ss:$16 sps:$4 sm:$0xff]   ;;  %v3210_v46 = vmul.f32 %v11312_v22, %v3146_v4 }
 0x6fc   :  { %5248 = vmatprep.mubr.bf16.mxu1 %v11714_v9  ;;  %5930 = vmatpush1.bf16.msra.mxu0 %v9192_v57  ;;  %v3283_v9 = vmul.f32 %v11754_v31, %v3198_v63  ;;  %v3133_v57 = vsub.f32 %v13580_v16, %v13574_v43  ;;  %v13582_v63 = vld [vmem:[#allocation21_spill] sm:$0xff] }
 0x6fd   :  { %6156 = vmatpush1.bf16.msra.mxu1 %v9195_v44  ;;  %5931 = vmatprep.subr.bf16.mxu0 %v9200_v5  ;;  %v3201_v44 = vmul.f32 %v11278_v37, %v3137_v47  ;;  %v13581_v5 = vld [vmem:[#allocation84_spill] sm:$0xff]  ;;  %v3295_v14 = vmul.f32 %v11754_v31, %v3210_v46  ;;  %v9227_v46 = vld [vmem:[#allocation11 + $0x66c] ss:$16 sps:$4 sm:$0xff]  }
 0x6fe   :  { %6157 = vmatprep.subr.bf16.mxu1 %v9203_v38  ;;  %v3142_v38 = vsub.f32 %v13581_v5, %v11193_v25  ;;  %v3368_v27 = vadd.f32 %v11760_v59, %v3283_v9  ;;  %v3197_v21 = vmul.f32 %v13576_v26, %v3133_v57  ;;  %v13583_v9 = vld [vmem:[#allocation85_spill] sm:$0xff]  ;;  %v13584_v57 = vld [vmem:[#allocation94_spill] sm:$0xff] }
 0x6ff   :  { %v3145_v47 = vsub.f32 %v13583_v9, %v11202_v55 }
 0x700   :  { %5932 = vmatpush1.bf16.msra.mxu0 %v9198_v2  ;;  %v11781_v2 = vrot.slane %v11738_v18, %v13582_v63  ;;  %v3432_v4 = vmax.f32 %v3368_v27, 0.0 }
 0x701   :  { %6158 = vmatpush1.bf16.msra.mxu1 %v9201_v19  ;;  %5933 = vmatprep.subr.bf16.mxu0 %v9206_v10  ;;  %v9213_v19 = vld [vmem:[#allocation11 + $0x628] ss:$16 sps:$4 sm:$0xff]   ;;  %v3206_v10 = vmul.f32 %v11308_v36, %v3142_v38  ;;  %v9224_v38 = vld [vmem:[#allocation11 + $0x664] ss:$16 sps:$4 sm:$0xff]  }
 0x702   :  { %6159 = vmatprep.subr.bf16.mxu1 %v9209_v41  ;;  %5023 = vmatmul.mubr.bf16.gmra.mrb[112].mxu0 %v11722_v34  ;;  %v9218_v41 = vld [vmem:[#allocation11 + $0x644] ss:$16 sps:$4 sm:$0xff]   ;;  %v3858_v5 = vpack.c.bf16 %v3436_v24, %v3432_v4  ;;  %v9225_v4 = vld [vmem:[#allocation11 + $0x668] ss:$16 sps:$4 sm:$0xff]  }
 0x703   :  { %5249 = vmatmul.mubr.bf16.gmra.mrb[108].mxu1 %v11722_v34  ;;  %5032 = vmatprep.mubr.bf16.mxu0 %v11730_v56  ;;  %v9210_v34 = vld [vmem:[#allocation11 + $0x620] ss:$16 sps:$4 sm:$0xff]   ;;  %v3291_v16 = vmul.f32 %v11754_v31, %v3206_v10 }
 0x704   :  { %5258 = vmatprep.mubr.bf16.mxu1 %v11730_v56  ;;  %5934 = vmatpush1.bf16.msra.mxu0 %v9204_v51  ;;  %v3286_v56 = vmul.f32 %v11781_v2, %v3201_v44  ;;  %v3282_v51 = vmul.f32 %v11781_v2, %v3197_v21  ;;  %v3154_v44 = vsub.f32 %v13584_v57, %v11241_v29  ;;  %v13585_v21 = vld [vmem:[#allocation82_spill] sm:$0xff] }
 0x705   :  { %6160 = vmatpush1.bf16.msra.mxu1 %v9207_v45  ;;  %5935 = vmatprep.subr.bf16.mxu0 %v9212_v28  ;;  %v11791_v45 = vrot.slane %v11749_v42, %v13582_v63  ;;  %v3209_v28 = vmul.f32 %v11312_v22, %v3145_v47  ;;  %v3141_v9 = vsub.f32 %v13585_v21, %v11193_v25  ;;  %v9222_v47 = vld [vmem:[#allocation11 + $0x660] ss:$16 sps:$4 sm:$0xff]   ;;  %v9233_v21 = vld [vmem:[#allocation11 + $0x68c] ss:$16 sps:$4 sm:$0xff]  }
 0x706   :  { %6161 = vmatprep.subr.bf16.mxu1 %v9215_v48  ;;  %v9216_v48 = vld [vmem:[#allocation11 + $0x640] ss:$16 sps:$4 sm:$0xff]  }
 0x707   :  { %v3371_v27 = vadd.f32 %v11791_v45, %v3286_v56  ;;  %v3205_v24 = vmul.f32 %v11308_v36, %v3141_v9  ;;  %v3294_v56 = vmul.f32 %v11781_v2, %v3209_v28 }
 0x708   :  { %5936 = vmatpush1.bf16.msra.mxu0 %v9210_v34  ;;  %v3380_v34 = vadd.f32 %v11760_v59, %v3295_v14 }
 0x709   :  { %6162 = vmatpush1.bf16.msra.mxu1 %v9213_v19  ;;  %5937 = vmatprep.subr.bf16.mxu0 %v9218_v41  ;;  %v13586_v19 = vld [vmem:[#allocation92_spill] sm:$0xff]  ;;  %v3218_v41 = vmul.f32 %v11349_v61, %v3154_v44  ;;  %v3435_v57 = vmax.f32 %v3371_v27, 0.0  ;;  %v3290_v9 = vmul.f32 %v11781_v2, %v3205_v24  ;;  %v3379_v28 = vadd.f32 %v11791_v45, %v3294_v56  ;;  %v9231_v24 = vld [vmem:[#allocation11 + $0x688] ss:$16 sps:$4 sm:$0xff]  }
 0x70a   :  { %6163 = vmatprep.subr.bf16.mxu1 %v9221_v32  ;;  %5033 = vmatmul.mubr.bf16.gmra.mrb[116].mxu0 %v11732_v1  ;;  %v3150_v10 = vsub.f32 %v13586_v19, %v11230_v6  ;;  %v3367_v32 = vadd.f32 %v11791_v45, %v3282_v51  ;;  %v9230_v44 = vld [vmem:[#allocation11 + $0x684] ss:$16 sps:$4 sm:$0xff]  }
 0x70b   :  { %5259 = vmatmul.mubr.bf16.gmra.mrb[112].mxu1 %v11732_v1  ;;  %5941 = vmatprep.mubr.bf16.mxu0 %v3858_v5  ;;  %v3376_v1 = vadd.f32 %v11760_v59, %v3291_v16  ;;  %v3303_v51 = vmul.f32 %v11754_v31, %v3218_v41  ;;  %v9228_v16 = vld [vmem:[#allocation11 + $0x680] ss:$16 sps:$4 sm:$0xff]  }
 0x70c   :  { %6167 = vmatprep.mubr.bf16.mxu1 %v3858_v5  ;;  %5938 = vmatpush1.bf16.msra.mxu0 %v9216_v48  ;;  %v3214_v14 = vmul.f32 %v11341_v30, %v3150_v10  ;;  %v3444_v5 = vmax.f32 %v3380_v34, 0.0  ;;  %v3431_v19 = vmax.f32 %v3367_v32, 0.0  ;;  %v13587_v48 = vld [vmem:[#allocation93_spill] sm:$0xff]  ;;  %v13589_v34 = vld [vmem:[#allocation102_spill] sm:$0xff] }
 0x70d   :  { %6164 = vmatpush1.bf16.msra.mxu1 %v9219_v13  ;;  %5939 = vmatprep.subr.bf16.mxu0 %v9224_v38  ;;  %v3153_v13 = vsub.f32 %v13587_v48, %v11241_v29  ;;  %v3440_v10 = vmax.f32 %v3376_v1, 0.0  ;;  %v3162_v41 = vsub.f32 %v13589_v34, %v11293_v62  ;;  %v13590_v48 = vld [vmem:[#allocation100_spill] sm:$0xff]  ;;  %v9239_v1 = vld [vmem:[#allocation11 + $0x6ac] ss:$16 sps:$4 sm:$0xff]  }
 0x70e   :  { %6165 = vmatprep.subr.bf16.mxu1 %v9227_v46  ;;  %v3299_v38 = vmul.f32 %v11754_v31, %v3214_v14  ;;  %v13588_v46 = vld [vmem:[#allocation91_spill] sm:$0xff]  ;;  %v3857_v32 = vpack.c.bf16 %v3435_v57, %v3431_v19  ;;  %v3388_v14 = vadd.f32 %v11760_v59, %v3303_v51  ;;  %v9242_v51 = vld [vmem:[#allocation11 + $0x6c4] ss:$16 sps:$4 sm:$0xff]  }
 0x70f   :  { %v3149_v27 = vsub.f32 %v13588_v46, %v11230_v6  ;;  %v3217_v56 = vmul.f32 %v11349_v61, %v3153_v13  ;;  %v3226_v63 = vmul.f32 %v11384_v60, %v3162_v41  ;;  %v3375_v46 = vadd.f32 %v11791_v45, %v3290_v9  ;;  %v9245_v34 = vld [vmem:[#allocation11 + $0x6cc] ss:$16 sps:$4 sm:$0xff]  }
 0x710   :  { %5940 = vmatpush1.bf16.msra.mxu0 %v9222_v47  ;;  %v3158_v47 = vsub.f32 %v13590_v48, %v11280_v7  ;;  %v3384_v19 = vadd.f32 %v11760_v59, %v3299_v38  ;;  %v3443_v13 = vmax.f32 %v3379_v28, 0.0  ;;  %v3452_v9 = vmax.f32 %v3388_v14, 0.0  ;;  %v13591_v41 = vld [vmem:[#allocation101_spill] sm:$0xff] }
 0x711   :  { %6166 = vmatpush1.bf16.msra.mxu1 %v9225_v4  ;;  %6022 = vmatprep.subr.bf16.mxu0 %v9230_v44  ;;  %v3862_v4 = vpack.c.bf16 %v3444_v5, %v3440_v10  ;;  %v3213_v57 = vmul.f32 %v11341_v30, %v3149_v27  ;;  %v9237_v5 = vld [vmem:[#allocation11 + $0x6a8] ss:$16 sps:$4 sm:$0xff]   ;;  %v3302_v10 = vmul.f32 %v11781_v2, %v3217_v56 }
 0x712   :  { %6248 = vmatprep.subr.bf16.mxu1 %v9233_v21  ;;  %v3222_v44 = vmul.f32 %v11380_v39, %v3158_v47  ;;  %v9234_v21 = vld [vmem:[#allocation11 + $0x6a0] ss:$16 sps:$4 sm:$0xff]   ;;  %v3311_v27 = vmul.f32 %v11754_v31, %v3226_v63  ;;  %v3448_v56 = vmax.f32 %v3384_v19, 0.0  ;;  %v9243_v14 = vld [vmem:[#allocation11 + $0x6c8] ss:$16 sps:$4 sm:$0xff]  }
 0x713   :  { %5942 = vmatmul.mubr.bf16.vlgmr.msra.gmra.mrb[88].mxu0 %v3857_v32  ;;  %v3298_v48 = vmul.f32 %v11781_v2, %v3213_v57  ;;  %v9240_v47 = vld [vmem:[#allocation11 + $0x6c0] ss:$16 sps:$4 sm:$0xff]  }
 0x714   :  { %6168 = vmatmul.mubr.bf16.vlgmr.msra.gmra.mrb[84].mxu1 %v3857_v32  ;;  %5951 = vmatprep.mubr.bf16.mxu0 %v3862_v4  ;;  %v3161_v32 = vsub.f32 %v13591_v41, %v11293_v62  ;;  %v3307_v38 = vmul.f32 %v11754_v31, %v3222_v44  ;;  %v3866_v44 = vpack.c.bf16 %v3452_v9, %v3448_v56  ;;  %v9248_v41 = vld [vmem:[#allocation11 + $0x6e4] ss:$16 sps:$4 sm:$0xff]   ;;  %v9249_v9 = vld [vmem:[#allocation11 + $0x6e8] ss:$16 sps:$4 sm:$0xff]  }
 0x715   :  { %6023 = vmatpush1.bf16.msra.mxu0 %v9228_v16  ;;  %6177 = vmatprep.mubr.bf16.mxu1 %v3862_v4  ;;  %v3439_v16 = vmax.f32 %v3375_v46, 0.0  ;;  %v13593_v4 = vld [vmem:[#allocation110_spill] sm:$0xff]  ;;  %v3387_v46 = vadd.f32 %v11791_v45, %v3302_v10  ;;  %v13594_v19 = vld [vmem:[#allocation108_spill] sm:$0xff] }
 0x716   :  { %6249 = vmatpush1.bf16.msra.mxu1 %v9231_v24  ;;  %6024 = vmatprep.subr.bf16.mxu0 %v9236_v35  ;;  %v13592_v24 = vld [vmem:[#allocation99_spill] sm:$0xff]  ;;  %v3225_v35 = vmul.f32 %v11384_v60, %v3161_v32  ;;  %v3166_v32 = vsub.f32 %v13594_v19, %v11314_v8 }
 0x717   :  { %6250 = vmatprep.subr.bf16.mxu1 %v9239_v1  ;;  %v3157_v28 = vsub.f32 %v13592_v24, %v11280_v7  ;;  %v3170_v1 = vsub.f32 %v13593_v4, %v11325_v52  ;;  %v3861_v63 = vpack.c.bf16 %v3443_v13, %v3439_v16  ;;  %v9251_v24 = vld [vmem:[#allocation11 + $0x6ec] ss:$16 sps:$4 sm:$0xff]   ;;  %v3392_v13 = vadd.f32 %v11760_v59, %v3307_v38  ;;  %v9254_v16 = vld [vmem:[#allocation11 + $0x704] ss:$16 sps:$4 sm:$0xff]  }
 0x718   :  { %v3310_v10 = vmul.f32 %v11781_v2, %v3225_v35 }
 0x719   :  { %6025 = vmatpush1.bf16.msra.mxu0 %v9234_v21  ;;  %v3221_v57 = vmul.f32 %v11380_v39, %v3157_v28  ;;  %v3396_v21 = vadd.f32 %v11760_v59, %v3311_v27  ;;  %v3234_v60 = vmul.f32 %v11417_v54, %v3170_v1  ;;  %v3451_v27 = vmax.f32 %v3387_v46, 0.0  ;;  %v9257_v28 = vld [vmem:[#allocation11 + $0x70c] ss:$16 sps:$4 sm:$0xff]  }
 0x71a   :  { %6251 = vmatpush1.bf16.msra.mxu1 %v9237_v5  ;;  %6026 = vmatprep.subr.bf16.mxu0 %v9242_v51  ;;  %v3383_v5 = vadd.f32 %v11791_v45, %v3298_v48  ;;  %v9246_v51 = vld [vmem:[#allocation11 + $0x6e0] ss:$16 sps:$4 sm:$0xff]   ;;  %v13595_v1 = vld [vmem:[#allocation109_spill] sm:$0xff] }
 0x71b   :  { %6252 = vmatprep.subr.bf16.mxu1 %v9245_v34  ;;  %5952 = vmatmul.mubr.bf16.gmra.mrb[92].mxu0 %v3861_v63  ;;  %v3230_v34 = vmul.f32 %v11407_v15, %v3166_v32  ;;  %v3460_v56 = vmax.f32 %v3396_v21, 0.0  ;;  %v3306_v48 = vmul.f32 %v11781_v2, %v3221_v57  ;;  %v3319_v38 = vmul.f32 %v11754_v31, %v3234_v60  ;;  %v9255_v60 = vld [vmem:[#allocation11 + $0x708] ss:$16 sps:$4 sm:$0xff]   ;;  %v13598_v32 = vld [vmem:[#allocation116_spill] sm:$0xff] }
 0x71c   :  { %6178 = vmatmul.mubr.bf16.gmra.mrb[88].mxu1 %v3861_v63  ;;  %5961 = vmatprep.mubr.bf16.mxu0 %v3866_v44  ;;  %v3447_v4 = vmax.f32 %v3383_v5, 0.0  ;;  %v3169_v35 = vsub.f32 %v13595_v1, %v11325_v52  ;;  %v9252_v63 = vld [vmem:[#allocation11 + $0x700] ss:$16 sps:$4 sm:$0xff]   ;;  %v3174_v5 = vsub.f32 %v13598_v32, %v11351_v33 }
 0x71d   :  { %6027 = vmatpush1.bf16.msra.mxu0 %v9240_v47  ;;  %6187 = vmatprep.mubr.bf16.mxu1 %v3866_v44  ;;  %v3456_v47 = vmax.f32 %v3392_v13, 0.0  ;;  %v3315_v46 = vmul.f32 %v11754_v31, %v3230_v34  ;;  %v13596_v44 = vld [vmem:[#allocation107_spill] sm:$0xff]  ;;  %v3391_v34 = vadd.f32 %v11791_v45, %v3306_v48  ;;  %v3404_v1 = vadd.f32 %v11760_v59, %v3319_v38  ;;  %v9266_v48 = vld [vmem:[#allocation11 + $0x744] ss:$16 sps:$4 sm:$0xff]  }
 0x71e   :  { %6253 = vmatpush1.bf16.msra.mxu1 %v9243_v14  ;;  %6028 = vmatprep.subr.bf16.mxu0 %v9248_v41  ;;  %v3395_v14 = vadd.f32 %v11791_v45, %v3310_v10  ;;  %v3165_v41 = vsub.f32 %v13596_v44, %v11314_v8  ;;  %v3865_v57 = vpack.c.bf16 %v3451_v27, %v3447_v4  ;;  %v9263_v10 = vld [vmem:[#allocation11 + $0x72c] ss:$16 sps:$4 sm:$0xff]  }
 0x71f   :  { %6254 = vmatprep.subr.bf16.mxu1 %v9251_v24  ;;  %v13597_v24 = vld [vmem:[#allocation118_spill] sm:$0xff]  ;;  %v3233_v19 = vmul.f32 %v11417_v54, %v3169_v35  ;;  %v3870_v13 = vpack.c.bf16 %v3460_v56, %v3456_v47  ;;  %v3238_v27 = vmul.f32 %v11441_v17, %v3174_v5  ;;  %v9261_v56 = vld [vmem:[#allocation11 + $0x728] ss:$16 sps:$4 sm:$0xff]   ;;  %v3455_v47 = vmax.f32 %v3391_v34, 0.0  ;;  %v9269_v35 = vld [vmem:[#allocation11 + $0x74c] ss:$16 sps:$4 sm:$0xff]  }
 0x720   :  { %v3178_v21 = vsub.f32 %v13597_v24, %v11360_v12  ;;  %v3459_v4 = vmax.f32 %v3395_v14, 0.0  ;;  %v3468_v24 = vmax.f32 %v3404_v1, 0.0  ;;  %v13599_v14 = vld [vmem:[#allocation117_spill] sm:$0xff] }
 0x721   :  { %6029 = vmatpush1.bf16.msra.mxu0 %v9246_v51  ;;  %v9260_v51 = vld [vmem:[#allocation11 + $0x724] ss:$16 sps:$4 sm:$0xff]   ;;  %v3318_v38 = vmul.f32 %v11781_v2, %v3233_v19 }
 0x722   :  { %6255 = vmatpush1.bf16.msra.mxu1 %v9249_v9  ;;  %6030 = vmatprep.subr.bf16.mxu0 %v9254_v16  ;;  %v3242_v44 = vmul.f32 %v11448_v40, %v3178_v21  ;;  %v3229_v9 = vmul.f32 %v11407_v15, %v3165_v41  ;;  %v9258_v16 = vld [vmem:[#allocation11 + $0x720] ss:$16 sps:$4 sm:$0xff]  }
 0x723   :  { %6256 = vmatprep.subr.bf16.mxu1 %v9257_v28  ;;  %5962 = vmatmul.mubr.bf16.gmra.mrb[96].mxu0 %v3865_v57  ;;  %v3400_v28 = vadd.f32 %v11760_v59, %v3315_v46  ;;  %v3177_v46 = vsub.f32 %v13599_v14, %v11360_v12  ;;  %v13600_v19 = vld [vmem:[#allocation126_spill] sm:$0xff] }
 0x724   :  { %6188 = vmatmul.mubr.bf16.gmra.mrb[92].mxu1 %v3865_v57  ;;  %5971 = vmatprep.mubr.bf16.mxu0 %v3870_v13  ;;  %v3327_v41 = vmul.f32 %v11754_v31, %v3242_v44  ;;  %v3314_v21 = vmul.f32 %v11781_v2, %v3229_v9  ;;  %v3869_v57 = vpack.c.bf16 %v3459_v4, %v3455_v47  ;;  %v9272_v9 = vld [vmem:[#allocation11 + $0x764] ss:$16 sps:$4 sm:$0xff]  }
 0x725   :  { %6031 = vmatpush1.bf16.msra.mxu0 %v9252_v63  ;;  %6197 = vmatprep.mubr.bf16.mxu1 %v3870_v13  ;;  %v3323_v63 = vmul.f32 %v11754_v31, %v3238_v27  ;;  %v3464_v32 = vmax.f32 %v3400_v28, 0.0  ;;  %v3186_v5 = vsub.f32 %v13600_v19, %v11394_v3  ;;  %v9267_v13 = vld [vmem:[#allocation11 + $0x748] ss:$16 sps:$4 sm:$0xff]   ;;  %v3241_v1 = vmul.f32 %v11448_v40, %v3177_v46  ;;  %v9275_v27 = vld [vmem:[#allocation11 + $0x76c] ss:$16 sps:$4 sm:$0xff]   ;;  %v13602_v4 = vld [vmem:[#allocation124_spill] sm:$0xff] }
 0x726   :  { %6257 = vmatpush1.bf16.msra.mxu1 %v9255_v60  ;;  %6032 = vmatprep.subr.bf16.mxu0 %v9260_v51  ;;  %v9264_v60 = vld [vmem:[#allocation11 + $0x740] ss:$16 sps:$4 sm:$0xff]   ;;  %v3403_v51 = vadd.f32 %v11791_v45, %v3318_v38  ;;  %v3182_v28 = vsub.f32 %v13602_v4, %v11386_v53  ;;  %v9278_v46 = vld [vmem:[#allocation11 + $0x784] ss:$16 sps:$4 sm:$0xff]   ;;  %v13603_v19 = vld [vmem:[#allocation125_spill] sm:$0xff] }
 0x727   :  { %6258 = vmatprep.subr.bf16.mxu1 %v9263_v10  ;;  %v13601_v10 = vld [vmem:[#allocation115_spill] sm:$0xff]  ;;  %v3874_v44 = vpack.c.bf16 %v3468_v24, %v3464_v32  ;;  %v3408_v38 = vadd.f32 %v11760_v59, %v3323_v63  ;;  %v3326_v32 = vmul.f32 %v11781_v2, %v3241_v1 }
 0x728   :  { %v3173_v34 = vsub.f32 %v13601_v10, %v11351_v33  ;;  %v3246_v24 = vmul.f32 %v11467_v0, %v3182_v28  ;;  %v3467_v14 = vmax.f32 %v3403_v51, 0.0  ;;  %v9279_v28 = vld [vmem:[#allocation11 + $0x788] ss:$16 sps:$4 sm:$0xff]  }
 0x729   :  { %6033 = vmatpush1.bf16.msra.mxu0 %v9258_v16  ;;  %v3412_v16 = vadd.f32 %v11760_v59, %v3327_v41  ;;  %v9273_v41 = vld [vmem:[#allocation11 + $0x768] ss:$16 sps:$4 sm:$0xff]   ;;  %v3472_v10 = vmax.f32 %v3408_v38, 0.0 }
 0x72a   :  { %6259 = vmatpush1.bf16.msra.mxu1 %v9261_v56  ;;  %6034 = vmatprep.subr.bf16.mxu0 %v9266_v48  ;;  %v3250_v56 = vmul.f32 %v11472_v20, %v3186_v5  ;;  %v3399_v48 = vadd.f32 %v11791_v45, %v3314_v21  ;;  %v3237_v47 = vmul.f32 %v11441_v17, %v3173_v34 }
 0x72b   :  { %6260 = vmatprep.subr.bf16.mxu1 %v9269_v35  ;;  %5972 = vmatmul.mubr.bf16.gmra.mrb[100].mxu0 %v3869_v57  ;;  %v9270_v35 = vld [vmem:[#allocation11 + $0x760] ss:$16 sps:$4 sm:$0xff]   ;;  %v3476_v21 = vmax.f32 %v3412_v16, 0.0  ;;  %v3185_v5 = vsub.f32 %v13603_v19, %v11394_v3  ;;  %v3331_v51 = vmul.f32 %v11754_v31, %v3246_v24  ;;  %v9287_v24 = vld [vmem:[#allocation11 + $0x7ac] ss:$16 sps:$4 sm:$0xff]  }
 0x72c   :  { %6198 = vmatmul.mubr.bf16.gmra.mrb[96].mxu1 %v3869_v57  ;;  %5981 = vmatprep.mubr.bf16.mxu0 %v3874_v44  ;;  %v9281_v57 = vld [vmem:[#allocation11 + $0x78c] ss:$16 sps:$4 sm:$0xff]   ;;  %v3335_v63 = vmul.f32 %v11754_v31, %v3250_v56  ;;  %v3322_v34 = vmul.f32 %v11781_v2, %v3237_v47  ;;  %v3411_v56 = vadd.f32 %v11791_v45, %v3326_v32 }
 0x72d   :  { %6035 = vmatpush1.bf16.msra.mxu0 %v9264_v60  ;;  %6207 = vmatprep.mubr.bf16.mxu1 %v3874_v44  ;;  %v3463_v60 = vmax.f32 %v3399_v48, 0.0  ;;  %v13604_v44 = vld [vmem:[#allocation123_spill] sm:$0xff]  ;;  %v13606_v48 = vld [vmem:[#allocation132_spill] sm:$0xff]  ;;  %v3878_v47 = vpack.c.bf16 %v3476_v21, %v3472_v10  ;;  %v3416_v32 = vadd.f32 %v11760_v59, %v3331_v51 }
 0x72e   :  { %6261 = vmatpush1.bf16.msra.mxu1 %v9267_v13  ;;  %6036 = vmatprep.subr.bf16.mxu0 %v9272_v9  ;;  %v9276_v13 = vld [vmem:[#allocation11 + $0x780] ss:$16 sps:$4 sm:$0xff]   ;;  %v3181_v1 = vsub.f32 %v13604_v44, %v11386_v53  ;;  %v3249_v9 = vmul.f32 %v11472_v20, %v3185_v5  ;;  %v3190_v38 = vsub.f32 %v13606_v48, %v11419_v23  ;;  %v9285_v21 = vld [vmem:[#allocation11 + $0x7a8] ss:$16 sps:$4 sm:$0xff]   ;;  %v9293_v10 = vld [vmem:[#allocation11 + $0x7cc] ss:$16 sps:$4 sm:$0xff]  }
 0x72f   :  { %6262 = vmatprep.subr.bf16.mxu1 %v9275_v27  ;;  %v13605_v27 = vld [vmem:[#allocation138_spill] sm:$0xff]  ;;  %v3873_v4 = vpack.c.bf16 %v3467_v14, %v3463_v60  ;;  %v3420_v19 = vadd.f32 %v11760_v59, %v3335_v63  ;;  %v3475_v63 = vmax.f32 %v3411_v56, 0.0  ;;  %v3480_v48 = vmax.f32 %v3416_v32, 0.0  ;;  %v9299_v32 = vld [vmem:[#allocation11 + $0x7ec] ss:$16 sps:$4 sm:$0xff]  }
 0x730   :  { %v3194_v16 = vsub.f32 %v13605_v27, %v11426_v50  ;;  %v3245_v5 = vmul.f32 %v11467_v0, %v3181_v1  ;;  %v3254_v14 = vmul.f32 %v11509_v11, %v3190_v38  ;;  %v9290_v60 = vld [vmem:[#allocation11 + $0x7c4] ss:$16 sps:$4 sm:$0xff]   ;;  %v9288_v56 = vld [vmem:[#allocation11 + $0x7c0] ss:$16 sps:$4 sm:$0xff]  }
 0x731   :  { %6037 = vmatpush1.bf16.msra.mxu0 %v9270_v35  ;;  %v9284_v35 = vld [vmem:[#allocation11 + $0x7a4] ss:$16 sps:$4 sm:$0xff]   ;;  %v3484_v1 = vmax.f32 %v3420_v19, 0.0 }
 0x732   :  { %6263 = vmatpush1.bf16.msra.mxu1 %v9273_v41  ;;  %6038 = vmatprep.subr.bf16.mxu0 %v9278_v46  ;;  %v3258_v44 = vmul.f32 %v11518_v58, %v3194_v16  ;;  %v3407_v41 = vadd.f32 %v11791_v45, %v3322_v34  ;;  %v9282_v46 = vld [vmem:[#allocation11 + $0x7a0] ss:$16 sps:$4 sm:$0xff]   ;;  %v3330_v34 = vmul.f32 %v11781_v2, %v3245_v5  ;;  %v9291_v5 = vld [vmem:[#allocation11 + $0x7c8] ss:$16 sps:$4 sm:$0xff]  }
 0x733   :  { %6264 = vmatprep.subr.bf16.mxu1 %v9281_v57  ;;  %5982 = vmatmul.mubr.bf16.gmra.mrb[104].mxu0 %v3873_v4  ;;  %v3334_v57 = vmul.f32 %v11781_v2, %v3249_v9  ;;  %v3339_v51 = vmul.f32 %v11754_v31, %v3254_v14  ;;  %v13608_v9 = vld [vmem:[#allocation131_spill] sm:$0xff]  ;;  %v3882_v14 = vpack.c.bf16 %v3484_v1, %v3480_v48  ;;  %v13611_v1 = vld [vmem:[#allocation24_spill] sm:$0xff] }
 0x734   :  { %6208 = vmatmul.mubr.bf16.gmra.mrb[100].mxu1 %v3873_v4  ;;  %5991 = vmatprep.mubr.bf16.mxu0 %v3878_v47  ;;  %v3343_v27 = vmul.f32 %v11754_v31, %v3258_v44  ;;  %v3471_v4 = vmax.f32 %v3407_v41, 0.0  ;;  %v13610_v31 = vld [vmem:[#allocation88_spill] sm:$0xff] }
 0x735   :  { %6039 = vmatpush1.bf16.msra.mxu0 %v9276_v13  ;;  %6217 = vmatprep.mubr.bf16.mxu1 %v3878_v47  ;;  %v13607_v13 = vld [vmem:[#allocation135_spill] sm:$0xff]  ;;  %v3419_v38 = vadd.f32 %v11791_v45, %v3334_v57  ;;  %v3136_v41 = vsub.f32 %v13610_v31, %v13574_v43  ;;  %v3415_v57 = vadd.f32 %v11791_v45, %v3330_v34  ;;  %v13613_v31 = vld [vmem:[#allocation98_spill] sm:$0xff] }
 0x736   :  { %6265 = vmatpush1.bf16.msra.mxu1 %v9279_v28  ;;  %6040 = vmatprep.subr.bf16.mxu0 %v9284_v35  ;;  %v3193_v16 = vsub.f32 %v13607_v13, %v11426_v50  ;;  %v3189_v28 = vsub.f32 %v13608_v9, %v11419_v23  ;;  %v13609_v35 = vld [vmem:[#allocation90_spill] sm:$0xff]  ;;  %v3877_v19 = vpack.c.bf16 %v3475_v63, %v3471_v4  ;;  %v9297_v34 = vld [vmem:[#allocation11 + $0x7e8] ss:$16 sps:$4 sm:$0xff]  }
 0x737   :  { %6266 = vmatprep.subr.bf16.mxu1 %v9287_v24  ;;  %v3140_v24 = vsub.f32 %v13609_v35, %v11166_v49  ;;  %v3428_v13 = vadd.f32 %v11760_v59, %v3343_v27  ;;  %v9294_v63 = vld [vmem:[#allocation11 + $0x7e0] ss:$16 sps:$4 sm:$0xff]   ;;  %v11933_v9 = vrot.slane %v11738_v18, %v13611_v1  ;;  %v9302_v27 = vld [vmem:[#allocation11 + $0x804] ss:$16 sps:$4 sm:$0xff]   ;;  %v13612_v35 = vld [vmem:[#allocation89_spill] sm:$0xff] }
 0x738   :  { %v3257_v47 = vmul.f32 %v11518_v58, %v3193_v16  ;;  %v3253_v44 = vmul.f32 %v11509_v11, %v3189_v28 }
 0x739   :  { %6041 = vmatpush1.bf16.msra.mxu0 %v9282_v46  ;;  %v9296_v46 = vld [vmem:[#allocation11 + $0x7e4] ss:$16 sps:$4 sm:$0xff]   ;;  %v3204_v16 = vmul.f32 %v11278_v37, %v3140_v24  ;;  %v3139_v24 = vsub.f32 %v13612_v35, %v11166_v49 }
 0x73a   :  { %6267 = vmatpush1.bf16.msra.mxu1 %v9285_v21  ;;  %6042 = vmatprep.subr.bf16.mxu0 %v9290_v60  ;;  %v3424_v21 = vadd.f32 %v11760_v59, %v3339_v51  ;;  %v3483_v60 = vmax.f32 %v3419_v38, 0.0  ;;  %v3342_v4 = vmul.f32 %v11781_v2, %v3257_v47  ;;  %v3338_v28 = vmul.f32 %v11781_v2, %v3253_v44  ;;  %v9305_v51 = vld [vmem:[#allocation11 + $0x80c] ss:$16 sps:$4 sm:$0xff]  }
 0x73b   :  { %6268 = vmatprep.subr.bf16.mxu1 %v9293_v10  ;;  %5992 = vmatmul.mubr.bf16.gmra.mrb[108].mxu0 %v3877_v19  ;;  %v3200_v10 = vmul.f32 %v13576_v26, %v3136_v41  ;;  %v3479_v59 = vmax.f32 %v3415_v57, 0.0  ;;  %v3289_v48 = vmul.f32 %v11933_v9, %v3204_v16  ;;  %v11939_v47 = vrot.slane %v11749_v42, %v13611_v1  ;;  %v9308_v16 = vld [vmem:[#allocation11 + $0x824] ss:$16 sps:$4 sm:$0xff]  }
 0x73c   :  { %6218 = vmatmul.mubr.bf16.gmra.mrb[104].mxu1 %v3877_v19  ;;  %6001 = vmatprep.mubr.bf16.mxu0 %v3882_v14  ;;  %v3488_v38 = vmax.f32 %v3424_v21, 0.0  ;;  %v3427_v2 = vadd.f32 %v11791_v45, %v3342_v4  ;;  %v3148_v41 = vsub.f32 %v13613_v31, %v11202_v55  ;;  %v3203_v49 = vmul.f32 %v11278_v37, %v3139_v24  ;;  %v9311_v21 = vld [vmem:[#allocation11 + $0x82c] ss:$16 sps:$4 sm:$0xff]   ;;  %v9306_v37 = vld [vmem:[#allocation11 + $0x820] ss:$16 sps:$4 sm:$0xff]  }
 0x73d   :  { %6043 = vmatpush1.bf16.msra.mxu0 %v9288_v56  ;;  %6227 = vmatprep.mubr.bf16.mxu1 %v3882_v14  ;;  %v3492_v56 = vmax.f32 %v3428_v13, 0.0  ;;  %v3881_v19 = vpack.c.bf16 %v3483_v60, %v3479_v59  ;;  %v3285_v44 = vmul.f32 %v11933_v9, %v3200_v10  ;;  %v9303_v14 = vld [vmem:[#allocation11 + $0x808] ss:$16 sps:$4 sm:$0xff]   ;;  %v13615_v60 = vld [vmem:[#allocation96_spill] sm:$0xff] }
 0x73e   :  { %6269 = vmatpush1.bf16.msra.mxu1 %v9291_v5  ;;  %6044 = vmatprep.subr.bf16.mxu0 %v9296_v46  ;;  %v9300_v5 = vld [vmem:[#allocation11 + $0x800] ss:$16 sps:$4 sm:$0xff]   ;;  %v3423_v46 = vadd.f32 %v11791_v45, %v3338_v28  ;;  %v3144_v4 = vsub.f32 %v13615_v60, %v11193_v25  ;;  %v3212_v10 = vmul.f32 %v11312_v22, %v3148_v41 }
 0x73f   :  { %6270 = vmatprep.subr.bf16.mxu1 %v9299_v32  ;;  %v13614_v32 = vld [vmem:[#allocation87_spill] sm:$0xff]  ;;  %v3886_v13 = vpack.c.bf16 %v3492_v56, %v3488_v38  ;;  %v3370_v28 = vadd.f32 %v11939_v47, %v3285_v44  ;;  %v9314_v56 = vld [vmem:[#allocation11 + $0x844] ss:$16 sps:$4 sm:$0xff]   ;;  %v9312_v31 = vld [vmem:[#allocation11 + $0x840] ss:$16 sps:$4 sm:$0xff]  }
 0x740   :  { %v3135_v57 = vsub.f32 %v13614_v32, %v13574_v43  ;;  %v3208_v59 = vmul.f32 %v11308_v36, %v3144_v4  ;;  %v9317_v38 = vld [vmem:[#allocation11 + $0x84c] ss:$16 sps:$4 sm:$0xff]   ;;  %v3297_v35 = vmul.f32 %v11933_v9, %v3212_v10  ;;  %v13620_v4 = vld [vmem:[#allocation104_spill] sm:$0xff] }
 0x741   :  { %6045 = vmatpush1.bf16.msra.mxu0 %v9294_v63  ;;  %v3374_v63 = vadd.f32 %v11939_v47, %v3289_v48  ;;  %v3434_v41 = vmax.f32 %v3370_v28, 0.0  ;;  %v3152_v10 = vsub.f32 %v13620_v4, %v11230_v6 }
 0x742   :  { %6271 = vmatpush1.bf16.msra.mxu1 %v9297_v34  ;;  %6046 = vmatprep.subr.bf16.mxu0 %v9302_v27  ;;  %v3199_v45 = vmul.f32 %v13576_v26, %v3135_v57  ;;  %v13616_v34 = vld [vmem:[#allocation23_spill] sm:$0xff]  ;;  %v3491_v27 = vmax.f32 %v3427_v2, 0.0  ;;  %v3487_v26 = vmax.f32 %v3423_v46, 0.0  ;;  %v13618_v46 = vld [vmem:[#allocation106_spill] sm:$0xff]  ;;  %v3382_v60 = vadd.f32 %v11939_v47, %v3297_v35 }
 0x743   :  { %6272 = vmatprep.subr.bf16.mxu1 %v9305_v51  ;;  %6002 = vmatmul.mubr.bf16.gmra.mrb[112].mxu0 %v3881_v19  ;;  %v11958_v43 = vrot.slane %v11738_v18, %v13616_v34  ;;  %v9309_v51 = vld [vmem:[#allocation11 + $0x828] ss:$16 sps:$4 sm:$0xff]   ;;  %v3438_v18 = vmax.f32 %v3374_v63, 0.0  ;;  %v3156_v32 = vsub.f32 %v13618_v46, %v11241_v29  ;;  %v9323_v63 = vld [vmem:[#allocation11 + $0x86c] ss:$16 sps:$4 sm:$0xff]   ;;  %v3216_v28 = vmul.f32 %v11341_v30, %v3152_v10 }
 0x744   :  { %6228 = vmatmul.mubr.bf16.gmra.mrb[108].mxu1 %v3881_v19  ;;  %6011 = vmatprep.mubr.bf16.mxu0 %v3886_v13  ;;  %v11967_v19 = vrot.slane %v11749_v42, %v13616_v34  ;;  %v3885_v44 = vpack.c.bf16 %v3491_v27, %v3487_v26  ;;  %v9315_v57 = vld [vmem:[#allocation11 + $0x848] ss:$16 sps:$4 sm:$0xff]  }
 0x745   :  { %6047 = vmatpush1.bf16.msra.mxu0 %v9300_v5  ;;  %6237 = vmatprep.mubr.bf16.mxu1 %v3886_v13  ;;  %v3288_v48 = vmul.f32 %v11958_v43, %v3203_v49  ;;  %v3284_v24 = vmul.f32 %v11958_v43, %v3199_v45  ;;  %v13617_v5 = vld [vmem:[#allocation97_spill] sm:$0xff]  ;;  %v13619_v42 = vld [vmem:[#allocation95_spill] sm:$0xff]  ;;  %v3220_v45 = vmul.f32 %v11349_v61, %v3156_v32 }
 0x746   :  { %6273 = vmatpush1.bf16.msra.mxu1 %v9303_v14  ;;  %6048 = vmatprep.subr.bf16.mxu0 %v9308_v16  ;;  %v3147_v2 = vsub.f32 %v13617_v5, %v11202_v55  ;;  %v3293_v14 = vmul.f32 %v11933_v9, %v3208_v59  ;;  %v3143_v13 = vsub.f32 %v13619_v42, %v11193_v25  ;;  %v9318_v25 = vld [vmem:[#allocation11 + $0x860] ss:$16 sps:$4 sm:$0xff]   ;;  %v9321_v59 = vld [vmem:[#allocation11 + $0x868] ss:$16 sps:$4 sm:$0xff]  }
 0x747   :  { %6274 = vmatprep.subr.bf16.mxu1 %v9311_v21  ;;  %v3373_v49 = vadd.f32 %v11967_v19, %v3288_v48  ;;  %v3860_v55 = vpack.c.bf16 %v3438_v18, %v3434_v41  ;;  %v9320_v21 = vld [vmem:[#allocation11 + $0x864] ss:$16 sps:$4 sm:$0xff]   ;;  %v3446_v48 = vmax.f32 %v3382_v60, 0.0  ;;  %v3305_v26 = vmul.f32 %v11933_v9, %v3220_v45  ;;  %v13621_v18 = vld [vmem:[#allocation105_spill] sm:$0xff] }
 0x748   :  { %v3211_v16 = vmul.f32 %v11312_v22, %v3147_v2  ;;  %v3207_v27 = vmul.f32 %v11308_v36, %v3143_v13  ;;  %v3378_v22 = vadd.f32 %v11939_v47, %v3293_v14  ;;  %v3155_v35 = vsub.f32 %v13621_v18, %v11241_v29  ;;  %v13622_v2 = vld [vmem:[#allocation114_spill] sm:$0xff]  ;;  %v13623_v14 = vld [vmem:[#allocation103_spill] sm:$0xff]  ;;  %v13624_v29 = vld [vmem:[#allocation112_spill] sm:$0xff] }
 0x749   :  { %6049 = vmatpush1.bf16.msra.mxu0 %v9306_v37  ;;  %v3369_v37 = vadd.f32 %v11967_v19, %v3284_v24  ;;  %v3301_v5 = vmul.f32 %v11933_v9, %v3216_v28  ;;  %v3151_v46 = vsub.f32 %v13623_v14, %v11230_v6  ;;  %v3160_v42 = vsub.f32 %v13624_v29, %v11280_v7  ;;  %v13625_v13 = vld [vmem:[#allocation30_spill] sm:$0xff] }
 0x74a   :  { %6275 = vmatpush1.bf16.msra.mxu1 %v9309_v51  ;;  %6050 = vmatprep.subr.bf16.mxu0 %v9314_v56  ;;  %v3437_v51 = vmax.f32 %v3373_v49, 0.0  ;;  %v3296_v56 = vmul.f32 %v11958_v43, %v3211_v16  ;;  %v3292_v36 = vmul.f32 %v11958_v43, %v3207_v27  ;;  %v3442_v24 = vmax.f32 %v3378_v22, 0.0  ;;  %v13626_v27 = vld [vmem:[#allocation113_spill] sm:$0xff]  ;;  %v13627_v28 = vld [vmem:[#allocation122_spill] sm:$0xff] }
 0x74b   :  { %6276 = vmatprep.subr.bf16.mxu1 %v9317_v38  ;;  %6012 = vmatmul.mubr.bf16.gmra.mrb[116].mxu0 %v3885_v44  ;;  %v3433_v38 = vmax.f32 %v3369_v37, 0.0  ;;  %v3219_v32 = vmul.f32 %v11349_v61, %v3155_v35  ;;  %v3390_v49 = vadd.f32 %v11939_v47, %v3305_v26  ;;  %v3224_v6 = vmul.f32 %v11380_v39, %v3160_v42  ;;  %v13629_v35 = vld [vmem:[#allocation120_spill] sm:$0xff] }
 0x74c   :  { %6238 = vmatmul.mubr.bf16.gmra.mrb[112].mxu1 %v3885_v44  ;;  %6054 = vmatprep.mubr.bf16.mxu0 %v3860_v55  ;;  %v3164_v44 = vsub.f32 %v13622_v2, %v11293_v62  ;;  %v3381_v41 = vadd.f32 %v11967_v19, %v3296_v56 }
 0x74d   :  { %6051 = vmatpush1.bf16.msra.mxu0 %v9312_v31  ;;  %6280 = vmatprep.mubr.bf16.mxu1 %v3860_v55  ;;  %v3859_v31 = vpack.c.bf16 %v3437_v51, %v3433_v38  ;;  %v3377_v55 = vadd.f32 %v11967_v19, %v3292_v36  ;;  %v3304_v60 = vmul.f32 %v11958_v43, %v3219_v32  ;;  %v3454_v4 = vmax.f32 %v3390_v49, 0.0  ;;  %v13630_v49 = vld [vmem:[#allocation121_spill] sm:$0xff] }
 0x74e   :  { %6277 = vmatpush1.bf16.msra.mxu1 %v9315_v57  ;;  %6052 = vmatprep.subr.bf16.mxu0 %v9320_v21  ;;  %v3864_v57 = vpack.c.bf16 %v3446_v48, %v3442_v24  ;;  %v3228_v16 = vmul.f32 %v13625_v13, %v3164_v44  ;;  %v3215_v21 = vmul.f32 %v11341_v30, %v3151_v46  ;;  %v3445_v61 = vmax.f32 %v3381_v41, 0.0  ;;  %v13628_v48 = vld [vmem:[#allocation111_spill] sm:$0xff] }
 0x74f   :  { %6278 = vmatprep.subr.bf16.mxu1 %v9323_v63  ;;  %v3386_v63 = vadd.f32 %v11939_v47, %v3301_v5  ;;  %v3441_v45 = vmax.f32 %v3377_v55, 0.0  ;;  %v3309_v22 = vmul.f32 %v11933_v9, %v3224_v6  ;;  %v3389_v56 = vadd.f32 %v11967_v19, %v3304_v60 }
 0x750   :  { %v3313_v10 = vmul.f32 %v11933_v9, %v3228_v16  ;;  %v3300_v37 = vmul.f32 %v11958_v43, %v3215_v21  ;;  %v3159_v26 = vsub.f32 %v13628_v48, %v11280_v7  ;;  %v3171_v29 = vsub.f32 %v13630_v49, %v11325_v52 }
 0x751   :  { %6053 = vmatpush1.bf16.msra.mxu0 %v9318_v25  ;;  %v3163_v25 = vsub.f32 %v13626_v27, %v11293_v62  ;;  %v3450_v30 = vmax.f32 %v3386_v63, 0.0  ;;  %v3863_v51 = vpack.c.bf16 %v3445_v61, %v3441_v45  ;;  %v3168_v62 = vsub.f32 %v13629_v35, %v11314_v8  ;;  %v13632_v63 = vld [vmem:[#allocation119_spill] sm:$0xff] }
 0x752   :  { %6279 = vmatpush1.bf16.msra.mxu1 %v9321_v59  ;;  %v3172_v59 = vsub.f32 %v13627_v28, %v11325_v52  ;;  %v3398_v18 = vadd.f32 %v11939_v47, %v3313_v10  ;;  %v3385_v5 = vadd.f32 %v11967_v19, %v3300_v37  ;;  %v3223_v2 = vmul.f32 %v11380_v39, %v3159_v26  ;;  %v13633_v10 = vld [vmem:[#allocation128_spill] sm:$0xff] }
 0x753   :  { %v3227_v38 = vmul.f32 %v13625_v13, %v3163_v25  ;;  %v3868_v36 = vpack.c.bf16 %v3454_v4, %v3450_v30  ;;  %v3394_v44 = vadd.f32 %v11939_v47, %v3309_v22  ;;  %v3232_v7 = vmul.f32 %v11407_v15, %v3168_v62  ;;  %v13631_v13 = vld [vmem:[#allocation130_spill] sm:$0xff]  ;;  %v13636_v62 = vld [vmem:[#allocation127_spill] sm:$0xff] }
 0x754   :  { %6055 = vmatmul.mubr.bf16.vlgmr.msra.gmra.mrb[88].mxu0 %v3859_v31  ;;  %v3236_v24 = vmul.f32 %v11417_v54, %v3172_v59  ;;  %v3462_v14 = vmax.f32 %v3398_v18, 0.0  ;;  %v3449_v32 = vmax.f32 %v3385_v5, 0.0  ;;  %v3180_v16 = vsub.f32 %v13631_v13, %v11360_v12 }
 0x755   :  { %6281 = vmatmul.mubr.bf16.vlgmr.msra.gmra.mrb[84].mxu1 %v3859_v31  ;;  %6064 = vmatprep.mubr.bf16.mxu0 %v3864_v57  ;;  %v3453_v31 = vmax.f32 %v3389_v56, 0.0  ;;  %v3312_v41 = vmul.f32 %v11958_v43, %v3227_v38  ;;  %v3458_v39 = vmax.f32 %v3394_v44, 0.0  ;;  %v3317_v42 = vmul.f32 %v11933_v9, %v3232_v7  ;;  %v13634_v56 = vld [vmem:[#allocation129_spill] sm:$0xff]  ;;  %v13637_v7 = vld [vmem:[#allocation134_spill] sm:$0xff] }
 0x756   :  { %6290 = vmatprep.mubr.bf16.mxu1 %v3864_v57  ;;  %v3321_v46 = vmul.f32 %v11933_v9, %v3236_v24  ;;  %v3308_v57 = vmul.f32 %v11958_v43, %v3223_v2  ;;  %v3167_v6 = vsub.f32 %v13632_v63, %v11314_v8  ;;  %v3235_v61 = vmul.f32 %v11417_v54, %v3171_v29  ;;  %v13635_v38 = vld [vmem:[#allocation137_spill] sm:$0xff] }
 0x757   :  { %v3867_v55 = vpack.c.bf16 %v3453_v31, %v3449_v32  ;;  %v3397_v21 = vadd.f32 %v11967_v19, %v3312_v41  ;;  %v3872_v60 = vpack.c.bf16 %v3462_v14, %v3458_v39  ;;  %v3176_v52 = vsub.f32 %v13633_v10, %v11351_v33 }
 0x758   :  { %v3406_v4 = vadd.f32 %v11939_v47, %v3321_v46  ;;  %v3244_v45 = vmul.f32 %v11448_v40, %v3180_v16  ;;  %v3393_v37 = vadd.f32 %v11967_v19, %v3308_v57  ;;  %v3231_v27 = vmul.f32 %v11407_v15, %v3167_v6 }
 0x759   :  { %v3402_v25 = vadd.f32 %v11939_v47, %v3317_v42  ;;  %v3240_v8 = vmul.f32 %v11441_v17, %v3176_v52  ;;  %v3461_v54 = vmax.f32 %v3397_v21, 0.0  ;;  %v3320_v30 = vmul.f32 %v11958_v43, %v3235_v61  ;;  %v13638_v42 = vld [vmem:[#allocation136_spill] sm:$0xff]  ;;  %v13640_v61 = vld [vmem:[#allocation133_spill] sm:$0xff] }
 0x75a   :  { %v3470_v22 = vmax.f32 %v3406_v4, 0.0  ;;  %v3329_v28 = vmul.f32 %v11933_v9, %v3244_v45  ;;  %v3457_v59 = vmax.f32 %v3393_v37, 0.0  ;;  %v3179_v48 = vsub.f32 %v13634_v56, %v11360_v12  ;;  %v13641_v45 = vld [vmem:[#allocation140_spill] sm:$0xff] }
 0x75b   :  { %v3466_v15 = vmax.f32 %v3402_v25, 0.0  ;;  %v3325_v26 = vmul.f32 %v11933_v9, %v3240_v8  ;;  %v3405_v35 = vadd.f32 %v11967_v19, %v3320_v30  ;;  %v3175_v24 = vsub.f32 %v13636_v62, %v11351_v33 }
 0x75c   :  { %6065 = vmatmul.mubr.bf16.gmra.mrb[92].mxu0 %v3863_v51  ;;  %v3871_v18 = vpack.c.bf16 %v3461_v54, %v3457_v59  ;;  %v3243_v5 = vmul.f32 %v11448_v40, %v3179_v48  ;;  %v3414_v44 = vadd.f32 %v11939_v47, %v3329_v28  ;;  %v3184_v12 = vsub.f32 %v13637_v7, %v11386_v53 }
 0x75d   :  { %6291 = vmatmul.mubr.bf16.gmra.mrb[88].mxu1 %v3863_v51  ;;  %6074 = vmatprep.mubr.bf16.mxu0 %v3868_v36  ;;  %v3316_v51 = vmul.f32 %v11958_v43, %v3231_v27  ;;  %v3876_v2 = vpack.c.bf16 %v3470_v22, %v3466_v15  ;;  %v3239_v14 = vmul.f32 %v11441_v17, %v3175_v24  ;;  %v3469_v40 = vmax.f32 %v3405_v35, 0.0 }
 0x75e   :  { %6300 = vmatprep.mubr.bf16.mxu1 %v3868_v36  ;;  %v3188_v36 = vsub.f32 %v13635_v38, %v11394_v3  ;;  %v3410_v46 = vadd.f32 %v11939_v47, %v3325_v26  ;;  %v3248_v33 = vmul.f32 %v11467_v0, %v3184_v12  ;;  %v3328_v32 = vmul.f32 %v11958_v43, %v3243_v5  ;;  %v13643_v38 = vld [vmem:[#allocation139_spill] sm:$0xff] }
 0x75f   :  { %v3401_v41 = vadd.f32 %v11967_v19, %v3316_v51  ;;  %v3478_v57 = vmax.f32 %v3414_v44, 0.0  ;;  %v3324_v39 = vmul.f32 %v11958_v43, %v3239_v14  ;;  %v3187_v13 = vsub.f32 %v13638_v42, %v11394_v3  ;;  %v13642_v51 = vld [vmem:[#allocation141_spill] sm:$0xff]  ;;  %v9330_v42 = vld [vmem:[#allocation12 + $0x10] sm:$0xff]  }
 0x760   :  { %v3252_v31 = vmul.f32 %v11472_v20, %v3188_v36  ;;  %v3474_v17 = vmax.f32 %v3410_v46, 0.0  ;;  %v3333_v16 = vmul.f32 %v11933_v9, %v3248_v33  ;;  %v3413_v6 = vadd.f32 %v11967_v19, %v3328_v32  ;;  %v9324_v33 = vld [vmem:[#allocation12 + $0x40] sm:$0xff]   ;;  %v9326_v32 = vld [vmem:[#allocation12 + $0x48] sm:$0xff]  }
 0x761   :  { %v3465_v29 = vmax.f32 %v3401_v41, 0.0  ;;  %v3251_v4 = vmul.f32 %v11472_v20, %v3187_v13  ;;  %v3192_v3 = vsub.f32 %v13641_v45, %v11419_v23  ;;  %v3409_v27 = vadd.f32 %v11967_v19, %v3324_v39  ;;  %8284 = vmatprep.subr.bf16.mxu0 %v9324_v33  ;;  %v9335_v39 = vld [vmem:[#allocation12 + $0x88] sm:$0xff]   ;;  %v9332_v13 = vld [vmem:[#allocation12 + $0x58] sm:$0xff]  }
 0x762   :  { %v3337_v49 = vmul.f32 %v11933_v9, %v3252_v31  ;;  %v3880_v10 = vpack.c.bf16 %v3478_v57, %v3474_v17  ;;  %v3418_v8 = vadd.f32 %v11939_v47, %v3333_v16  ;;  %v3477_v20 = vmax.f32 %v3413_v6, 0.0  ;;  %v9331_v57 = vld [vmem:[#allocation12 + $0x80] sm:$0xff]   ;;  %v9334_v17 = vld [vmem:[#allocation12 + $0x18] sm:$0xff]   ;;  %v13645_v6 = vld [vmem:[#allocation22_spill] sm:$0xff] }
 0x763   :  { %v3875_v63 = vpack.c.bf16 %v3469_v40, %v3465_v29  ;;  %v3336_v54 = vmul.f32 %v11958_v43, %v3251_v4  ;;  %v3473_v28 = vmax.f32 %v3409_v27, 0.0  ;;  %v3195_v56 = vsub.f32 %v13642_v51, %v11426_v50  ;;  %v9325_v40 = vld [vmem:[#allocation12] sm:$0xff]   ;;  %v9328_v29 = vld [vmem:[#allocation12 + $0x50] sm:$0xff]  }
 0x764   :  { %6075 = vmatmul.mubr.bf16.gmra.mrb[96].mxu0 %v3867_v55  ;;  %v3422_v52 = vadd.f32 %v11939_v47, %v3337_v49  ;;  %v3191_v36 = vsub.f32 %v13643_v38, %v11419_v23  ;;  %v9327_v49 = vld [vmem:[#allocation12 + $0x8] sm:$0xff]  }
 0x765   :  { %6301 = vmatmul.mubr.bf16.gmra.mrb[92].mxu1 %v3867_v55  ;;  %6084 = vmatprep.mubr.bf16.mxu0 %v3872_v60  ;;  %v13639_v55 = vld [vmem:[#allocation142_spill] sm:$0xff]  ;;  %v3879_v15 = vpack.c.bf16 %v3477_v20, %v3473_v28  ;;  %v3421_v26 = vadd.f32 %v11967_v19, %v3336_v54 }
 0x766   :  { %6310 = vmatprep.mubr.bf16.mxu1 %v3872_v60  ;;  %v3196_v21 = vsub.f32 %v13639_v55, %v11426_v50  ;;  %v3183_v60 = vsub.f32 %v13640_v61, %v11386_v53  ;;  %v3256_v53 = vmul.f32 %v11509_v11, %v3192_v3  ;;  %v3486_v30 = vmax.f32 %v3422_v52, 0.0  ;;  %8285 = vmatpush3.bf16.msra.mxu0 %v9325_v40  ;;  %v124_v16 = vld [vmem:[#allocation8 + $0x4] ss:$8 sm:$0xf] }
 0x767   :  { %v3255_v5 = vmul.f32 %v11509_v11, %v3191_v36  ;;  %8286 = vmatprep.subr.bf16.mxu0 %v9326_v32  ;;  %v13644_v55 = vld [vmem:[#allocation21_spill] sm:$0xff]  ;;  %v12114_v61 = vrot.slane %v124_v16, %v13645_v6  ;;  %v12120_v45 = vrot.slane %v124_v16, %v13611_v1 }
 0x768   :  { %v3260_v37 = vmul.f32 %v11518_v58, %v3196_v21  ;;  %v3247_v25 = vmul.f32 %v11467_v0, %v3183_v60  ;;  %v3482_v0 = vmax.f32 %v3418_v8, 0.0  ;;  %v3341_v48 = vmul.f32 %v11933_v9, %v3256_v53 }
 0x769   :  { %v12108_v21 = vrot.slane %v124_v16, %v13644_v55 }
 0x76a   :  { %v3345_v22 = vmul.f32 %v11933_v9, %v3260_v37  ;;  %v3332_v59 = vmul.f32 %v11958_v43, %v3247_v25  ;;  %v3884_v35 = vpack.c.bf16 %v3486_v30, %v3482_v0  ;;  %v3426_v50 = vadd.f32 %v11939_v47, %v3341_v48  ;;  %8287 = vmatpush3.bf16.msra.mxu0 %v9327_v49 }
 0x76b   :  { %v3485_v9 = vmax.f32 %v3421_v26, 0.0  ;;  %8288 = vmatprep.subr.bf16.mxu0 %v9328_v29 }
 0x76c   :  { %6085 = vmatmul.mubr.bf16.gmra.mrb[100].mxu0 %v3871_v18  ;;  %v3430_v62 = vadd.f32 %v11939_v47, %v3345_v22  ;;  %v3417_v24 = vadd.f32 %v11967_v19, %v3332_v59  ;;  %v3490_v7 = vmax.f32 %v3426_v50, 0.0 }
 0x76d   :  { %6311 = vmatmul.mubr.bf16.gmra.mrb[96].mxu1 %v3871_v18  ;;  %6094 = vmatprep.mubr.bf16.mxu0 %v3876_v2  ;;  %v3259_v18 = vmul.f32 %v11518_v58, %v3195_v56  ;;  %v3340_v58 = vmul.f32 %v11958_v43, %v3255_v5 }
 0x76e   :  { %6320 = vmatprep.mubr.bf16.mxu1 %v3876_v2  ;;  %v3494_v44 = vmax.f32 %v3430_v62, 0.0  ;;  %v3481_v23 = vmax.f32 %v3417_v24, 0.0  ;;  %8289 = vmatpush3.bf16.msra.mxu0 %v9330_v42 }
 0x76f   :  { %v3344_v2 = vmul.f32 %v11958_v43, %v3259_v18  ;;  %v3425_v11 = vadd.f32 %v11967_v19, %v3340_v58  ;;  %v12104_v43 = vld [vmem:[#allocation12 + $0xc0] sm:$0xff]   ;;  %8290 = vmatprep.subr.bf16.mxu0 %v9332_v13 }
 0x770   :  { %v3883_v12 = vpack.c.bf16 %v3485_v9, %v3481_v23  ;;  %v3888_v41 = vpack.c.bf16 %v3494_v44, %v3490_v7  ;;  %8444 = vmatprep.subr.bf16.mxu1 %v12104_v43 }
 0x771   :  { %v3429_v31 = vadd.f32 %v11967_v19, %v3344_v2  ;;  %v3489_v14 = vmax.f32 %v3425_v11, 0.0  ;;  %v9333_v19 = vld [vmem:[#allocation12 + $0xc8] sm:$0xff]   ;;  %8452 = vmatpush3.bf16.msra.mxu1 %v9331_v57 }
 0x772   :  { %8445 = vmatprep.subr.bf16.mxu1 %v9333_v19  ;;  %8291 = vmatpush3.bf16.msra.mxu0 %v9334_v17 }
 0x773   :  { %v3493_v47 = vmax.f32 %v3429_v31, 0.0 }
 0x774   :  { %6095 = vmatmul.mubr.bf16.gmra.mrb[104].mxu0 %v3875_v63 }
 0x775   :  { %6321 = vmatmul.mubr.bf16.gmra.mrb[100].mxu1 %v3875_v63  ;;  %6104 = vmatprep.mubr.bf16.mxu0 %v3880_v10  ;;  %v3887_v46 = vpack.c.bf16 %v3493_v47, %v3489_v14  ;;  %v12111_v63 = vrot.slane %v124_v16, %v13616_v34 }
 0x776   :  { %6330 = vmatprep.mubr.bf16.mxu1 %v3880_v10  ;;  %8453 = vmatpush3.bf16.msra.mxu1 %v9335_v39 }
 0x77c   :  { %6105 = vmatmul.mubr.bf16.gmra.mrb[108].mxu0 %v3879_v15 }
 0x77d   :  { %6331 = vmatmul.mubr.bf16.gmra.mrb[104].mxu1 %v3879_v15  ;;  %6114 = vmatprep.mubr.bf16.mxu0 %v3884_v35 }
 0x77e   :  { %6340 = vmatprep.mubr.bf16.mxu1 %v3884_v35 }
 0x784   :  { %6115 = vmatmul.mubr.bf16.gmra.mrb[112].mxu0 %v3883_v12 }
 0x785   :  { %6341 = vmatmul.mubr.bf16.gmra.mrb[108].mxu1 %v3883_v12  ;;  %6124 = vmatprep.mubr.bf16.mxu0 %v3888_v41 }
 0x786   :  { %6350 = vmatprep.mubr.bf16.mxu1 %v3888_v41 }
 0x78c   :  { %6125 = vmatmul.mubr.bf16.gmra.mrb[116].mxu0 %v3887_v46 }
 0x78d   :  { %6351 = vmatmul.mubr.bf16.gmra.mrb[112].mxu1 %v3887_v46 }
 0x827   :  { %v6056_v60 = vpop.f32.mrb[88].mxu0 }
 0x828   :  { %v12117_v4 = vadd.f32 %v12108_v21, %v6056_v60  ;;  %v6282_v10 = vpop.f32.mrb[84].mxu1  ;;  %v6058_v52 = vpop.f32.mrb[89].mxu0 }
 0x829   :  { %v12123_v3 = vadd.f32 %v12111_v63, %v6282_v10  ;;  %v12126_v37 = vadd.f32 %v12114_v61, %v6058_v52  ;;  %v6284_v27 = vpop.f32.mrb[85].mxu1  ;;  %v6060_v25 = vpop.f32.mrb[90].mxu0 }
 0x82a   :  { %v6543_v8 = vmul.f32 %v12117_v4, %v12117_v4  ;;  %v12131_v53 = vadd.f32 %v12108_v21, %v6060_v25  ;;  %v6286_v20 = vpop.f32.mrb[86].mxu1  ;;  %v6062_v54 = vpop.f32.mrb[91].mxu0  ;;  %v12138_v59 = vadd.f32 %v12120_v45, %v6284_v27 }
 0x82b   :  { %v6446_v30 = vadd.f32 %v12126_v37, %v12117_v4  ;;  %v6544_v22 = vmul.f32 %v12126_v37, %v12126_v37  ;;  %v6288_v28 = vpop.f32.mrb[87].mxu1  ;;  %v12141_v51 = vadd.f32 %v12114_v61, %v6062_v54  ;;  %v6545_v56 = vmul.f32 %v12123_v3, %v12123_v3 }
 0x82c   :  { %v6547_v48 = vmul.f32 %v12131_v53, %v12131_v53  ;;  %v12149_v26 = vadd.f32 %v12111_v63, %v6286_v20  ;;  %v12157_v24 = vadd.f32 %v12120_v45, %v6288_v28  ;;  %v6546_v44 = vmul.f32 %v12138_v59, %v12138_v59 }
 0x82d   :  { %v6607_v0 = vadd.f32 %v6544_v22, %v6543_v8  ;;  %v6447_v15 = vadd.f32 %v6446_v30, %v12123_v3  ;;  %v6451_v38 = vadd.f32 %v12141_v51, %v12131_v53  ;;  %v6548_v36 = vmul.f32 %v12141_v51, %v12141_v51 }
 0x82e   :  { %13646 = vst [vmem:[#allocation26_spill] sm:$0xff] %v12149_v26  ;;  %13647 = vst [vmem:[#allocation29_spill] sm:$0xff] %v12157_v24  ;;  %v6549_v33 = vmul.f32 %v12149_v26, %v12149_v26  ;;  %v6550_v19 = vmul.f32 %v12157_v24, %v12157_v24 }
 0x82f   :  { %v6066_v18 = vpop.f32.mrb[92].mxu0  ;;  %v6448_v35 = vadd.f32 %v6447_v15, %v12138_v59  ;;  %v6608_v62 = vadd.f32 %v6607_v0, %v6545_v56  ;;  %v6452_v2 = vadd.f32 %v6451_v38, %v12149_v26  ;;  %v6612_v23 = vadd.f32 %v6548_v36, %v6547_v48 }
 0x830   :  { %v12160_v5 = vadd.f32 %v12108_v21, %v6066_v18  ;;  %v6292_v50 = vpop.f32.mrb[88].mxu1  ;;  %v6068_v9 = vpop.f32.mrb[93].mxu0 }
 0x831   :  { %v12166_v58 = vadd.f32 %v12111_v63, %v6292_v50  ;;  %v12169_v7 = vadd.f32 %v12114_v61, %v6068_v9  ;;  %v6294_v12 = vpop.f32.mrb[89].mxu1  ;;  %6449 = vadd.xlane.f32.xlu0 %v6448_v35  ;;  %v6070_v31 = vpop.f32.mrb[94].mxu0  ;;  %v6453_v46 = vadd.f32 %v6452_v2, %v12157_v24  ;;  %v6609_v49 = vadd.f32 %v6608_v62, %v6546_v44 }
 0x832   :  { %v6551_v41 = vmul.f32 %v12160_v5, %v12160_v5  ;;  %v6296_v11 = vpop.f32.mrb[90].mxu1  ;;  %v12174_v47 = vadd.f32 %v12108_v21, %v6070_v31  ;;  %v6072_v14 = vpop.f32.mrb[95].mxu0  ;;  %v12188_v39 = vadd.f32 %v12120_v45, %v6294_v12  ;;  %v6613_v16 = vadd.f32 %v6612_v23, %v6549_v33 }
 0x833   :  { %v6456_v40 = vadd.f32 %v12169_v7, %v12160_v5  ;;  %v6552_v32 = vmul.f32 %v12169_v7, %v12169_v7  ;;  %v6298_v57 = vpop.f32.mrb[91].mxu1  ;;  %v6553_v29 = vmul.f32 %v12166_v58, %v12166_v58  ;;  %v12191_v42 = vadd.f32 %v12114_v61, %v6072_v14  ;;  %6454 = vadd.xlane.f32.xlu1 %v6453_v46 }
 0x834   :  { %v6555_v17 = vmul.f32 %v12174_v47, %v12174_v47  ;;  %v12197_v10 = vadd.f32 %v12111_v63, %v6296_v11  ;;  %v6614_v25 = vadd.f32 %v6613_v16, %v6550_v19  ;;  %v6554_v30 = vmul.f32 %v12188_v39, %v12188_v39 }
 0x835   :  { %v6617_v13 = vadd.f32 %v6552_v32, %v6551_v41  ;;  %6610 = vadd.xlane.f32.xlu0 %v6609_v49  ;;  %v6457_v60 = vadd.f32 %v6456_v40, %v12166_v58  ;;  %v6461_v52 = vadd.f32 %v12191_v42, %v12174_v47  ;;  %v6556_v27 = vmul.f32 %v12191_v42, %v12191_v42 }
 0x836   :  { %v12207_v22 = vadd.f32 %v12120_v45, %v6298_v57  ;;  %v6557_v23 = vmul.f32 %v12197_v10, %v12197_v10 }
 0x837   :  { %v6076_v8 = vpop.f32.mrb[96].mxu0  ;;  %v6458_v20 = vadd.f32 %v6457_v60, %v12188_v39  ;;  %v6618_v54 = vadd.f32 %v6617_v13, %v6553_v29  ;;  %v6462_v48 = vadd.f32 %v6461_v52, %v12197_v10  ;;  %v6622_v15 = vadd.f32 %v6556_v27, %v6555_v17  ;;  %6615 = vadd.xlane.f32.xlu1 %v6614_v25 }
 0x838   :  { %v6302_v28 = vpop.f32.mrb[92].mxu1  ;;  %v12210_v56 = vadd.f32 %v12108_v21, %v6076_v8  ;;  %v6078_v0 = vpop.f32.mrb[97].mxu0  ;;  %v6558_v14 = vmul.f32 %v12207_v22, %v12207_v22 }
 0x839   :  { %v12214_v38 = vadd.f32 %v12111_v63, %v6302_v28  ;;  %v12217_v36 = vadd.f32 %v12114_v61, %v6078_v0  ;;  %v6304_v18 = vpop.f32.mrb[93].mxu1  ;;  %6459 = vadd.xlane.f32.xlu0 %v6458_v20  ;;  %v6080_v35 = vpop.f32.mrb[98].mxu0  ;;  %v6463_v44 = vadd.f32 %v6462_v48, %v12207_v22  ;;  %v6619_v11 = vadd.f32 %v6618_v54, %v6554_v30 }
 0x83a   :  { %v6559_v62 = vmul.f32 %v12210_v56, %v12210_v56  ;;  %v6306_v50 = vpop.f32.mrb[94].mxu1  ;;  %v12222_v9 = vadd.f32 %v12108_v21, %v6080_v35  ;;  %v6082_v2 = vpop.f32.mrb[99].mxu0  ;;  %v12236_v33 = vadd.f32 %v12120_v45, %v6304_v18  ;;  %v6623_v49 = vadd.f32 %v6622_v15, %v6557_v23 }
 0x83b   :  { %v6466_v12 = vadd.f32 %v12217_v36, %v12210_v56  ;;  %v6560_v31 = vmul.f32 %v12217_v36, %v12217_v36  ;;  %v6308_v41 = vpop.f32.mrb[95].mxu1  ;;  %v6561_v46 = vmul.f32 %v12214_v38, %v12214_v38  ;;  %v12239_v40 = vadd.f32 %v12114_v61, %v6082_v2  ;;  %6464 = vadd.xlane.f32.xlu1 %v6463_v44 }
 0x83c   :  { %v6563_v57 = vmul.f32 %v12222_v9, %v12222_v9  ;;  %v12244_v19 = vadd.f32 %v12111_v63, %v6306_v50  ;;  %v12252_v16 = vadd.f32 %v12120_v45, %v6308_v41  ;;  %v6624_v60 = vadd.f32 %v6623_v49, %v6558_v14 }
 0x83d   :  { %v6627_v32 = vadd.f32 %v6560_v31, %v6559_v62  ;;  %6620 = vadd.xlane.f32.xlu0 %v6619_v11  ;;  %v6471_v29 = vadd.f32 %v12239_v40, %v12222_v9  ;;  %v6564_v13 = vmul.f32 %v12239_v40, %v12239_v40  ;;  %v6467_v17 = vadd.f32 %v6466_v12, %v12214_v38 }
 0x83e   :  { %v6562_v28 = vmul.f32 %v12236_v33, %v12236_v33  ;;  %v6565_v12 = vmul.f32 %v12244_v19, %v12244_v19  ;;  %v6566_v14 = vmul.f32 %v12252_v16, %v12252_v16 }
 0x83f   :  { %v6086_v52 = vpop.f32.mrb[100].mxu0  ;;  %v6468_v20 = vadd.f32 %v6467_v17, %v12236_v33  ;;  %v6472_v54 = vadd.f32 %v6471_v29, %v12244_v19  ;;  %v6628_v30 = vadd.f32 %v6627_v32, %v6561_v46  ;;  %v6632_v0 = vadd.f32 %v6564_v13, %v6563_v57  ;;  %6625 = vadd.xlane.f32.xlu1 %v6624_v60 }
 0x840   :  { %v6312_v27 = vpop.f32.mrb[96].mxu1  ;;  %v12255_v25 = vadd.f32 %v12108_v21, %v6086_v52  ;;  %v6088_v8 = vpop.f32.mrb[101].mxu0 }
 0x841   :  { %v12262_v48 = vadd.f32 %v12114_v61, %v6088_v8  ;;  %v6314_v15 = vpop.f32.mrb[97].mxu1  ;;  %v6090_v18 = vpop.f32.mrb[102].mxu0  ;;  %v12265_v35 = vadd.f32 %v12111_v63, %v6312_v27  ;;  %6469 = vadd.xlane.f32.xlu0 %v6468_v20  ;;  %v6473_v23 = vadd.f32 %v6472_v54, %v12252_v16  ;;  %v6629_v57 = vadd.f32 %v6628_v30, %v6562_v28 }
 0x842   :  { %13648 = vst [vmem:[#allocation36_spill] sm:$0xff] %v12255_v25  ;;  %v6567_v62 = vmul.f32 %v12255_v25, %v12255_v25  ;;  %v6316_v50 = vpop.f32.mrb[98].mxu1  ;;  %v12270_v2 = vadd.f32 %v12108_v21, %v6090_v18  ;;  %v6092_v44 = vpop.f32.mrb[103].mxu0  ;;  %v12282_v46 = vadd.f32 %v12120_v45, %v6314_v15  ;;  %v6633_v13 = vadd.f32 %v6632_v0, %v6565_v12 }
 0x843   :  { %13649 = vst [vmem:[#allocation32_spill] sm:$0xff] %v12262_v48  ;;  %13650 = vst [vmem:[#allocation34_spill] sm:$0xff] %v12265_v35  ;;  %v6476_v31 = vadd.f32 %v12262_v48, %v12255_v25  ;;  %v6568_v41 = vmul.f32 %v12262_v48, %v12262_v48  ;;  %v6318_v11 = vpop.f32.mrb[99].mxu1  ;;  %v12285_v32 = vadd.f32 %v12114_v61, %v6092_v44  ;;  %6474 = vadd.xlane.f32.xlu1 %v6473_v23  ;;  %v12450_v48 = vld [vmem:[#allocation12 + $0xa0] sm:$0xff]  }
 0x844   :  { %13651 = vst [vmem:[#allocation33_spill] sm:$0xff] %v12270_v2  ;;  %13652 = vst [vmem:[#allocation44_spill] sm:$0xff] %v12282_v46  ;;  %v6571_v29 = vmul.f32 %v12270_v2, %v12270_v2  ;;  %v6569_v60 = vmul.f32 %v12265_v35, %v12265_v35  ;;  %v12293_v52 = vadd.f32 %v12111_v63, %v6316_v50 }
 0x845   :  { %13653 = vst [vmem:[#allocation41_spill] sm:$0xff] %v12285_v32  ;;  %v6637_v49 = vadd.f32 %v6568_v41, %v6567_v62  ;;  %v6477_v17 = vadd.f32 %v6476_v31, %v12265_v35  ;;  %v6481_v27 = vadd.f32 %v12285_v32, %v12270_v2  ;;  %v6572_v8 = vmul.f32 %v12285_v32, %v12285_v32  ;;  %v12339_v35 = vld [vmem:[#allocation12 + $0x90] sm:$0xff]  }
 0x846   :  { %13654 = vst [vmem:[#allocation42_spill] sm:$0xff] %v12293_v52  ;;  %6630 = vadd.xlane.f32.xlu0 %v6629_v57  ;;  %v12300_v20 = vadd.f32 %v12120_v45, %v6318_v11  ;;  %v6634_v54 = vadd.f32 %v6633_v13, %v6566_v14  ;;  %v6570_v11 = vmul.f32 %v12282_v46, %v12282_v46  ;;  %13678 = vst [vmem:[#allocation45_spill] sm:$0xff] %v12450_v48 }
 0x847   :  { %v6096_v30 = vpop.f32.mrb[104].mxu0  ;;  %v6478_v28 = vadd.f32 %v6477_v17, %v12282_v46  ;;  %v6482_v62 = vadd.f32 %v6481_v27, %v12293_v52  ;;  %v6638_v50 = vadd.f32 %v6637_v49, %v6569_v60  ;;  %v6642_v44 = vadd.f32 %v6572_v8, %v6571_v29 }
 0x848   :  { %13655 = vst [vmem:[#allocation40_spill] sm:$0xff] %v12300_v20  ;;  %v6322_v0 = vpop.f32.mrb[100].mxu1  ;;  %v12304_v15 = vadd.f32 %v12108_v21, %v6096_v30  ;;  %v6098_v18 = vpop.f32.mrb[105].mxu0  ;;  %6635 = vadd.xlane.f32.xlu1 %v6634_v54  ;;  %v6573_v17 = vmul.f32 %v12293_v52, %v12293_v52  ;;  %v6574_v60 = vmul.f32 %v12300_v20, %v12300_v20  ;;  %v9336_v30 = vld [vmem:[#allocation12 + $0x60] sm:$0xff]  }
 0x849   :  { %v12308_v23 = vadd.f32 %v12111_v63, %v6322_v0  ;;  %v12311_v12 = vadd.f32 %v12114_v61, %v6098_v18  ;;  %v6324_v31 = vpop.f32.mrb[101].mxu1  ;;  %v6100_v41 = vpop.f32.mrb[106].mxu0  ;;  %v6483_v13 = vadd.f32 %v6482_v62, %v12300_v20  ;;  %v9338_v0 = vld [vmem:[#allocation12 + $0x20] sm:$0xff]   ;;  %v6639_v52 = vadd.f32 %v6638_v50, %v6570_v11  ;;  %8292 = vmatprep.subr.bf16.mxu0 %v9336_v30 }
 0x84a   :  { %13656 = vst [vmem:[#allocation52_spill] sm:$0xff] %v12304_v15  ;;  %v6575_v14 = vmul.f32 %v12304_v15, %v12304_v15  ;;  %v6326_v57 = vpop.f32.mrb[102].mxu1  ;;  %6479 = vadd.xlane.f32.xlu0 %v6478_v28  ;;  %v12318_v49 = vadd.f32 %v12108_v21, %v6100_v41  ;;  %v6102_v29 = vpop.f32.mrb[107].mxu0  ;;  %v12329_v28 = vld [vmem:[#allocation12 + $0xd0] sm:$0xff]   ;;  %v12334_v62 = vadd.f32 %v12120_v45, %v6324_v31 }
 0x84b   :  { %13657 = vst [vmem:[#allocation50_spill] sm:$0xff] %v12308_v23  ;;  %13658 = vst [vmem:[#allocation49_spill] sm:$0xff] %v12311_v12  ;;  %v6486_v27 = vadd.f32 %v12311_v12, %v12304_v15  ;;  %v6576_v8 = vmul.f32 %v12311_v12, %v12311_v12  ;;  %v6328_v54 = vpop.f32.mrb[103].mxu1  ;;  %v6577_v18 = vmul.f32 %v12308_v23, %v12308_v23  ;;  %8446 = vmatprep.subr.bf16.mxu1 %v12329_v28 }
 0x84c   :  { %13659 = vst [vmem:[#allocation48_spill] sm:$0xff] %v12318_v49  ;;  %13660 = vst [vmem:[#allocation60_spill] sm:$0xff] %v12334_v62  ;;  %v12337_v41 = vadd.f32 %v12114_v61, %v6102_v29  ;;  %v6579_v12 = vmul.f32 %v12318_v49, %v12318_v49  ;;  %6484 = vadd.xlane.f32.xlu1 %v6483_v13  ;;  %v6643_v2 = vadd.f32 %v6642_v44, %v6573_v17 }
 0x84d   :  { %v6647_v15 = vadd.f32 %v6576_v8, %v6575_v14  ;;  %v6487_v25 = vadd.f32 %v6486_v27, %v12308_v23  ;;  %v12345_v20 = vadd.f32 %v12111_v63, %v6326_v57  ;;  %v12352_v50 = vadd.f32 %v12120_v45, %v6328_v54  ;;  %8293 = vmatpush3.bf16.msra.mxu0 %v9338_v0  ;;  %v12383_v23 = vld [vmem:[#allocation12 + $0xd8] sm:$0xff]  }
 0x84e   :  { %13661 = vst [vmem:[#allocation57_spill] sm:$0xff] %v12337_v41  ;;  %v6491_v31 = vadd.f32 %v12337_v41, %v12318_v49  ;;  %v6580_v29 = vmul.f32 %v12337_v41, %v12337_v41  ;;  %6640 = vadd.xlane.f32.xlu0 %v6639_v52  ;;  %v6644_v11 = vadd.f32 %v6643_v2, %v6574_v60 }
 0x84f   :  { %13662 = vst [vmem:[#allocation58_spill] sm:$0xff] %v12345_v20  ;;  %13663 = vst [vmem:[#allocation56_spill] sm:$0xff] %v12352_v50  ;;  %v6106_v14 = vpop.f32.mrb[108].mxu0  ;;  %v6488_v44 = vadd.f32 %v6487_v25, %v12334_v62  ;;  %v6648_v8 = vadd.f32 %v6647_v15, %v6577_v18  ;;  %8454 = vmatpush3.bf16.msra.mxu1 %v12339_v35  ;;  %v6578_v30 = vmul.f32 %v12334_v62, %v12334_v62  ;;  %v12393_v62 = vld [vmem:[#allocation12 + $0x98] sm:$0xff]  }
 0x850   :  { %v6332_v57 = vpop.f32.mrb[104].mxu1  ;;  %v12357_v13 = vadd.f32 %v12108_v21, %v6106_v14  ;;  %v6108_v17 = vpop.f32.mrb[109].mxu0  ;;  %v6492_v27 = vadd.f32 %v6491_v31, %v12345_v20  ;;  %v6652_v52 = vadd.f32 %v6580_v29, %v6579_v12  ;;  %6645 = vadd.xlane.f32.xlu1 %v6644_v11  ;;  %v6581_v29 = vmul.f32 %v12345_v20, %v12345_v20 }
 0x851   :  { %v12362_v54 = vadd.f32 %v12111_v63, %v6332_v57  ;;  %v12365_v25 = vadd.f32 %v12114_v61, %v6108_v17  ;;  %v6334_v2 = vpop.f32.mrb[105].mxu1  ;;  %v6110_v60 = vpop.f32.mrb[110].mxu0  ;;  %v6582_v11 = vmul.f32 %v12352_v50, %v12352_v50  ;;  %8447 = vmatprep.subr.bf16.mxu1 %v12383_v23 }
 0x852   :  { %13664 = vst [vmem:[#allocation65_spill] sm:$0xff] %v12357_v13  ;;  %v6583_v0 = vmul.f32 %v12357_v13, %v12357_v13  ;;  %v6336_v31 = vpop.f32.mrb[106].mxu1  ;;  %6489 = vadd.xlane.f32.xlu0 %v6488_v44  ;;  %v12372_v15 = vadd.f32 %v12108_v21, %v6110_v60  ;;  %v6112_v12 = vpop.f32.mrb[111].mxu0  ;;  %v6493_v18 = vadd.f32 %v6492_v27, %v12352_v50  ;;  %v9340_v44 = vld [vmem:[#allocation12 + $0x68] sm:$0xff]  }
 0x853   :  { %13665 = vst [vmem:[#allocation68_spill] sm:$0xff] %v12362_v54  ;;  %13666 = vst [vmem:[#allocation64_spill] sm:$0xff] %v12365_v25  ;;  %v6496_v14 = vadd.f32 %v12365_v25, %v12357_v13  ;;  %v6584_v57 = vmul.f32 %v12365_v25, %v12365_v25  ;;  %v6338_v17 = vpop.f32.mrb[107].mxu1  ;;  %v9342_v60 = vld [vmem:[#allocation12 + $0x28] sm:$0xff]   ;;  %v6585_v27 = vmul.f32 %v12362_v54, %v12362_v54  ;;  %8294 = vmatprep.subr.bf16.mxu0 %v9340_v44 }
 0x854   :  { %13667 = vst [vmem:[#allocation66_spill] sm:$0xff] %v12372_v15  ;;  %v12388_v49 = vadd.f32 %v12120_v45, %v6334_v2  ;;  %v12391_v20 = vadd.f32 %v12114_v61, %v6112_v12  ;;  %v6649_v50 = vadd.f32 %v6648_v8, %v6578_v30  ;;  %v6587_v25 = vmul.f32 %v12372_v15, %v12372_v15 }
 0x855   :  { %v6657_v13 = vadd.f32 %v6584_v57, %v6583_v0  ;;  %6494 = vadd.xlane.f32.xlu1 %v6493_v18  ;;  %v6653_v41 = vadd.f32 %v6652_v52, %v6581_v29  ;;  %v6497_v46 = vadd.f32 %v6496_v14, %v12362_v54  ;;  %v12399_v32 = vadd.f32 %v12111_v63, %v6336_v31  ;;  %v9344_v54 = vld [vmem:[#allocation12 + $0x70] sm:$0xff]  }
 0x856   :  { %13668 = vst [vmem:[#allocation28_spill] sm:$0xff] %v12388_v49  ;;  %13669 = vst [vmem:[#allocation144_spill] sm:$0xff] %v12391_v20  ;;  %v6501_v2 = vadd.f32 %v12391_v20, %v12372_v15  ;;  %v6588_v12 = vmul.f32 %v12391_v20, %v12391_v20  ;;  %6650 = vadd.xlane.f32.xlu0 %v6649_v50  ;;  %v12406_v8 = vadd.f32 %v12120_v45, %v6338_v17  ;;  %v12445_v15 = vld [vmem:[#allocation12 + $0xe0] sm:$0xff]  }
 0x857   :  { %13670 = vst [vmem:[#allocation25_spill] sm:$0xff] %v12399_v32  ;;  %v6654_v30 = vadd.f32 %v6653_v41, %v6582_v11  ;;  %v6116_v0 = vpop.f32.mrb[112].mxu0  ;;  %v6498_v52 = vadd.f32 %v6497_v46, %v12388_v49  ;;  %8295 = vmatpush3.bf16.msra.mxu0 %v9342_v60  ;;  %v6658_v57 = vadd.f32 %v6657_v13, %v6585_v27 }
 0x858   :  { %13671 = vst [vmem:[#allocation146_spill] sm:$0xff] %v12406_v8  ;;  %v6342_v31 = vpop.f32.mrb[108].mxu1  ;;  %v12411_v18 = vadd.f32 %v12108_v21, %v6116_v0  ;;  %v6118_v29 = vpop.f32.mrb[113].mxu0  ;;  %v6502_v14 = vadd.f32 %v6501_v2, %v12399_v32  ;;  %8455 = vmatpush3.bf16.msra.mxu1 %v12393_v62  ;;  %v6662_v50 = vadd.f32 %v6588_v12, %v6587_v25 }
 0x859   :  { %v12416_v17 = vadd.f32 %v12111_v63, %v6342_v31  ;;  %6655 = vadd.xlane.f32.xlu1 %v6654_v30  ;;  %v12419_v46 = vadd.f32 %v12114_v61, %v6118_v29  ;;  %v6344_v41 = vpop.f32.mrb[109].mxu1  ;;  %v6120_v11 = vpop.f32.mrb[114].mxu0  ;;  %v6586_v44 = vmul.f32 %v12388_v49, %v12388_v49  ;;  %v6589_v12 = vmul.f32 %v12399_v32, %v12399_v32 }
 0x85a   :  { %13672 = vst [vmem:[#allocation145_spill] sm:$0xff] %v12411_v18  ;;  %v6591_v60 = vmul.f32 %v12411_v18, %v12411_v18  ;;  %v6346_v2 = vpop.f32.mrb[110].mxu1  ;;  %6499 = vadd.xlane.f32.xlu0 %v6498_v52  ;;  %v12426_v13 = vadd.f32 %v12108_v21, %v6120_v11  ;;  %v6122_v25 = vpop.f32.mrb[115].mxu0  ;;  %v6503_v27 = vadd.f32 %v6502_v14, %v12406_v8 }
 0x85b   :  { %13673 = vst [vmem:[#allocation147_spill] sm:$0xff] %v12416_v17  ;;  %13674 = vst [vmem:[#allocation37_spill] sm:$0xff] %v12419_v46  ;;  %v6590_v30 = vmul.f32 %v12406_v8, %v12406_v8  ;;  %v6506_v0 = vadd.f32 %v12419_v46, %v12411_v18  ;;  %v6592_v31 = vmul.f32 %v12419_v46, %v12419_v46  ;;  %v6348_v29 = vpop.f32.mrb[111].mxu1  ;;  %v9346_v8 = vld [vmem:[#allocation12 + $0x30] sm:$0xff]   ;;  %8296 = vmatprep.subr.bf16.mxu0 %v9344_v54 }
 0x85c   :  { %13675 = vst [vmem:[#allocation38_spill] sm:$0xff] %v12426_v13  ;;  %v6593_v52 = vmul.f32 %v12416_v17, %v12416_v17  ;;  %v12440_v11 = vadd.f32 %v12120_v45, %v6344_v41  ;;  %v12443_v14 = vadd.f32 %v12114_v61, %v6122_v25  ;;  %v6659_v32 = vadd.f32 %v6658_v57, %v6586_v44 }
 0x85d   :  { %v6667_v49 = vadd.f32 %v6592_v31, %v6591_v60  ;;  %v6595_v18 = vmul.f32 %v12426_v13, %v12426_v13  ;;  %6504 = vadd.xlane.f32.xlu1 %v6503_v27  ;;  %v6663_v46 = vadd.f32 %v6662_v50, %v6589_v12  ;;  %v6507_v20 = vadd.f32 %v6506_v0, %v12416_v17 }
 0x85e   :  { %13676 = vst [vmem:[#allocation31_spill] sm:$0xff] %v12440_v11  ;;  %13677 = vst [vmem:[#allocation35_spill] sm:$0xff] %v12443_v14  ;;  %v12453_v41 = vadd.f32 %v12111_v63, %v6346_v2  ;;  %v6511_v57 = vadd.f32 %v12443_v14, %v12426_v13  ;;  %v6596_v44 = vmul.f32 %v12443_v14, %v12443_v14  ;;  %6660 = vadd.xlane.f32.xlu0 %v6659_v32  ;;  %v12499_v13 = vld [vmem:[#allocation12 + $0xe8] sm:$0xff]  }
 0x85f   :  { %v12460_v60 = vadd.f32 %v12120_v45, %v6348_v29  ;;  %v6664_v25 = vadd.f32 %v6663_v46, %v6590_v30  ;;  %v6126_v50 = vpop.f32.mrb[116].mxu0  ;;  %v6508_v27 = vadd.f32 %v6507_v20, %v12440_v11  ;;  %8448 = vmatprep.subr.bf16.mxu1 %v12445_v15  ;;  %8297 = vmatpush3.bf16.msra.mxu0 %v9346_v8  ;;  %v12505_v14 = vld [vmem:[#allocation12 + $0xa8] sm:$0xff]  }
 0x860   :  { %13679 = vst [vmem:[#allocation46_spill] sm:$0xff] %v12453_v41  ;;  %v6352_v2 = vpop.f32.mrb[112].mxu1  ;;  %v12465_v12 = vadd.f32 %v12108_v21, %v6126_v50  ;;  %v6128_v0 = vpop.f32.mrb[117].mxu0  ;;  %v6512_v31 = vadd.f32 %v6511_v57, %v12453_v41  ;;  %v6668_v17 = vadd.f32 %v6667_v49, %v6593_v52  ;;  %8456 = vmatpush3.bf16.msra.mxu1 %v12450_v48 }
 0x861   :  { %13680 = vst [vmem:[#allocation39_spill] sm:$0xff] %v12460_v60  ;;  %v6594_v32 = vmul.f32 %v12440_v11, %v12440_v11  ;;  %v6672_v54 = vadd.f32 %v6596_v44, %v6595_v18  ;;  %6665 = vadd.xlane.f32.xlu1 %v6664_v25  ;;  %v12472_v20 = vadd.f32 %v12114_v61, %v6128_v0  ;;  %v6354_v46 = vpop.f32.mrb[113].mxu1  ;;  %v6130_v8 = vpop.f32.mrb[118].mxu0 }
 0x862   :  { %13681 = vst [vmem:[#allocation43_spill] sm:$0xff] %v12465_v12  ;;  %v12475_v30 = vadd.f32 %v12111_v63, %v6352_v2  ;;  %v6599_v29 = vmul.f32 %v12465_v12, %v12465_v12  ;;  %v6356_v57 = vpop.f32.mrb[114].mxu1  ;;  %6509 = vadd.xlane.f32.xlu0 %v6508_v27  ;;  %v12480_v49 = vadd.f32 %v12108_v21, %v6130_v8  ;;  %v6132_v52 = vpop.f32.mrb[119].mxu0 }
 0x863   :  { %13682 = vst [vmem:[#allocation53_spill] sm:$0xff] %v12472_v20  ;;  %v6513_v18 = vadd.f32 %v6512_v31, %v12460_v60  ;;  %v6597_v44 = vmul.f32 %v12453_v41, %v12453_v41  ;;  %v6598_v25 = vmul.f32 %v12460_v60, %v12460_v60  ;;  %v6516_v50 = vadd.f32 %v12472_v20, %v12465_v12  ;;  %v6358_v0 = vpop.f32.mrb[115].mxu1  ;;  %v9348_v41 = vld [vmem:[#allocation12 + $0x78] sm:$0xff]  }
 0x864   :  { %13683 = vst [vmem:[#allocation54_spill] sm:$0xff] %v12475_v30  ;;  %13684 = vst [vmem:[#allocation47_spill] sm:$0xff] %v12480_v49  ;;  %v6600_v2 = vmul.f32 %v12472_v20, %v12472_v20  ;;  %v12492_v27 = vadd.f32 %v12120_v45, %v6354_v46  ;;  %v6603_v21 = vmul.f32 %v12480_v49, %v12480_v49  ;;  %v9350_v60 = vld [vmem:[#allocation12 + $0x38] sm:$0xff]   ;;  %8298 = vmatprep.subr.bf16.mxu0 %v9348_v41 }
 0x865   :  { %v12497_v31 = vadd.f32 %v12114_v61, %v6132_v52  ;;  %v6669_v8 = vadd.f32 %v6668_v17, %v6594_v32  ;;  %v12502_v12 = vadd.f32 %v12111_v63, %v6356_v57  ;;  %6514 = vadd.xlane.f32.xlu1 %v6513_v18  ;;  %v6673_v20 = vadd.f32 %v6672_v54, %v6597_v44  ;;  %v12526_v44 = vld [vmem:[#allocation12 + $0xf0] sm:$0xff]  }
 0x866   :  { %13685 = vst [vmem:[#allocation51_spill] sm:$0xff] %v12492_v27  ;;  %v6677_v11 = vadd.f32 %v6600_v2, %v6599_v29  ;;  %v6517_v46 = vadd.f32 %v6516_v50, %v12475_v30  ;;  %v6601_v48 = vmul.f32 %v12475_v30, %v12475_v30  ;;  %8449 = vmatprep.subr.bf16.mxu1 %v12499_v13  ;;  %v12536_v50 = vld [vmem:[#allocation12 + $0xb8] sm:$0xff]  }
 0x867   :  { %13686 = vst [vmem:[#allocation61_spill] sm:$0xff] %v12497_v31  ;;  %13687 = vst [vmem:[#allocation62_spill] sm:$0xff] %v12502_v12  ;;  %v6521_v61 = vadd.f32 %v12497_v31, %v12480_v49  ;;  %v6604_v17 = vmul.f32 %v12497_v31, %v12497_v31  ;;  %6670 = vadd.xlane.f32.xlu0 %v6669_v8  ;;  %v6674_v32 = vadd.f32 %v6673_v20, %v6598_v25  ;;  %v12528_v25 = vld [vmem:[#allocation12 + $0xb0] sm:$0xff]  }
 0x868   :  { %v6518_v63 = vadd.f32 %v6517_v46, %v12492_v27  ;;  %8299 = vmatpush3.bf16.msra.mxu0 %v9350_v60  ;;  %v12516_v29 = vadd.f32 %v12120_v45, %v6358_v0  ;;  %v6678_v52 = vadd.f32 %v6677_v11, %v6601_v48  ;;  %8457 = vmatpush3.bf16.msra.mxu1 %v12505_v14  ;;  %v12534_v11 = vld [vmem:[#allocation12 + $0xf8] sm:$0xff]  }
 0x869   :  { %v6682_v54 = vadd.f32 %v6604_v17, %v6603_v21  ;;  %v6522_v57 = vadd.f32 %v6521_v61, %v12502_v12  ;;  %v6605_v18 = vmul.f32 %v12502_v12, %v12502_v12  ;;  %6675 = vadd.xlane.f32.xlu1 %v6674_v32  ;;  %8348 = vmatprep.subr.bf16.mxu0 %v12104_v43 }
 0x86a   :  { %13688 = vst [vmem:[#allocation55_spill] sm:$0xff] %v12516_v29  ;;  %v6602_v41 = vmul.f32 %v12492_v27, %v12492_v27  ;;  %v6606_v48 = vmul.f32 %v12516_v29, %v12516_v29  ;;  %8450 = vmatprep.subr.bf16.mxu1 %v12526_v44 }
 0x86b   :  { %6519 = vadd.xlane.f32.xlu0 %v6518_v63  ;;  %v6523_v60 = vadd.f32 %v6522_v57, %v12516_v29  ;;  %v6683_v20 = vadd.f32 %v6682_v54, %v6605_v18  ;;  %v126_v57 = vld [vmem:[#allocation8 + $0x24] ss:$8 sm:$0xf] }
 0x86c   :  { %v6679_v45 = vadd.f32 %v6678_v52, %v6602_v41  ;;  %8458 = vmatpush3.bf16.msra.mxu1 %v12528_v25  ;;  %v128_v52 = vld [vmem:[#allocation8 + $0x5] ss:$8 sm:$0xf]  ;;  %v12575_v12 = vrot.slane %v126_v57, %v13616_v34 }
 0x86d   :  { %6524 = vadd.xlane.f32.xlu1 %v6523_v60  ;;  %v6684_v43 = vadd.f32 %v6683_v20, %v6606_v48  ;;  %8451 = vmatprep.subr.bf16.mxu1 %v12534_v11 }
 0x86f   :  { %6680 = vadd.xlane.f32.xlu0 %v6679_v45 }
 0x870   :  { %8459 = vmatpush3.bf16.msra.mxu1 %v12536_v50 }
 0x871   :  { %6685 = vadd.xlane.f32.xlu1 %v6684_v43  ;;  %v12551_v43 = vrot.slane %v126_v57, %v13645_v6 }
 0x8be   :  { %v6450_v2 = vpop.xlane.xlu0 %6449 }
 0x8bf   :  { %v12540_v0 = vmul.f32 0.001953125, %v6450_v2  ;;  %v12554_v2 = vrot.slane %v128_v52, %v13645_v6 }
 0x8c0   :  { %v6455_v21 = vpop.xlane.xlu1 %6454 }
 0x8c1   :  { %v12542_v46 = vmul.f32 0.001953125, %v6455_v21  ;;  %v6703_v61 = vmul.f32 %v12540_v0, %v12540_v0  ;;  %v6753_v30 = vsub.f32 %v12123_v3, %v12540_v0 }
 0x8c2   :  { %v6611_v8 = vpop.xlane.xlu0 %6610 }
 0x8c3   :  { %13689 = vst [vmem:[#allocation59_spill] sm:$0xff] %v12542_v46  ;;  %v6687_v17 = vmul.f32 0.001953125, %v6611_v8  ;;  %v6704_v41 = vmul.f32 %v12542_v46, %v12542_v46 }
 0x8c4   :  { %v6616_v63 = vpop.xlane.xlu1 %6615 }
 0x8c5   :  { %v6719_v32 = vsub.f32 %v6687_v17, %v6703_v61  ;;  %v6688_v60 = vmul.f32 0.001953125, %v6616_v63  ;;  %v12559_v17 = vrot.slane %v126_v57, %v13644_v55  ;;  %v12565_v63 = vrot.slane %v126_v57, %v13611_v1 }
 0x8c6   :  { %v6460_v54 = vpop.xlane.xlu0 %6459  ;;  %v6756_v57 = vsub.f32 %v12141_v51, %v12542_v46 }
 0x8c7   :  { %v6735_v18 = vmax.f32 %v6719_v32, 0.0  ;;  %v12548_v20 = vmul.f32 0.001953125, %v6460_v54  ;;  %v6720_v48 = vsub.f32 %v6688_v60, %v6704_v41  ;;  %v12562_v32 = vrot.slane %v128_v52, %v13644_v55 }
 0x8c8   :  { %v6465_v21 = vpop.xlane.xlu1 %6464  ;;  %v6751_v41 = vsub.f32 %v12117_v4, %v12540_v0  ;;  %v12572_v60 = vrot.slane %v128_v52, %v13611_v1  ;;  %v12578_v55 = vrot.slane %v128_v52, %v13616_v34  ;;  %v6754_v34 = vsub.f32 %v12138_v59, %v12540_v0 }
 0x8c9   :  { %v6815_v45 = vadd.f32 1e-05, %v6735_v18  ;;  %v6705_v8 = vmul.f32 %v12548_v20, %v12548_v20  ;;  %v6736_v54 = vmax.f32 %v6720_v48, 0.0  ;;  %v12567_v18 = vmul.f32 0.001953125, %v6465_v21 }
 0x8ca   :  { %v6621_v61 = vpop.xlane.xlu0 %6620  ;;  %v6752_v21 = vsub.f32 %v12126_v37, %v12540_v0 }
 0x8cb   :  { %9404 = vrsqrt.f32 %v6815_v45  ;;  %v6689_v6 = vmul.f32 0.001953125, %v6621_v61  ;;  %v6816_v45 = vadd.f32 1e-05, %v6736_v54  ;;  %v6706_v52 = vmul.f32 %v12567_v18, %v12567_v18 }
 0x8cc   :  { %v6626_v61 = vpop.xlane.xlu1 %6625 }
 0x8cd   :  { %v6721_v48 = vsub.f32 %v6689_v6, %v6705_v8  ;;  %9406 = vrsqrt.f32 %v6816_v45  ;;  %v6690_v8 = vmul.f32 0.001953125, %v6626_v61 }
 0x8ce   :  { %v6470_v37 = vpop.xlane.xlu0 %6469 }
 0x8cf   :  { %v6737_v3 = vmax.f32 %v6721_v48, 0.0  ;;  %v12596_v6 = vmul.f32 0.001953125, %v6470_v37  ;;  %v6722_v59 = vsub.f32 %v6690_v8, %v6706_v52 }
 0x8d0   :  { %v6475_v61 = vpop.xlane.xlu1 %6474 }
 0x8d1   :  { %v6817_v4 = vadd.f32 1e-05, %v6737_v3  ;;  %v6738_v52 = vmax.f32 %v6722_v59, 0.0  ;;  %v12614_v8 = vmul.f32 0.001953125, %v6475_v61  ;;  %v6707_v51 = vmul.f32 %v12596_v6, %v12596_v6 }
 0x8d3   :  { %9408 = vrsqrt.f32 %v6817_v4  ;;  %v6631_v45 = vpop.xlane.xlu0 %6630  ;;  %v6818_v3 = vadd.f32 1e-05, %v6738_v52  ;;  %v6708_v4 = vmul.f32 %v12614_v8, %v12614_v8 }
 0x8d4   :  { %v6691_v0 = vmul.f32 0.001953125, %v6631_v45 }
 0x8d5   :  { %v9405_v1 = vpop.eup %9404  ;;  %v6636_v26 = vpop.xlane.xlu1 %6635  ;;  %9410 = vrsqrt.f32 %v6818_v3 }
 0x8d6   :  { %v6723_v61 = vsub.f32 %v6691_v0, %v6707_v51  ;;  %v6848_v48 = vmul.f32 %v9405_v1, %v6752_v21  ;;  %v6847_v24 = vmul.f32 %v9405_v1, %v6751_v41  ;;  %v6692_v54 = vmul.f32 0.001953125, %v6636_v26 }
 0x8d7   :  { %v6480_v49 = vpop.xlane.xlu0 %6479  ;;  %v6850_v29 = vmul.f32 %v9405_v1, %v6754_v34  ;;  %v12638_v0 = vpop.eup %9406  ;;  %v12645_v3 = vmul.f32 %v9405_v1, %v6753_v30 }
 0x8d8   :  { %v6739_v27 = vmax.f32 %v6723_v61, 0.0  ;;  %v12634_v31 = vmul.f32 0.001953125, %v6480_v49  ;;  %v6933_v59 = vmul.f32 %v12551_v43, %v6848_v48  ;;  %v6932_v51 = vmul.f32 %v12559_v17, %v6847_v24  ;;  %13690 = vst [vmem:[#allocation69_spill] sm:$0xff] %v12638_v0 }
 0x8d9   :  { %v6724_v41 = vsub.f32 %v6692_v54, %v6708_v4  ;;  %v12643_v26 = vmul.f32 %v12565_v63, %v6850_v29  ;;  %13692 = vst [vmem:[#allocation63_spill] sm:$0xff] %v12645_v3  ;;  %v6485_v34 = vpop.xlane.xlu1 %6484  ;;  %v6852_v48 = vmul.f32 %v12638_v0, %v6756_v57  ;;  %v13693_v4 = vsub.f32 %v12131_v53, %v12542_v46 }
 0x8da   :  { %v6819_v45 = vadd.f32 1e-05, %v6739_v27  ;;  %v6709_v49 = vmul.f32 %v12634_v31, %v12634_v31  ;;  %v7018_v24 = vadd.f32 %v12554_v2, %v6933_v59  ;;  %v12651_v52 = vmul.f32 0.001953125, %v6485_v34 }
 0x8db   :  { %13691 = vst [vmem:[#allocation70_spill] sm:$0xff] %v12643_v26  ;;  %v6740_v61 = vmax.f32 %v6724_v41, 0.0  ;;  %v6641_v54 = vpop.xlane.xlu0 %6640  ;;  %v6851_v29 = vmul.f32 %v12638_v0, %v13693_v4  ;;  %v7017_v30 = vadd.f32 %v12562_v32, %v6932_v51  ;;  %v6937_v1 = vmul.f32 %v12551_v43, %v6852_v48 }
 0x8dc   :  { %9412 = vrsqrt.f32 %v6819_v45  ;;  %v6693_v27 = vmul.f32 0.001953125, %v6641_v54  ;;  %v7082_v21 = vmax.f32 %v7018_v24, 0.0  ;;  %v6710_v59 = vmul.f32 %v12651_v52, %v12651_v52 }
 0x8dd   :  { %v12659_v37 = vpop.eup %9408  ;;  %v6820_v57 = vadd.f32 1e-05, %v6740_v61  ;;  %v6936_v41 = vmul.f32 %v12559_v17, %v6851_v29  ;;  %v7081_v34 = vmax.f32 %v7017_v30, 0.0  ;;  %v6646_v53 = vpop.xlane.xlu1 %6645  ;;  %v7022_v4 = vadd.f32 %v12554_v2, %v6937_v1 }
 0x8de   :  { %v6725_v3 = vsub.f32 %v6693_v27, %v6709_v49  ;;  %v13694_v45 = vsub.f32 %v12169_v7, %v12548_v20  ;;  %v13695_v48 = vsub.f32 %v12188_v39, %v12548_v20  ;;  %v6694_v61 = vmul.f32 0.001953125, %v6646_v53 }
 0x8df   :  { %9414 = vrsqrt.f32 %v6820_v57  ;;  %v6490_v54 = vpop.xlane.xlu0 %6489  ;;  %v7021_v29 = vadd.f32 %v12562_v32, %v6936_v41  ;;  %v13696_v49 = vsub.f32 %v12160_v5, %v12548_v20  ;;  %v7086_v7 = vmax.f32 %v7022_v4, 0.0  ;;  %v9411_v26 = vpop.eup %9410 }
 0x8e0   :  { %v6856_v51 = vmul.f32 %v12659_v37, %v13694_v45  ;;  %v6858_v24 = vmul.f32 %v12659_v37, %v13695_v48  ;;  %v6741_v27 = vmax.f32 %v6725_v3, 0.0  ;;  %v12678_v1 = vmul.f32 0.001953125, %v6490_v54 }
 0x8e1   :  { %v6855_v30 = vmul.f32 %v12659_v37, %v13696_v49  ;;  %v6726_v39 = vsub.f32 %v6694_v61, %v6710_v59  ;;  %v7085_v0 = vmax.f32 %v7021_v29, 0.0  ;;  %v7146_v46 = vpack.c.bf16 %v7086_v7, %v7082_v21 }
 0x8e2   :  { %v6941_v45 = vmul.f32 %v12551_v43, %v6856_v51  ;;  %v6943_v57 = vmul.f32 %v12565_v63, %v6858_v24  ;;  %v6821_v48 = vadd.f32 1e-05, %v6741_v27  ;;  %v6495_v41 = vpop.xlane.xlu1 %6494  ;;  %v6711_v5 = vmul.f32 %v12678_v1, %v12678_v1 }
 0x8e3   :  { %v6940_v53 = vmul.f32 %v12559_v17, %v6855_v30  ;;  %v13697_v3 = vsub.f32 %v12191_v42, %v12567_v18  ;;  %v6742_v4 = vmax.f32 %v6726_v39, 0.0  ;;  %v12688_v49 = vmul.f32 0.001953125, %v6495_v41  ;;  %v6651_v51 = vpop.xlane.xlu0 %6650  ;;  %7465 = vmatprep.mubr.bf16.mxu0 %v7146_v46 }
 0x8e4   :  { %v7145_v59 = vpack.c.bf16 %v7085_v0, %v7081_v34  ;;  %v7026_v61 = vadd.f32 %v12554_v2, %v6941_v45  ;;  %9416 = vrsqrt.f32 %v6821_v48  ;;  %v6695_v24 = vmul.f32 0.001953125, %v6651_v51  ;;  %v9500_v45 = vld [vmem:[#allocation12 + $0x80] sm:$0xff]  }
 0x8e5   :  { %v6860_v54 = vmul.f32 %v9411_v26, %v13697_v3  ;;  %v13698_v21 = vsub.f32 %v12207_v22, %v12567_v18  ;;  %v6822_v27 = vadd.f32 1e-05, %v6742_v4  ;;  %v6712_v42 = vmul.f32 %v12688_v49, %v12688_v49 }
 0x8e6   :  { %7466 = vmatmul.mubr.bf16.vlgmr.msra.gmra.mrb[120].mxu0 %v7145_v59  ;;  %v7090_v7 = vmax.f32 %v7026_v61, 0.0  ;;  %v7028_v39 = vadd.f32 %v12572_v60, %v6943_v57  ;;  %v12698_v0 = vpop.eup %9412  ;;  %v6727_v34 = vsub.f32 %v6695_v24, %v6711_v5  ;;  %v6656_v46 = vpop.xlane.xlu1 %6655  ;;  %v13699_v22 = vsub.f32 %v12174_v47, %v12567_v18  ;;  %v9501_v59 = vld [vmem:[#allocation12 + $0xc8] sm:$0xff]  }
 0x8e7   :  { %v6945_v29 = vmul.f32 %v12551_v43, %v6860_v54  ;;  %v6862_v30 = vmul.f32 %v9411_v26, %v13698_v21  ;;  %8349 = vmatpush3.bf16.msra.mxu0 %v9500_v45  ;;  %9418 = vrsqrt.f32 %v6822_v27  ;;  %v6696_v54 = vmul.f32 0.001953125, %v6656_v46  ;;  %v6500_v4 = vpop.xlane.xlu0 %6499 }
 0x8e8   :  { %v6859_v3 = vmul.f32 %v9411_v26, %v13699_v22  ;;  %v7092_v51 = vmax.f32 %v7028_v39, 0.0  ;;  %v7025_v57 = vadd.f32 %v12562_v32, %v6940_v53  ;;  %8350 = vmatprep.subr.bf16.mxu0 %v9501_v59  ;;  %v6743_v5 = vmax.f32 %v6727_v34, 0.0 }
 0x8e9   :  { %v7030_v48 = vadd.f32 %v12554_v2, %v6945_v29  ;;  %v6947_v41 = vmul.f32 %v12565_v63, %v6862_v30  ;;  %v12706_v61 = vmul.f32 0.001953125, %v6500_v4  ;;  %v12709_v21 = vpop.eup %9414  ;;  %v6728_v30 = vsub.f32 %v6696_v54, %v6712_v42  ;;  %v9502_v4 = vld [vmem:[#allocation12 + $0x88] sm:$0xff]  }
 0x8ea   :  { %v6944_v47 = vmul.f32 %v12559_v17, %v6859_v3  ;;  %v7089_v45 = vmax.f32 %v7025_v57, 0.0  ;;  %v13700_v27 = vsub.f32 %v12166_v58, %v12548_v20  ;;  %v6823_v53 = vadd.f32 1e-05, %v6743_v5  ;;  %v6505_v46 = vpop.xlane.xlu1 %6504 }
 0x8eb   :  { %v7094_v24 = vmax.f32 %v7030_v48, 0.0  ;;  %v7032_v29 = vadd.f32 %v12572_v60, %v6947_v41  ;;  %v6713_v48 = vmul.f32 %v12706_v61, %v12706_v61  ;;  %8351 = vmatpush3.bf16.msra.mxu0 %v9502_v4  ;;  %v6744_v41 = vmax.f32 %v6728_v30, 0.0  ;;  %v6661_v42 = vpop.xlane.xlu0 %6660 }
 0x8ec   :  { %v6857_v39 = vmul.f32 %v12659_v37, %v13700_v27  ;;  %v12718_v59 = vmul.f32 0.001953125, %v6505_v46  ;;  %v7029_v3 = vadd.f32 %v12562_v32, %v6944_v47  ;;  %v13701_v58 = vsub.f32 %v12197_v10, %v12567_v18  ;;  %8352 = vmatprep.subr.bf16.mxu0 %v12329_v28 }
 0x8ed   :  { %v7150_v22 = vpack.c.bf16 %v7094_v24, %v7090_v7  ;;  %v7096_v34 = vmax.f32 %v7032_v29, 0.0  ;;  %9420 = vrsqrt.f32 %v6823_v53  ;;  %v6697_v7 = vmul.f32 0.001953125, %v6661_v42 }
 0x8ee   :  { %v6861_v20 = vmul.f32 %v9411_v26, %v13701_v58  ;;  %v6942_v54 = vmul.f32 %v12575_v12, %v6857_v39  ;;  %v6824_v57 = vadd.f32 1e-05, %v6744_v41  ;;  %v7093_v5 = vmax.f32 %v7029_v3, 0.0  ;;  %v12729_v30 = vpop.eup %9416  ;;  %v6666_v28 = vpop.xlane.xlu1 %6665 }
 0x8ef   :  { %7473 = vmatprep.mubr.bf16.mxu0 %v7150_v22  ;;  %v7152_v37 = vpack.c.bf16 %v7096_v34, %v7092_v51  ;;  %v6714_v29 = vmul.f32 %v12718_v59, %v12718_v59  ;;  %v6729_v10 = vsub.f32 %v6697_v7, %v6713_v48  ;;  %v13702_v26 = vsub.f32 %v12217_v36, %v12596_v6  ;;  %v6510_v22 = vpop.xlane.xlu0 %6509 }
 0x8f0   :  { %v6946_v24 = vmul.f32 %v12575_v12, %v6861_v20  ;;  %v7027_v18 = vadd.f32 %v12578_v55, %v6942_v54  ;;  %v13703_v47 = vsub.f32 %v12239_v40, %v12614_v8  ;;  %9422 = vrsqrt.f32 %v6824_v57  ;;  %8353 = vmatpush3.bf16.msra.mxu0 %v12339_v35 }
 0x8f1   :  { %7570 = vmatprep.mubr.bf16.mxu1 %v7152_v37  ;;  %v6864_v51 = vmul.f32 %v12698_v0, %v13702_v26  ;;  %v7149_v39 = vpack.c.bf16 %v7093_v5, %v7089_v45  ;;  %v6698_v46 = vmul.f32 0.001953125, %v6666_v28  ;;  %v6745_v34 = vmax.f32 %v6729_v10, 0.0  ;;  %8354 = vmatprep.subr.bf16.mxu0 %v12383_v23  ;;  %v12746_v41 = vpop.eup %9418 }
 0x8f2   :  { %v6868_v27 = vmul.f32 %v12709_v21, %v13703_v47  ;;  %v7031_v53 = vadd.f32 %v12578_v55, %v6946_v24  ;;  %v7091_v48 = vmax.f32 %v7027_v18, 0.0  ;;  %v12742_v4 = vmul.f32 0.001953125, %v6510_v22  ;;  %v6515_v20 = vpop.xlane.xlu1 %6514 }
 0x8f3   :  { %v6949_v36 = vmul.f32 %v12551_v43, %v6864_v51  ;;  %7474 = vmatmul.mubr.bf16.gmra.mrb[124].mxu0 %v7149_v39  ;;  %v6730_v42 = vsub.f32 %v6698_v46, %v6714_v29  ;;  %v13704_v3 = vsub.f32 %v12236_v33, %v12596_v6  ;;  %v6825_v58 = vadd.f32 1e-05, %v6745_v34 }
 0x8f4   :  { %v7095_v40 = vmax.f32 %v7031_v53, 0.0  ;;  %v6953_v45 = vmul.f32 %v12551_v43, %v6868_v27  ;;  %v13705_v7 = vsub.f32 %v12252_v16, %v12614_v8  ;;  %v6715_v54 = vmul.f32 %v12742_v4, %v12742_v4  ;;  %v6671_v29 = vpop.xlane.xlu0 %6670  ;;  %8355 = vmatpush3.bf16.msra.mxu0 %v12393_v62 }
 0x8f5   :  { %v6866_v35 = vmul.f32 %v12698_v0, %v13704_v3  ;;  %v7034_v37 = vadd.f32 %v12554_v2, %v6949_v36  ;;  %v6746_v5 = vmax.f32 %v6730_v42, 0.0  ;;  %v12760_v24 = vmul.f32 0.001953125, %v6515_v20  ;;  %8356 = vmatprep.subr.bf16.mxu0 %v12445_v15 }
 0x8f6   :  { %v6870_v23 = vmul.f32 %v12709_v21, %v13705_v7  ;;  %v7151_v57 = vpack.c.bf16 %v7095_v40, %v7091_v48  ;;  %v7038_v33 = vadd.f32 %v12554_v2, %v6953_v45  ;;  %9424 = vrsqrt.f32 %v6825_v58  ;;  %v6676_v48 = vpop.xlane.xlu1 %6675  ;;  %v13709_v45 = vld [vmem:[#allocation45_spill] sm:$0xff] }
 0x8f7   :  { %v7098_v10 = vmax.f32 %v7034_v37, 0.0  ;;  %v6951_v18 = vmul.f32 %v12565_v63, %v6866_v35  ;;  %v6826_v28 = vadd.f32 1e-05, %v6746_v5  ;;  %v6699_v51 = vmul.f32 0.001953125, %v6671_v29  ;;  %v12771_v39 = vpop.eup %9420 }
 0x8f8   :  { %v6955_v16 = vmul.f32 %v12565_v63, %v6870_v23  ;;  %7571 = vmatmul.mubr.bf16.vlgmr.msra.gmra.mrb[116].mxu1 %v7151_v57  ;;  %v7102_v26 = vmax.f32 %v7038_v33, 0.0  ;;  %v13706_v47 = vsub.f32 %v12210_v56, %v12596_v6  ;;  %v13707_v46 = vsub.f32 %v12222_v9, %v12614_v8  ;;  %v6520_v42 = vpop.xlane.xlu0 %6519  ;;  %8357 = vmatpush3.bf16.msra.mxu0 %v13709_v45 }
 0x8f9   :  { %v7036_v62 = vadd.f32 %v12572_v60, %v6951_v18  ;;  %v13708_v22 = vsub.f32 %v12214_v38, %v12596_v6  ;;  %9426 = vrsqrt.f32 %v6826_v28  ;;  %v6731_v36 = vsub.f32 %v6699_v51, %v6715_v54  ;;  %8358 = vmatprep.subr.bf16.mxu0 %v12499_v13 }
 0x8fa   :  { %v6863_v27 = vmul.f32 %v12698_v0, %v13706_v47  ;;  %v7040_v53 = vadd.f32 %v12572_v60, %v6955_v16  ;;  %v6867_v15 = vmul.f32 %v12709_v21, %v13707_v46  ;;  %v7154_v56 = vpack.c.bf16 %v7102_v26, %v7098_v10  ;;  %v12791_v6 = vpop.eup %9422  ;;  %v13711_v26 = vld [vmem:[#allocation32_spill] sm:$0xff]  ;;  %v13712_v47 = vld [vmem:[#allocation41_spill] sm:$0xff] }
 0x8fb   :  { %v6865_v34 = vmul.f32 %v12698_v0, %v13708_v22  ;;  %v7100_v3 = vmax.f32 %v7036_v62, 0.0  ;;  %v13710_v58 = vsub.f32 %v12244_v19, %v12614_v8  ;;  %v6747_v0 = vmax.f32 %v6731_v36, 0.0  ;;  %v13713_v22 = vld [vmem:[#allocation44_spill] sm:$0xff] }
 0x8fc   :  { %v6948_v40 = vmul.f32 %v12559_v17, %v6863_v27  ;;  %v7104_v35 = vmax.f32 %v7040_v53, 0.0  ;;  %v6952_v9 = vmul.f32 %v12559_v17, %v6867_v15  ;;  %7481 = vmatprep.mubr.bf16.mxu0 %v7154_v56  ;;  %v6716_v7 = vmul.f32 %v12760_v24, %v12760_v24  ;;  %8359 = vmatpush3.bf16.msra.mxu0 %v12505_v14  ;;  %v6681_v62 = vpop.xlane.xlu0 %6680  ;;  %v13714_v56 = vld [vmem:[#allocation40_spill] sm:$0xff] }
 0x8fd   :  { %v6869_v38 = vmul.f32 %v12709_v21, %v13710_v58  ;;  %v6950_v37 = vmul.f32 %v12575_v12, %v6865_v34  ;;  %v6700_v8 = vmul.f32 0.001953125, %v6676_v48  ;;  %v6525_v21 = vpop.xlane.xlu1 %6524  ;;  %v6827_v57 = vadd.f32 1e-05, %v6747_v0  ;;  %8360 = vmatprep.subr.bf16.mxu0 %v12526_v44 }
 0x8fe   :  { %v7033_v20 = vadd.f32 %v12562_v32, %v6948_v40  ;;  %v7156_v23 = vpack.c.bf16 %v7104_v35, %v7100_v3  ;;  %v7037_v54 = vadd.f32 %v12562_v32, %v6952_v9  ;;  %v12800_v33 = vmul.f32 0.001953125, %v6520_v42 }
 0x8ff   :  { %v6954_v19 = vmul.f32 %v12575_v12, %v6869_v38  ;;  %v7035_v5 = vadd.f32 %v12578_v55, %v6950_v37  ;;  %v6732_v18 = vsub.f32 %v6700_v8, %v6716_v7  ;;  %v12804_v16 = vmul.f32 0.001953125, %v6525_v21 }
 0x900   :  { %v7097_v13 = vmax.f32 %v7033_v20, 0.0  ;;  %7578 = vmatprep.mubr.bf16.mxu1 %v7156_v23  ;;  %v7101_v29 = vmax.f32 %v7037_v54, 0.0  ;;  %9428 = vrsqrt.f32 %v6827_v57  ;;  %v6776_v51 = vsub.f32 %v13711_v26, %v12634_v31  ;;  %v12811_v53 = vpop.eup %9424  ;;  %8361 = vmatpush3.bf16.msra.mxu0 %v12528_v25  ;;  %v13715_v20 = vld [vmem:[#allocation36_spill] sm:$0xff]  ;;  %v13716_v23 = vld [vmem:[#allocation33_spill] sm:$0xff] }
 0x901   :  { %v7039_v10 = vadd.f32 %v12578_v55, %v6954_v19  ;;  %v7099_v28 = vmax.f32 %v7035_v5, 0.0  ;;  %v6780_v27 = vsub.f32 %v13712_v47, %v12651_v52  ;;  %v6748_v15 = vmax.f32 %v6732_v18, 0.0  ;;  %8362 = vmatprep.subr.bf16.mxu0 %v12534_v11 }
 0x902   :  { %v7153_v14 = vpack.c.bf16 %v7101_v29, %v7097_v13  ;;  %v6778_v34 = vsub.f32 %v13713_v22, %v12634_v31  ;;  %v6872_v48 = vmul.f32 %v12729_v30, %v6776_v51  ;;  %v6782_v36 = vsub.f32 %v13714_v56, %v12651_v52  ;;  %v13717_v29 = vld [vmem:[#allocation34_spill] sm:$0xff] }
 0x903   :  { %v7103_v46 = vmax.f32 %v7039_v10, 0.0  ;;  %v6876_v44 = vmul.f32 %v12746_v41, %v6780_v27  ;;  %v6717_v40 = vmul.f32 %v12800_v33, %v12800_v33  ;;  %v6828_v45 = vadd.f32 1e-05, %v6748_v15  ;;  %v12824_v9 = vpop.eup %9426 }
 0x904   :  { %7482 = vmatmul.mubr.bf16.gmra.mrb[128].mxu0 %v7153_v14  ;;  %v6874_v3 = vmul.f32 %v12729_v30, %v6778_v34  ;;  %v6701_v35 = vmul.f32 0.001953125, %v6681_v62  ;;  %v6957_v58 = vmul.f32 %v12551_v43, %v6872_v48  ;;  %v6878_v0 = vmul.f32 %v12746_v41, %v6782_v36 }
 0x905   :  { %v7155_v42 = vpack.c.bf16 %v7103_v46, %v7099_v28  ;;  %v6961_v38 = vmul.f32 %v12551_v43, %v6876_v44  ;;  %v6775_v37 = vsub.f32 %v13715_v20, %v12634_v31  ;;  %9430 = vrsqrt.f32 %v6828_v45  ;;  %8363 = vmatpush3.bf16.msra.mxu0 %v12536_v50  ;;  %v13718_v50 = vld [vmem:[#allocation42_spill] sm:$0xff]  ;;  %v6686_v46 = vpop.xlane.xlu1 %6685 }
 0x906   :  { %v6959_v25 = vmul.f32 %v12565_v63, %v6874_v3  ;;  %v6733_v7 = vsub.f32 %v6701_v35, %v6717_v40  ;;  %v6779_v54 = vsub.f32 %v13716_v23, %v12651_v52  ;;  %v7042_v11 = vadd.f32 %v12554_v2, %v6957_v58  ;;  %v13719_v58 = vld [vmem:[#allocation49_spill] sm:$0xff] }
 0x907   :  { %7579 = vmatmul.mubr.bf16.gmra.mrb[120].mxu1 %v7155_v42  ;;  %v7046_v19 = vadd.f32 %v12554_v2, %v6961_v38  ;;  %v6963_v8 = vmul.f32 %v12565_v63, %v6878_v0  ;;  %v6871_v21 = vmul.f32 %v12729_v30, %v6775_v37  ;;  %v6777_v10 = vsub.f32 %v13717_v29, %v12634_v31  ;;  %v13720_v38 = vld [vmem:[#allocation57_spill] sm:$0xff]  ;;  %v13721_v37 = vld [vmem:[#allocation60_spill] sm:$0xff] }
 0x908   :  { %v7044_v57 = vadd.f32 %v12572_v60, %v6959_v25  ;;  %v6749_v13 = vmax.f32 %v6733_v7, 0.0  ;;  %v6875_v5 = vmul.f32 %v12746_v41, %v6779_v54  ;;  %v7106_v18 = vmax.f32 %v7042_v11, 0.0  ;;  %v13722_v7 = vld [vmem:[#allocation56_spill] sm:$0xff] }
 0x909   :  { %v7110_v28 = vmax.f32 %v7046_v19, 0.0  ;;  %v7048_v26 = vadd.f32 %v12572_v60, %v6963_v8  ;;  %v6956_v51 = vmul.f32 %v12559_v17, %v6871_v21  ;;  %v6781_v14 = vsub.f32 %v13718_v50, %v12651_v52  ;;  %v13724_v50 = vld [vmem:[#allocation48_spill] sm:$0xff] }
 0x90a   :  { %v7108_v47 = vmax.f32 %v7044_v57, 0.0  ;;  %v6829_v27 = vadd.f32 1e-05, %v6749_v13  ;;  %v6960_v62 = vmul.f32 %v12559_v17, %v6875_v5  ;;  %v12848_v15 = vpop.eup %9428  ;;  %v6873_v48 = vmul.f32 %v12729_v30, %v6777_v10 }
 0x90b   :  { %v7158_v22 = vpack.c.bf16 %v7110_v28, %v7106_v18  ;;  %v7112_v34 = vmax.f32 %v7048_v26, 0.0  ;;  %v7041_v31 = vadd.f32 %v12562_v32, %v6956_v51  ;;  %v6877_v56 = vmul.f32 %v12746_v41, %v6781_v14  ;;  %v13723_v26 = vld [vmem:[#allocation52_spill] sm:$0xff] }
 0x90c   :  { %9432 = vrsqrt.f32 %v6829_v27  ;;  %v7045_v44 = vadd.f32 %v12562_v32, %v6960_v62  ;;  %v6718_v36 = vmul.f32 %v12804_v16, %v12804_v16  ;;  %v6958_v42 = vmul.f32 %v12575_v12, %v6873_v48 }
 0x90d   :  { %7489 = vmatprep.mubr.bf16.mxu0 %v7158_v22  ;;  %v7160_v40 = vpack.c.bf16 %v7112_v34, %v7108_v47  ;;  %v7105_v52 = vmax.f32 %v7041_v31, 0.0  ;;  %v6702_v45 = vmul.f32 0.001953125, %v6686_v46  ;;  %v6962_v35 = vmul.f32 %v12575_v12, %v6877_v56 }
 0x90e   :  { %v7109_v3 = vmax.f32 %v7045_v44, 0.0  ;;  %v6784_v30 = vsub.f32 %v13719_v58, %v12678_v1  ;;  %v6788_v0 = vsub.f32 %v13720_v38, %v12688_v49  ;;  %v7043_v41 = vadd.f32 %v12578_v55, %v6958_v42  ;;  %v13726_v38 = vld [vmem:[#allocation58_spill] sm:$0xff] }
 0x90f   :  { %7586 = vmatprep.mubr.bf16.mxu1 %v7160_v40  ;;  %v6734_v20 = vsub.f32 %v6702_v45, %v6718_v36  ;;  %v6786_v25 = vsub.f32 %v13721_v37, %v12678_v1  ;;  %v6790_v23 = vsub.f32 %v13722_v7, %v12688_v49  ;;  %v12867_v54 = vpop.eup %9430  ;;  %v7047_v19 = vadd.f32 %v12578_v55, %v6962_v35  ;;  %v13725_v45 = vld [vmem:[#allocation50_spill] sm:$0xff] }
 0x910   :  { %v7157_v11 = vpack.c.bf16 %v7109_v3, %v7105_v52  ;;  %v6880_v8 = vmul.f32 %v12771_v39, %v6784_v30  ;;  %v6884_v21 = vmul.f32 %v12791_v6, %v6788_v0  ;;  %v7107_v57 = vmax.f32 %v7043_v41, 0.0 }
 0x911   :  { %v6750_v13 = vmax.f32 %v6734_v20, 0.0  ;;  %v6882_v5 = vmul.f32 %v12771_v39, %v6786_v25  ;;  %v6886_v29 = vmul.f32 %v12791_v6, %v6790_v23  ;;  %v7111_v10 = vmax.f32 %v7047_v19, 0.0  ;;  %v13727_v25 = vld [vmem:[#allocation64_spill] sm:$0xff] }
 0x912   :  { %7490 = vmatmul.mubr.bf16.gmra.mrb[132].mxu0 %v7157_v11  ;;  %v6965_v18 = vmul.f32 %v12551_v43, %v6880_v8  ;;  %v6969_v28 = vmul.f32 %v12551_v43, %v6884_v21  ;;  %v6783_v51 = vsub.f32 %v13723_v26, %v12678_v1  ;;  %v6787_v14 = vsub.f32 %v13724_v50, %v12688_v49  ;;  %v13728_v19 = vld [vmem:[#allocation144_spill] sm:$0xff] }
 0x913   :  { %v6830_v47 = vadd.f32 1e-05, %v6750_v13  ;;  %v6967_v27 = vmul.f32 %v12565_v63, %v6882_v5  ;;  %v6971_v62 = vmul.f32 %v12565_v63, %v6886_v29  ;;  %v7159_v46 = vpack.c.bf16 %v7111_v10, %v7107_v57  ;;  %v13729_v13 = vld [vmem:[#allocation28_spill] sm:$0xff] }
 0x914   :  { %v7050_v22 = vadd.f32 %v12554_v2, %v6965_v18  ;;  %v7054_v34 = vadd.f32 %v12554_v2, %v6969_v28  ;;  %v6879_v31 = vmul.f32 %v12771_v39, %v6783_v51  ;;  %v6883_v56 = vmul.f32 %v12791_v6, %v6787_v14 }
 0x915   :  { %9434 = vrsqrt.f32 %v6830_v47  ;;  %v7052_v48 = vadd.f32 %v12572_v60, %v6967_v27  ;;  %v7056_v44 = vadd.f32 %v12572_v60, %v6971_v62  ;;  %7587 = vmatmul.mubr.bf16.gmra.mrb[124].mxu1 %v7159_v46  ;;  %v6785_v3 = vsub.f32 %v13725_v45, %v12678_v1  ;;  %v13731_v47 = vld [vmem:[#allocation65_spill] sm:$0xff] }
 0x916   :  { %v12888_v36 = vpop.eup %9432  ;;  %v7114_v40 = vmax.f32 %v7050_v22, 0.0  ;;  %v7118_v52 = vmax.f32 %v7054_v34, 0.0  ;;  %v6964_v42 = vmul.f32 %v12559_v17, %v6879_v31  ;;  %v6968_v30 = vmul.f32 %v12559_v17, %v6883_v56 }
 0x917   :  { %v7116_v35 = vmax.f32 %v7052_v48, 0.0  ;;  %v7120_v58 = vmax.f32 %v7056_v44, 0.0  ;;  %v6789_v0 = vsub.f32 %v13726_v38, %v12688_v49  ;;  %v6881_v37 = vmul.f32 %v12771_v39, %v6785_v3  ;;  %v13732_v48 = vld [vmem:[#allocation66_spill] sm:$0xff] }
 0x918   :  { %v7162_v41 = vpack.c.bf16 %v7118_v52, %v7114_v40  ;;  %v7049_v20 = vadd.f32 %v12562_v32, %v6964_v42  ;;  %v6792_v7 = vsub.f32 %v13727_v25, %v12706_v61  ;;  %v7053_v11 = vadd.f32 %v12562_v32, %v6968_v30  ;;  %v13733_v30 = vld [vmem:[#allocation68_spill] sm:$0xff] }
 0x919   :  { %v7164_v23 = vpack.c.bf16 %v7120_v58, %v7116_v35  ;;  %v6885_v1 = vmul.f32 %v12791_v6, %v6789_v0  ;;  %v6796_v8 = vsub.f32 %v13728_v19, %v12718_v59  ;;  %v6966_v49 = vmul.f32 %v12575_v12, %v6881_v37  ;;  %v13730_v6 = vld [vmem:[#allocation146_spill] sm:$0xff] }
 0x91a   :  { %7497 = vmatprep.mubr.bf16.mxu0 %v7162_v41  ;;  %v7113_v21 = vmax.f32 %v7049_v20, 0.0  ;;  %v6888_v57 = vmul.f32 %v12811_v53, %v6792_v7  ;;  %v6794_v39 = vsub.f32 %v13729_v13, %v12706_v61  ;;  %v7117_v5 = vmax.f32 %v7053_v11, 0.0 }
 0x91b   :  { %7594 = vmatprep.mubr.bf16.mxu1 %v7164_v23  ;;  %v6970_v29 = vmul.f32 %v12575_v12, %v6885_v1  ;;  %v6892_v10 = vmul.f32 %v12824_v9, %v6796_v8  ;;  %v6798_v18 = vsub.f32 %v13730_v6, %v12718_v59  ;;  %v7051_v28 = vadd.f32 %v12578_v55, %v6966_v49  ;;  %v13734_v23 = vld [vmem:[#allocation25_spill] sm:$0xff]  ;;  %v13737_v6 = vld [vmem:[#allocation31_spill] sm:$0xff] }
 0x91c   :  { %v6973_v26 = vmul.f32 %v12551_v43, %v6888_v57  ;;  %v6890_v51 = vmul.f32 %v12811_v53, %v6794_v39  ;;  %v6791_v27 = vsub.f32 %v13731_v47, %v12706_v61  ;;  %v7161_v62 = vpack.c.bf16 %v7117_v5, %v7113_v21  ;;  %v13736_v5 = vld [vmem:[#allocation35_spill] sm:$0xff] }
 0x91d   :  { %v7055_v50 = vadd.f32 %v12578_v55, %v6970_v29  ;;  %v6977_v14 = vmul.f32 %v12551_v43, %v6892_v10  ;;  %v6894_v46 = vmul.f32 %v12824_v9, %v6798_v18  ;;  %v7115_v22 = vmax.f32 %v7051_v28, 0.0 }
 0x91e   :  { %v7058_v34 = vadd.f32 %v12554_v2, %v6973_v26  ;;  %v6975_v31 = vmul.f32 %v12565_v63, %v6890_v51  ;;  %v6795_v44 = vsub.f32 %v13732_v48, %v12718_v59  ;;  %7498 = vmatmul.mubr.bf16.gmra.mrb[136].mxu0 %v7161_v62  ;;  %v6887_v45 = vmul.f32 %v12811_v53, %v6791_v27  ;;  %v13738_v27 = vld [vmem:[#allocation39_spill] sm:$0xff] }
 0x91f   :  { %v12924_v56 = vpop.eup %9434  ;;  %v7119_v40 = vmax.f32 %v7055_v50, 0.0  ;;  %v7062_v52 = vadd.f32 %v12554_v2, %v6977_v14  ;;  %v6979_v42 = vmul.f32 %v12565_v63, %v6894_v46  ;;  %v6793_v38 = vsub.f32 %v13733_v30, %v12706_v61  ;;  %v13735_v61 = vld [vmem:[#allocation37_spill] sm:$0xff]  ;;  %v13741_v30 = vld [vmem:[#allocation147_spill] sm:$0xff] }
 0x920   :  { %v7122_v3 = vmax.f32 %v7058_v34, 0.0  ;;  %v7060_v35 = vadd.f32 %v12572_v60, %v6975_v31  ;;  %v6891_v58 = vmul.f32 %v12824_v9, %v6795_v44  ;;  %v6972_v37 = vmul.f32 %v12559_v17, %v6887_v45  ;;  %v13739_v14 = vld [vmem:[#allocation145_spill] sm:$0xff] }
 0x921   :  { %v7163_v0 = vpack.c.bf16 %v7119_v40, %v7115_v22  ;;  %v7126_v41 = vmax.f32 %v7062_v52, 0.0  ;;  %v7064_v20 = vadd.f32 %v12572_v60, %v6979_v42  ;;  %v6797_v11 = vsub.f32 %v13734_v23, %v12718_v59  ;;  %v13740_v42 = vld [vmem:[#allocation38_spill] sm:$0xff] }
 0x922   :  { %v7124_v25 = vmax.f32 %v7060_v35, 0.0  ;;  %v6976_v7 = vmul.f32 %v12559_v17, %v6891_v58  ;;  %v6889_v1 = vmul.f32 %v12811_v53, %v6793_v38  ;;  %v7057_v21 = vadd.f32 %v12562_v32, %v6972_v37 }
 0x923   :  { %7595 = vmatmul.mubr.bf16.gmra.mrb[128].mxu1 %v7163_v0  ;;  %v7166_v19 = vpack.c.bf16 %v7126_v41, %v7122_v3  ;;  %v7128_v8 = vmax.f32 %v7064_v20, 0.0  ;;  %v6800_v49 = vsub.f32 %v13735_v61, %v12742_v4  ;;  %v6893_v13 = vmul.f32 %v12824_v9, %v6797_v11  ;;  %v13742_v11 = vld [vmem:[#allocation46_spill] sm:$0xff] }
 0x924   :  { %v7061_v57 = vadd.f32 %v12562_v32, %v6976_v7  ;;  %v6974_v39 = vmul.f32 %v12575_v12, %v6889_v1  ;;  %v6804_v29 = vsub.f32 %v13736_v5, %v12760_v24  ;;  %v7121_v53 = vmax.f32 %v7057_v21, 0.0 }
 0x925   :  { %7505 = vmatprep.mubr.bf16.mxu0 %v7166_v19  ;;  %v7168_v59 = vpack.c.bf16 %v7128_v8, %v7124_v25  ;;  %v6896_v10 = vmul.f32 %v12848_v15, %v6800_v49  ;;  %v6802_v18 = vsub.f32 %v13737_v6, %v12742_v4  ;;  %v6978_v26 = vmul.f32 %v12575_v12, %v6893_v13  ;;  %v13743_v13 = vld [vmem:[#allocation53_spill] sm:$0xff] }
 0x926   :  { %v7125_v28 = vmax.f32 %v7061_v57, 0.0  ;;  %v7059_v51 = vadd.f32 %v12578_v55, %v6974_v39  ;;  %v6900_v9 = vmul.f32 %v12867_v54, %v6804_v29  ;;  %v6806_v62 = vsub.f32 %v13738_v27, %v12760_v24 }
 0x927   :  { %7602 = vmatprep.mubr.bf16.mxu1 %v7168_v59  ;;  %v6981_v47 = vmul.f32 %v12551_v43, %v6896_v10  ;;  %v6898_v50 = vmul.f32 %v12848_v15, %v6802_v18  ;;  %v6799_v46 = vsub.f32 %v13739_v14, %v12742_v4  ;;  %v7063_v34 = vadd.f32 %v12578_v55, %v6978_v26  ;;  %v13744_v59 = vld [vmem:[#allocation61_spill] sm:$0xff]  ;;  %v13745_v18 = vld [vmem:[#allocation51_spill] sm:$0xff] }
 0x928   :  { %v7165_v22 = vpack.c.bf16 %v7125_v28, %v7121_v53  ;;  %v7123_v31 = vmax.f32 %v7059_v51, 0.0  ;;  %v6985_v48 = vmul.f32 %v12551_v43, %v6900_v9  ;;  %v6902_v40 = vmul.f32 %v12867_v54, %v6806_v62  ;;  %v13746_v62 = vld [vmem:[#allocation55_spill] sm:$0xff] }
 0x929   :  { %v7066_v44 = vadd.f32 %v12554_v2, %v6981_v47  ;;  %v6983_v52 = vmul.f32 %v12565_v63, %v6898_v50  ;;  %v6803_v45 = vsub.f32 %v13740_v42, %v12760_v24  ;;  %v7127_v3 = vmax.f32 %v7063_v34, 0.0 }
 0x92a   :  { %7506 = vmatmul.mubr.bf16.gmra.mrb[140].mxu0 %v7165_v22  ;;  %v7070_v35 = vadd.f32 %v12554_v2, %v6985_v48  ;;  %v6895_v58 = vmul.f32 %v12848_v15, %v6799_v46  ;;  %v6801_v38 = vsub.f32 %v13741_v30, %v12742_v4  ;;  %v6987_v41 = vmul.f32 %v12565_v63, %v6902_v40 }
 0x92b   :  { %v7130_v0 = vmax.f32 %v7066_v44, 0.0  ;;  %v7068_v20 = vadd.f32 %v12572_v60, %v6983_v52  ;;  %v6899_v37 = vmul.f32 %v12867_v54, %v6803_v45  ;;  %v7167_v25 = vpack.c.bf16 %v7127_v3, %v7123_v31  ;;  %v13747_v31 = vld [vmem:[#allocation43_spill] sm:$0xff] }
 0x92c   :  { %v7134_v7 = vmax.f32 %v7070_v35, 0.0  ;;  %v6980_v23 = vmul.f32 %v12559_v17, %v6895_v58  ;;  %v6805_v1 = vsub.f32 %v13742_v11, %v12760_v24  ;;  %v7072_v19 = vadd.f32 %v12572_v60, %v6987_v41  ;;  %v13748_v3 = vld [vmem:[#allocation47_spill] sm:$0xff] }
 0x92d   :  { %v7132_v8 = vmax.f32 %v7068_v20, 0.0  ;;  %v6984_v21 = vmul.f32 %v12559_v17, %v6899_v37  ;;  %v6897_v4 = vmul.f32 %v12848_v15, %v6801_v38  ;;  %7603 = vmatmul.mubr.bf16.gmra.mrb[132].mxu1 %v7167_v25  ;;  %v6808_v39 = vsub.f32 %v13743_v13, %v12800_v33 }
 0x92e   :  { %v7170_v61 = vpack.c.bf16 %v7134_v7, %v7130_v0  ;;  %v7065_v49 = vadd.f32 %v12562_v32, %v6980_v23  ;;  %v6901_v57 = vmul.f32 %v12867_v54, %v6805_v1  ;;  %v7136_v5 = vmax.f32 %v7072_v19, 0.0  ;;  %v13751_v19 = vld [vmem:[#allocation29_spill] sm:$0xff] }
 0x92f   :  { %v7069_v29 = vadd.f32 %v12562_v32, %v6984_v21  ;;  %v6982_v24 = vmul.f32 %v12575_v12, %v6897_v4  ;;  %v6812_v53 = vsub.f32 %v13744_v59, %v12804_v16  ;;  %v6904_v6 = vmul.f32 %v12888_v36, %v6808_v39  ;;  %v13754_v4 = vld [vmem:[#allocation69_spill] sm:$0xff] }
 0x930   :  { %7513 = vmatprep.mubr.bf16.mxu0 %v7170_v61  ;;  %v7129_v10 = vmax.f32 %v7065_v49, 0.0  ;;  %v6986_v15 = vmul.f32 %v12575_v12, %v6901_v57  ;;  %v6810_v54 = vsub.f32 %v13745_v18, %v12800_v33  ;;  %v7172_v28 = vpack.c.bf16 %v7136_v5, %v7132_v8  ;;  %v13752_v8 = vld [vmem:[#allocation59_spill] sm:$0xff] }
 0x931   :  { %v7133_v26 = vmax.f32 %v7069_v29, 0.0  ;;  %v7067_v51 = vadd.f32 %v12578_v55, %v6982_v24  ;;  %v6908_v9 = vmul.f32 %v12924_v56, %v6812_v53  ;;  %v6989_v27 = vmul.f32 %v12551_v43, %v6904_v6  ;;  %v13755_v24 = vld [vmem:[#allocation70_spill] sm:$0xff] }
 0x932   :  { %v7071_v47 = vadd.f32 %v12578_v55, %v6986_v15  ;;  %v6814_v50 = vsub.f32 %v13746_v62, %v12804_v16  ;;  %v6906_v14 = vmul.f32 %v12888_v36, %v6810_v54  ;;  %7610 = vmatprep.mubr.bf16.mxu1 %v7172_v28  ;;  %v6807_v48 = vsub.f32 %v13747_v31, %v12800_v33 }
 0x933   :  { %v7169_v46 = vpack.c.bf16 %v7133_v26, %v7129_v10  ;;  %v7131_v22 = vmax.f32 %v7067_v51, 0.0  ;;  %v6993_v34 = vmul.f32 %v12551_v43, %v6908_v9  ;;  %v7074_v40 = vadd.f32 %v12554_v2, %v6989_v27  ;;  %v13749_v43 = vld [vmem:[#allocation54_spill] sm:$0xff]  ;;  %v13758_v26 = vld [vmem:[#allocation63_spill] sm:$0xff] }
 0x934   :  { %v7135_v44 = vmax.f32 %v7071_v47, 0.0  ;;  %v6910_v52 = vmul.f32 %v12924_v56, %v6814_v50  ;;  %v6991_v42 = vmul.f32 %v12565_v63, %v6906_v14  ;;  %v6811_v35 = vsub.f32 %v13748_v3, %v12804_v16  ;;  %v13756_v10 = vld [vmem:[#allocation26_spill] sm:$0xff] }
 0x935   :  { %7514 = vmatmul.mubr.bf16.gmra.mrb[144].mxu0 %v7169_v46  ;;  %v7078_v45 = vadd.f32 %v12554_v2, %v6993_v34  ;;  %v6903_v58 = vmul.f32 %v12888_v36, %v6807_v48  ;;  %v6809_v30 = vsub.f32 %v13749_v43, %v12800_v33  ;;  %v7138_v0 = vmax.f32 %v7074_v40, 0.0  ;;  %v13750_v2 = vld [vmem:[#allocation62_spill] sm:$0xff] }
 0x936   :  { %v7171_v38 = vpack.c.bf16 %v7135_v44, %v7131_v22  ;;  %v6995_v41 = vmul.f32 %v12565_v63, %v6910_v52  ;;  %v7076_v20 = vadd.f32 %v12572_v60, %v6991_v42  ;;  %v6907_v25 = vmul.f32 %v12924_v56, %v6811_v35  ;;  %v13047_v43 = vld [vmem:[#allocation8 + $0x10] ss:$0 sm:$0xff] }
 0x937   :  { %v7142_v37 = vmax.f32 %v7078_v45, 0.0  ;;  %v6988_v7 = vmul.f32 %v12559_v17, %v6903_v58  ;;  %v6813_v23 = vsub.f32 %v13750_v2, %v12804_v16  ;;  %v6905_v33 = vmul.f32 %v12888_v36, %v6809_v30 }
 0x938   :  { %7611 = vmatmul.mubr.bf16.gmra.mrb[136].mxu1 %v7171_v38  ;;  %v7080_v11 = vadd.f32 %v12572_v60, %v6995_v41  ;;  %v7140_v1 = vmax.f32 %v7076_v20, 0.0  ;;  %v13753_v21 = vsub.f32 %v13751_v19, %v13752_v8  ;;  %v6992_v57 = vmul.f32 %v12559_v17, %v6907_v25 }
 0x939   :  { %v7174_v49 = vpack.c.bf16 %v7142_v37, %v7138_v0  ;;  %v7073_v13 = vadd.f32 %v12562_v32, %v6988_v7  ;;  %v6909_v39 = vmul.f32 %v12924_v56, %v6813_v23  ;;  %v6990_v16 = vmul.f32 %v12575_v12, %v6905_v33 }
 0x93a   :  { %v6854_v61 = vmul.f32 %v13754_v4, %v13753_v21  ;;  %v7144_v5 = vmax.f32 %v7080_v11, 0.0  ;;  %v7020_v36 = vadd.f32 %v12572_v60, %v13755_v24  ;;  %v7077_v59 = vadd.f32 %v12562_v32, %v6992_v57 }
 0x93b   :  { %7521 = vmatprep.mubr.bf16.mxu0 %v7174_v49  ;;  %v6994_v53 = vmul.f32 %v12575_v12, %v6909_v39  ;;  %v13757_v17 = vsub.f32 %v13756_v10, %v13752_v8  ;;  %v7137_v56 = vmax.f32 %v7073_v13, 0.0  ;;  %v7075_v18 = vadd.f32 %v12578_v55, %v6990_v16 }
 0x93c   :  { %v6939_v29 = vmul.f32 %v12565_v63, %v6854_v61  ;;  %v7176_v6 = vpack.c.bf16 %v7144_v5, %v7140_v1  ;;  %v7141_v63 = vmax.f32 %v7077_v59, 0.0  ;;  %v6934_v51 = vmul.f32 %v12575_v12, %v13758_v26 }
 0x93d   :  { %v6853_v15 = vmul.f32 %v13754_v4, %v13757_v17  ;;  %v7079_v28 = vadd.f32 %v12578_v55, %v6994_v53  ;;  %v7139_v9 = vmax.f32 %v7075_v18, 0.0  ;;  %v7084_v47 = vmax.f32 %v7020_v36, 0.0 }
 0x93e   :  { %v7024_v54 = vadd.f32 %v12572_v60, %v6939_v29  ;;  %7618 = vmatprep.mubr.bf16.mxu1 %v7176_v6  ;;  %v7173_v62 = vpack.c.bf16 %v7141_v63, %v7137_v56  ;;  %v7019_v14 = vadd.f32 %v12578_v55, %v6934_v51 }
 0x93f   :  { %v6938_v32 = vmul.f32 %v12575_v12, %v6853_v15  ;;  %v7143_v50 = vmax.f32 %v7079_v28, 0.0 }
 0x940   :  { %v7088_v27 = vmax.f32 %v7024_v54, 0.0  ;;  %7522 = vmatmul.mubr.bf16.gmra.mrb[148].mxu0 %v7173_v62  ;;  %v7083_v34 = vmax.f32 %v7019_v14, 0.0 }
 0x941   :  { %v7023_v46 = vadd.f32 %v12578_v55, %v6938_v32  ;;  %v7175_v60 = vpack.c.bf16 %v7143_v50, %v7139_v9  ;;  %v13759_v9 = vld [vmem:[#allocation20_spill] sm:$0xff] }
 0x942   :  { %v7148_v22 = vpack.c.bf16 %v7088_v27, %v7084_v47  ;;  %vm7627_vm3 = vcmp.eq.s32.totalorder %v13759_v9, 51 }
 0x943   :  { %v7087_v31 = vmax.f32 %v7023_v46, 0.0  ;;  %7619 = vmatmul.mubr.bf16.gmra.mrb[140].mxu1 %v7175_v60 }
 0x944   :  { %7562 = vmatprep.mubr.bf16.mxu0 %v7148_v22 }
 0x945   :  { %v7147_v48 = vpack.c.bf16 %v7087_v31, %v7083_v34 }
 0x948   :  { %7563 = vmatmul.mubr.bf16.vlgmr.msra.gmra.mrb[152].mxu0 %v7147_v48 }
 0x9b9   :  { %v8300_v12 = vpop.f32.mrb[120].mxu0 }
 0x9ba   :  { %v8301_v44 = vpop.f32.mrb[121].mxu0 }
 0x9bb   :  { %v13043_v40 = vadd.f32 %v8301_v44, %v8300_v12  ;;  %v8303_v52 = vpop.f32.mrb[122].mxu0 }
 0x9bc   :  { %v8304_v42 = vpop.f32.mrb[123].mxu0 }
 0x9bd   :  { %v13045_v45 = vadd.f32 %v8304_v42, %v8303_v52 }
 0x9c6   :  { %v8306_v3 = vpop.f32.mrb[124].mxu0 }
 0x9c7   :  { %v8307_v35 = vpop.f32.mrb[125].mxu0 }
 0x9c8   :  { %v8308_v55 = vadd.f32 %v8307_v35, %v8306_v3  ;;  %v8309_v58 = vpop.f32.mrb[126].mxu0 }
 0x9c9   :  { %v8310_v30 = vpop.f32.mrb[127].mxu0 }
 0x9ca   :  { %v7476_v0 = vadd.f32 %v8308_v55, %v13047_v43  ;;  %v8311_v41 = vadd.f32 %v8310_v30, %v8309_v58 }
 0x9cb   :  { %v8370_v38 = vpop.f32.mrb[116].mxu1 }
 0x9cc   :  { %v8371_v20 = vpop.f32.mrb[117].mxu1  ;;  %v7479_v7 = vadd.f32 %v8311_v41, %v13047_v43 }
 0x9cd   :  { %v8372_v37 = vadd.f32 %v8371_v20, %v8370_v38  ;;  %v8373_v25 = vpop.f32.mrb[118].mxu1 }
 0x9ce   :  { %v8374_v2 = vpop.f32.mrb[119].mxu1 }
 0x9cf   :  { %v7573_v23 = vadd.f32 %v8372_v37, %v7476_v0  ;;  %v8375_v11 = vadd.f32 %v8374_v2, %v8373_v25 }
 0x9d1   :  { %v8254_v1 = vmul.f32 -1.442695, %v7573_v23  ;;  %v7576_v33 = vadd.f32 %v8375_v11, %v7479_v7 }
 0x9d3   :  { %9436 = vpow2.f32 %v8254_v1  ;;  %v8255_v19 = vmul.f32 -1.442695, %v7576_v33 }
 0x9d5   :  { %9438 = vpow2.f32 %v8255_v19 }
 0x9d7   :  { %v8312_v8 = vpop.f32.mrb[128].mxu0 }
 0x9d8   :  { %v8313_v21 = vpop.f32.mrb[129].mxu0 }
 0x9d9   :  { %v8314_v61 = vadd.f32 %v8313_v21, %v8312_v8  ;;  %v8315_v49 = vpop.f32.mrb[130].mxu0 }
 0x9da   :  { %v8376_v4 = vpop.f32.mrb[120].mxu1  ;;  %v8316_v13 = vpop.f32.mrb[131].mxu0 }
 0x9db   :  { %v8377_v57 = vpop.f32.mrb[121].mxu1  ;;  %v7484_v39 = vadd.f32 %v8314_v61, %v13047_v43  ;;  %v8317_v29 = vadd.f32 %v8316_v13, %v8315_v49 }
 0x9dc   :  { %v8378_v5 = vadd.f32 %v8377_v57, %v8376_v4  ;;  %v8379_v16 = vpop.f32.mrb[122].mxu1 }
 0x9dd   :  { %v8380_v24 = vpop.f32.mrb[123].mxu1  ;;  %v7487_v59 = vadd.f32 %v8317_v29, %v13047_v43  ;;  %v9437_v10 = vpop.eup %9436 }
 0x9de   :  { %v7581_v36 = vadd.f32 %v8378_v5, %v7484_v39  ;;  %v8381_v53 = vadd.f32 %v8380_v24, %v8379_v16  ;;  %v7678_v17 = vadd.f32 1.0, %v9437_v10 }
 0x9df   :  { %v9439_v56 = vpop.eup %9438 }
 0x9e0   :  { %v8256_v15 = vmul.f32 -1.442695, %v7581_v36  ;;  %v7584_v6 = vadd.f32 %v8381_v53, %v7487_v59  ;;  %9440 = vrcp.f32 %v7678_v17  ;;  %v7679_v18 = vadd.f32 1.0, %v9439_v56 }
 0x9e2   :  { %v8257_v54 = vmul.f32 -1.442695, %v7584_v6  ;;  %9442 = vpow2.f32 %v8256_v15 }
 0x9e3   :  { %9444 = vrcp.f32 %v7679_v18 }
 0x9e4   :  { %9446 = vpow2.f32 %v8257_v54 }
 0x9e5   :  { %v8318_v63 = vpop.f32.mrb[132].mxu0 }
 0x9e6   :  { %v8319_v28 = vpop.f32.mrb[133].mxu0 }
 0x9e7   :  { %v8320_v26 = vadd.f32 %v8319_v28, %v8318_v63  ;;  %v8321_v51 = vpop.f32.mrb[134].mxu0 }
 0x9e8   :  { %v8322_v32 = vpop.f32.mrb[135].mxu0  ;;  %v8382_v47 = vpop.f32.mrb[124].mxu1 }
 0x9e9   :  { %v7492_v27 = vadd.f32 %v8320_v26, %v13047_v43  ;;  %v8323_v62 = vadd.f32 %v8322_v32, %v8321_v51  ;;  %v8383_v50 = vpop.f32.mrb[125].mxu1 }
 0x9ea   :  { %v9441_v14 = vpop.eup %9440  ;;  %v8384_v46 = vadd.f32 %v8383_v50, %v8382_v47  ;;  %v8385_v22 = vpop.f32.mrb[126].mxu1 }
 0x9eb   :  { %v7495_v60 = vadd.f32 %v8323_v62, %v13047_v43  ;;  %v7726_v31 = vsel %vm7627_vm3, %v9441_v14, %v7573_v23  ;;  %v8386_v48 = vpop.f32.mrb[127].mxu1 }
 0x9ec   :  { %v9443_v34 = vpop.eup %9442  ;;  %7742 = vst [vmem:[#allocation14 + $0x10] sm:$0xff] %v7726_v31  ;;  %v13058_v52 = vadd.f32 %v8384_v46, %v7492_v27  ;;  %v8387_v42 = vadd.f32 %v8386_v48, %v8385_v22 }
 0x9ed   :  { %v9445_v12 = vpop.eup %9444  ;;  %v7680_v44 = vadd.f32 1.0, %v9443_v34 }
 0x9ee   :  { %v9447_v3 = vpop.eup %9446  ;;  %v7727_v35 = vsel %vm7627_vm3, %v9445_v12, %v7576_v33  ;;  %v8258_v58 = vmul.f32 -1.442695, %v13058_v52  ;;  %v13063_v30 = vadd.f32 %v8387_v42, %v7495_v60 }
 0x9ef   :  { %7743 = vst [vmem:[#allocation14 + $0x18] sm:$0xff] %v7727_v35  ;;  %9448 = vrcp.f32 %v7680_v44  ;;  %v7681_v55 = vadd.f32 1.0, %v9447_v3 }
 0x9f0   :  { %v8259_v38 = vmul.f32 -1.442695, %v13063_v30 }
 0x9f1   :  { %9450 = vrcp.f32 %v7681_v55  ;;  %v8324_v0 = vpop.f32.mrb[136].mxu0 }
 0x9f2   :  { %9452 = vpow2.f32 %v8258_v58  ;;  %v8325_v41 = vpop.f32.mrb[137].mxu0 }
 0x9f3   :  { %9454 = vpow2.f32 %v8259_v38  ;;  %v8326_v20 = vadd.f32 %v8325_v41, %v8324_v0  ;;  %v8327_v37 = vpop.f32.mrb[138].mxu0 }
 0x9f4   :  { %v8328_v25 = vpop.f32.mrb[139].mxu0 }
 0x9f5   :  { %v7500_v2 = vadd.f32 %v8326_v20, %v13047_v43  ;;  %v8329_v23 = vadd.f32 %v8328_v25, %v8327_v37 }
 0x9f6   :  { %v8388_v7 = vpop.f32.mrb[128].mxu1 }
 0x9f7   :  { %v8389_v11 = vpop.f32.mrb[129].mxu1  ;;  %v7503_v19 = vadd.f32 %v8329_v23, %v13047_v43 }
 0x9f8   :  { %v8390_v1 = vadd.f32 %v8389_v11, %v8388_v7  ;;  %v8391_v33 = vpop.f32.mrb[130].mxu1 }
 0x9f9   :  { %v9449_v8 = vpop.eup %9448  ;;  %v8392_v21 = vpop.f32.mrb[131].mxu1 }
 0x9fa   :  { %v7728_v4 = vsel %vm7627_vm3, %v9449_v8, %v7581_v36  ;;  %v13070_v61 = vadd.f32 %v8390_v1, %v7500_v2  ;;  %v8393_v49 = vadd.f32 %v8392_v21, %v8391_v33 }
 0x9fb   :  { %v9451_v57 = vpop.eup %9450  ;;  %7744 = vst [vmem:[#allocation14 + $0x20] sm:$0xff] %v7728_v4 }
 0x9fc   :  { %v9453_v13 = vpop.eup %9452  ;;  %v7729_v39 = vsel %vm7627_vm3, %v9451_v57, %v7584_v6  ;;  %v8260_v5 = vmul.f32 -1.442695, %v13070_v61  ;;  %v13075_v16 = vadd.f32 %v8393_v49, %v7503_v19 }
 0x9fd   :  { %v9455_v29 = vpop.eup %9454  ;;  %7745 = vst [vmem:[#allocation14 + $0x28] sm:$0xff] %v7729_v39  ;;  %v7682_v24 = vadd.f32 1.0, %v9453_v13  ;;  %v8330_v59 = vpop.f32.mrb[140].mxu0 }
 0x9fe   :  { %v7683_v53 = vadd.f32 1.0, %v9455_v29  ;;  %9456 = vpow2.f32 %v8260_v5  ;;  %v8261_v36 = vmul.f32 -1.442695, %v13075_v16  ;;  %v8331_v10 = vpop.f32.mrb[141].mxu0 }
 0x9ff   :  { %9458 = vrcp.f32 %v7682_v24  ;;  %v8332_v17 = vadd.f32 %v8331_v10, %v8330_v59  ;;  %v8333_v15 = vpop.f32.mrb[142].mxu0 }
 0xa00   :  { %9460 = vrcp.f32 %v7683_v53  ;;  %v8334_v56 = vpop.f32.mrb[143].mxu0  ;;  %v8394_v6 = vpop.f32.mrb[132].mxu1 }
 0xa01   :  { %9462 = vpow2.f32 %v8261_v36  ;;  %v7508_v18 = vadd.f32 %v8332_v17, %v13047_v43  ;;  %v8335_v54 = vadd.f32 %v8334_v56, %v8333_v15  ;;  %v8395_v63 = vpop.f32.mrb[133].mxu1 }
 0xa02   :  { %v8396_v28 = vadd.f32 %v8395_v63, %v8394_v6  ;;  %v8397_v26 = vpop.f32.mrb[134].mxu1 }
 0xa03   :  { %v7511_v51 = vadd.f32 %v8335_v54, %v13047_v43  ;;  %v8398_v32 = vpop.f32.mrb[135].mxu1 }
 0xa04   :  { %v13080_v47 = vadd.f32 %v8396_v28, %v7508_v18  ;;  %v8399_v27 = vadd.f32 %v8398_v32, %v8397_v26  ;;  %v7468_v32 = vadd.f32 %v13043_v40, %v13047_v43 }
 0xa06   :  { %v8262_v62 = vmul.f32 -1.442695, %v13080_v47  ;;  %v13083_v50 = vadd.f32 %v8399_v27, %v7511_v51 }
 0xa08   :  { %v9457_v14 = vpop.eup %9456  ;;  %v8336_v46 = vpop.f32.mrb[144].mxu0  ;;  %9464 = vpow2.f32 %v8262_v62  ;;  %v8263_v34 = vmul.f32 -1.442695, %v13083_v50 }
 0xa09   :  { %v9459_v22 = vpop.eup %9458  ;;  %v7684_v60 = vadd.f32 1.0, %v9457_v14  ;;  %v8337_v31 = vpop.f32.mrb[145].mxu0 }
 0xa0a   :  { %v9461_v48 = vpop.eup %9460  ;;  %v7730_v12 = vsel %vm7627_vm3, %v9459_v22, %v13058_v52  ;;  %v8338_v44 = vadd.f32 %v8337_v31, %v8336_v46  ;;  %v8339_v42 = vpop.f32.mrb[146].mxu0 }
 0xa0b   :  { %v9463_v3 = vpop.eup %9462  ;;  %7746 = vst [vmem:[#allocation14 + $0x30] sm:$0xff] %v7730_v12  ;;  %v7731_v35 = vsel %vm7627_vm3, %v9461_v48, %v13063_v30  ;;  %9466 = vrcp.f32 %v7684_v60  ;;  %v8400_v55 = vpop.f32.mrb[136].mxu1  ;;  %v7471_v60 = vadd.f32 %v13045_v45, %v13047_v43 }
 0xa0c   :  { %v8340_v58 = vpop.f32.mrb[147].mxu0  ;;  %7747 = vst [vmem:[#allocation14 + $0x38] sm:$0xff] %v7731_v35  ;;  %v7685_v38 = vadd.f32 1.0, %v9463_v3  ;;  %9468 = vpow2.f32 %v8263_v34  ;;  %v7516_v0 = vadd.f32 %v8338_v44, %v13047_v43  ;;  %v8401_v41 = vpop.f32.mrb[137].mxu1 }
 0xa0d   :  { %v8341_v20 = vadd.f32 %v8340_v58, %v8339_v42  ;;  %v8402_v37 = vadd.f32 %v8401_v41, %v8400_v55  ;;  %v8403_v52 = vpop.f32.mrb[138].mxu1 }
 0xa0e   :  { %9470 = vrcp.f32 %v7685_v38  ;;  %v8404_v7 = vpop.f32.mrb[139].mxu1 }
 0xa0f   :  { %v7519_v25 = vadd.f32 %v8341_v20, %v13047_v43  ;;  %v13094_v2 = vadd.f32 %v8402_v37, %v7516_v0  ;;  %v8405_v23 = vadd.f32 %v8404_v7, %v8403_v52 }
 0xa11   :  { %v8264_v30 = vmul.f32 -1.442695, %v13094_v2  ;;  %v13097_v11 = vadd.f32 %v8405_v23, %v7519_v25 }
 0xa12   :  { %v9465_v1 = vpop.eup %9464 }
 0xa13   :  { %9472 = vpow2.f32 %v8264_v30  ;;  %v8265_v33 = vmul.f32 -1.442695, %v13097_v11  ;;  %v7686_v19 = vadd.f32 1.0, %v9465_v1  ;;  %v8342_v8 = vpop.f32.mrb[148].mxu0 }
 0xa14   :  { %v8343_v4 = vpop.f32.mrb[149].mxu0 }
 0xa15   :  { %v9467_v21 = vpop.eup %9466  ;;  %9474 = vpow2.f32 %v8265_v33  ;;  %v8344_v39 = vadd.f32 %v8343_v4, %v8342_v8  ;;  %v8345_v5 = vpop.f32.mrb[150].mxu0 }
 0xa16   :  { %v9469_v49 = vpop.eup %9468  ;;  %v7732_v57 = vsel %vm7627_vm3, %v9467_v21, %v13070_v61  ;;  %9476 = vrcp.f32 %v7686_v19  ;;  %v8406_v13 = vpop.f32.mrb[140].mxu1 }
 0xa17   :  { %7748 = vst [vmem:[#allocation14 + $0x40] sm:$0xff] %v7732_v57  ;;  %v7687_v29 = vadd.f32 1.0, %v9469_v49  ;;  %v8407_v24 = vpop.f32.mrb[141].mxu1  ;;  %v8346_v59 = vpop.f32.mrb[151].mxu0  ;;  %v7524_v36 = vadd.f32 %v8344_v39, %v13047_v43 }
 0xa18   :  { %v9471_v53 = vpop.eup %9470  ;;  %v8408_v10 = vadd.f32 %v8407_v24, %v8406_v13  ;;  %v8409_v17 = vpop.f32.mrb[142].mxu1  ;;  %v8347_v15 = vadd.f32 %v8346_v59, %v8345_v5 }
 0xa19   :  { %v7733_v56 = vsel %vm7627_vm3, %v9471_v53, %v13075_v16  ;;  %9478 = vrcp.f32 %v7687_v29  ;;  %v8410_v61 = vpop.f32.mrb[143].mxu1 }
 0xa1a   :  { %7749 = vst [vmem:[#allocation14 + $0x48] sm:$0xff] %v7733_v56  ;;  %v7621_v6 = vadd.f32 %v8408_v10, %v7524_v36  ;;  %v7527_v18 = vadd.f32 %v8347_v15, %v13047_v43  ;;  %v8411_v54 = vadd.f32 %v8410_v61, %v8409_v17 }
 0xa1b   :  { %v8364_v26 = vpop.f32.mrb[152].mxu0 }
 0xa1c   :  { %v8266_v63 = vmul.f32 -1.442695, %v7621_v6  ;;  %v7624_v28 = vadd.f32 %v8411_v54, %v7527_v18  ;;  %v8365_v27 = vpop.f32.mrb[153].mxu0 }
 0xa1d   :  { %v9473_v51 = vpop.eup %9472  ;;  %v8366_v46 = vadd.f32 %v8365_v27, %v8364_v26  ;;  %v8367_v16 = vpop.f32.mrb[154].mxu0 }
 0xa1e   :  { %v7688_v62 = vadd.f32 1.0, %v9473_v51  ;;  %9480 = vpow2.f32 %v8266_v63  ;;  %v8267_v14 = vmul.f32 -1.442695, %v7624_v28  ;;  %v8368_v34 = vpop.f32.mrb[155].mxu0 }
 0xa1f   :  { %v9475_v22 = vpop.eup %9474  ;;  %v7565_v12 = vadd.f32 %v8366_v46, %v7468_v32  ;;  %v8369_v44 = vadd.f32 %v8368_v34, %v8367_v16 }
 0xa20   :  { %v9477_v31 = vpop.eup %9476  ;;  %9482 = vrcp.f32 %v7688_v62  ;;  %v7689_v48 = vadd.f32 1.0, %v9475_v22 }
 0xa21   :  { %v7734_v40 = vsel %vm7627_vm3, %v9477_v31, %v13080_v47  ;;  %9484 = vpow2.f32 %v8267_v14  ;;  %v8252_v42 = vmul.f32 -1.442695, %v7565_v12  ;;  %v7568_v3 = vadd.f32 %v8369_v44, %v7471_v60 }
 0xa22   :  { %7750 = vst [vmem:[#allocation14 + $0x50] sm:$0xff] %v7734_v40  ;;  %9486 = vrcp.f32 %v7689_v48 }
 0xa23   :  { %v9479_v35 = vpop.eup %9478  ;;  %9488 = vpow2.f32 %v8252_v42  ;;  %v8253_v43 = vmul.f32 -1.442695, %v7568_v3 }
 0xa24   :  { %v7735_v45 = vsel %vm7627_vm3, %v9479_v35, %v13083_v50 }
 0xa25   :  { %7751 = vst [vmem:[#allocation14 + $0x58] sm:$0xff] %v7735_v45  ;;  %9490 = vpow2.f32 %v8253_v43 }
 0xa28   :  { %v9481_v55 = vpop.eup %9480 }
 0xa29   :  { %v7690_v58 = vadd.f32 1.0, %v9481_v55 }
 0xa2a   :  { %v9483_v38 = vpop.eup %9482 }
 0xa2b   :  { %v9485_v0 = vpop.eup %9484  ;;  %v7736_v47 = vsel %vm7627_vm3, %v9483_v38, %v13094_v2  ;;  %9492 = vrcp.f32 %v7690_v58 }
 0xa2c   :  { %v9487_v41 = vpop.eup %9486  ;;  %7752 = vst [vmem:[#allocation14 + $0x60] sm:$0xff] %v7736_v47  ;;  %v7691_v20 = vadd.f32 1.0, %v9485_v0 }
 0xa2d   :  { %v7737_v50 = vsel %vm7627_vm3, %v9487_v41, %v13097_v11  ;;  %v9489_v37 = vpop.eup %9488 }
 0xa2e   :  { %7753 = vst [vmem:[#allocation14 + $0x68] sm:$0xff] %v7737_v50  ;;  %9494 = vrcp.f32 %v7691_v20  ;;  %v7676_v52 = vadd.f32 1.0, %v9489_v37 }
 0xa2f   :  { %v9491_v25 = vpop.eup %9490 }
 0xa30   :  { %9496 = vrcp.f32 %v7676_v52  ;;  %v7677_v7 = vadd.f32 1.0, %v9491_v25 }
 0xa32   :  { %9498 = vrcp.f32 %v7677_v7 }
 0xa35   :  { %v9493_v23 = vpop.eup %9492 }
 0xa36   :  { %v7738_v2 = vsel %vm7627_vm3, %v9493_v23, %v7621_v6 }
 0xa37   :  { %7754 = vst [vmem:[#allocation14 + $0x70] sm:$0xff] %v7738_v2 }
 0xa38   :  { %v9495_v30 = vpop.eup %9494 }
 0xa39   :  { %v7739_v1 = vsel %vm7627_vm3, %v9495_v30, %v7624_v28 }
 0xa3a   :  { %7755 = vst [vmem:[#allocation14 + $0x78] sm:$0xff] %v7739_v1  ;;  %v9497_v11 = vpop.eup %9496 }
 0xa3b   :  { %v7724_v33 = vsel %vm7627_vm3, %v9497_v11, %v7565_v12 }
 0xa3c   :  { %v9499_v19 = vpop.eup %9498  ;;  %7740 = vst [vmem:[#allocation14] sm:$0xff] %v7724_v33 }
 0xa3d   :  { %v7725_v8 = vsel %vm7627_vm3, %v9499_v19, %v7568_v3 }
 0xa3e   :  { %7741 = vst [vmem:[#allocation14 + $0x8] sm:$0xff] %v7725_v8 }
 0xa3f   :  { %9646 = shalt.err (!%p9643_p10)
}
 0xa40   :  { %s9647_s16 = scalar_lea.hbm %s13154_s7, 2048 }
 0xa41   :  { %p9648_p11 = scmp.ne.s32.totalorder %s13154_s7, %s9647_s16  ;;  %p9651_p12 = scmp.lt.u32.totalorder %s9647_s16, %s13154_s7 }
 0xa43   :  { %p9653_p13 = pnand %p9651_p12, %p9648_p11 }
 0xa45   :  { %9656 = shalt.err (!%p9653_p13)
}
 0xa46   :  { %7767 = dma.vmem_to_hbm [thread:$0]  %s7762_s14, 2048, %s13154_s7, [#allocation5], %s9672_s25, %s9672_s25, %s9673_s27  }
 0xa47   :  { %9665 = dma.done.wait [#allocation5], 2048  }
 0xa48   :  { %9666 = vsyncadd [#allocation5], 4294965248 }
 0xa49   :  { %7771 = vsyncpa [#allocation4], 1 }
 0xa4a   :  { %7772 = vsyncpa [#allocation7], 1 }
 0xa4b   :  { %7773 = vsyncpa [#allocation10], 1 }
 0xa4c   :  { %7774 = vsyncpa [#allocation13], 1 }
 0xa4d   :  { %7775 = vsyncpa [#allocation5], 1 }

</bundles_post_ra>
